<compile_context>
chip_gen: v5e
topology: v5e:2x2
jax: 0.10.0
libtpu: 0.0.40
codegen_flags: <defaults>
</compile_context>

<pallas_src>
import functools
import jax
import jax.numpy as jnp
from jax.flatten_util import ravel_pytree
from jax.experimental import pallas as pl
from jax.experimental.pallas import tpu as pltpu

# ----------------------- small synthetic hyper-params -----------------------
B = 2              # batch
IMG = 32           # image_res
PATCH = 16         # patch_size -> (32/16)^2 = 4 patches
C_IN = 3
D_V = 64           # vision_width
D_T = 64           # text_width
EMBED = 32         # embed_dim
N_HEADS = 4
N_OBJ = 8          # num_obj_query
L_TEXT = 8
N_PHRASE = 3
L_PHRASE = 6
VOCAB = 32
QUEUE = 16         # queue_size (divisible by batch)
TEMP = 0.07
MOMENTUM = 0.995
ALPHA = 0.4
DISTILL = True

VMEM = pl.BlockSpec(memory_space=pltpu.MemorySpace.VMEM)
SMEM = pl.BlockSpec(memory_space=pltpu.MemorySpace.SMEM)

BLOCK_NPARAMS = 16   # per-block parameter refs fed to the fused encoder kernel


def _rep_spec(a):
    """Full-array block replicated across the grid (weights)."""
    zeros = (0,) * a.ndim
    return pl.BlockSpec(a.shape, lambda b, _z=zeros: _z)


# ------------------------- in-kernel building blocks -------------------------
def _ln(x, g, b, eps):
    mu = jnp.mean(x, axis=-1, keepdims=True)
    var = jnp.mean((x - mu) ** 2, axis=-1, keepdims=True)
    return (x - mu) * jax.lax.rsqrt(var + eps) * g + b


def _block_body(x, bias_row, blk, n_heads, eps):
    """One fused transformer block on a single (S, D) sequence (all in VMEM).

    blk is a tuple of 16 refs:
      ln1_g, ln1_b, qw(H,D,dh), kw, vw, qb(H,1,dh), kb, vb,
      pwh(H,dh,D), proj_b, ln2_g, ln2_b, fc1_w, fc1_b, fc2_w, fc2_b
    """
    (ln1g, ln1b, qw, kw, vw, qb, kb, vb, pwh, projb,
     ln2g, ln2b, fc1w, fc1b, fc2w, fc2b) = blk
    s, d = x.shape
    dh = d // n_heads
    scale = dh ** -0.5

    h = _ln(x, ln1g[...], ln1b[...], eps)
    hb = h.astype(jnp.bfloat16)

    # Per-head attention; the output projection is folded per head so no
    # lane-concatenation is needed:  concat_h(P_h V_h) @ W == sum_h P_h V_h W_h.
    attn_out = jnp.zeros((s, d), jnp.float32)
    for hh in range(n_heads):
        qh = jnp.dot(hb, qw[hh].astype(jnp.bfloat16),
                     preferred_element_type=jnp.float32) + qb[hh]
        kh = jnp.dot(hb, kw[hh].astype(jnp.bfloat16),
                     preferred_element_type=jnp.float32) + kb[hh]
        vh = jnp.dot(hb, vw[hh].astype(jnp.bfloat16),
                     preferred_element_type=jnp.float32) + vb[hh]
        sc = jax.lax.dot_general(qh, kh, (((1,), (1,)), ((), ())),
                                 preferred_element_type=jnp.float32) * scale
        if bias_row is not None:
            sc = sc + bias_row                                   # (1, S) additive
        sc = sc - jnp.max(sc, axis=-1, keepdims=True)
        pexp = jnp.exp(sc)
        pr = pexp * pl.reciprocal(jnp.sum(pexp, axis=-1, keepdims=True),
                                  approx=True)
        ctx = jnp.dot(pr, vh, preferred_element_type=jnp.float32)   # (S, dh)
        attn_out = attn_out + jnp.dot(ctx.astype(jnp.bfloat16),
                                      pwh[hh].astype(jnp.bfloat16),
                                      preferred_element_type=jnp.float32)
    x = x + attn_out + projb[...]

    h2 = _ln(x, ln2g[...], ln2b[...], eps)
    h2 = jnp.dot(h2.astype(jnp.bfloat16), fc1w[...].astype(jnp.bfloat16),
                 preferred_element_type=jnp.float32) + fc1b[...]
    h2 = jax.nn.gelu(h2, approximate=True)
    x = x + jnp.dot(h2.astype(jnp.bfloat16), fc2w[...].astype(jnp.bfloat16),
                    preferred_element_type=jnp.float32) + fc2b[...]
    return x


# ------------------------------ fused ViT kernel -----------------------------
def _vit_kernel(ptok_ref, pw_ref, base_ref, *rest, n_heads):
    blk = rest[:BLOCK_NPARAMS]
    lnfg, lnfb, o_ref = rest[BLOCK_NPARAMS], rest[BLOCK_NPARAMS + 1], rest[BLOCK_NPARAMS + 2]
    # patch embedding: padded-token matmul; cls/obj/pos/patch-bias are folded
    # into `base` on the host side, so no in-kernel concatenation is needed.
    x = base_ref[...] + jnp.dot(ptok_ref[0].astype(jnp.bfloat16),
                                pw_ref[...].astype(jnp.bfloat16),
                                preferred_element_type=jnp.float32)
    x = _block_body(x, None, blk, n_heads, 1e-6)
    o_ref[0] = _ln(x, lnfg[...], lnfb[...], 1e-6)


# ----------------------------- fused BERT kernel -----------------------------
def _bert_kernel(x_ref, bias_ref, *rest, n_heads):
    elng, elnb = rest[0], rest[1]
    blk = rest[2:2 + BLOCK_NPARAMS]
    o_ref = rest[2 + BLOCK_NPARAMS]
    x = _ln(x_ref[0], elng[...], elnb[...], 1e-12)
    x = _block_body(x, bias_ref[0], blk, n_heads, 1e-12)
    o_ref[0] = x[:1, :]                     # only the CLS row is consumed


# ---------------------- projection + L2-normalize kernel ---------------------
def _proj_norm_kernel(x_ref, w_ref, b_ref, o_ref):
    y = jnp.dot(x_ref[...], w_ref[...],
                preferred_element_type=jnp.float32) + b_ref[...]
    ss = jnp.sum(y * y, axis=-1, keepdims=True)
    o_ref[...] = y * jax.lax.rsqrt(jnp.maximum(ss, 1e-24))   # F.normalize


def pl_proj_norm(x, w, b):
    m = x.shape[0]
    n = w.shape[1]
    return pl.pallas_call(
        _proj_norm_kernel,
        out_shape=jax.ShapeDtypeStruct((m, n), jnp.float32),
        in_specs=[VMEM, VMEM, VMEM],
        out_specs=VMEM,
    )(x, w, b.reshape(1, n))


# -------------------------- object/phrase similarity -------------------------
def _bsim_kernel(a_ref, b_ref, o_ref):
    o_ref[...] = jnp.einsum('bqe,bpe->bqp', a_ref[...], b_ref[...],
                            preferred_element_type=jnp.float32)


def pl_batched_sim(a, b):
    bb, q, _ = a.shape
    p = b.shape[1]
    return pl.pallas_call(
        _bsim_kernel,
        out_shape=jax.ShapeDtypeStruct((bb, q, p), jnp.float32),
        in_specs=[VMEM, VMEM],
        out_specs=VMEM,
    )(a, b)


# ------------------------- fused contrastive-loss kernel ---------------------
def _loss_kernel(if_ref, tf_ref, ifm_ref, tfm_ref, ifa_ref, tfa_ref, tgt_ref,
                 ob_ref, ph_ref, obm_ref, phm_ref, pm_ref, sc_ref,
                 ita_ref, opa_ref, *, distill, nb):
    inv_t = sc_ref[0, 0]
    alpha = sc_ref[0, 1]

    def softmax(s):
        m = jnp.max(s, axis=-1, keepdims=True)
        e = jnp.exp(s - m)
        return e * pl.reciprocal(jnp.sum(e, axis=-1, keepdims=True), approx=True)

    def log_softmax(s):
        m = jnp.max(s, axis=-1, keepdims=True)
        lse = jnp.log(jnp.sum(jnp.exp(s - m), axis=-1, keepdims=True)) + m
        return s - lse

    def total(x):                           # sum of all elements, kept (1, 1)
        return jnp.sum(jnp.sum(x, axis=-1, keepdims=True), axis=0, keepdims=True)

    def dotT(a, b):                         # a @ b.T
        return jax.lax.dot_general(a, b, (((1,), (1,)), ((), ())),
                                   preferred_element_type=jnp.float32)

    # ---------------- image <-> text contrastive (ITA) ----------------
    ifa = ifa_ref[...]
    tfa = tfa_ref[...]
    tgt = tgt_ref[...]
    sim_i2t = jnp.dot(if_ref[...], tfa, preferred_element_type=jnp.float32) * inv_t
    sim_t2i = jnp.dot(tf_ref[...], ifa, preferred_element_type=jnp.float32) * inv_t
    if distill:
        sim_i2t_m = jnp.dot(ifm_ref[...], tfa, preferred_element_type=jnp.float32) * inv_t
        sim_t2i_m = jnp.dot(tfm_ref[...], ifa, preferred_element_type=jnp.float32) * inv_t
        i2t_tgt = alpha * softmax(sim_i2t_m) + (1.0 - alpha) * tgt
        t2i_tgt = alpha * softmax(sim_t2i_m) + (1.0 - alpha) * tgt
    else:
        i2t_tgt, t2i_tgt = tgt, tgt
    loss_i2t = -total(log_softmax(sim_i2t) * i2t_tgt) * (1.0 / nb)
    loss_t2i = -total(log_softmax(sim_t2i) * t2i_tgt) * (1.0 / nb)
    ita_ref[...] = 0.5 * (loss_i2t + loss_t2i)

    # ------------- object <-> phrase alignment (OPA), masked -------------
    pm = pm_ref[...]                        # (1, P) with 1 = keep
    col_bias = (1.0 - pm) * (-1e9)          # exclude masked columns from softmax
    npair = pm.shape[1]
    eye = (jax.lax.broadcasted_iota(jnp.int32, (npair, npair), 0) ==
           jax.lax.broadcasted_iota(jnp.int32, (npair, npair), 1)).astype(jnp.float32)
    nvalid = jnp.sum(pm, axis=-1, keepdims=True)           # (1, 1)

    ob, ph = ob_ref[...], ph_ref[...]
    ob_m, ph_m = obm_ref[...], phm_ref[...]
    sim_o2p = dotT(ob, ph_m) * inv_t + col_bias
    sim_p2o = dotT(ph, ob_m) * inv_t + col_bias
    sim_o2p_m = dotT(ob_m, ph_m) * inv_t + col_bias
    sim_p2o_m = dotT(ph_m, ob_m) * inv_t + col_bias
    o2p_tgt = alpha * softmax(sim_o2p_m) + (1.0 - alpha) * eye
    p2o_tgt = alpha * softmax(sim_p2o_m) + (1.0 - alpha) * eye

    def masked_ce(s, t):                    # mean over valid rows -> (1, 1)
        rows = -jnp.sum(log_softmax(s) * t, axis=-1, keepdims=True)   # (P, 1)
        return jnp.dot(pm, rows, preferred_element_type=jnp.float32) / nvalid

    loss_o2p = masked_ce(sim_o2p, o2p_tgt)
    loss_p2o = masked_ce(sim_p2o, p2o_tgt)
    opa_ref[...] = 0.5 * (loss_o2p + loss_p2o)


def pl_losses(image_feat, text_feat, image_feat_m, text_feat_m,
              image_feat_all, text_feat_all, sim_targets,
              aligned_obj, aligned_phrase, aligned_obj_m, aligned_phrase_m,
              pmask, inv_temp, alpha, distill):
    nb = image_feat.shape[0]
    scal = jnp.stack([jnp.asarray(inv_temp, jnp.float32),
                      jnp.asarray(alpha, jnp.float32)]).reshape(1, 2)
    ita, opa = pl.pallas_call(
        functools.partial(_loss_kernel, distill=distill, nb=nb),
        out_shape=(jax.ShapeDtypeStruct((1, 1), jnp.float32),
                   jax.ShapeDtypeStruct((1, 1), jnp.float32)),
        in_specs=[VMEM] * 12 + [SMEM],
        out_specs=(VMEM, VMEM),
    )(image_feat, text_feat, image_feat_m, text_feat_m,
      image_feat_all, text_feat_all, sim_targets,
      aligned_obj, aligned_phrase, aligned_obj_m, aligned_phrase_m,
      pmask, scal)
    return ita[0, 0], opa[0, 0]


# --------------------------- packed momentum EMA -----------------------------
def _ema_kernel(pm_ref, p_ref, o_ref, *, momentum):
    o_ref[...] = pm_ref[...] * momentum + p_ref[...] * (1.0 - momentum)


def pl_momentum_update(params_m, params, momentum):
    """One lane-dense EMA kernel over ALL parameters (packed (-1, 1024) view)."""
    flat_m, unravel = ravel_pytree(params_m)
    flat_p, _ = ravel_pytree(params)
    n = flat_m.shape[0]
    cols = 1024
    pad = (-n) % cols
    fm = jnp.pad(flat_m, (0, pad)).reshape(-1, cols)
    fp = jnp.pad(flat_p, (0, pad)).reshape(-1, cols)
    out = pl.pallas_call(
        functools.partial(_ema_kernel, momentum=momentum),
        out_shape=jax.ShapeDtypeStruct(fm.shape, jnp.float32),
        in_specs=[VMEM, VMEM],
        out_specs=VMEM,
    )(fm, fp)
    return unravel(out.reshape(-1)[:n])


# --------------------------- encoder host wrappers ---------------------------
def _prep_block(bp, n_heads):
    """Split block params into per-head 3-D weights (leading-dim indexed in-kernel)."""
    d = bp['ln1_g'].shape[0]
    dh = d // n_heads
    qkv_w, qkv_b = bp['qkv_w'], bp['qkv_b']

    def split_w(which):
        w = qkv_w[:, which * d:(which + 1) * d]
        return w.reshape(d, n_heads, dh).transpose(1, 0, 2)       # (H, D, dh)

    def split_b(which):
        return qkv_b[which * d:(which + 1) * d].reshape(n_heads, 1, dh)

    pwh = bp['proj_w'].reshape(n_heads, dh, d)                    # (H, dh, D)
    return [bp['ln1_g'].reshape(1, d), bp['ln1_b'].reshape(1, d),
            split_w(0), split_w(1), split_w(2),
            split_b(0), split_b(1), split_b(2),
            pwh, bp['proj_b'].reshape(1, d),
            bp['ln2_g'].reshape(1, d), bp['ln2_b'].reshape(1, d),
            bp['fc1_w'], bp['fc1_b'].reshape(1, -1),
            bp['fc2_w'], bp['fc2_b'].reshape(1, -1)]


def vit_forward(p, image):
    bi = image.shape[0]
    g = IMG // PATCH
    npatch = g * g
    cpp = C_IN * PATCH * PATCH
    seq = 1 + npatch + N_OBJ

    patches = image.reshape(bi, C_IN, g, PATCH, g, PATCH)
    patches = patches.transpose(0, 2, 4, 1, 3, 5).reshape(bi, npatch, cpp)
    ptok = jnp.pad(patches, ((0, 0), (1, N_OBJ), (0, 0)))         # (B, S, CPP)

    row_ids = jnp.arange(seq)[:, None]
    patch_row = ((row_ids >= 1) & (row_ids < 1 + npatch)).astype(jnp.float32)
    base = (jnp.concatenate([p['cls_token'].reshape(1, D_V),
                             jnp.zeros((npatch, D_V), jnp.float32),
                             p['obj_query']], axis=0)
            + p['pos_embed'].reshape(seq, D_V)
            + patch_row * p['patch_b'].reshape(1, D_V))

    blk = _prep_block(p['block'], N_HEADS)
    args = [ptok, p['patch_w'], base] + blk + [p['lnf_g'].reshape(1, -1),
                                               p['lnf_b'].reshape(1, -1)]
    in_specs = ([pl.BlockSpec((1, seq, cpp), lambda b: (b, 0, 0))]
                + [_rep_spec(a) for a in args[1:]])
    return pl.pallas_call(
        functools.partial(_vit_kernel, n_heads=N_HEADS),
        out_shape=jax.ShapeDtypeStruct((bi, seq, D_V), jnp.float32),
        grid=(bi,),
        in_specs=in_specs,
        out_specs=pl.BlockSpec((1, seq, D_V), lambda b: (b, 0, 0)),
        compiler_params=pltpu.CompilerParams(dimension_semantics=("parallel",)),
    )(*args)


def bert_forward(p, ids, att_mask):
    bb, seq_len = ids.shape
    x = jnp.take(p['tok_emb'], ids, axis=0) + p['pos_emb'][:, :seq_len, :]
    bias = (1.0 - att_mask.astype(jnp.float32))[:, None, :] * (-1e9)   # (BB,1,L)

    blk = _prep_block(p['block'], N_HEADS)
    args = [x, bias, p['emb_ln_g'].reshape(1, -1),
            p['emb_ln_b'].reshape(1, -1)] + blk
    in_specs = ([pl.BlockSpec((1, seq_len, D_T), lambda b: (b, 0, 0)),
                 pl.BlockSpec((1, 1, seq_len), lambda b: (b, 0, 0))]
                + [_rep_spec(a) for a in args[2:]])
    out = pl.pallas_call(
        functools.partial(_bert_kernel, n_heads=N_HEADS),
        out_shape=jax.ShapeDtypeStruct((bb, 1, D_T), jnp.float32),
        grid=(bb,),
        in_specs=in_specs,
        out_specs=pl.BlockSpec((1, 1, D_T), lambda b: (b, 0, 0)),
        compiler_params=pltpu.CompilerParams(dimension_semantics=("parallel",)),
    )(*args)
    return out[:, 0, :]                     # CLS hidden states (BB, D)


# ------------------------------- init helpers -------------------------------
def _dense(key, din, dout):
    return {'w': 0.02 * jax.random.normal(key, (din, dout), jnp.float32),
            'b': jnp.zeros((dout,), jnp.float32)}


def init_block(key, d):
    k = jax.random.split(key, 4)
    return dict(
        ln1_g=jnp.ones((d,), jnp.float32), ln1_b=jnp.zeros((d,), jnp.float32),
        qkv_w=0.02 * jax.random.normal(k[0], (d, 3 * d), jnp.float32),
        qkv_b=jnp.zeros((3 * d,), jnp.float32),
        proj_w=0.02 * jax.random.normal(k[1], (d, d), jnp.float32),
        proj_b=jnp.zeros((d,), jnp.float32),
        ln2_g=jnp.ones((d,), jnp.float32), ln2_b=jnp.zeros((d,), jnp.float32),
        fc1_w=0.02 * jax.random.normal(k[2], (d, 4 * d), jnp.float32),
        fc1_b=jnp.zeros((4 * d,), jnp.float32),
        fc2_w=0.02 * jax.random.normal(k[3], (4 * d, d), jnp.float32),
        fc2_b=jnp.zeros((d,), jnp.float32))


def init_vit(key):
    k = jax.random.split(key, 5)
    seq = 1 + (IMG // PATCH) ** 2 + N_OBJ
    return dict(
        patch_w=0.02 * jax.random.normal(k[0], (C_IN * PATCH * PATCH, D_V), jnp.float32),
        patch_b=jnp.zeros((D_V,), jnp.float32),
        cls_token=0.02 * jax.random.normal(k[1], (1, 1, D_V), jnp.float32),
        obj_query=0.02 * jax.random.normal(k[2], (N_OBJ, D_V), jnp.float32),
        pos_embed=0.02 * jax.random.normal(k[3], (1, seq, D_V), jnp.float32),
        block=init_block(k[4], D_V),
        lnf_g=jnp.ones((D_V,), jnp.float32), lnf_b=jnp.zeros((D_V,), jnp.float32))


def init_bert(key):
    k = jax.random.split(key, 3)
    return dict(
        tok_emb=0.02 * jax.random.normal(k[0], (VOCAB, D_T), jnp.float32),
        pos_emb=0.02 * jax.random.normal(k[1], (1, max(L_TEXT, L_PHRASE), D_T), jnp.float32),
        emb_ln_g=jnp.ones((D_T,), jnp.float32), emb_ln_b=jnp.zeros((D_T,), jnp.float32),
        block=init_block(k[2], D_T))


def init_state(key):
    k = jax.random.split(key, 6)
    vit = init_vit(k[0])
    bert = init_bert(k[1])
    vproj = _dense(k[2], D_V, EMBED)
    tproj = _dense(k[3], D_T, EMBED)
    iq = jax.random.normal(k[4], (EMBED, QUEUE), jnp.float32)
    tq = jax.random.normal(k[5], (EMBED, QUEUE), jnp.float32)
    iq = iq / jnp.linalg.norm(iq, axis=0, keepdims=True)
    tq = tq / jnp.linalg.norm(tq, axis=0, keepdims=True)
    copy = lambda t: jax.tree_util.tree_map(lambda x: x, t)        # copy_params()
    return dict(vit=vit, bert=bert, vproj=vproj, tproj=tproj,
                vit_m=copy(vit), bert_m=copy(bert),
                vproj_m=copy(vproj), tproj_m=copy(tproj),
                temp=jnp.asarray(TEMP, jnp.float32),
                image_queue=iq, text_queue=tq,
                idx_queue=jnp.full((1, QUEUE), -100, jnp.int32),
                queue_ptr=jnp.zeros((), jnp.int32))


# ------------------------------- ALBEF forward -------------------------------
def albef_forward(state, image, text_ids, text_mask, phrase, alpha, idx):
    num_batch, num_phrase, len_phrase = phrase['input_ids'].shape
    phrase_ids = phrase['input_ids'].reshape(-1, len_phrase)
    phrase_att = phrase['attention_mask'].reshape(-1, len_phrase)

    # Batch text + phrase sequences into ONE BERT launch (pad phrases to L_TEXT;
    # padded positions are attention-masked so CLS outputs are unchanged).
    pad = L_TEXT - len_phrase
    all_ids = jnp.concatenate([text_ids, jnp.pad(phrase_ids, ((0, 0), (0, pad)))], axis=0)
    all_att = jnp.concatenate([text_mask, jnp.pad(phrase_att, ((0, 0), (0, pad)))], axis=0)

    # ----- online branch -----
    image_embeds = vit_forward(state['vit'], image)                           # (B, S, Dv)
    vis_rows = jnp.concatenate(
        [image_embeds[:, 0, :],
         image_embeds[:, -N_OBJ:, :].reshape(num_batch * N_OBJ, D_V)], axis=0)
    vis_feats = pl_proj_norm(vis_rows, state['vproj']['w'], state['vproj']['b'])
    image_feat = vis_feats[:num_batch]                                        # (B, E)
    obj_feat = vis_feats[num_batch:].reshape(num_batch, N_OBJ, EMBED)

    txt_cls = bert_forward(state['bert'], all_ids, all_att)                   # (B+B*P, Dt)
    txt_feats = pl_proj_norm(txt_cls, state['tproj']['w'], state['tproj']['b'])
    text_feat = txt_feats[:num_batch]
    phrase_feat = txt_feats[num_batch:].reshape(num_batch, num_phrase, EMBED)

    obj_phrase_sim = pl_batched_sim(obj_feat, phrase_feat)                    # (B, Q, P)
    obj_phrase_align = jnp.argmax(obj_phrase_sim, axis=-2)                    # (B, P)

    # Fixed-size masked formulation of the boolean select (jit friendly):
    # invalid pairs are removed inside the loss kernel via a row/column mask.
    aligned_obj_feat = jnp.take_along_axis(
        obj_feat, obj_phrase_align[..., None], axis=1).reshape(-1, EMBED)
    aligned_phrase_feat = phrase_feat.reshape(-1, EMBED)
    pmask = phrase['mask'].reshape(1, -1).astype(jnp.float32)

    idx = idx.reshape(-1, 1)
    idx_all = jnp.concatenate([idx.T, state['idx_queue']], axis=1)            # (1, B+Q)
    pos_idx = (idx == idx_all).astype(jnp.float32)                            # (B, B+Q)
    sim_targets = pos_idx / jnp.sum(pos_idx, axis=1, keepdims=True)

    # ----- momentum branch (torch.no_grad; pure values here) -----
    online = dict(vit=state['vit'], bert=state['bert'],
                  vproj=state['vproj'], tproj=state['tproj'])
    moment = dict(vit=state['vit_m'], bert=state['bert_m'],
                  vproj=state['vproj_m'], tproj=state['tproj_m'])
    moment = pl_momentum_update(moment, online, MOMENTUM)
    vit_m, bert_m = moment['vit'], moment['bert']
    vproj_m, tproj_m = moment['vproj'], moment['tproj']

    image_embeds_m = vit_forward(vit_m, image)
    vis_rows_m = jnp.concatenate(
        [image_embeds_m[:, 0, :],
         image_embeds_m[:, -N_OBJ:, :].reshape(num_batch * N_OBJ, D_V)], axis=0)
    vis_feats_m = pl_proj_norm(vis_rows_m, vproj_m['w'], vproj_m['b'])
    image_feat_m = vis_feats_m[:num_batch]
    obj_feat_m = vis_feats_m[num_batch:].reshape(num_batch, N_OBJ, EMBED)

    txt_cls_m = bert_forward(bert_m, all_ids, all_att)
    txt_feats_m = pl_proj_norm(txt_cls_m, tproj_m['w'], tproj_m['b'])
    text_feat_m = txt_feats_m[:num_batch]
    aligned_phrase_feat_m = txt_feats_m[num_batch:]                           # (B*P, E)

    aligned_obj_feat_m = jnp.take_along_axis(
        obj_feat_m, obj_phrase_align[..., None], axis=1).reshape(-1, EMBED)

    image_feat_all = jnp.concatenate([image_feat_m.T, state['image_queue']], axis=1)
    text_feat_all = jnp.concatenate([text_feat_m.T, state['text_queue']], axis=1)

    # ----- fused sims + soft targets + cross-entropy (one kernel) -----
    inv_temp = 1.0 / state['temp']
    loss_ita, loss_opa = pl_losses(
        image_feat, text_feat, image_feat_m, text_feat_m,
        image_feat_all, text_feat_all, sim_targets,
        aligned_obj_feat, aligned_phrase_feat,
        aligned_obj_feat_m, aligned_phrase_feat_m,
        pmask, inv_temp, alpha, DISTILL)

    # ----- dequeue & enqueue (concat_all_gather == identity, world_size == 1) -----
    ptr = state['queue_ptr']
    image_queue = jax.lax.dynamic_update_slice_in_dim(
        state['image_queue'], image_feat_m.T, ptr, axis=1)
    text_queue = jax.lax.dynamic_update_slice_in_dim(
        state['text_queue'], text_feat_m.T, ptr, axis=1)
    idx_queue = jax.lax.dynamic_update_slice_in_dim(
        state['idx_queue'], idx.T, ptr, axis=1)
    new_ptr = (ptr + num_batch) % QUEUE

    new_state = dict(state, vit_m=vit_m, vproj_m=vproj_m, bert_m=bert_m, tproj_m=tproj_m,
                     image_queue=image_queue, text_queue=text_queue,
                     idx_queue=idx_queue, queue_ptr=new_ptr)
    return (loss_ita, loss_opa), new_state


# ------------------------------------ main -----------------------------------
if __name__ == "__main__":
    key = jax.random.PRNGKey(0)
    kparams, kdata = jax.random.split(key)
    state = init_state(kparams)

    kd = jax.random.split(kdata, 3)
    image = jax.random.normal(kd[0], (B, C_IN, IMG, IMG), jnp.float32)
    text_ids = jax.random.randint(kd[1], (B, L_TEXT), 0, VOCAB, dtype=jnp.int32)
    text_mask = jnp.array([[1] * L_TEXT, [1] * (L_TEXT - 2) + [0, 0]], jnp.int32)
    phrase = {
        'input_ids': jax.random.randint(kd[2], (B, N_PHRASE, L_PHRASE), 0, VOCAB,
                                        dtype=jnp.int32),
        'attention_mask': jnp.ones((B, N_PHRASE, L_PHRASE), jnp.int32),
        'mask': jnp.array([[1, 1, 1], [1, 0, 1]], jnp.int32),
    }
    idx = jnp.array([3, 7], jnp.int32)
    alpha = jnp.asarray(ALPHA, jnp.float32)

    fwd = jax.jit(albef_forward)
    (loss_ita, loss_opa), new_state = fwd(state, image, text_ids, text_mask,
                                          phrase, alpha, idx)
    jax.block_until_ready((loss_ita, loss_opa, new_state))
    assert bool(jnp.isfinite(loss_ita)) and bool(jnp.isfinite(loss_opa))
    print("KERNEL_OK")
</pallas_src>

<mosaic_0001>
module attributes {stable_mosaic.version = 11 : i64} {
  func.func @_ema_kernel(%arg0: memref<154x1024xf32, #tpu.memory_space<vmem>>, %arg1: memref<154x1024xf32, #tpu.memory_space<vmem>>, %arg2: memref<154x1024xf32, #tpu.memory_space<vmem>>) attributes {dimension_semantics = [], scalar_prefetch = 0 : i64, scratch_operands = 0 : i64, tpu.core_type = #tpu.core_type<tc>} {
    %c0 = arith.constant 0 : index
    %c0_0 = arith.constant 0 : index
    %0 = vector.load %arg0[%c0, %c0_0] : memref<154x1024xf32, #tpu.memory_space<vmem>>, vector<154x1024xf32>
    %cst = arith.constant 9.950000e-01 : f32
    %1 = vector.broadcast %cst : f32 to vector<154x1024xf32>
    %2 = arith.mulf %0, %1 : vector<154x1024xf32>
    %c0_1 = arith.constant 0 : index
    %c0_2 = arith.constant 0 : index
    %3 = vector.load %arg1[%c0_1, %c0_2] : memref<154x1024xf32, #tpu.memory_space<vmem>>, vector<154x1024xf32>
    %cst_3 = arith.constant 5.000000e-03 : f32
    %4 = vector.broadcast %cst_3 : f32 to vector<154x1024xf32>
    %5 = arith.mulf %3, %4 : vector<154x1024xf32>
    %6 = arith.addf %2, %5 : vector<154x1024xf32>
    %c0_4 = arith.constant 0 : index
    %c0_5 = arith.constant 0 : index
    %7 = vector.load %arg2[%c0_4, %c0_5] : memref<154x1024xf32, #tpu.memory_space<vmem>>, vector<154x1024xf32>
    tpu.vector_store %arg2[%c0_4, %c0_5], %6 {strides = array<i32>} : memref<154x1024xf32, #tpu.memory_space<vmem>>, vector<154x1024xf32>,
    return
  }
}

module attributes {stable_mosaic.version = 11 : i64} {
  func.func @_proj_norm_kernel(%arg0: memref<18x64xf32, #tpu.memory_space<vmem>>, %arg1: memref<64x32xf32, #tpu.memory_space<vmem>>, %arg2: memref<1x32xf32, #tpu.memory_space<vmem>>, %arg3: memref<18x32xf32, #tpu.memory_space<vmem>>) attributes {dimension_semantics = [], scalar_prefetch = 0 : i64, scratch_operands = 0 : i64, tpu.core_type = #tpu.core_type<tc>} {
    %c0 = arith.constant 0 : index
    %c0_0 = arith.constant 0 : index
    %0 = vector.load %arg0[%c0, %c0_0] : memref<18x64xf32, #tpu.memory_space<vmem>>, vector<18x64xf32>
    %c0_1 = arith.constant 0 : index
    %c0_2 = arith.constant 0 : index
    %1 = vector.load %arg1[%c0_1, %c0_2] : memref<64x32xf32, #tpu.memory_space<vmem>>, vector<64x32xf32>
    %cst = arith.constant dense<0.000000e+00> : vector<18x32xf32>
    %2 = tpu.matmul %0, %1, %cst {dimension_numbers = #tpu.dot_dimension_numbers<[1], [0], [0], [1], [0, 0, 1, 1], [], []>} : vector<18x64xf32>, vector<64x32xf32>, vector<18x32xf32> -> vector<18x32xf32>
    %c0_3 = arith.constant 0 : index
    %c0_4 = arith.constant 0 : index
    %3 = vector.load %arg2[%c0_3, %c0_4] : memref<1x32xf32, #tpu.memory_space<vmem>>, vector<1x32xf32>
    %4 = vector.broadcast %3 : vector<1x32xf32> to vector<18x32xf32>
    %5 = arith.addf %2, %4 : vector<18x32xf32>
    %6 = arith.mulf %5, %5 : vector<18x32xf32>
    %cst_5 = arith.constant dense<0.000000e+00> : vector<18xf32>
    %7 = vector.multi_reduction <add>, %6, %cst_5 [1] : vector<18x32xf32> to vector<18xf32>
    %8 = vector.shape_cast %7 : vector<18xf32> to vector<18x1xf32>
    %cst_6 = arith.constant 1.000000e-24 : f32
    %9 = vector.broadcast %cst_6 : f32 to vector<18x1xf32>
    %10 = arith.maximumf %8, %9 : vector<18x1xf32>
    %11 = math.rsqrt %10 : vector<18x1xf32>
    %12 = vector.broadcast %11 : vector<18x1xf32> to vector<18x32xf32>
    %13 = arith.mulf %5, %12 : vector<18x32xf32>
    %c0_7 = arith.constant 0 : index
    %c0_8 = arith.constant 0 : index
    %14 = vector.load %arg3[%c0_7, %c0_8] : memref<18x32xf32, #tpu.memory_space<vmem>>, vector<18x32xf32>
    tpu.vector_store %arg3[%c0_7, %c0_8], %13 {strides = array<i32>} : memref<18x32xf32, #tpu.memory_space<vmem>>, vector<18x32xf32>,
    return
  }
}

module attributes {stable_mosaic.version = 11 : i64} {
  func.func @_vit_kernel(%arg0: i32, %arg1: memref<1x13x768xf32, #tpu.memory_space<vmem>>, %arg2: memref<768x64xf32, #tpu.memory_space<vmem>>, %arg3: memref<13x64xf32, #tpu.memory_space<vmem>>, %arg4: memref<1x64xf32, #tpu.memory_space<vmem>>, %arg5: memref<1x64xf32, #tpu.memory_space<vmem>>, %arg6: memref<4x64x16xf32, #tpu.memory_space<vmem>>, %arg7: memref<4x64x16xf32, #tpu.memory_space<vmem>>, %arg8: memref<4x64x16xf32, #tpu.memory_space<vmem>>, %arg9: memref<4x1x16xf32, #tpu.memory_space<vmem>>, %arg10: memref<4x1x16xf32, #tpu.memory_space<vmem>>, %arg11: memref<4x1x16xf32, #tpu.memory_space<vmem>>, %arg12: memref<4x16x64xf32, #tpu.memory_space<vmem>>, %arg13: memref<1x64xf32, #tpu.memory_space<vmem>>, %arg14: memref<1x64xf32, #tpu.memory_space<vmem>>, %arg15: memref<1x64xf32, #tpu.memory_space<vmem>>, %arg16: memref<64x256xf32, #tpu.memory_space<vmem>>, %arg17: memref<1x256xf32, #tpu.memory_space<vmem>>, %arg18: memref<256x64xf32, #tpu.memory_space<vmem>>, %arg19: memref<1x64xf32, #tpu.memory_space<vmem>>, %arg20: memref<1x64xf32, #tpu.memory_space<vmem>>, %arg21: memref<1x64xf32, #tpu.memory_space<vmem>>, %arg22: memref<1x13x64xf32, #tpu.memory_space<vmem>>) attributes {dimension_semantics = [#tpu.dimension_semantics<parallel>], iteration_bounds = array<i64: 2>, scalar_prefetch = 0 : i64, scratch_operands = 0 : i64, tpu.core_type = #tpu.core_type<tc>, window_params = [{transform_indices = @transform_0, window_bounds = array<i64: 1, 13, 768>}, {pipeline_mode = #tpu.pipeline_mode<synchronous>, transform_indices = @transform_1, window_bounds = array<i64: 768, 64>}, {pipeline_mode = #tpu.pipeline_mode<synchronous>, transform_indices = @transform_2, window_bounds = array<i64: 13, 64>}, {pipeline_mode = #tpu.pipeline_mode<synchronous>, transform_indices = @transform_3, window_bounds = array<i64: 1, 64>}, {pipeline_mode = #tpu.pipeline_mode<synchronous>, transform_indices = @transform_4, window_bounds = array<i64: 1, 64>}, {pipeline_mode = #tpu.pipeline_mode<synchronous>, transform_indices = @transform_5, window_bounds = array<i64: 4, 64, 16>}, {pipeline_mode = #tpu.pipeline_mode<synchronous>, transform_indices = @transform_6, window_bounds = array<i64: 4, 64, 16>}, {pipeline_mode = #tpu.pipeline_mode<synchronous>, transform_indices = @transform_7, window_bounds = array<i64: 4, 64, 16>}, {pipeline_mode = #tpu.pipeline_mode<synchronous>, transform_indices = @transform_8, window_bounds = array<i64: 4, 1, 16>}, {pipeline_mode = #tpu.pipeline_mode<synchronous>, transform_indices = @transform_9, window_bounds = array<i64: 4, 1, 16>}, {pipeline_mode = #tpu.pipeline_mode<synchronous>, transform_indices = @transform_10, window_bounds = array<i64: 4, 1, 16>}, {pipeline_mode = #tpu.pipeline_mode<synchronous>, transform_indices = @transform_11, window_bounds = array<i64: 4, 16, 64>}, {pipeline_mode = #tpu.pipeline_mode<synchronous>, transform_indices = @transform_12, window_bounds = array<i64: 1, 64>}, {pipeline_mode = #tpu.pipeline_mode<synchronous>, transform_indices = @transform_13, window_bounds = array<i64: 1, 64>}, {pipeline_mode = #tpu.pipeline_mode<synchronous>, transform_indices = @transform_14, window_bounds = array<i64: 1, 64>}, {pipeline_mode = #tpu.pipeline_mode<synchronous>, transform_indices = @transform_15, window_bounds = array<i64: 64, 256>}, {pipeline_mode = #tpu.pipeline_mode<synchronous>, transform_indices = @transform_16, window_bounds = array<i64: 1, 256>}, {pipeline_mode = #tpu.pipeline_mode<synchronous>, transform_indices = @transform_17, window_bounds = array<i64: 256, 64>}, {pipeline_mode = #tpu.pipeline_mode<synchronous>, transform_indices = @transform_18, window_bounds = array<i64: 1, 64>}, {pipeline_mode = #tpu.pipeline_mode<synchronous>, transform_indices = @transform_19, window_bounds = array<i64: 1, 64>}, {pipeline_mode = #tpu.pipeline_mode<synchronous>, transform_indices = @transform_20, window_bounds = array<i64: 1, 64>}, {transform_indices = @transform_21, window_bounds = array<i64: 1, 13, 64>}]} {
    %c0 = arith.constant 0 : index
    %c0_0 = arith.constant 0 : index
    %0 = vector.load %arg3[%c0, %c0_0] : memref<13x64xf32, #tpu.memory_space<vmem>>, vector<13x64xf32>
    %c0_1 = arith.constant 0 : index
    %c0_2 = arith.constant 0 : index
    %c0_3 = arith.constant 0 : index
    %1 = vector.load %arg1[%c0_1, %c0_2, %c0_3] : memref<1x13x768xf32, #tpu.memory_space<vmem>>, vector<1x13x768xf32>
    %2 = vector.shape_cast %1 : vector<1x13x768xf32> to vector<13x768xf32>
    %3 = arith.truncf %2 : vector<13x768xf32> to vector<13x768xbf16>
    %c0_4 = arith.constant 0 : index
    %c0_5 = arith.constant 0 : index
    %4 = vector.load %arg2[%c0_4, %c0_5] : memref<768x64xf32, #tpu.memory_space<vmem>>, vector<768x64xf32>
    %5 = arith.truncf %4 : vector<768x64xf32> to vector<768x64xbf16>
    %cst = arith.constant dense<0.000000e+00> : vector<13x64xf32>
    %6 = tpu.matmul %3, %5, %cst {dimension_numbers = #tpu.dot_dimension_numbers<[1], [0], [0], [1], [0, 0, 1, 1], [], []>} : vector<13x768xbf16>, vector<768x64xbf16>, vector<13x64xf32> -> vector<13x64xf32>
    %7 = arith.addf %0, %6 : vector<13x64xf32>
    %c0_6 = arith.constant 0 : index
    %c0_7 = arith.constant 0 : index
    %8 = vector.load %arg4[%c0_6, %c0_7] : memref<1x64xf32, #tpu.memory_space<vmem>>, vector<1x64xf32>
    %c0_8 = arith.constant 0 : index
    %c0_9 = arith.constant 0 : index
    %9 = vector.load %arg5[%c0_8, %c0_9] : memref<1x64xf32, #tpu.memory_space<vmem>>, vector<1x64xf32>
    %cst_10 = arith.constant dense<0.000000e+00> : vector<13xf32>
    %10 = vector.multi_reduction <add>, %7, %cst_10 [1] : vector<13x64xf32> to vector<13xf32>
    %11 = vector.shape_cast %10 : vector<13xf32> to vector<13x1xf32>
    %cst_11 = arith.constant 6.400000e+01 : f32
    %12 = vector.broadcast %cst_11 : f32 to vector<13x1xf32>
    %13 = arith.divf %11, %12 : vector<13x1xf32>
    %14 = vector.broadcast %13 : vector<13x1xf32> to vector<13x64xf32>
    %15 = arith.subf %7, %14 : vector<13x64xf32>
    %16 = arith.mulf %15, %15 : vector<13x64xf32>
    %cst_12 = arith.constant dense<0.000000e+00> : vector<13xf32>
    %17 = vector.multi_reduction <add>, %16, %cst_12 [1] : vector<13x64xf32> to vector<13xf32>
    %18 = vector.shape_cast %17 : vector<13xf32> to vector<13x1xf32>
    %cst_13 = arith.constant 6.400000e+01 : f32
    %19 = vector.broadcast %cst_13 : f32 to vector<13x1xf32>
    %20 = arith.divf %18, %19 : vector<13x1xf32>
    %21 = vector.broadcast %13 : vector<13x1xf32> to vector<13x64xf32>
    %22 = arith.subf %7, %21 : vector<13x64xf32>
    %cst_14 = arith.constant 9.99999997E-7 : f32
    %23 = vector.broadcast %cst_14 : f32 to vector<13x1xf32>
    %24 = arith.addf %20, %23 : vector<13x1xf32>
    %25 = math.rsqrt %24 : vector<13x1xf32>
    %26 = vector.broadcast %25 : vector<13x1xf32> to vector<13x64xf32>
    %27 = arith.mulf %22, %26 : vector<13x64xf32>
    %28 = vector.broadcast %8 : vector<1x64xf32> to vector<13x64xf32>
    %29 = arith.mulf %27, %28 : vector<13x64xf32>
    %30 = vector.broadcast %9 : vector<1x64xf32> to vector<13x64xf32>
    %31 = arith.addf %29, %30 : vector<13x64xf32>
    %32 = arith.truncf %31 : vector<13x64xf32> to vector<13x64xbf16>
    %cst_15 = arith.constant 0.000000e+00 : f32
    %33 = vector.broadcast %cst_15 : f32 to vector<13x64xf32>
    %c0_16 = arith.constant 0 : index
    %c0_17 = arith.constant 0 : index
    %c0_18 = arith.constant 0 : index
    %34 = vector.load %arg6[%c0_16, %c0_17, %c0_18] : memref<4x64x16xf32, #tpu.memory_space<vmem>>, vector<1x64x16xf32>
    %35 = vector.shape_cast %34 : vector<1x64x16xf32> to vector<64x16xf32>
    %36 = arith.truncf %35 : vector<64x16xf32> to vector<64x16xbf16>
    %cst_19 = arith.constant dense<0.000000e+00> : vector<13x16xf32>
    %37 = tpu.matmul %32, %36, %cst_19 {dimension_numbers = #tpu.dot_dimension_numbers<[1], [0], [0], [1], [0, 0, 1, 1], [], []>} : vector<13x64xbf16>, vector<64x16xbf16>, vector<13x16xf32> -> vector<13x16xf32>
    %c0_20 = arith.constant 0 : index
    %c0_21 = arith.constant 0 : index
    %c0_22 = arith.constant 0 : index
    %38 = vector.load %arg9[%c0_20, %c0_21, %c0_22] : memref<4x1x16xf32, #tpu.memory_space<vmem>>, vector<1x1x16xf32>
    %39 = vector.shape_cast %38 : vector<1x1x16xf32> to vector<1x16xf32>
    %40 = vector.broadcast %39 : vector<1x16xf32> to vector<13x16xf32>
    %41 = arith.addf %37, %40 : vector<13x16xf32>
    %c0_23 = arith.constant 0 : index
    %c0_24 = arith.constant 0 : index
    %c0_25 = arith.constant 0 : index
    %42 = vector.load %arg7[%c0_23, %c0_24, %c0_25] : memref<4x64x16xf32, #tpu.memory_space<vmem>>, vector<1x64x16xf32>
    %43 = vector.shape_cast %42 : vector<1x64x16xf32> to vector<64x16xf32>
    %44 = arith.truncf %43 : vector<64x16xf32> to vector<64x16xbf16>
    %cst_26 = arith.constant dense<0.000000e+00> : vector<13x16xf32>
    %45 = tpu.matmul %32, %44, %cst_26 {dimension_numbers = #tpu.dot_dimension_numbers<[1], [0], [0], [1], [0, 0, 1, 1], [], []>} : vector<13x64xbf16>, vector<64x16xbf16>, vector<13x16xf32> -> vector<13x16xf32>
    %c0_27 = arith.constant 0 : index
    %c0_28 = arith.constant 0 : index
    %c0_29 = arith.constant 0 : index
    %46 = vector.load %arg10[%c0_27, %c0_28, %c0_29] : memref<4x1x16xf32, #tpu.memory_space<vmem>>, vector<1x1x16xf32>
    %47 = vector.shape_cast %46 : vector<1x1x16xf32> to vector<1x16xf32>
    %48 = vector.broadcast %47 : vector<1x16xf32> to vector<13x16xf32>
    %49 = arith.addf %45, %48 : vector<13x16xf32>
    %c0_30 = arith.constant 0 : index
    %c0_31 = arith.constant 0 : index
    %c0_32 = arith.constant 0 : index
    %50 = vector.load %arg8[%c0_30, %c0_31, %c0_32] : memref<4x64x16xf32, #tpu.memory_space<vmem>>, vector<1x64x16xf32>
    %51 = vector.shape_cast %50 : vector<1x64x16xf32> to vector<64x16xf32>
    %52 = arith.truncf %51 : vector<64x16xf32> to vector<64x16xbf16>
    %cst_33 = arith.constant dense<0.000000e+00> : vector<13x16xf32>
    %53 = tpu.matmul %32, %52, %cst_33 {dimension_numbers = #tpu.dot_dimension_numbers<[1], [0], [0], [1], [0, 0, 1, 1], [], []>} : vector<13x64xbf16>, vector<64x16xbf16>, vector<13x16xf32> -> vector<13x16xf32>
    %c0_34 = arith.constant 0 : index
    %c0_35 = arith.constant 0 : index
    %c0_36 = arith.constant 0 : index
    %54 = vector.load %arg11[%c0_34, %c0_35, %c0_36] : memref<4x1x16xf32, #tpu.memory_space<vmem>>, vector<1x1x16xf32>
    %55 = vector.shape_cast %54 : vector<1x1x16xf32> to vector<1x16xf32>
    %56 = vector.broadcast %55 : vector<1x16xf32> to vector<13x16xf32>
    %57 = arith.addf %53, %56 : vector<13x16xf32>
    %cst_37 = arith.constant dense<0.000000e+00> : vector<13x13xf32>
    %58 = tpu.matmul %41, %49, %cst_37 {dimension_numbers = #tpu.dot_dimension_numbers<[1], [1], [0], [0], [0, 0, 1, 0], [], []>} : vector<13x16xf32>, vector<13x16xf32>, vector<13x13xf32> -> vector<13x13xf32>
    %cst_38 = arith.constant 2.500000e-01 : f32
    %59 = vector.broadcast %cst_38 : f32 to vector<13x13xf32>
    %60 = arith.mulf %58, %59 : vector<13x13xf32>
    %cst_39 = arith.constant dense<0xFF800000> : vector<13xf32>
    %61 = vector.multi_reduction <maximumf>, %60, %cst_39 [1] : vector<13x13xf32> to vector<13xf32>
    %62 = vector.shape_cast %61 : vector<13xf32> to vector<13x1xf32>
    %63 = vector.broadcast %62 : vector<13x1xf32> to vector<13x13xf32>
    %64 = arith.subf %60, %63 : vector<13x13xf32>
    %65 = math.exp %64 : vector<13x13xf32>
    %cst_40 = arith.constant dense<0.000000e+00> : vector<13xf32>
    %66 = vector.multi_reduction <add>, %65, %cst_40 [1] : vector<13x13xf32> to vector<13xf32>
    %67 = vector.shape_cast %66 : vector<13xf32> to vector<13x1xf32>
    %68 = tpu.reciprocal %67 {approx = true} : vector<13x1xf32> -> vector<13x1xf32>
    %69 = vector.broadcast %68 : vector<13x1xf32> to vector<13x13xf32>
    %70 = arith.mulf %65, %69 : vector<13x13xf32>
    %cst_41 = arith.constant dense<0.000000e+00> : vector<13x16xf32>
    %71 = tpu.matmul %70, %57, %cst_41 {dimension_numbers = #tpu.dot_dimension_numbers<[1], [0], [0], [1], [0, 0, 1, 1], [], []>} : vector<13x13xf32>, vector<13x16xf32>, vector<13x16xf32> -> vector<13x16xf32>
    %72 = arith.truncf %71 : vector<13x16xf32> to vector<13x16xbf16>
    %c0_42 = arith.constant 0 : index
    %c0_43 = arith.constant 0 : index
    %c0_44 = arith.constant 0 : index
    %73 = vector.load %arg12[%c0_42, %c0_43, %c0_44] : memref<4x16x64xf32, #tpu.memory_space<vmem>>, vector<1x16x64xf32>
    %74 = vector.shape_cast %73 : vector<1x16x64xf32> to vector<16x64xf32>
    %75 = arith.truncf %74 : vector<16x64xf32> to vector<16x64xbf16>
    %cst_45 = arith.constant dense<0.000000e+00> : vector<13x64xf32>
    %76 = tpu.matmul %72, %75, %cst_45 {dimension_numbers = #tpu.dot_dimension_numbers<[1], [0], [0], [1], [0, 0, 1, 1], [], []>} : vector<13x16xbf16>, vector<16x64xbf16>, vector<13x64xf32> -> vector<13x64xf32>
    %77 = arith.addf %33, %76 : vector<13x64xf32>
    %c1 = arith.constant 1 : index
    %c0_46 = arith.constant 0 : index
    %c0_47 = arith.constant 0 : index
    %78 = vector.load %arg6[%c1, %c0_46, %c0_47] : memref<4x64x16xf32, #tpu.memory_space<vmem>>, vector<1x64x16xf32>
    %79 = vector.shape_cast %78 : vector<1x64x16xf32> to vector<64x16xf32>
    %80 = arith.truncf %79 : vector<64x16xf32> to vector<64x16xbf16>
    %cst_48 = arith.constant dense<0.000000e+00> : vector<13x16xf32>
    %81 = tpu.matmul %32, %80, %cst_48 {dimension_numbers = #tpu.dot_dimension_numbers<[1], [0], [0], [1], [0, 0, 1, 1], [], []>} : vector<13x64xbf16>, vector<64x16xbf16>, vector<13x16xf32> -> vector<13x16xf32>
    %c1_49 = arith.constant 1 : index
    %c0_50 = arith.constant 0 : index
    %c0_51 = arith.constant 0 : index
    %82 = vector.load %arg9[%c1_49, %c0_50, %c0_51] : memref<4x1x16xf32, #tpu.memory_space<vmem>>, vector<1x1x16xf32>
    %83 = vector.shape_cast %82 : vector<1x1x16xf32> to vector<1x16xf32>
    %84 = vector.broadcast %83 : vector<1x16xf32> to vector<13x16xf32>
    %85 = arith.addf %81, %84 : vector<13x16xf32>
    %c1_52 = arith.constant 1 : index
    %c0_53 = arith.constant 0 : index
    %c0_54 = arith.constant 0 : index
    %86 = vector.load %arg7[%c1_52, %c0_53, %c0_54] : memref<4x64x16xf32, #tpu.memory_space<vmem>>, vector<1x64x16xf32>
    %87 = vector.shape_cast %86 : vector<1x64x16xf32> to vector<64x16xf32>
    %88 = arith.truncf %87 : vector<64x16xf32> to vector<64x16xbf16>
    %cst_55 = arith.constant dense<0.000000e+00> : vector<13x16xf32>
    %89 = tpu.matmul %32, %88, %cst_55 {dimension_numbers = #tpu.dot_dimension_numbers<[1], [0], [0], [1], [0, 0, 1, 1], [], []>} : vector<13x64xbf16>, vector<64x16xbf16>, vector<13x16xf32> -> vector<13x16xf32>
    %c1_56 = arith.constant 1 : index
    %c0_57 = arith.constant 0 : index
    %c0_58 = arith.constant 0 : index
    %90 = vector.load %arg10[%c1_56, %c0_57, %c0_58] : memref<4x1x16xf32, #tpu.memory_space<vmem>>, vector<1x1x16xf32>
    %91 = vector.shape_cast %90 : vector<1x1x16xf32> to vector<1x16xf32>
    %92 = vector.broadcast %91 : vector<1x16xf32> to vector<13x16xf32>
    %93 = arith.addf %89, %92 : vector<13x16xf32>
    %c1_59 = arith.constant 1 : index
    %c0_60 = arith.constant 0 : index
    %c0_61 = arith.constant 0 : index
    %94 = vector.load %arg8[%c1_59, %c0_60, %c0_61] : memref<4x64x16xf32, #tpu.memory_space<vmem>>, vector<1x64x16xf32>
    %95 = vector.shape_cast %94 : vector<1x64x16xf32> to vector<64x16xf32>
    %96 = arith.truncf %95 : vector<64x16xf32> to vector<64x16xbf16>
    %cst_62 = arith.constant dense<0.000000e+00> : vector<13x16xf32>
    %97 = tpu.matmul %32, %96, %cst_62 {dimension_numbers = #tpu.dot_dimension_numbers<[1], [0], [0], [1], [0, 0, 1, 1], [], []>} : vector<13x64xbf16>, vector<64x16xbf16>, vector<13x16xf32> -> vector<13x16xf32>
    %c1_63 = arith.constant 1 : index
    %c0_64 = arith.constant 0 : index
    %c0_65 = arith.constant 0 : index
    %98 = vector.load %arg11[%c1_63, %c0_64, %c0_65] : memref<4x1x16xf32, #tpu.memory_space<vmem>>, vector<1x1x16xf32>
    %99 = vector.shape_cast %98 : vector<1x1x16xf32> to vector<1x16xf32>
    %100 = vector.broadcast %99 : vector<1x16xf32> to vector<13x16xf32>
    %101 = arith.addf %97, %100 : vector<13x16xf32>
    %cst_66 = arith.constant dense<0.000000e+00> : vector<13x13xf32>
    %102 = tpu.matmul %85, %93, %cst_66 {dimension_numbers = #tpu.dot_dimension_numbers<[1], [1], [0], [0], [0, 0, 1, 0], [], []>} : vector<13x16xf32>, vector<13x16xf32>, vector<13x13xf32> -> vector<13x13xf32>
    %cst_67 = arith.constant 2.500000e-01 : f32
    %103 = vector.broadcast %cst_67 : f32 to vector<13x13xf32>
    %104 = arith.mulf %102, %103 : vector<13x13xf32>
    %cst_68 = arith.constant dense<0xFF800000> : vector<13xf32>
    %105 = vector.multi_reduction <maximumf>, %104, %cst_68 [1] : vector<13x13xf32> to vector<13xf32>
    %106 = vector.shape_cast %105 : vector<13xf32> to vector<13x1xf32>
    %107 = vector.broadcast %106 : vector<13x1xf32> to vector<13x13xf32>
    %108 = arith.subf %104, %107 : vector<13x13xf32>
    %109 = math.exp %108 : vector<13x13xf32>
    %cst_69 = arith.constant dense<0.000000e+00> : vector<13xf32>
    %110 = vector.multi_reduction <add>, %109, %cst_69 [1] : vector<13x13xf32> to vector<13xf32>
    %111 = vector.shape_cast %110 : vector<13xf32> to vector<13x1xf32>
    %112 = tpu.reciprocal %111 {approx = true} : vector<13x1xf32> -> vector<13x1xf32>
    %113 = vector.broadcast %112 : vector<13x1xf32> to vector<13x13xf32>
    %114 = arith.mulf %109, %113 : vector<13x13xf32>
    %cst_70 = arith.constant dense<0.000000e+00> : vector<13x16xf32>
    %115 = tpu.matmul %114, %101, %cst_70 {dimension_numbers = #tpu.dot_dimension_numbers<[1], [0], [0], [1], [0, 0, 1, 1], [], []>} : vector<13x13xf32>, vector<13x16xf32>, vector<13x16xf32> -> vector<13x16xf32>
    %116 = arith.truncf %115 : vector<13x16xf32> to vector<13x16xbf16>
    %c1_71 = arith.constant 1 : index
    %c0_72 = arith.constant 0 : index
    %c0_73 = arith.constant 0 : index
    %117 = vector.load %arg12[%c1_71, %c0_72, %c0_73] : memref<4x16x64xf32, #tpu.memory_space<vmem>>, vector<1x16x64xf32>
    %118 = vector.shape_cast %117 : vector<1x16x64xf32> to vector<16x64xf32>
    %119 = arith.truncf %118 : vector<16x64xf32> to vector<16x64xbf16>
    %cst_74 = arith.constant dense<0.000000e+00> : vector<13x64xf32>
    %120 = tpu.matmul %116, %119, %cst_74 {dimension_numbers = #tpu.dot_dimension_numbers<[1], [0], [0], [1], [0, 0, 1, 1], [], []>} : vector<13x16xbf16>, vector<16x64xbf16>, vector<13x64xf32> -> vector<13x64xf32>
    %121 = arith.addf %77, %120 : vector<13x64xf32>
    %c2 = arith.constant 2 : index
    %c0_75 = arith.constant 0 : index
    %c0_76 = arith.constant 0 : index
    %122 = vector.load %arg6[%c2, %c0_75, %c0_76] : memref<4x64x16xf32, #tpu.memory_space<vmem>>, vector<1x64x16xf32>
    %123 = vector.shape_cast %122 : vector<1x64x16xf32> to vector<64x16xf32>
    %124 = arith.truncf %123 : vector<64x16xf32> to vector<64x16xbf16>
    %cst_77 = arith.constant dense<0.000000e+00> : vector<13x16xf32>
    %125 = tpu.matmul %32, %124, %cst_77 {dimension_numbers = #tpu.dot_dimension_numbers<[1], [0], [0], [1], [0, 0, 1, 1], [], []>} : vector<13x64xbf16>, vector<64x16xbf16>, vector<13x16xf32> -> vector<13x16xf32>
    %c2_78 = arith.constant 2 : index
    %c0_79 = arith.constant 0 : index
    %c0_80 = arith.constant 0 : index
    %126 = vector.load %arg9[%c2_78, %c0_79, %c0_80] : memref<4x1x16xf32, #tpu.memory_space<vmem>>, vector<1x1x16xf32>
    %127 = vector.shape_cast %126 : vector<1x1x16xf32> to vector<1x16xf32>
    %128 = vector.broadcast %127 : vector<1x16xf32> to vector<13x16xf32>
    %129 = arith.addf %125, %128 : vector<13x16xf32>
    %c2_81 = arith.constant 2 : index
    %c0_82 = arith.constant 0 : index
    %c0_83 = arith.constant 0 : index
    %130 = vector.load %arg7[%c2_81, %c0_82, %c0_83] : memref<4x64x16xf32, #tpu.memory_space<vmem>>, vector<1x64x16xf32>
    %131 = vector.shape_cast %130 : vector<1x64x16xf32> to vector<64x16xf32>
    %132 = arith.truncf %131 : vector<64x16xf32> to vector<64x16xbf16>
    %cst_84 = arith.constant dense<0.000000e+00> : vector<13x16xf32>
    %133 = tpu.matmul %32, %132, %cst_84 {dimension_numbers = #tpu.dot_dimension_numbers<[1], [0], [0], [1], [0, 0, 1, 1], [], []>} : vector<13x64xbf16>, vector<64x16xbf16>, vector<13x16xf32> -> vector<13x16xf32>
    %c2_85 = arith.constant 2 : index
    %c0_86 = arith.constant 0 : index
    %c0_87 = arith.constant 0 : index
    %134 = vector.load %arg10[%c2_85, %c0_86, %c0_87] : memref<4x1x16xf32, #tpu.memory_space<vmem>>, vector<1x1x16xf32>
    %135 = vector.shape_cast %134 : vector<1x1x16xf32> to vector<1x16xf32>
    %136 = vector.broadcast %135 : vector<1x16xf32> to vector<13x16xf32>
    %137 = arith.addf %133, %136 : vector<13x16xf32>
    %c2_88 = arith.constant 2 : index
    %c0_89 = arith.constant 0 : index
    %c0_90 = arith.constant 0 : index
    %138 = vector.load %arg8[%c2_88, %c0_89, %c0_90] : memref<4x64x16xf32, #tpu.memory_space<vmem>>, vector<1x64x16xf32>
    %139 = vector.shape_cast %138 : vector<1x64x16xf32> to vector<64x16xf32>
    %140 = arith.truncf %139 : vector<64x16xf32> to vector<64x16xbf16>
    %cst_91 = arith.constant dense<0.000000e+00> : vector<13x16xf32>
    %141 = tpu.matmul %32, %140, %cst_91 {dimension_numbers = #tpu.dot_dimension_numbers<[1], [0], [0], [1], [0, 0, 1, 1], [], []>} : vector<13x64xbf16>, vector<64x16xbf16>, vector<13x16xf32> -> vector<13x16xf32>
    %c2_92 = arith.constant 2 : index
    %c0_93 = arith.constant 0 : index
    %c0_94 = arith.constant 0 : index
    %142 = vector.load %arg11[%c2_92, %c0_93, %c0_94] : memref<4x1x16xf32, #tpu.memory_space<vmem>>, vector<1x1x16xf32>
    %143 = vector.shape_cast %142 : vector<1x1x16xf32> to vector<1x16xf32>
    %144 = vector.broadcast %143 : vector<1x16xf32> to vector<13x16xf32>
    %145 = arith.addf %141, %144 : vector<13x16xf32>
    %cst_95 = arith.constant dense<0.000000e+00> : vector<13x13xf32>
    %146 = tpu.matmul %129, %137, %cst_95 {dimension_numbers = #tpu.dot_dimension_numbers<[1], [1], [0], [0], [0, 0, 1, 0], [], []>} : vector<13x16xf32>, vector<13x16xf32>, vector<13x13xf32> -> vector<13x13xf32>
    %cst_96 = arith.constant 2.500000e-01 : f32
    %147 = vector.broadcast %cst_96 : f32 to vector<13x13xf32>
    %148 = arith.mulf %146, %147 : vector<13x13xf32>
    %cst_97 = arith.constant dense<0xFF800000> : vector<13xf32>
    %149 = vector.multi_reduction <maximumf>, %148, %cst_97 [1] : vector<13x13xf32> to vector<13xf32>
    %150 = vector.shape_cast %149 : vector<13xf32> to vector<13x1xf32>
    %151 = vector.broadcast %150 : vector<13x1xf32> to vector<13x13xf32>
    %152 = arith.subf %148, %151 : vector<13x13xf32>
    %153 = math.exp %152 : vector<13x13xf32>
    %cst_98 = arith.constant dense<0.000000e+00> : vector<13xf32>
    %154 = vector.multi_reduction <add>, %153, %cst_98 [1] : vector<13x13xf32> to vector<13xf32>
    %155 = vector.shape_cast %154 : vector<13xf32> to vector<13x1xf32>
    %156 = tpu.reciprocal %155 {approx = true} : vector<13x1xf32> -> vector<13x1xf32>
    %157 = vector.broadcast %156 : vector<13x1xf32> to vector<13x13xf32>
    %158 = arith.mulf %153, %157 : vector<13x13xf32>
    %cst_99 = arith.constant dense<0.000000e+00> : vector<13x16xf32>
    %159 = tpu.matmul %158, %145, %cst_99 {dimension_numbers = #tpu.dot_dimension_numbers<[1], [0], [0], [1], [0, 0, 1, 1], [], []>} : vector<13x13xf32>, vector<13x16xf32>, vector<13x16xf32> -> vector<13x16xf32>
    %160 = arith.truncf %159 : vector<13x16xf32> to vector<13x16xbf16>
    %c2_100 = arith.constant 2 : index
    %c0_101 = arith.constant 0 : index
    %c0_102 = arith.constant 0 : index
    %161 = vector.load %arg12[%c2_100, %c0_101, %c0_102] : memref<4x16x64xf32, #tpu.memory_space<vmem>>, vector<1x16x64xf32>
    %162 = vector.shape_cast %161 : vector<1x16x64xf32> to vector<16x64xf32>
    %163 = arith.truncf %162 : vector<16x64xf32> to vector<16x64xbf16>
    %cst_103 = arith.constant dense<0.000000e+00> : vector<13x64xf32>
    %164 = tpu.matmul %160, %163, %cst_103 {dimension_numbers = #tpu.dot_dimension_numbers<[1], [0], [0], [1], [0, 0, 1, 1], [], []>} : vector<13x16xbf16>, vector<16x64xbf16>, vector<13x64xf32> -> vector<13x64xf32>
    %165 = arith.addf %121, %164 : vector<13x64xf32>
    %c3 = arith.constant 3 : index
    %c0_104 = arith.constant 0 : index
    %c0_105 = arith.constant 0 : index
    %166 = vector.load %arg6[%c3, %c0_104, %c0_105] : memref<4x64x16xf32, #tpu.memory_space<vmem>>, vector<1x64x16xf32>
    %167 = vector.shape_cast %166 : vector<1x64x16xf32> to vector<64x16xf32>
    %168 = arith.truncf %167 : vector<64x16xf32> to vector<64x16xbf16>
    %cst_106 = arith.constant dense<0.000000e+00> : vector<13x16xf32>
    %169 = tpu.matmul %32, %168, %cst_106 {dimension_numbers = #tpu.dot_dimension_numbers<[1], [0], [0], [1], [0, 0, 1, 1], [], []>} : vector<13x64xbf16>, vector<64x16xbf16>, vector<13x16xf32> -> vector<13x16xf32>
    %c3_107 = arith.constant 3 : index
    %c0_108 = arith.constant 0 : index
    %c0_109 = arith.constant 0 : index
    %170 = vector.load %arg9[%c3_107, %c0_108, %c0_109] : memref<4x1x16xf32, #tpu.memory_space<vmem>>, vector<1x1x16xf32>
    %171 = vector.shape_cast %170 : vector<1x1x16xf32> to vector<1x16xf32>
    %172 = vector.broadcast %171 : vector<1x16xf32> to vector<13x16xf32>
    %173 = arith.addf %169, %172 : vector<13x16xf32>
    %c3_110 = arith.constant 3 : index
    %c0_111 = arith.constant 0 : index
    %c0_112 = arith.constant 0 : index
    %174 = vector.load %arg7[%c3_110, %c0_111, %c0_112] : memref<4x64x16xf32, #tpu.memory_space<vmem>>, vector<1x64x16xf32>
    %175 = vector.shape_cast %174 : vector<1x64x16xf32> to vector<64x16xf32>
    %176 = arith.truncf %175 : vector<64x16xf32> to vector<64x16xbf16>
    %cst_113 = arith.constant dense<0.000000e+00> : vector<13x16xf32>
    %177 = tpu.matmul %32, %176, %cst_113 {dimension_numbers = #tpu.dot_dimension_numbers<[1], [0], [0], [1], [0, 0, 1, 1], [], []>} : vector<13x64xbf16>, vector<64x16xbf16>, vector<13x16xf32> -> vector<13x16xf32>
    %c3_114 = arith.constant 3 : index
    %c0_115 = arith.constant 0 : index
    %c0_116 = arith.constant 0 : index
    %178 = vector.load %arg10[%c3_114, %c0_115, %c0_116] : memref<4x1x16xf32, #tpu.memory_space<vmem>>, vector<1x1x16xf32>
    %179 = vector.shape_cast %178 : vector<1x1x16xf32> to vector<1x16xf32>
    %180 = vector.broadcast %179 : vector<1x16xf32> to vector<13x16xf32>
    %181 = arith.addf %177, %180 : vector<13x16xf32>
    %c3_117 = arith.constant 3 : index
    %c0_118 = arith.constant 0 : index
    %c0_119 = arith.constant 0 : index
    %182 = vector.load %arg8[%c3_117, %c0_118, %c0_119] : memref<4x64x16xf32, #tpu.memory_space<vmem>>, vector<1x64x16xf32>
    %183 = vector.shape_cast %182 : vector<1x64x16xf32> to vector<64x16xf32>
    %184 = arith.truncf %183 : vector<64x16xf32> to vector<64x16xbf16>
    %cst_120 = arith.constant dense<0.000000e+00> : vector<13x16xf32>
    %185 = tpu.matmul %32, %184, %cst_120 {dimension_numbers = #tpu.dot_dimension_numbers<[1], [0], [0], [1], [0, 0, 1, 1], [], []>} : vector<13x64xbf16>, vector<64x16xbf16>, vector<13x16xf32> -> vector<13x16xf32>
    %c3_121 = arith.constant 3 : index
    %c0_122 = arith.constant 0 : index
    %c0_123 = arith.constant 0 : index
    %186 = vector.load %arg11[%c3_121, %c0_122, %c0_123] : memref<4x1x16xf32, #tpu.memory_space<vmem>>, vector<1x1x16xf32>
    %187 = vector.shape_cast %186 : vector<1x1x16xf32> to vector<1x16xf32>
    %188 = vector.broadcast %187 : vector<1x16xf32> to vector<13x16xf32>
    %189 = arith.addf %185, %188 : vector<13x16xf32>
    %cst_124 = arith.constant dense<0.000000e+00> : vector<13x13xf32>
    %190 = tpu.matmul %173, %181, %cst_124 {dimension_numbers = #tpu.dot_dimension_numbers<[1], [1], [0], [0], [0, 0, 1, 0], [], []>} : vector<13x16xf32>, vector<13x16xf32>, vector<13x13xf32> -> vector<13x13xf32>
    %cst_125 = arith.constant 2.500000e-01 : f32
    %191 = vector.broadcast %cst_125 : f32 to vector<13x13xf32>
    %192 = arith.mulf %190, %191 : vector<13x13xf32>
    %cst_126 = arith.constant dense<0xFF800000> : vector<13xf32>
    %193 = vector.multi_reduction <maximumf>, %192, %cst_126 [1] : vector<13x13xf32> to vector<13xf32>
    %194 = vector.shape_cast %193 : vector<13xf32> to vector<13x1xf32>
    %195 = vector.broadcast %194 : vector<13x1xf32> to vector<13x13xf32>
    %196 = arith.subf %192, %195 : vector<13x13xf32>
    %197 = math.exp %196 : vector<13x13xf32>
    %cst_127 = arith.constant dense<0.000000e+00> : vector<13xf32>
    %198 = vector.multi_reduction <add>, %197, %cst_127 [1] : vector<13x13xf32> to vector<13xf32>
    %199 = vector.shape_cast %198 : vector<13xf32> to vector<13x1xf32>
    %200 = tpu.reciprocal %199 {approx = true} : vector<13x1xf32> -> vector<13x1xf32>
    %201 = vector.broadcast %200 : vector<13x1xf32> to vector<13x13xf32>
    %202 = arith.mulf %197, %201 : vector<13x13xf32>
    %cst_128 = arith.constant dense<0.000000e+00> : vector<13x16xf32>
    %203 = tpu.matmul %202, %189, %cst_128 {dimension_numbers = #tpu.dot_dimension_numbers<[1], [0], [0], [1], [0, 0, 1, 1], [], []>} : vector<13x13xf32>, vector<13x16xf32>, vector<13x16xf32> -> vector<13x16xf32>
    %204 = arith.truncf %203 : vector<13x16xf32> to vector<13x16xbf16>
    %c3_129 = arith.constant 3 : index
    %c0_130 = arith.constant 0 : index
    %c0_131 = arith.constant 0 : index
    %205 = vector.load %arg12[%c3_129, %c0_130, %c0_131] : memref<4x16x64xf32, #tpu.memory_space<vmem>>, vector<1x16x64xf32>
    %206 = vector.shape_cast %205 : vector<1x16x64xf32> to vector<16x64xf32>
    %207 = arith.truncf %206 : vector<16x64xf32> to vector<16x64xbf16>
    %cst_132 = arith.constant dense<0.000000e+00> : vector<13x64xf32>
    %208 = tpu.matmul %204, %207, %cst_132 {dimension_numbers = #tpu.dot_dimension_numbers<[1], [0], [0], [1], [0, 0, 1, 1], [], []>} : vector<13x16xbf16>, vector<16x64xbf16>, vector<13x64xf32> -> vector<13x64xf32>
    %209 = arith.addf %165, %208 : vector<13x64xf32>
    %210 = arith.addf %7, %209 : vector<13x64xf32>
    %c0_133 = arith.constant 0 : index
    %c0_134 = arith.constant 0 : index
    %211 = vector.load %arg13[%c0_133, %c0_134] : memref<1x64xf32, #tpu.memory_space<vmem>>, vector<1x64xf32>
    %212 = vector.broadcast %211 : vector<1x64xf32> to vector<13x64xf32>
    %213 = arith.addf %210, %212 : vector<13x64xf32>
    %c0_135 = arith.constant 0 : index
    %c0_136 = arith.constant 0 : index
    %214 = vector.load %arg14[%c0_135, %c0_136] : memref<1x64xf32, #tpu.memory_space<vmem>>, vector<1x64xf32>
    %c0_137 = arith.constant 0 : index
    %c0_138 = arith.constant 0 : index
    %215 = vector.load %arg15[%c0_137, %c0_138] : memref<1x64xf32, #tpu.memory_space<vmem>>, vector<1x64xf32>
    %cst_139 = arith.constant dense<0.000000e+00> : vector<13xf32>
    %216 = vector.multi_reduction <add>, %213, %cst_139 [1] : vector<13x64xf32> to vector<13xf32>
    %217 = vector.shape_cast %216 : vector<13xf32> to vector<13x1xf32>
    %cst_140 = arith.constant 6.400000e+01 : f32
    %218 = vector.broadcast %cst_140 : f32 to vector<13x1xf32>
    %219 = arith.divf %217, %218 : vector<13x1xf32>
    %220 = vector.broadcast %219 : vector<13x1xf32> to vector<13x64xf32>
    %221 = arith.subf %213, %220 : vector<13x64xf32>
    %222 = arith.mulf %221, %221 : vector<13x64xf32>
    %cst_141 = arith.constant dense<0.000000e+00> : vector<13xf32>
    %223 = vector.multi_reduction <add>, %222, %cst_141 [1] : vector<13x64xf32> to vector<13xf32>
    %224 = vector.shape_cast %223 : vector<13xf32> to vector<13x1xf32>
    %cst_142 = arith.constant 6.400000e+01 : f32
    %225 = vector.broadcast %cst_142 : f32 to vector<13x1xf32>
    %226 = arith.divf %224, %225 : vector<13x1xf32>
    %227 = vector.broadcast %219 : vector<13x1xf32> to vector<13x64xf32>
    %228 = arith.subf %213, %227 : vector<13x64xf32>
    %cst_143 = arith.constant 9.99999997E-7 : f32
    %229 = vector.broadcast %cst_143 : f32 to vector<13x1xf32>
    %230 = arith.addf %226, %229 : vector<13x1xf32>
    %231 = math.rsqrt %230 : vector<13x1xf32>
    %232 = vector.broadcast %231 : vector<13x1xf32> to vector<13x64xf32>
    %233 = arith.mulf %228, %232 : vector<13x64xf32>
    %234 = vector.broadcast %214 : vector<1x64xf32> to vector<13x64xf32>
    %235 = arith.mulf %233, %234 : vector<13x64xf32>
    %236 = vector.broadcast %215 : vector<1x64xf32> to vector<13x64xf32>
    %237 = arith.addf %235, %236 : vector<13x64xf32>
    %238 = arith.truncf %237 : vector<13x64xf32> to vector<13x64xbf16>
    %c0_144 = arith.constant 0 : index
    %c0_145 = arith.constant 0 : index
    %239 = vector.load %arg16[%c0_144, %c0_145] : memref<64x256xf32, #tpu.memory_space<vmem>>, vector<64x256xf32>
    %240 = arith.truncf %239 : vector<64x256xf32> to vector<64x256xbf16>
    %cst_146 = arith.constant dense<0.000000e+00> : vector<13x256xf32>
    %241 = tpu.matmul %238, %240, %cst_146 {dimension_numbers = #tpu.dot_dimension_numbers<[1], [0], [0], [1], [0, 0, 1, 1], [], []>} : vector<13x64xbf16>, vector<64x256xbf16>, vector<13x256xf32> -> vector<13x256xf32>
    %c0_147 = arith.constant 0 : index
    %c0_148 = arith.constant 0 : index
    %242 = vector.load %arg17[%c0_147, %c0_148] : memref<1x256xf32, #tpu.memory_space<vmem>>, vector<1x256xf32>
    %243 = vector.broadcast %242 : vector<1x256xf32> to vector<13x256xf32>
    %244 = arith.addf %241, %243 : vector<13x256xf32>
    %245 = arith.mulf %244, %244 : vector<13x256xf32>
    %246 = arith.mulf %244, %245 : vector<13x256xf32>
    %cst_149 = arith.constant 4.471500e-02 : f32
    %247 = vector.broadcast %cst_149 : f32 to vector<13x256xf32>
    %248 = arith.mulf %247, %246 : vector<13x256xf32>
    %249 = arith.addf %244, %248 : vector<13x256xf32>
    %cst_150 = arith.constant 0.797884583 : f32
    %250 = vector.broadcast %cst_150 : f32 to vector<13x256xf32>
    %251 = arith.mulf %250, %249 : vector<13x256xf32>
    %252 = math.tanh %251 : vector<13x256xf32>
    %cst_151 = arith.constant 1.000000e+00 : f32
    %253 = vector.broadcast %cst_151 : f32 to vector<13x256xf32>
    %254 = arith.addf %253, %252 : vector<13x256xf32>
    %cst_152 = arith.constant 5.000000e-01 : f32
    %255 = vector.broadcast %cst_152 : f32 to vector<13x256xf32>
    %256 = arith.mulf %255, %254 : vector<13x256xf32>
    %257 = arith.mulf %244, %256 : vector<13x256xf32>
    %258 = arith.truncf %257 : vector<13x256xf32> to vector<13x256xbf16>
    %c0_153 = arith.constant 0 : index
    %c0_154 = arith.constant 0 : index
    %259 = vector.load %arg18[%c0_153, %c0_154] : memref<256x64xf32, #tpu.memory_space<vmem>>, vector<256x64xf32>
    %260 = arith.truncf %259 : vector<256x64xf32> to vector<256x64xbf16>
    %cst_155 = arith.constant dense<0.000000e+00> : vector<13x64xf32>
    %261 = tpu.matmul %258, %260, %cst_155 {dimension_numbers = #tpu.dot_dimension_numbers<[1], [0], [0], [1], [0, 0, 1, 1], [], []>} : vector<13x256xbf16>, vector<256x64xbf16>, vector<13x64xf32> -> vector<13x64xf32>
    %262 = arith.addf %213, %261 : vector<13x64xf32>
    %c0_156 = arith.constant 0 : index
    %c0_157 = arith.constant 0 : index
    %263 = vector.load %arg19[%c0_156, %c0_157] : memref<1x64xf32, #tpu.memory_space<vmem>>, vector<1x64xf32>
    %264 = vector.broadcast %263 : vector<1x64xf32> to vector<13x64xf32>
    %265 = arith.addf %262, %264 : vector<13x64xf32>
    %c0_158 = arith.constant 0 : index
    %c0_159 = arith.constant 0 : index
    %266 = vector.load %arg20[%c0_158, %c0_159] : memref<1x64xf32, #tpu.memory_space<vmem>>, vector<1x64xf32>
    %c0_160 = arith.constant 0 : index
    %c0_161 = arith.constant 0 : index
    %267 = vector.load %arg21[%c0_160, %c0_161] : memref<1x64xf32, #tpu.memory_space<vmem>>, vector<1x64xf32>
    %cst_162 = arith.constant dense<0.000000e+00> : vector<13xf32>
    %268 = vector.multi_reduction <add>, %265, %cst_162 [1] : vector<13x64xf32> to vector<13xf32>
    %269 = vector.shape_cast %268 : vector<13xf32> to vector<13x1xf32>
    %cst_163 = arith.constant 6.400000e+01 : f32
    %270 = vector.broadcast %cst_163 : f32 to vector<13x1xf32>
    %271 = arith.divf %269, %270 : vector<13x1xf32>
    %272 = vector.broadcast %271 : vector<13x1xf32> to vector<13x64xf32>
    %273 = arith.subf %265, %272 : vector<13x64xf32>
    %274 = arith.mulf %273, %273 : vector<13x64xf32>
    %cst_164 = arith.constant dense<0.000000e+00> : vector<13xf32>
    %275 = vector.multi_reduction <add>, %274, %cst_164 [1] : vector<13x64xf32> to vector<13xf32>
    %276 = vector.shape_cast %275 : vector<13xf32> to vector<13x1xf32>
    %cst_165 = arith.constant 6.400000e+01 : f32
    %277 = vector.broadcast %cst_165 : f32 to vector<13x1xf32>
    %278 = arith.divf %276, %277 : vector<13x1xf32>
    %279 = vector.broadcast %271 : vector<13x1xf32> to vector<13x64xf32>
    %280 = arith.subf %265, %279 : vector<13x64xf32>
    %cst_166 = arith.constant 9.99999997E-7 : f32
    %281 = vector.broadcast %cst_166 : f32 to vector<13x1xf32>
    %282 = arith.addf %278, %281 : vector<13x1xf32>
    %283 = math.rsqrt %282 : vector<13x1xf32>
    %284 = vector.broadcast %283 : vector<13x1xf32> to vector<13x64xf32>
    %285 = arith.mulf %280, %284 : vector<13x64xf32>
    %286 = vector.broadcast %266 : vector<1x64xf32> to vector<13x64xf32>
    %287 = arith.mulf %285, %286 : vector<13x64xf32>
    %288 = vector.broadcast %267 : vector<1x64xf32> to vector<13x64xf32>
    %289 = arith.addf %287, %288 : vector<13x64xf32>
    %c0_167 = arith.constant 0 : index
    %c0_168 = arith.constant 0 : index
    %c0_169 = arith.constant 0 : index
    %290 = vector.load %arg22[%c0_167, %c0_168, %c0_169] : memref<1x13x64xf32, #tpu.memory_space<vmem>>, vector<1x13x64xf32>
    %291 = vector.shape_cast %290 : vector<1x13x64xf32> to vector<13x64xf32>
    %292 = vector.shape_cast %289 : vector<13x64xf32> to vector<1x13x64xf32>
    tpu.vector_store %arg22[%c0_167, %c0_168, %c0_169], %292 {strides = array<i32>} : memref<1x13x64xf32, #tpu.memory_space<vmem>>, vector<1x13x64xf32>,
    return
  }
  func.func @transform_0(%arg0: i32) -> (i32, i32, i32) {
    %c0_i32 = arith.constant 0 : i32
    %c0_i32_0 = arith.constant 0 : i32
    %c0_i32_1 = arith.constant 0 : i32
    return %arg0, %c0_i32, %c0_i32_0 : i32, i32, i32
  }
  func.func @transform_1(%arg0: i32) -> (i32, i32) {
    %c0_i32 = arith.constant 0 : i32
    %c0_i32_0 = arith.constant 0 : i32
    %c0_i32_1 = arith.constant 0 : i32
    return %c0_i32, %c0_i32_0 : i32, i32
  }
  func.func @transform_2(%arg0: i32) -> (i32, i32) {
    %c0_i32 = arith.constant 0 : i32
    %c0_i32_0 = arith.constant 0 : i32
    %c0_i32_1 = arith.constant 0 : i32
    return %c0_i32, %c0_i32_0 : i32, i32
  }
  func.func @transform_3(%arg0: i32) -> (i32, i32) {
    %c0_i32 = arith.constant 0 : i32
    %c0_i32_0 = arith.constant 0 : i32
    %c0_i32_1 = arith.constant 0 : i32
    return %c0_i32, %c0_i32_0 : i32, i32
  }
  func.func @transform_4(%arg0: i32) -> (i32, i32) {
    %c0_i32 = arith.constant 0 : i32
    %c0_i32_0 = arith.constant 0 : i32
    %c0_i32_1 = arith.constant 0 : i32
    return %c0_i32, %c0_i32_0 : i32, i32
  }
  func.func @transform_5(%arg0: i32) -> (i32, i32, i32) {
    %c0_i32 = arith.constant 0 : i32
    %c0_i32_0 = arith.constant 0 : i32
    %c0_i32_1 = arith.constant 0 : i32
    %c0_i32_2 = arith.constant 0 : i32
    return %c0_i32, %c0_i32_0, %c0_i32_1 : i32, i32, i32
  }
  func.func @transform_6(%arg0: i32) -> (i32, i32, i32) {
    %c0_i32 = arith.constant 0 : i32
    %c0_i32_0 = arith.constant 0 : i32
    %c0_i32_1 = arith.constant 0 : i32
    %c0_i32_2 = arith.constant 0 : i32
    return %c0_i32, %c0_i32_0, %c0_i32_1 : i32, i32, i32
  }
  func.func @transform_7(%arg0: i32) -> (i32, i32, i32) {
    %c0_i32 = arith.constant 0 : i32
    %c0_i32_0 = arith.constant 0 : i32
    %c0_i32_1 = arith.constant 0 : i32
    %c0_i32_2 = arith.constant 0 : i32
    return %c0_i32, %c0_i32_0, %c0_i32_1 : i32, i32, i32
  }
  func.func @transform_8(%arg0: i32) -> (i32, i32, i32) {
    %c0_i32 = arith.constant 0 : i32
    %c0_i32_0 = arith.constant 0 : i32
    %c0_i32_1 = arith.constant 0 : i32
    %c0_i32_2 = arith.constant 0 : i32
    return %c0_i32, %c0_i32_0, %c0_i32_1 : i32, i32, i32
  }
  func.func @transform_9(%arg0: i32) -> (i32, i32, i32) {
    %c0_i32 = arith.constant 0 : i32
    %c0_i32_0 = arith.constant 0 : i32
    %c0_i32_1 = arith.constant 0 : i32
    %c0_i32_2 = arith.constant 0 : i32
    return %c0_i32, %c0_i32_0, %c0_i32_1 : i32, i32, i32
  }
  func.func @transform_10(%arg0: i32) -> (i32, i32, i32) {
    %c0_i32 = arith.constant 0 : i32
    %c0_i32_0 = arith.constant 0 : i32
    %c0_i32_1 = arith.constant 0 : i32
    %c0_i32_2 = arith.constant 0 : i32
    return %c0_i32, %c0_i32_0, %c0_i32_1 : i32, i32, i32
  }
  func.func @transform_11(%arg0: i32) -> (i32, i32, i32) {
    %c0_i32 = arith.constant 0 : i32
    %c0_i32_0 = arith.constant 0 : i32
    %c0_i32_1 = arith.constant 0 : i32
    %c0_i32_2 = arith.constant 0 : i32
    return %c0_i32, %c0_i32_0, %c0_i32_1 : i32, i32, i32
  }
  func.func @transform_12(%arg0: i32) -> (i32, i32) {
    %c0_i32 = arith.constant 0 : i32
    %c0_i32_0 = arith.constant 0 : i32
    %c0_i32_1 = arith.constant 0 : i32
    return %c0_i32, %c0_i32_0 : i32, i32
  }
  func.func @transform_13(%arg0: i32) -> (i32, i32) {
    %c0_i32 = arith.constant 0 : i32
    %c0_i32_0 = arith.constant 0 : i32
    %c0_i32_1 = arith.constant 0 : i32
    return %c0_i32, %c0_i32_0 : i32, i32
  }
  func.func @transform_14(%arg0: i32) -> (i32, i32) {
    %c0_i32 = arith.constant 0 : i32
    %c0_i32_0 = arith.constant 0 : i32
    %c0_i32_1 = arith.constant 0 : i32
    return %c0_i32, %c0_i32_0 : i32, i32
  }
  func.func @transform_15(%arg0: i32) -> (i32, i32) {
    %c0_i32 = arith.constant 0 : i32
    %c0_i32_0 = arith.constant 0 : i32
    %c0_i32_1 = arith.constant 0 : i32
    return %c0_i32, %c0_i32_0 : i32, i32
  }
  func.func @transform_16(%arg0: i32) -> (i32, i32) {
    %c0_i32 = arith.constant 0 : i32
    %c0_i32_0 = arith.constant 0 : i32
    %c0_i32_1 = arith.constant 0 : i32
    return %c0_i32, %c0_i32_0 : i32, i32
  }
  func.func @transform_17(%arg0: i32) -> (i32, i32) {
    %c0_i32 = arith.constant 0 : i32
    %c0_i32_0 = arith.constant 0 : i32
    %c0_i32_1 = arith.constant 0 : i32
    return %c0_i32, %c0_i32_0 : i32, i32
  }
  func.func @transform_18(%arg0: i32) -> (i32, i32) {
    %c0_i32 = arith.constant 0 : i32
    %c0_i32_0 = arith.constant 0 : i32
    %c0_i32_1 = arith.constant 0 : i32
    return %c0_i32, %c0_i32_0 : i32, i32
  }
  func.func @transform_19(%arg0: i32) -> (i32, i32) {
    %c0_i32 = arith.constant 0 : i32
    %c0_i32_0 = arith.constant 0 : i32
    %c0_i32_1 = arith.constant 0 : i32
    return %c0_i32, %c0_i32_0 : i32, i32
  }
  func.func @transform_20(%arg0: i32) -> (i32, i32) {
    %c0_i32 = arith.constant 0 : i32
    %c0_i32_0 = arith.constant 0 : i32
    %c0_i32_1 = arith.constant 0 : i32
    return %c0_i32, %c0_i32_0 : i32, i32
  }
  func.func @transform_21(%arg0: i32) -> (i32, i32, i32) {
    %c0_i32 = arith.constant 0 : i32
    %c0_i32_0 = arith.constant 0 : i32
    %c0_i32_1 = arith.constant 0 : i32
    return %arg0, %c0_i32, %c0_i32_0 : i32, i32, i32
  }
}

module attributes {stable_mosaic.version = 11 : i64} {
  func.func @_bert_kernel(%arg0: i32, %arg1: memref<1x8x64xf32, #tpu.memory_space<vmem>>, %arg2: memref<1x1x8xf32, #tpu.memory_space<vmem>>, %arg3: memref<1x64xf32, #tpu.memory_space<vmem>>, %arg4: memref<1x64xf32, #tpu.memory_space<vmem>>, %arg5: memref<1x64xf32, #tpu.memory_space<vmem>>, %arg6: memref<1x64xf32, #tpu.memory_space<vmem>>, %arg7: memref<4x64x16xf32, #tpu.memory_space<vmem>>, %arg8: memref<4x64x16xf32, #tpu.memory_space<vmem>>, %arg9: memref<4x64x16xf32, #tpu.memory_space<vmem>>, %arg10: memref<4x1x16xf32, #tpu.memory_space<vmem>>, %arg11: memref<4x1x16xf32, #tpu.memory_space<vmem>>, %arg12: memref<4x1x16xf32, #tpu.memory_space<vmem>>, %arg13: memref<4x16x64xf32, #tpu.memory_space<vmem>>, %arg14: memref<1x64xf32, #tpu.memory_space<vmem>>, %arg15: memref<1x64xf32, #tpu.memory_space<vmem>>, %arg16: memref<1x64xf32, #tpu.memory_space<vmem>>, %arg17: memref<64x256xf32, #tpu.memory_space<vmem>>, %arg18: memref<1x256xf32, #tpu.memory_space<vmem>>, %arg19: memref<256x64xf32, #tpu.memory_space<vmem>>, %arg20: memref<1x64xf32, #tpu.memory_space<vmem>>, %arg21: memref<1x1x64xf32, #tpu.memory_space<vmem>>) attributes {dimension_semantics = [#tpu.dimension_semantics<parallel>], iteration_bounds = array<i64: 8>, scalar_prefetch = 0 : i64, scratch_operands = 0 : i64, tpu.core_type = #tpu.core_type<tc>, window_params = [{transform_indices = @transform_0, window_bounds = array<i64: 1, 8, 64>}, {transform_indices = @transform_1, window_bounds = array<i64: 1, 1, 8>}, {pipeline_mode = #tpu.pipeline_mode<synchronous>, transform_indices = @transform_2, window_bounds = array<i64: 1, 64>}, {pipeline_mode = #tpu.pipeline_mode<synchronous>, transform_indices = @transform_3, window_bounds = array<i64: 1, 64>}, {pipeline_mode = #tpu.pipeline_mode<synchronous>, transform_indices = @transform_4, window_bounds = array<i64: 1, 64>}, {pipeline_mode = #tpu.pipeline_mode<synchronous>, transform_indices = @transform_5, window_bounds = array<i64: 1, 64>}, {pipeline_mode = #tpu.pipeline_mode<synchronous>, transform_indices = @transform_6, window_bounds = array<i64: 4, 64, 16>}, {pipeline_mode = #tpu.pipeline_mode<synchronous>, transform_indices = @transform_7, window_bounds = array<i64: 4, 64, 16>}, {pipeline_mode = #tpu.pipeline_mode<synchronous>, transform_indices = @transform_8, window_bounds = array<i64: 4, 64, 16>}, {pipeline_mode = #tpu.pipeline_mode<synchronous>, transform_indices = @transform_9, window_bounds = array<i64: 4, 1, 16>}, {pipeline_mode = #tpu.pipeline_mode<synchronous>, transform_indices = @transform_10, window_bounds = array<i64: 4, 1, 16>}, {pipeline_mode = #tpu.pipeline_mode<synchronous>, transform_indices = @transform_11, window_bounds = array<i64: 4, 1, 16>}, {pipeline_mode = #tpu.pipeline_mode<synchronous>, transform_indices = @transform_12, window_bounds = array<i64: 4, 16, 64>}, {pipeline_mode = #tpu.pipeline_mode<synchronous>, transform_indices = @transform_13, window_bounds = array<i64: 1, 64>}, {pipeline_mode = #tpu.pipeline_mode<synchronous>, transform_indices = @transform_14, window_bounds = array<i64: 1, 64>}, {pipeline_mode = #tpu.pipeline_mode<synchronous>, transform_indices = @transform_15, window_bounds = array<i64: 1, 64>}, {pipeline_mode = #tpu.pipeline_mode<synchronous>, transform_indices = @transform_16, window_bounds = array<i64: 64, 256>}, {pipeline_mode = #tpu.pipeline_mode<synchronous>, transform_indices = @transform_17, window_bounds = array<i64: 1, 256>}, {pipeline_mode = #tpu.pipeline_mode<synchronous>, transform_indices = @transform_18, window_bounds = array<i64: 256, 64>}, {pipeline_mode = #tpu.pipeline_mode<synchronous>, transform_indices = @transform_19, window_bounds = array<i64: 1, 64>}, {transform_indices = @transform_20, window_bounds = array<i64: 1, 1, 64>}]} {
    %c0 = arith.constant 0 : index
    %c0_0 = arith.constant 0 : index
    %c0_1 = arith.constant 0 : index
    %0 = vector.load %arg1[%c0, %c0_0, %c0_1] : memref<1x8x64xf32, #tpu.memory_space<vmem>>, vector<1x8x64xf32>
    %1 = vector.shape_cast %0 : vector<1x8x64xf32> to vector<8x64xf32>
    %c0_2 = arith.constant 0 : index
    %c0_3 = arith.constant 0 : index
    %2 = vector.load %arg3[%c0_2, %c0_3] : memref<1x64xf32, #tpu.memory_space<vmem>>, vector<1x64xf32>
    %c0_4 = arith.constant 0 : index
    %c0_5 = arith.constant 0 : index
    %3 = vector.load %arg4[%c0_4, %c0_5] : memref<1x64xf32, #tpu.memory_space<vmem>>, vector<1x64xf32>
    %cst = arith.constant dense<0.000000e+00> : vector<8xf32>
    %4 = vector.multi_reduction <add>, %1, %cst [1] : vector<8x64xf32> to vector<8xf32>
    %5 = vector.shape_cast %4 : vector<8xf32> to vector<8x1xf32>
    %cst_6 = arith.constant 6.400000e+01 : f32
    %6 = vector.broadcast %cst_6 : f32 to vector<8x1xf32>
    %7 = arith.divf %5, %6 : vector<8x1xf32>
    %8 = vector.broadcast %7 : vector<8x1xf32> to vector<8x64xf32>
    %9 = arith.subf %1, %8 : vector<8x64xf32>
    %10 = arith.mulf %9, %9 : vector<8x64xf32>
    %cst_7 = arith.constant dense<0.000000e+00> : vector<8xf32>
    %11 = vector.multi_reduction <add>, %10, %cst_7 [1] : vector<8x64xf32> to vector<8xf32>
    %12 = vector.shape_cast %11 : vector<8xf32> to vector<8x1xf32>
    %cst_8 = arith.constant 6.400000e+01 : f32
    %13 = vector.broadcast %cst_8 : f32 to vector<8x1xf32>
    %14 = arith.divf %12, %13 : vector<8x1xf32>
    %15 = vector.broadcast %7 : vector<8x1xf32> to vector<8x64xf32>
    %16 = arith.subf %1, %15 : vector<8x64xf32>
    %cst_9 = arith.constant 9.99999996E-13 : f32
    %17 = vector.broadcast %cst_9 : f32 to vector<8x1xf32>
    %18 = arith.addf %14, %17 : vector<8x1xf32>
    %19 = math.rsqrt %18 : vector<8x1xf32>
    %20 = vector.broadcast %19 : vector<8x1xf32> to vector<8x64xf32>
    %21 = arith.mulf %16, %20 : vector<8x64xf32>
    %22 = vector.broadcast %2 : vector<1x64xf32> to vector<8x64xf32>
    %23 = arith.mulf %21, %22 : vector<8x64xf32>
    %24 = vector.broadcast %3 : vector<1x64xf32> to vector<8x64xf32>
    %25 = arith.addf %23, %24 : vector<8x64xf32>
    %c0_10 = arith.constant 0 : index
    %c0_11 = arith.constant 0 : index
    %c0_12 = arith.constant 0 : index
    %26 = vector.load %arg2[%c0_10, %c0_11, %c0_12] : memref<1x1x8xf32, #tpu.memory_space<vmem>>, vector<1x1x8xf32>
    %27 = vector.shape_cast %26 : vector<1x1x8xf32> to vector<1x8xf32>
    %c0_13 = arith.constant 0 : index
    %c0_14 = arith.constant 0 : index
    %28 = vector.load %arg5[%c0_13, %c0_14] : memref<1x64xf32, #tpu.memory_space<vmem>>, vector<1x64xf32>
    %c0_15 = arith.constant 0 : index
    %c0_16 = arith.constant 0 : index
    %29 = vector.load %arg6[%c0_15, %c0_16] : memref<1x64xf32, #tpu.memory_space<vmem>>, vector<1x64xf32>
    %cst_17 = arith.constant dense<0.000000e+00> : vector<8xf32>
    %30 = vector.multi_reduction <add>, %25, %cst_17 [1] : vector<8x64xf32> to vector<8xf32>
    %31 = vector.shape_cast %30 : vector<8xf32> to vector<8x1xf32>
    %cst_18 = arith.constant 6.400000e+01 : f32
    %32 = vector.broadcast %cst_18 : f32 to vector<8x1xf32>
    %33 = arith.divf %31, %32 : vector<8x1xf32>
    %34 = vector.broadcast %33 : vector<8x1xf32> to vector<8x64xf32>
    %35 = arith.subf %25, %34 : vector<8x64xf32>
    %36 = arith.mulf %35, %35 : vector<8x64xf32>
    %cst_19 = arith.constant dense<0.000000e+00> : vector<8xf32>
    %37 = vector.multi_reduction <add>, %36, %cst_19 [1] : vector<8x64xf32> to vector<8xf32>
    %38 = vector.shape_cast %37 : vector<8xf32> to vector<8x1xf32>
    %cst_20 = arith.constant 6.400000e+01 : f32
    %39 = vector.broadcast %cst_20 : f32 to vector<8x1xf32>
    %40 = arith.divf %38, %39 : vector<8x1xf32>
    %41 = vector.broadcast %33 : vector<8x1xf32> to vector<8x64xf32>
    %42 = arith.subf %25, %41 : vector<8x64xf32>
    %cst_21 = arith.constant 9.99999996E-13 : f32
    %43 = vector.broadcast %cst_21 : f32 to vector<8x1xf32>
    %44 = arith.addf %40, %43 : vector<8x1xf32>
    %45 = math.rsqrt %44 : vector<8x1xf32>
    %46 = vector.broadcast %45 : vector<8x1xf32> to vector<8x64xf32>
    %47 = arith.mulf %42, %46 : vector<8x64xf32>
    %48 = vector.broadcast %28 : vector<1x64xf32> to vector<8x64xf32>
    %49 = arith.mulf %47, %48 : vector<8x64xf32>
    %50 = vector.broadcast %29 : vector<1x64xf32> to vector<8x64xf32>
    %51 = arith.addf %49, %50 : vector<8x64xf32>
    %52 = arith.truncf %51 : vector<8x64xf32> to vector<8x64xbf16>
    %cst_22 = arith.constant 0.000000e+00 : f32
    %53 = vector.broadcast %cst_22 : f32 to vector<8x64xf32>
    %c0_23 = arith.constant 0 : index
    %c0_24 = arith.constant 0 : index
    %c0_25 = arith.constant 0 : index
    %54 = vector.load %arg7[%c0_23, %c0_24, %c0_25] : memref<4x64x16xf32, #tpu.memory_space<vmem>>, vector<1x64x16xf32>
    %55 = vector.shape_cast %54 : vector<1x64x16xf32> to vector<64x16xf32>
    %56 = arith.truncf %55 : vector<64x16xf32> to vector<64x16xbf16>
    %cst_26 = arith.constant dense<0.000000e+00> : vector<8x16xf32>
    %57 = tpu.matmul %52, %56, %cst_26 {dimension_numbers = #tpu.dot_dimension_numbers<[1], [0], [0], [1], [0, 0, 1, 1], [], []>} : vector<8x64xbf16>, vector<64x16xbf16>, vector<8x16xf32> -> vector<8x16xf32>
    %c0_27 = arith.constant 0 : index
    %c0_28 = arith.constant 0 : index
    %c0_29 = arith.constant 0 : index
    %58 = vector.load %arg10[%c0_27, %c0_28, %c0_29] : memref<4x1x16xf32, #tpu.memory_space<vmem>>, vector<1x1x16xf32>
    %59 = vector.shape_cast %58 : vector<1x1x16xf32> to vector<1x16xf32>
    %60 = vector.broadcast %59 : vector<1x16xf32> to vector<8x16xf32>
    %61 = arith.addf %57, %60 : vector<8x16xf32>
    %c0_30 = arith.constant 0 : index
    %c0_31 = arith.constant 0 : index
    %c0_32 = arith.constant 0 : index
    %62 = vector.load %arg8[%c0_30, %c0_31, %c0_32] : memref<4x64x16xf32, #tpu.memory_space<vmem>>, vector<1x64x16xf32>
    %63 = vector.shape_cast %62 : vector<1x64x16xf32> to vector<64x16xf32>
    %64 = arith.truncf %63 : vector<64x16xf32> to vector<64x16xbf16>
    %cst_33 = arith.constant dense<0.000000e+00> : vector<8x16xf32>
    %65 = tpu.matmul %52, %64, %cst_33 {dimension_numbers = #tpu.dot_dimension_numbers<[1], [0], [0], [1], [0, 0, 1, 1], [], []>} : vector<8x64xbf16>, vector<64x16xbf16>, vector<8x16xf32> -> vector<8x16xf32>
    %c0_34 = arith.constant 0 : index
    %c0_35 = arith.constant 0 : index
    %c0_36 = arith.constant 0 : index
    %66 = vector.load %arg11[%c0_34, %c0_35, %c0_36] : memref<4x1x16xf32, #tpu.memory_space<vmem>>, vector<1x1x16xf32>
    %67 = vector.shape_cast %66 : vector<1x1x16xf32> to vector<1x16xf32>
    %68 = vector.broadcast %67 : vector<1x16xf32> to vector<8x16xf32>
    %69 = arith.addf %65, %68 : vector<8x16xf32>
    %c0_37 = arith.constant 0 : index
    %c0_38 = arith.constant 0 : index
    %c0_39 = arith.constant 0 : index
    %70 = vector.load %arg9[%c0_37, %c0_38, %c0_39] : memref<4x64x16xf32, #tpu.memory_space<vmem>>, vector<1x64x16xf32>
    %71 = vector.shape_cast %70 : vector<1x64x16xf32> to vector<64x16xf32>
    %72 = arith.truncf %71 : vector<64x16xf32> to vector<64x16xbf16>
    %cst_40 = arith.constant dense<0.000000e+00> : vector<8x16xf32>
    %73 = tpu.matmul %52, %72, %cst_40 {dimension_numbers = #tpu.dot_dimension_numbers<[1], [0], [0], [1], [0, 0, 1, 1], [], []>} : vector<8x64xbf16>, vector<64x16xbf16>, vector<8x16xf32> -> vector<8x16xf32>
    %c0_41 = arith.constant 0 : index
    %c0_42 = arith.constant 0 : index
    %c0_43 = arith.constant 0 : index
    %74 = vector.load %arg12[%c0_41, %c0_42, %c0_43] : memref<4x1x16xf32, #tpu.memory_space<vmem>>, vector<1x1x16xf32>
    %75 = vector.shape_cast %74 : vector<1x1x16xf32> to vector<1x16xf32>
    %76 = vector.broadcast %75 : vector<1x16xf32> to vector<8x16xf32>
    %77 = arith.addf %73, %76 : vector<8x16xf32>
    %cst_44 = arith.constant dense<0.000000e+00> : vector<8x8xf32>
    %78 = tpu.matmul %61, %69, %cst_44 {dimension_numbers = #tpu.dot_dimension_numbers<[1], [1], [0], [0], [0, 0, 1, 0], [], []>} : vector<8x16xf32>, vector<8x16xf32>, vector<8x8xf32> -> vector<8x8xf32>
    %cst_45 = arith.constant 2.500000e-01 : f32
    %79 = vector.broadcast %cst_45 : f32 to vector<8x8xf32>
    %80 = arith.mulf %78, %79 : vector<8x8xf32>
    %81 = vector.broadcast %27 : vector<1x8xf32> to vector<8x8xf32>
    %82 = arith.addf %80, %81 : vector<8x8xf32>
    %cst_46 = arith.constant dense<0xFF800000> : vector<8xf32>
    %83 = vector.multi_reduction <maximumf>, %82, %cst_46 [1] : vector<8x8xf32> to vector<8xf32>
    %84 = vector.shape_cast %83 : vector<8xf32> to vector<8x1xf32>
    %85 = vector.broadcast %84 : vector<8x1xf32> to vector<8x8xf32>
    %86 = arith.subf %82, %85 : vector<8x8xf32>
    %87 = math.exp %86 : vector<8x8xf32>
    %cst_47 = arith.constant dense<0.000000e+00> : vector<8xf32>
    %88 = vector.multi_reduction <add>, %87, %cst_47 [1] : vector<8x8xf32> to vector<8xf32>
    %89 = vector.shape_cast %88 : vector<8xf32> to vector<8x1xf32>
    %90 = tpu.reciprocal %89 {approx = true} : vector<8x1xf32> -> vector<8x1xf32>
    %91 = vector.broadcast %90 : vector<8x1xf32> to vector<8x8xf32>
    %92 = arith.mulf %87, %91 : vector<8x8xf32>
    %cst_48 = arith.constant dense<0.000000e+00> : vector<8x16xf32>
    %93 = tpu.matmul %92, %77, %cst_48 {dimension_numbers = #tpu.dot_dimension_numbers<[1], [0], [0], [1], [0, 0, 1, 1], [], []>} : vector<8x8xf32>, vector<8x16xf32>, vector<8x16xf32> -> vector<8x16xf32>
    %94 = arith.truncf %93 : vector<8x16xf32> to vector<8x16xbf16>
    %c0_49 = arith.constant 0 : index
    %c0_50 = arith.constant 0 : index
    %c0_51 = arith.constant 0 : index
    %95 = vector.load %arg13[%c0_49, %c0_50, %c0_51] : memref<4x16x64xf32, #tpu.memory_space<vmem>>, vector<1x16x64xf32>
    %96 = vector.shape_cast %95 : vector<1x16x64xf32> to vector<16x64xf32>
    %97 = arith.truncf %96 : vector<16x64xf32> to vector<16x64xbf16>
    %cst_52 = arith.constant dense<0.000000e+00> : vector<8x64xf32>
    %98 = tpu.matmul %94, %97, %cst_52 {dimension_numbers = #tpu.dot_dimension_numbers<[1], [0], [0], [1], [0, 0, 1, 1], [], []>} : vector<8x16xbf16>, vector<16x64xbf16>, vector<8x64xf32> -> vector<8x64xf32>
    %99 = arith.addf %53, %98 : vector<8x64xf32>
    %c1 = arith.constant 1 : index
    %c0_53 = arith.constant 0 : index
    %c0_54 = arith.constant 0 : index
    %100 = vector.load %arg7[%c1, %c0_53, %c0_54] : memref<4x64x16xf32, #tpu.memory_space<vmem>>, vector<1x64x16xf32>
    %101 = vector.shape_cast %100 : vector<1x64x16xf32> to vector<64x16xf32>
    %102 = arith.truncf %101 : vector<64x16xf32> to vector<64x16xbf16>
    %cst_55 = arith.constant dense<0.000000e+00> : vector<8x16xf32>
    %103 = tpu.matmul %52, %102, %cst_55 {dimension_numbers = #tpu.dot_dimension_numbers<[1], [0], [0], [1], [0, 0, 1, 1], [], []>} : vector<8x64xbf16>, vector<64x16xbf16>, vector<8x16xf32> -> vector<8x16xf32>
    %c1_56 = arith.constant 1 : index
    %c0_57 = arith.constant 0 : index
    %c0_58 = arith.constant 0 : index
    %104 = vector.load %arg10[%c1_56, %c0_57, %c0_58] : memref<4x1x16xf32, #tpu.memory_space<vmem>>, vector<1x1x16xf32>
    %105 = vector.shape_cast %104 : vector<1x1x16xf32> to vector<1x16xf32>
    %106 = vector.broadcast %105 : vector<1x16xf32> to vector<8x16xf32>
    %107 = arith.addf %103, %106 : vector<8x16xf32>
    %c1_59 = arith.constant 1 : index
    %c0_60 = arith.constant 0 : index
    %c0_61 = arith.constant 0 : index
    %108 = vector.load %arg8[%c1_59, %c0_60, %c0_61] : memref<4x64x16xf32, #tpu.memory_space<vmem>>, vector<1x64x16xf32>
    %109 = vector.shape_cast %108 : vector<1x64x16xf32> to vector<64x16xf32>
    %110 = arith.truncf %109 : vector<64x16xf32> to vector<64x16xbf16>
    %cst_62 = arith.constant dense<0.000000e+00> : vector<8x16xf32>
    %111 = tpu.matmul %52, %110, %cst_62 {dimension_numbers = #tpu.dot_dimension_numbers<[1], [0], [0], [1], [0, 0, 1, 1], [], []>} : vector<8x64xbf16>, vector<64x16xbf16>, vector<8x16xf32> -> vector<8x16xf32>
    %c1_63 = arith.constant 1 : index
    %c0_64 = arith.constant 0 : index
    %c0_65 = arith.constant 0 : index
    %112 = vector.load %arg11[%c1_63, %c0_64, %c0_65] : memref<4x1x16xf32, #tpu.memory_space<vmem>>, vector<1x1x16xf32>
    %113 = vector.shape_cast %112 : vector<1x1x16xf32> to vector<1x16xf32>
    %114 = vector.broadcast %113 : vector<1x16xf32> to vector<8x16xf32>
    %115 = arith.addf %111, %114 : vector<8x16xf32>
    %c1_66 = arith.constant 1 : index
    %c0_67 = arith.constant 0 : index
    %c0_68 = arith.constant 0 : index
    %116 = vector.load %arg9[%c1_66, %c0_67, %c0_68] : memref<4x64x16xf32, #tpu.memory_space<vmem>>, vector<1x64x16xf32>
    %117 = vector.shape_cast %116 : vector<1x64x16xf32> to vector<64x16xf32>
    %118 = arith.truncf %117 : vector<64x16xf32> to vector<64x16xbf16>
    %cst_69 = arith.constant dense<0.000000e+00> : vector<8x16xf32>
    %119 = tpu.matmul %52, %118, %cst_69 {dimension_numbers = #tpu.dot_dimension_numbers<[1], [0], [0], [1], [0, 0, 1, 1], [], []>} : vector<8x64xbf16>, vector<64x16xbf16>, vector<8x16xf32> -> vector<8x16xf32>
    %c1_70 = arith.constant 1 : index
    %c0_71 = arith.constant 0 : index
    %c0_72 = arith.constant 0 : index
    %120 = vector.load %arg12[%c1_70, %c0_71, %c0_72] : memref<4x1x16xf32, #tpu.memory_space<vmem>>, vector<1x1x16xf32>
    %121 = vector.shape_cast %120 : vector<1x1x16xf32> to vector<1x16xf32>
    %122 = vector.broadcast %121 : vector<1x16xf32> to vector<8x16xf32>
    %123 = arith.addf %119, %122 : vector<8x16xf32>
    %cst_73 = arith.constant dense<0.000000e+00> : vector<8x8xf32>
    %124 = tpu.matmul %107, %115, %cst_73 {dimension_numbers = #tpu.dot_dimension_numbers<[1], [1], [0], [0], [0, 0, 1, 0], [], []>} : vector<8x16xf32>, vector<8x16xf32>, vector<8x8xf32> -> vector<8x8xf32>
    %cst_74 = arith.constant 2.500000e-01 : f32
    %125 = vector.broadcast %cst_74 : f32 to vector<8x8xf32>
    %126 = arith.mulf %124, %125 : vector<8x8xf32>
    %127 = vector.broadcast %27 : vector<1x8xf32> to vector<8x8xf32>
    %128 = arith.addf %126, %127 : vector<8x8xf32>
    %cst_75 = arith.constant dense<0xFF800000> : vector<8xf32>
    %129 = vector.multi_reduction <maximumf>, %128, %cst_75 [1] : vector<8x8xf32> to vector<8xf32>
    %130 = vector.shape_cast %129 : vector<8xf32> to vector<8x1xf32>
    %131 = vector.broadcast %130 : vector<8x1xf32> to vector<8x8xf32>
    %132 = arith.subf %128, %131 : vector<8x8xf32>
    %133 = math.exp %132 : vector<8x8xf32>
    %cst_76 = arith.constant dense<0.000000e+00> : vector<8xf32>
    %134 = vector.multi_reduction <add>, %133, %cst_76 [1] : vector<8x8xf32> to vector<8xf32>
    %135 = vector.shape_cast %134 : vector<8xf32> to vector<8x1xf32>
    %136 = tpu.reciprocal %135 {approx = true} : vector<8x1xf32> -> vector<8x1xf32>
    %137 = vector.broadcast %136 : vector<8x1xf32> to vector<8x8xf32>
    %138 = arith.mulf %133, %137 : vector<8x8xf32>
    %cst_77 = arith.constant dense<0.000000e+00> : vector<8x16xf32>
    %139 = tpu.matmul %138, %123, %cst_77 {dimension_numbers = #tpu.dot_dimension_numbers<[1], [0], [0], [1], [0, 0, 1, 1], [], []>} : vector<8x8xf32>, vector<8x16xf32>, vector<8x16xf32> -> vector<8x16xf32>
    %140 = arith.truncf %139 : vector<8x16xf32> to vector<8x16xbf16>
    %c1_78 = arith.constant 1 : index
    %c0_79 = arith.constant 0 : index
    %c0_80 = arith.constant 0 : index
    %141 = vector.load %arg13[%c1_78, %c0_79, %c0_80] : memref<4x16x64xf32, #tpu.memory_space<vmem>>, vector<1x16x64xf32>
    %142 = vector.shape_cast %141 : vector<1x16x64xf32> to vector<16x64xf32>
    %143 = arith.truncf %142 : vector<16x64xf32> to vector<16x64xbf16>
    %cst_81 = arith.constant dense<0.000000e+00> : vector<8x64xf32>
    %144 = tpu.matmul %140, %143, %cst_81 {dimension_numbers = #tpu.dot_dimension_numbers<[1], [0], [0], [1], [0, 0, 1, 1], [], []>} : vector<8x16xbf16>, vector<16x64xbf16>, vector<8x64xf32> -> vector<8x64xf32>
    %145 = arith.addf %99, %144 : vector<8x64xf32>
    %c2 = arith.constant 2 : index
    %c0_82 = arith.constant 0 : index
    %c0_83 = arith.constant 0 : index
    %146 = vector.load %arg7[%c2, %c0_82, %c0_83] : memref<4x64x16xf32, #tpu.memory_space<vmem>>, vector<1x64x16xf32>
    %147 = vector.shape_cast %146 : vector<1x64x16xf32> to vector<64x16xf32>
    %148 = arith.truncf %147 : vector<64x16xf32> to vector<64x16xbf16>
    %cst_84 = arith.constant dense<0.000000e+00> : vector<8x16xf32>
    %149 = tpu.matmul %52, %148, %cst_84 {dimension_numbers = #tpu.dot_dimension_numbers<[1], [0], [0], [1], [0, 0, 1, 1], [], []>} : vector<8x64xbf16>, vector<64x16xbf16>, vector<8x16xf32> -> vector<8x16xf32>
    %c2_85 = arith.constant 2 : index
    %c0_86 = arith.constant 0 : index
    %c0_87 = arith.constant 0 : index
    %150 = vector.load %arg10[%c2_85, %c0_86, %c0_87] : memref<4x1x16xf32, #tpu.memory_space<vmem>>, vector<1x1x16xf32>
    %151 = vector.shape_cast %150 : vector<1x1x16xf32> to vector<1x16xf32>
    %152 = vector.broadcast %151 : vector<1x16xf32> to vector<8x16xf32>
    %153 = arith.addf %149, %152 : vector<8x16xf32>
    %c2_88 = arith.constant 2 : index
    %c0_89 = arith.constant 0 : index
    %c0_90 = arith.constant 0 : index
    %154 = vector.load %arg8[%c2_88, %c0_89, %c0_90] : memref<4x64x16xf32, #tpu.memory_space<vmem>>, vector<1x64x16xf32>
    %155 = vector.shape_cast %154 : vector<1x64x16xf32> to vector<64x16xf32>
    %156 = arith.truncf %155 : vector<64x16xf32> to vector<64x16xbf16>
    %cst_91 = arith.constant dense<0.000000e+00> : vector<8x16xf32>
    %157 = tpu.matmul %52, %156, %cst_91 {dimension_numbers = #tpu.dot_dimension_numbers<[1], [0], [0], [1], [0, 0, 1, 1], [], []>} : vector<8x64xbf16>, vector<64x16xbf16>, vector<8x16xf32> -> vector<8x16xf32>
    %c2_92 = arith.constant 2 : index
    %c0_93 = arith.constant 0 : index
    %c0_94 = arith.constant 0 : index
    %158 = vector.load %arg11[%c2_92, %c0_93, %c0_94] : memref<4x1x16xf32, #tpu.memory_space<vmem>>, vector<1x1x16xf32>
    %159 = vector.shape_cast %158 : vector<1x1x16xf32> to vector<1x16xf32>
    %160 = vector.broadcast %159 : vector<1x16xf32> to vector<8x16xf32>
    %161 = arith.addf %157, %160 : vector<8x16xf32>
    %c2_95 = arith.constant 2 : index
    %c0_96 = arith.constant 0 : index
    %c0_97 = arith.constant 0 : index
    %162 = vector.load %arg9[%c2_95, %c0_96, %c0_97] : memref<4x64x16xf32, #tpu.memory_space<vmem>>, vector<1x64x16xf32>
    %163 = vector.shape_cast %162 : vector<1x64x16xf32> to vector<64x16xf32>
    %164 = arith.truncf %163 : vector<64x16xf32> to vector<64x16xbf16>
    %cst_98 = arith.constant dense<0.000000e+00> : vector<8x16xf32>
    %165 = tpu.matmul %52, %164, %cst_98 {dimension_numbers = #tpu.dot_dimension_numbers<[1], [0], [0], [1], [0, 0, 1, 1], [], []>} : vector<8x64xbf16>, vector<64x16xbf16>, vector<8x16xf32> -> vector<8x16xf32>
    %c2_99 = arith.constant 2 : index
    %c0_100 = arith.constant 0 : index
    %c0_101 = arith.constant 0 : index
    %166 = vector.load %arg12[%c2_99, %c0_100, %c0_101] : memref<4x1x16xf32, #tpu.memory_space<vmem>>, vector<1x1x16xf32>
    %167 = vector.shape_cast %166 : vector<1x1x16xf32> to vector<1x16xf32>
    %168 = vector.broadcast %167 : vector<1x16xf32> to vector<8x16xf32>
    %169 = arith.addf %165, %168 : vector<8x16xf32>
    %cst_102 = arith.constant dense<0.000000e+00> : vector<8x8xf32>
    %170 = tpu.matmul %153, %161, %cst_102 {dimension_numbers = #tpu.dot_dimension_numbers<[1], [1], [0], [0], [0, 0, 1, 0], [], []>} : vector<8x16xf32>, vector<8x16xf32>, vector<8x8xf32> -> vector<8x8xf32>
    %cst_103 = arith.constant 2.500000e-01 : f32
    %171 = vector.broadcast %cst_103 : f32 to vector<8x8xf32>
    %172 = arith.mulf %170, %171 : vector<8x8xf32>
    %173 = vector.broadcast %27 : vector<1x8xf32> to vector<8x8xf32>
    %174 = arith.addf %172, %173 : vector<8x8xf32>
    %cst_104 = arith.constant dense<0xFF800000> : vector<8xf32>
    %175 = vector.multi_reduction <maximumf>, %174, %cst_104 [1] : vector<8x8xf32> to vector<8xf32>
    %176 = vector.shape_cast %175 : vector<8xf32> to vector<8x1xf32>
    %177 = vector.broadcast %176 : vector<8x1xf32> to vector<8x8xf32>
    %178 = arith.subf %174, %177 : vector<8x8xf32>
    %179 = math.exp %178 : vector<8x8xf32>
    %cst_105 = arith.constant dense<0.000000e+00> : vector<8xf32>
    %180 = vector.multi_reduction <add>, %179, %cst_105 [1] : vector<8x8xf32> to vector<8xf32>
    %181 = vector.shape_cast %180 : vector<8xf32> to vector<8x1xf32>
    %182 = tpu.reciprocal %181 {approx = true} : vector<8x1xf32> -> vector<8x1xf32>
    %183 = vector.broadcast %182 : vector<8x1xf32> to vector<8x8xf32>
    %184 = arith.mulf %179, %183 : vector<8x8xf32>
    %cst_106 = arith.constant dense<0.000000e+00> : vector<8x16xf32>
    %185 = tpu.matmul %184, %169, %cst_106 {dimension_numbers = #tpu.dot_dimension_numbers<[1], [0], [0], [1], [0, 0, 1, 1], [], []>} : vector<8x8xf32>, vector<8x16xf32>, vector<8x16xf32> -> vector<8x16xf32>
    %186 = arith.truncf %185 : vector<8x16xf32> to vector<8x16xbf16>
    %c2_107 = arith.constant 2 : index
    %c0_108 = arith.constant 0 : index
    %c0_109 = arith.constant 0 : index
    %187 = vector.load %arg13[%c2_107, %c0_108, %c0_109] : memref<4x16x64xf32, #tpu.memory_space<vmem>>, vector<1x16x64xf32>
    %188 = vector.shape_cast %187 : vector<1x16x64xf32> to vector<16x64xf32>
    %189 = arith.truncf %188 : vector<16x64xf32> to vector<16x64xbf16>
    %cst_110 = arith.constant dense<0.000000e+00> : vector<8x64xf32>
    %190 = tpu.matmul %186, %189, %cst_110 {dimension_numbers = #tpu.dot_dimension_numbers<[1], [0], [0], [1], [0, 0, 1, 1], [], []>} : vector<8x16xbf16>, vector<16x64xbf16>, vector<8x64xf32> -> vector<8x64xf32>
    %191 = arith.addf %145, %190 : vector<8x64xf32>
    %c3 = arith.constant 3 : index
    %c0_111 = arith.constant 0 : index
    %c0_112 = arith.constant 0 : index
    %192 = vector.load %arg7[%c3, %c0_111, %c0_112] : memref<4x64x16xf32, #tpu.memory_space<vmem>>, vector<1x64x16xf32>
    %193 = vector.shape_cast %192 : vector<1x64x16xf32> to vector<64x16xf32>
    %194 = arith.truncf %193 : vector<64x16xf32> to vector<64x16xbf16>
    %cst_113 = arith.constant dense<0.000000e+00> : vector<8x16xf32>
    %195 = tpu.matmul %52, %194, %cst_113 {dimension_numbers = #tpu.dot_dimension_numbers<[1], [0], [0], [1], [0, 0, 1, 1], [], []>} : vector<8x64xbf16>, vector<64x16xbf16>, vector<8x16xf32> -> vector<8x16xf32>
    %c3_114 = arith.constant 3 : index
    %c0_115 = arith.constant 0 : index
    %c0_116 = arith.constant 0 : index
    %196 = vector.load %arg10[%c3_114, %c0_115, %c0_116] : memref<4x1x16xf32, #tpu.memory_space<vmem>>, vector<1x1x16xf32>
    %197 = vector.shape_cast %196 : vector<1x1x16xf32> to vector<1x16xf32>
    %198 = vector.broadcast %197 : vector<1x16xf32> to vector<8x16xf32>
    %199 = arith.addf %195, %198 : vector<8x16xf32>
    %c3_117 = arith.constant 3 : index
    %c0_118 = arith.constant 0 : index
    %c0_119 = arith.constant 0 : index
    %200 = vector.load %arg8[%c3_117, %c0_118, %c0_119] : memref<4x64x16xf32, #tpu.memory_space<vmem>>, vector<1x64x16xf32>
    %201 = vector.shape_cast %200 : vector<1x64x16xf32> to vector<64x16xf32>
    %202 = arith.truncf %201 : vector<64x16xf32> to vector<64x16xbf16>
    %cst_120 = arith.constant dense<0.000000e+00> : vector<8x16xf32>
    %203 = tpu.matmul %52, %202, %cst_120 {dimension_numbers = #tpu.dot_dimension_numbers<[1], [0], [0], [1], [0, 0, 1, 1], [], []>} : vector<8x64xbf16>, vector<64x16xbf16>, vector<8x16xf32> -> vector<8x16xf32>
    %c3_121 = arith.constant 3 : index
    %c0_122 = arith.constant 0 : index
    %c0_123 = arith.constant 0 : index
    %204 = vector.load %arg11[%c3_121, %c0_122, %c0_123] : memref<4x1x16xf32, #tpu.memory_space<vmem>>, vector<1x1x16xf32>
    %205 = vector.shape_cast %204 : vector<1x1x16xf32> to vector<1x16xf32>
    %206 = vector.broadcast %205 : vector<1x16xf32> to vector<8x16xf32>
    %207 = arith.addf %203, %206 : vector<8x16xf32>
    %c3_124 = arith.constant 3 : index
    %c0_125 = arith.constant 0 : index
    %c0_126 = arith.constant 0 : index
    %208 = vector.load %arg9[%c3_124, %c0_125, %c0_126] : memref<4x64x16xf32, #tpu.memory_space<vmem>>, vector<1x64x16xf32>
    %209 = vector.shape_cast %208 : vector<1x64x16xf32> to vector<64x16xf32>
    %210 = arith.truncf %209 : vector<64x16xf32> to vector<64x16xbf16>
    %cst_127 = arith.constant dense<0.000000e+00> : vector<8x16xf32>
    %211 = tpu.matmul %52, %210, %cst_127 {dimension_numbers = #tpu.dot_dimension_numbers<[1], [0], [0], [1], [0, 0, 1, 1], [], []>} : vector<8x64xbf16>, vector<64x16xbf16>, vector<8x16xf32> -> vector<8x16xf32>
    %c3_128 = arith.constant 3 : index
    %c0_129 = arith.constant 0 : index
    %c0_130 = arith.constant 0 : index
    %212 = vector.load %arg12[%c3_128, %c0_129, %c0_130] : memref<4x1x16xf32, #tpu.memory_space<vmem>>, vector<1x1x16xf32>
    %213 = vector.shape_cast %212 : vector<1x1x16xf32> to vector<1x16xf32>
    %214 = vector.broadcast %213 : vector<1x16xf32> to vector<8x16xf32>
    %215 = arith.addf %211, %214 : vector<8x16xf32>
    %cst_131 = arith.constant dense<0.000000e+00> : vector<8x8xf32>
    %216 = tpu.matmul %199, %207, %cst_131 {dimension_numbers = #tpu.dot_dimension_numbers<[1], [1], [0], [0], [0, 0, 1, 0], [], []>} : vector<8x16xf32>, vector<8x16xf32>, vector<8x8xf32> -> vector<8x8xf32>
    %cst_132 = arith.constant 2.500000e-01 : f32
    %217 = vector.broadcast %cst_132 : f32 to vector<8x8xf32>
    %218 = arith.mulf %216, %217 : vector<8x8xf32>
    %219 = vector.broadcast %27 : vector<1x8xf32> to vector<8x8xf32>
    %220 = arith.addf %218, %219 : vector<8x8xf32>
    %cst_133 = arith.constant dense<0xFF800000> : vector<8xf32>
    %221 = vector.multi_reduction <maximumf>, %220, %cst_133 [1] : vector<8x8xf32> to vector<8xf32>
    %222 = vector.shape_cast %221 : vector<8xf32> to vector<8x1xf32>
    %223 = vector.broadcast %222 : vector<8x1xf32> to vector<8x8xf32>
    %224 = arith.subf %220, %223 : vector<8x8xf32>
    %225 = math.exp %224 : vector<8x8xf32>
    %cst_134 = arith.constant dense<0.000000e+00> : vector<8xf32>
    %226 = vector.multi_reduction <add>, %225, %cst_134 [1] : vector<8x8xf32> to vector<8xf32>
    %227 = vector.shape_cast %226 : vector<8xf32> to vector<8x1xf32>
    %228 = tpu.reciprocal %227 {approx = true} : vector<8x1xf32> -> vector<8x1xf32>
    %229 = vector.broadcast %228 : vector<8x1xf32> to vector<8x8xf32>
    %230 = arith.mulf %225, %229 : vector<8x8xf32>
    %cst_135 = arith.constant dense<0.000000e+00> : vector<8x16xf32>
    %231 = tpu.matmul %230, %215, %cst_135 {dimension_numbers = #tpu.dot_dimension_numbers<[1], [0], [0], [1], [0, 0, 1, 1], [], []>} : vector<8x8xf32>, vector<8x16xf32>, vector<8x16xf32> -> vector<8x16xf32>
    %232 = arith.truncf %231 : vector<8x16xf32> to vector<8x16xbf16>
    %c3_136 = arith.constant 3 : index
    %c0_137 = arith.constant 0 : index
    %c0_138 = arith.constant 0 : index
    %233 = vector.load %arg13[%c3_136, %c0_137, %c0_138] : memref<4x16x64xf32, #tpu.memory_space<vmem>>, vector<1x16x64xf32>
    %234 = vector.shape_cast %233 : vector<1x16x64xf32> to vector<16x64xf32>
    %235 = arith.truncf %234 : vector<16x64xf32> to vector<16x64xbf16>
    %cst_139 = arith.constant dense<0.000000e+00> : vector<8x64xf32>
    %236 = tpu.matmul %232, %235, %cst_139 {dimension_numbers = #tpu.dot_dimension_numbers<[1], [0], [0], [1], [0, 0, 1, 1], [], []>} : vector<8x16xbf16>, vector<16x64xbf16>, vector<8x64xf32> -> vector<8x64xf32>
    %237 = arith.addf %191, %236 : vector<8x64xf32>
    %238 = arith.addf %25, %237 : vector<8x64xf32>
    %c0_140 = arith.constant 0 : index
    %c0_141 = arith.constant 0 : index
    %239 = vector.load %arg14[%c0_140, %c0_141] : memref<1x64xf32, #tpu.memory_space<vmem>>, vector<1x64xf32>
    %240 = vector.broadcast %239 : vector<1x64xf32> to vector<8x64xf32>
    %241 = arith.addf %238, %240 : vector<8x64xf32>
    %c0_142 = arith.constant 0 : index
    %c0_143 = arith.constant 0 : index
    %242 = vector.load %arg15[%c0_142, %c0_143] : memref<1x64xf32, #tpu.memory_space<vmem>>, vector<1x64xf32>
    %c0_144 = arith.constant 0 : index
    %c0_145 = arith.constant 0 : index
    %243 = vector.load %arg16[%c0_144, %c0_145] : memref<1x64xf32, #tpu.memory_space<vmem>>, vector<1x64xf32>
    %cst_146 = arith.constant dense<0.000000e+00> : vector<8xf32>
    %244 = vector.multi_reduction <add>, %241, %cst_146 [1] : vector<8x64xf32> to vector<8xf32>
    %245 = vector.shape_cast %244 : vector<8xf32> to vector<8x1xf32>
    %cst_147 = arith.constant 6.400000e+01 : f32
    %246 = vector.broadcast %cst_147 : f32 to vector<8x1xf32>
    %247 = arith.divf %245, %246 : vector<8x1xf32>
    %248 = vector.broadcast %247 : vector<8x1xf32> to vector<8x64xf32>
    %249 = arith.subf %241, %248 : vector<8x64xf32>
    %250 = arith.mulf %249, %249 : vector<8x64xf32>
    %cst_148 = arith.constant dense<0.000000e+00> : vector<8xf32>
    %251 = vector.multi_reduction <add>, %250, %cst_148 [1] : vector<8x64xf32> to vector<8xf32>
    %252 = vector.shape_cast %251 : vector<8xf32> to vector<8x1xf32>
    %cst_149 = arith.constant 6.400000e+01 : f32
    %253 = vector.broadcast %cst_149 : f32 to vector<8x1xf32>
    %254 = arith.divf %252, %253 : vector<8x1xf32>
    %255 = vector.broadcast %247 : vector<8x1xf32> to vector<8x64xf32>
    %256 = arith.subf %241, %255 : vector<8x64xf32>
    %cst_150 = arith.constant 9.99999996E-13 : f32
    %257 = vector.broadcast %cst_150 : f32 to vector<8x1xf32>
    %258 = arith.addf %254, %257 : vector<8x1xf32>
    %259 = math.rsqrt %258 : vector<8x1xf32>
    %260 = vector.broadcast %259 : vector<8x1xf32> to vector<8x64xf32>
    %261 = arith.mulf %256, %260 : vector<8x64xf32>
    %262 = vector.broadcast %242 : vector<1x64xf32> to vector<8x64xf32>
    %263 = arith.mulf %261, %262 : vector<8x64xf32>
    %264 = vector.broadcast %243 : vector<1x64xf32> to vector<8x64xf32>
    %265 = arith.addf %263, %264 : vector<8x64xf32>
    %266 = arith.truncf %265 : vector<8x64xf32> to vector<8x64xbf16>
    %c0_151 = arith.constant 0 : index
    %c0_152 = arith.constant 0 : index
    %267 = vector.load %arg17[%c0_151, %c0_152] : memref<64x256xf32, #tpu.memory_space<vmem>>, vector<64x256xf32>
    %268 = arith.truncf %267 : vector<64x256xf32> to vector<64x256xbf16>
    %cst_153 = arith.constant dense<0.000000e+00> : vector<8x256xf32>
    %269 = tpu.matmul %266, %268, %cst_153 {dimension_numbers = #tpu.dot_dimension_numbers<[1], [0], [0], [1], [0, 0, 1, 1], [], []>} : vector<8x64xbf16>, vector<64x256xbf16>, vector<8x256xf32> -> vector<8x256xf32>
    %c0_154 = arith.constant 0 : index
    %c0_155 = arith.constant 0 : index
    %270 = vector.load %arg18[%c0_154, %c0_155] : memref<1x256xf32, #tpu.memory_space<vmem>>, vector<1x256xf32>
    %271 = vector.broadcast %270 : vector<1x256xf32> to vector<8x256xf32>
    %272 = arith.addf %269, %271 : vector<8x256xf32>
    %273 = arith.mulf %272, %272 : vector<8x256xf32>
    %274 = arith.mulf %272, %273 : vector<8x256xf32>
    %cst_156 = arith.constant 4.471500e-02 : f32
    %275 = vector.broadcast %cst_156 : f32 to vector<8x256xf32>
    %276 = arith.mulf %275, %274 : vector<8x256xf32>
    %277 = arith.addf %272, %276 : vector<8x256xf32>
    %cst_157 = arith.constant 0.797884583 : f32
    %278 = vector.broadcast %cst_157 : f32 to vector<8x256xf32>
    %279 = arith.mulf %278, %277 : vector<8x256xf32>
    %280 = math.tanh %279 : vector<8x256xf32>
    %cst_158 = arith.constant 1.000000e+00 : f32
    %281 = vector.broadcast %cst_158 : f32 to vector<8x256xf32>
    %282 = arith.addf %281, %280 : vector<8x256xf32>
    %cst_159 = arith.constant 5.000000e-01 : f32
    %283 = vector.broadcast %cst_159 : f32 to vector<8x256xf32>
    %284 = arith.mulf %283, %282 : vector<8x256xf32>
    %285 = arith.mulf %272, %284 : vector<8x256xf32>
    %286 = arith.truncf %285 : vector<8x256xf32> to vector<8x256xbf16>
    %c0_160 = arith.constant 0 : index
    %c0_161 = arith.constant 0 : index
    %287 = vector.load %arg19[%c0_160, %c0_161] : memref<256x64xf32, #tpu.memory_space<vmem>>, vector<256x64xf32>
    %288 = arith.truncf %287 : vector<256x64xf32> to vector<256x64xbf16>
    %cst_162 = arith.constant dense<0.000000e+00> : vector<8x64xf32>
    %289 = tpu.matmul %286, %288, %cst_162 {dimension_numbers = #tpu.dot_dimension_numbers<[1], [0], [0], [1], [0, 0, 1, 1], [], []>} : vector<8x256xbf16>, vector<256x64xbf16>, vector<8x64xf32> -> vector<8x64xf32>
    %290 = arith.addf %241, %289 : vector<8x64xf32>
    %c0_163 = arith.constant 0 : index
    %c0_164 = arith.constant 0 : index
    %291 = vector.load %arg20[%c0_163, %c0_164] : memref<1x64xf32, #tpu.memory_space<vmem>>, vector<1x64xf32>
    %292 = vector.broadcast %291 : vector<1x64xf32> to vector<8x64xf32>
    %293 = arith.addf %290, %292 : vector<8x64xf32>
    %294 = vector.extract_strided_slice %293 {offsets = [0, 0], sizes = [1, 64], strides = [1, 1]} : vector<8x64xf32> to vector<1x64xf32>
    %c0_165 = arith.constant 0 : index
    %c0_166 = arith.constant 0 : index
    %c0_167 = arith.constant 0 : index
    %295 = vector.load %arg21[%c0_165, %c0_166, %c0_167] : memref<1x1x64xf32, #tpu.memory_space<vmem>>, vector<1x1x64xf32>
    %296 = vector.shape_cast %295 : vector<1x1x64xf32> to vector<1x64xf32>
    %297 = vector.shape_cast %294 : vector<1x64xf32> to vector<1x1x64xf32>
    tpu.vector_store %arg21[%c0_165, %c0_166, %c0_167], %297 {strides = array<i32>} : memref<1x1x64xf32, #tpu.memory_space<vmem>>, vector<1x1x64xf32>,
    return
  }
  func.func @transform_0(%arg0: i32) -> (i32, i32, i32) {
    %c0_i32 = arith.constant 0 : i32
    %c0_i32_0 = arith.constant 0 : i32
    %c0_i32_1 = arith.constant 0 : i32
    return %arg0, %c0_i32, %c0_i32_0 : i32, i32, i32
  }
  func.func @transform_1(%arg0: i32) -> (i32, i32, i32) {
    %c0_i32 = arith.constant 0 : i32
    %c0_i32_0 = arith.constant 0 : i32
    %c0_i32_1 = arith.constant 0 : i32
    return %arg0, %c0_i32, %c0_i32_0 : i32, i32, i32
  }
  func.func @transform_2(%arg0: i32) -> (i32, i32) {
    %c0_i32 = arith.constant 0 : i32
    %c0_i32_0 = arith.constant 0 : i32
    %c0_i32_1 = arith.constant 0 : i32
    return %c0_i32, %c0_i32_0 : i32, i32
  }
  func.func @transform_3(%arg0: i32) -> (i32, i32) {
    %c0_i32 = arith.constant 0 : i32
    %c0_i32_0 = arith.constant 0 : i32
    %c0_i32_1 = arith.constant 0 : i32
    return %c0_i32, %c0_i32_0 : i32, i32
  }
  func.func @transform_4(%arg0: i32) -> (i32, i32) {
    %c0_i32 = arith.constant 0 : i32
    %c0_i32_0 = arith.constant 0 : i32
    %c0_i32_1 = arith.constant 0 : i32
    return %c0_i32, %c0_i32_0 : i32, i32
  }
  func.func @transform_5(%arg0: i32) -> (i32, i32) {
    %c0_i32 = arith.constant 0 : i32
    %c0_i32_0 = arith.constant 0 : i32
    %c0_i32_1 = arith.constant 0 : i32
    return %c0_i32, %c0_i32_0 : i32, i32
  }
  func.func @transform_6(%arg0: i32) -> (i32, i32, i32) {
    %c0_i32 = arith.constant 0 : i32
    %c0_i32_0 = arith.constant 0 : i32
    %c0_i32_1 = arith.constant 0 : i32
    %c0_i32_2 = arith.constant 0 : i32
    return %c0_i32, %c0_i32_0, %c0_i32_1 : i32, i32, i32
  }
  func.func @transform_7(%arg0: i32) -> (i32, i32, i32) {
    %c0_i32 = arith.constant 0 : i32
    %c0_i32_0 = arith.constant 0 : i32
    %c0_i32_1 = arith.constant 0 : i32
    %c0_i32_2 = arith.constant 0 : i32
    return %c0_i32, %c0_i32_0, %c0_i32_1 : i32, i32, i32
  }
  func.func @transform_8(%arg0: i32) -> (i32, i32, i32) {
    %c0_i32 = arith.constant 0 : i32
    %c0_i32_0 = arith.constant 0 : i32
    %c0_i32_1 = arith.constant 0 : i32
    %c0_i32_2 = arith.constant 0 : i32
    return %c0_i32, %c0_i32_0, %c0_i32_1 : i32, i32, i32
  }
  func.func @transform_9(%arg0: i32) -> (i32, i32, i32) {
    %c0_i32 = arith.constant 0 : i32
    %c0_i32_0 = arith.constant 0 : i32
    %c0_i32_1 = arith.constant 0 : i32
    %c0_i32_2 = arith.constant 0 : i32
    return %c0_i32, %c0_i32_0, %c0_i32_1 : i32, i32, i32
  }
  func.func @transform_10(%arg0: i32) -> (i32, i32, i32) {
    %c0_i32 = arith.constant 0 : i32
    %c0_i32_0 = arith.constant 0 : i32
    %c0_i32_1 = arith.constant 0 : i32
    %c0_i32_2 = arith.constant 0 : i32
    return %c0_i32, %c0_i32_0, %c0_i32_1 : i32, i32, i32
  }
  func.func @transform_11(%arg0: i32) -> (i32, i32, i32) {
    %c0_i32 = arith.constant 0 : i32
    %c0_i32_0 = arith.constant 0 : i32
    %c0_i32_1 = arith.constant 0 : i32
    %c0_i32_2 = arith.constant 0 : i32
    return %c0_i32, %c0_i32_0, %c0_i32_1 : i32, i32, i32
  }
  func.func @transform_12(%arg0: i32) -> (i32, i32, i32) {
    %c0_i32 = arith.constant 0 : i32
    %c0_i32_0 = arith.constant 0 : i32
    %c0_i32_1 = arith.constant 0 : i32
    %c0_i32_2 = arith.constant 0 : i32
    return %c0_i32, %c0_i32_0, %c0_i32_1 : i32, i32, i32
  }
  func.func @transform_13(%arg0: i32) -> (i32, i32) {
    %c0_i32 = arith.constant 0 : i32
    %c0_i32_0 = arith.constant 0 : i32
    %c0_i32_1 = arith.constant 0 : i32
    return %c0_i32, %c0_i32_0 : i32, i32
  }
  func.func @transform_14(%arg0: i32) -> (i32, i32) {
    %c0_i32 = arith.constant 0 : i32
    %c0_i32_0 = arith.constant 0 : i32
    %c0_i32_1 = arith.constant 0 : i32
    return %c0_i32, %c0_i32_0 : i32, i32
  }
  func.func @transform_15(%arg0: i32) -> (i32, i32) {
    %c0_i32 = arith.constant 0 : i32
    %c0_i32_0 = arith.constant 0 : i32
    %c0_i32_1 = arith.constant 0 : i32
    return %c0_i32, %c0_i32_0 : i32, i32
  }
  func.func @transform_16(%arg0: i32) -> (i32, i32) {
    %c0_i32 = arith.constant 0 : i32
    %c0_i32_0 = arith.constant 0 : i32
    %c0_i32_1 = arith.constant 0 : i32
    return %c0_i32, %c0_i32_0 : i32, i32
  }
  func.func @transform_17(%arg0: i32) -> (i32, i32) {
    %c0_i32 = arith.constant 0 : i32
    %c0_i32_0 = arith.constant 0 : i32
    %c0_i32_1 = arith.constant 0 : i32
    return %c0_i32, %c0_i32_0 : i32, i32
  }
  func.func @transform_18(%arg0: i32) -> (i32, i32) {
    %c0_i32 = arith.constant 0 : i32
    %c0_i32_0 = arith.constant 0 : i32
    %c0_i32_1 = arith.constant 0 : i32
    return %c0_i32, %c0_i32_0 : i32, i32
  }
  func.func @transform_19(%arg0: i32) -> (i32, i32) {
    %c0_i32 = arith.constant 0 : i32
    %c0_i32_0 = arith.constant 0 : i32
    %c0_i32_1 = arith.constant 0 : i32
    return %c0_i32, %c0_i32_0 : i32, i32
  }
  func.func @transform_20(%arg0: i32) -> (i32, i32, i32) {
    %c0_i32 = arith.constant 0 : i32
    %c0_i32_0 = arith.constant 0 : i32
    %c0_i32_1 = arith.constant 0 : i32
    return %arg0, %c0_i32, %c0_i32_0 : i32, i32, i32
  }
}

module attributes {stable_mosaic.version = 11 : i64} {
  func.func @_proj_norm_kernel(%arg0: memref<8x64xf32, #tpu.memory_space<vmem>>, %arg1: memref<64x32xf32, #tpu.memory_space<vmem>>, %arg2: memref<1x32xf32, #tpu.memory_space<vmem>>, %arg3: memref<8x32xf32, #tpu.memory_space<vmem>>) attributes {dimension_semantics = [], scalar_prefetch = 0 : i64, scratch_operands = 0 : i64, tpu.core_type = #tpu.core_type<tc>} {
    %c0 = arith.constant 0 : index
    %c0_0 = arith.constant 0 : index
    %0 = vector.load %arg0[%c0, %c0_0] : memref<8x64xf32, #tpu.memory_space<vmem>>, vector<8x64xf32>
    %c0_1 = arith.constant 0 : index
    %c0_2 = arith.constant 0 : index
    %1 = vector.load %arg1[%c0_1, %c0_2] : memref<64x32xf32, #tpu.memory_space<vmem>>, vector<64x32xf32>
    %cst = arith.constant dense<0.000000e+00> : vector<8x32xf32>
    %2 = tpu.matmul %0, %1, %cst {dimension_numbers = #tpu.dot_dimension_numbers<[1], [0], [0], [1], [0, 0, 1, 1], [], []>} : vector<8x64xf32>, vector<64x32xf32>, vector<8x32xf32> -> vector<8x32xf32>
    %c0_3 = arith.constant 0 : index
    %c0_4 = arith.constant 0 : index
    %3 = vector.load %arg2[%c0_3, %c0_4] : memref<1x32xf32, #tpu.memory_space<vmem>>, vector<1x32xf32>
    %4 = vector.broadcast %3 : vector<1x32xf32> to vector<8x32xf32>
    %5 = arith.addf %2, %4 : vector<8x32xf32>
    %6 = arith.mulf %5, %5 : vector<8x32xf32>
    %cst_5 = arith.constant dense<0.000000e+00> : vector<8xf32>
    %7 = vector.multi_reduction <add>, %6, %cst_5 [1] : vector<8x32xf32> to vector<8xf32>
    %8 = vector.shape_cast %7 : vector<8xf32> to vector<8x1xf32>
    %cst_6 = arith.constant 1.000000e-24 : f32
    %9 = vector.broadcast %cst_6 : f32 to vector<8x1xf32>
    %10 = arith.maximumf %8, %9 : vector<8x1xf32>
    %11 = math.rsqrt %10 : vector<8x1xf32>
    %12 = vector.broadcast %11 : vector<8x1xf32> to vector<8x32xf32>
    %13 = arith.mulf %5, %12 : vector<8x32xf32>
    %c0_7 = arith.constant 0 : index
    %c0_8 = arith.constant 0 : index
    %14 = vector.load %arg3[%c0_7, %c0_8] : memref<8x32xf32, #tpu.memory_space<vmem>>, vector<8x32xf32>
    tpu.vector_store %arg3[%c0_7, %c0_8], %13 {strides = array<i32>} : memref<8x32xf32, #tpu.memory_space<vmem>>, vector<8x32xf32>,
    return
  }
}

module attributes {stable_mosaic.version = 11 : i64} {
  func.func @_bsim_kernel(%arg0: memref<2x8x32xf32, #tpu.memory_space<vmem>>, %arg1: memref<2x3x32xf32, #tpu.memory_space<vmem>>, %arg2: memref<2x8x3xf32, #tpu.memory_space<vmem>>) attributes {dimension_semantics = [], scalar_prefetch = 0 : i64, scratch_operands = 0 : i64, tpu.core_type = #tpu.core_type<tc>} {
    %c0 = arith.constant 0 : index
    %c0_0 = arith.constant 0 : index
    %c0_1 = arith.constant 0 : index
    %0 = vector.load %arg0[%c0, %c0_0, %c0_1] : memref<2x8x32xf32, #tpu.memory_space<vmem>>, vector<2x8x32xf32>
    %c0_2 = arith.constant 0 : index
    %c0_3 = arith.constant 0 : index
    %c0_4 = arith.constant 0 : index
    %1 = vector.load %arg1[%c0_2, %c0_3, %c0_4] : memref<2x3x32xf32, #tpu.memory_space<vmem>>, vector<2x3x32xf32>
    "tpu.trace_start"() <{level = 10 : i32, message = "bqe,bpe->bqp"}> : () -> ()
    %cst = arith.constant dense<0.000000e+00> : vector<2x8x3xf32>
    %2 = tpu.matmul %0, %1, %cst {dimension_numbers = #tpu.dot_dimension_numbers<[2], [2], [1], [1], [0, 0, 0, 1, 1, 1], [0], [0]>} : vector<2x8x32xf32>, vector<2x3x32xf32>, vector<2x8x3xf32> -> vector<2x8x3xf32>
    "tpu.trace_stop"() : () -> ()
    %c0_5 = arith.constant 0 : index
    %c0_6 = arith.constant 0 : index
    %c0_7 = arith.constant 0 : index
    %3 = vector.load %arg2[%c0_5, %c0_6, %c0_7] : memref<2x8x3xf32, #tpu.memory_space<vmem>>, vector<2x8x3xf32>
    tpu.vector_store %arg2[%c0_5, %c0_6, %c0_7], %2 {strides = array<i32>} : memref<2x8x3xf32, #tpu.memory_space<vmem>>, vector<2x8x3xf32>,
    return
  }
}

module attributes {stable_mosaic.version = 11 : i64} {
  func.func @_loss_kernel(%arg0: memref<2x32xf32, #tpu.memory_space<vmem>>, %arg1: memref<2x32xf32, #tpu.memory_space<vmem>>, %arg2: memref<2x32xf32, #tpu.memory_space<vmem>>, %arg3: memref<2x32xf32, #tpu.memory_space<vmem>>, %arg4: memref<32x18xf32, #tpu.memory_space<vmem>>, %arg5: memref<32x18xf32, #tpu.memory_space<vmem>>, %arg6: memref<2x18xf32, #tpu.memory_space<vmem>>, %arg7: memref<6x32xf32, #tpu.memory_space<vmem>>, %arg8: memref<6x32xf32, #tpu.memory_space<vmem>>, %arg9: memref<6x32xf32, #tpu.memory_space<vmem>>, %arg10: memref<6x32xf32, #tpu.memory_space<vmem>>, %arg11: memref<1x6xf32, #tpu.memory_space<vmem>>, %arg12: memref<1x2xf32, #tpu.memory_space<smem>>, %arg13: memref<1x1xf32, #tpu.memory_space<vmem>>, %arg14: memref<1x1xf32, #tpu.memory_space<vmem>>) attributes {dimension_semantics = [], scalar_prefetch = 0 : i64, scratch_operands = 0 : i64, tpu.core_type = #tpu.core_type<tc>} {
    %c0 = arith.constant 0 : index
    %c0_0 = arith.constant 0 : index
    %0 = memref.load %arg12[%c0, %c0_0] : memref<1x2xf32, #tpu.memory_space<smem>>
    %c0_1 = arith.constant 0 : index
    %c1 = arith.constant 1 : index
    %1 = memref.load %arg12[%c0_1, %c1] : memref<1x2xf32, #tpu.memory_space<smem>>
    %c0_2 = arith.constant 0 : index
    %c0_3 = arith.constant 0 : index
    %2 = vector.load %arg4[%c0_2, %c0_3] : memref<32x18xf32, #tpu.memory_space<vmem>>, vector<32x18xf32>
    %c0_4 = arith.constant 0 : index
    %c0_5 = arith.constant 0 : index
    %3 = vector.load %arg5[%c0_4, %c0_5] : memref<32x18xf32, #tpu.memory_space<vmem>>, vector<32x18xf32>
    %c0_6 = arith.constant 0 : index
    %c0_7 = arith.constant 0 : index
    %4 = vector.load %arg6[%c0_6, %c0_7] : memref<2x18xf32, #tpu.memory_space<vmem>>, vector<2x18xf32>
    %c0_8 = arith.constant 0 : index
    %c0_9 = arith.constant 0 : index
    %5 = vector.load %arg0[%c0_8, %c0_9] : memref<2x32xf32, #tpu.memory_space<vmem>>, vector<2x32xf32>
    %cst = arith.constant dense<0.000000e+00> : vector<2x18xf32>
    %6 = tpu.matmul %5, %3, %cst {dimension_numbers = #tpu.dot_dimension_numbers<[1], [0], [0], [1], [0, 0, 1, 1], [], []>} : vector<2x32xf32>, vector<32x18xf32>, vector<2x18xf32> -> vector<2x18xf32>
    %7 = vector.broadcast %0 : f32 to vector<2x18xf32>
    %8 = arith.mulf %6, %7 : vector<2x18xf32>
    %c0_10 = arith.constant 0 : index
    %c0_11 = arith.constant 0 : index
    %9 = vector.load %arg1[%c0_10, %c0_11] : memref<2x32xf32, #tpu.memory_space<vmem>>, vector<2x32xf32>
    %cst_12 = arith.constant dense<0.000000e+00> : vector<2x18xf32>
    %10 = tpu.matmul %9, %2, %cst_12 {dimension_numbers = #tpu.dot_dimension_numbers<[1], [0], [0], [1], [0, 0, 1, 1], [], []>} : vector<2x32xf32>, vector<32x18xf32>, vector<2x18xf32> -> vector<2x18xf32>
    %11 = vector.broadcast %0 : f32 to vector<2x18xf32>
    %12 = arith.mulf %10, %11 : vector<2x18xf32>
    %c0_13 = arith.constant 0 : index
    %c0_14 = arith.constant 0 : index
    %13 = vector.load %arg2[%c0_13, %c0_14] : memref<2x32xf32, #tpu.memory_space<vmem>>, vector<2x32xf32>
    %cst_15 = arith.constant dense<0.000000e+00> : vector<2x18xf32>
    %14 = tpu.matmul %13, %3, %cst_15 {dimension_numbers = #tpu.dot_dimension_numbers<[1], [0], [0], [1], [0, 0, 1, 1], [], []>} : vector<2x32xf32>, vector<32x18xf32>, vector<2x18xf32> -> vector<2x18xf32>
    %15 = vector.broadcast %0 : f32 to vector<2x18xf32>
    %16 = arith.mulf %14, %15 : vector<2x18xf32>
    %c0_16 = arith.constant 0 : index
    %c0_17 = arith.constant 0 : index
    %17 = vector.load %arg3[%c0_16, %c0_17] : memref<2x32xf32, #tpu.memory_space<vmem>>, vector<2x32xf32>
    %cst_18 = arith.constant dense<0.000000e+00> : vector<2x18xf32>
    %18 = tpu.matmul %17, %2, %cst_18 {dimension_numbers = #tpu.dot_dimension_numbers<[1], [0], [0], [1], [0, 0, 1, 1], [], []>} : vector<2x32xf32>, vector<32x18xf32>, vector<2x18xf32> -> vector<2x18xf32>
    %19 = vector.broadcast %0 : f32 to vector<2x18xf32>
    %20 = arith.mulf %18, %19 : vector<2x18xf32>
    %cst_19 = arith.constant dense<0xFF800000> : vector<2xf32>
    %21 = vector.multi_reduction <maximumf>, %16, %cst_19 [1] : vector<2x18xf32> to vector<2xf32>
    %22 = vector.shape_cast %21 : vector<2xf32> to vector<2x1xf32>
    %23 = vector.broadcast %22 : vector<2x1xf32> to vector<2x18xf32>
    %24 = arith.subf %16, %23 : vector<2x18xf32>
    %25 = math.exp %24 : vector<2x18xf32>
    %cst_20 = arith.constant dense<0.000000e+00> : vector<2xf32>
    %26 = vector.multi_reduction <add>, %25, %cst_20 [1] : vector<2x18xf32> to vector<2xf32>
    %27 = vector.shape_cast %26 : vector<2xf32> to vector<2x1xf32>
    %28 = tpu.reciprocal %27 {approx = true} : vector<2x1xf32> -> vector<2x1xf32>
    %29 = vector.broadcast %28 : vector<2x1xf32> to vector<2x18xf32>
    %30 = arith.mulf %25, %29 : vector<2x18xf32>
    %31 = vector.broadcast %1 : f32 to vector<2x18xf32>
    %32 = arith.mulf %31, %30 : vector<2x18xf32>
    %cst_21 = arith.constant 1.000000e+00 : f32
    %33 = arith.subf %cst_21, %1 : f32
    %34 = vector.broadcast %33 : f32 to vector<2x18xf32>
    %35 = arith.mulf %34, %4 : vector<2x18xf32>
    %36 = arith.addf %32, %35 : vector<2x18xf32>
    %cst_22 = arith.constant dense<0xFF800000> : vector<2xf32>
    %37 = vector.multi_reduction <maximumf>, %20, %cst_22 [1] : vector<2x18xf32> to vector<2xf32>
    %38 = vector.shape_cast %37 : vector<2xf32> to vector<2x1xf32>
    %39 = vector.broadcast %38 : vector<2x1xf32> to vector<2x18xf32>
    %40 = arith.subf %20, %39 : vector<2x18xf32>
    %41 = math.exp %40 : vector<2x18xf32>
    %cst_23 = arith.constant dense<0.000000e+00> : vector<2xf32>
    %42 = vector.multi_reduction <add>, %41, %cst_23 [1] : vector<2x18xf32> to vector<2xf32>
    %43 = vector.shape_cast %42 : vector<2xf32> to vector<2x1xf32>
    %44 = tpu.reciprocal %43 {approx = true} : vector<2x1xf32> -> vector<2x1xf32>
    %45 = vector.broadcast %44 : vector<2x1xf32> to vector<2x18xf32>
    %46 = arith.mulf %41, %45 : vector<2x18xf32>
    %47 = vector.broadcast %1 : f32 to vector<2x18xf32>
    %48 = arith.mulf %47, %46 : vector<2x18xf32>
    %cst_24 = arith.constant 1.000000e+00 : f32
    %49 = arith.subf %cst_24, %1 : f32
    %50 = vector.broadcast %49 : f32 to vector<2x18xf32>
    %51 = arith.mulf %50, %4 : vector<2x18xf32>
    %52 = arith.addf %48, %51 : vector<2x18xf32>
    %cst_25 = arith.constant dense<0xFF800000> : vector<2xf32>
    %53 = vector.multi_reduction <maximumf>, %8, %cst_25 [1] : vector<2x18xf32> to vector<2xf32>
    %54 = vector.shape_cast %53 : vector<2xf32> to vector<2x1xf32>
    %55 = vector.broadcast %54 : vector<2x1xf32> to vector<2x18xf32>
    %56 = arith.subf %8, %55 : vector<2x18xf32>
    %57 = math.exp %56 : vector<2x18xf32>
    %cst_26 = arith.constant dense<0.000000e+00> : vector<2xf32>
    %58 = vector.multi_reduction <add>, %57, %cst_26 [1] : vector<2x18xf32> to vector<2xf32>
    %59 = vector.shape_cast %58 : vector<2xf32> to vector<2x1xf32>
    %60 = math.log %59 : vector<2x1xf32>
    %61 = arith.addf %60, %54 : vector<2x1xf32>
    %62 = vector.broadcast %61 : vector<2x1xf32> to vector<2x18xf32>
    %63 = arith.subf %8, %62 : vector<2x18xf32>
    %64 = arith.mulf %63, %36 : vector<2x18xf32>
    %cst_27 = arith.constant dense<0.000000e+00> : vector<2xf32>
    %65 = vector.multi_reduction <add>, %64, %cst_27 [1] : vector<2x18xf32> to vector<2xf32>
    %66 = vector.shape_cast %65 : vector<2xf32> to vector<2x1xf32>
    %cst_28 = arith.constant dense<0.000000e+00> : vector<1xf32>
    %67 = vector.multi_reduction <add>, %66, %cst_28 [0] : vector<2x1xf32> to vector<1xf32>
    %68 = vector.shape_cast %67 : vector<1xf32> to vector<1x1xf32>
    %cst_29 = arith.constant 0.000000e+00 : f32
    %69 = vector.broadcast %cst_29 : f32 to vector<1x1xf32>
    %70 = arith.subf %69, %68 : vector<1x1xf32>
    %cst_30 = arith.constant 5.000000e-01 : f32
    %71 = vector.broadcast %cst_30 : f32 to vector<1x1xf32>
    %72 = arith.mulf %70, %71 : vector<1x1xf32>
    %cst_31 = arith.constant dense<0xFF800000> : vector<2xf32>
    %73 = vector.multi_reduction <maximumf>, %12, %cst_31 [1] : vector<2x18xf32> to vector<2xf32>
    %74 = vector.shape_cast %73 : vector<2xf32> to vector<2x1xf32>
    %75 = vector.broadcast %74 : vector<2x1xf32> to vector<2x18xf32>
    %76 = arith.subf %12, %75 : vector<2x18xf32>
    %77 = math.exp %76 : vector<2x18xf32>
    %cst_32 = arith.constant dense<0.000000e+00> : vector<2xf32>
    %78 = vector.multi_reduction <add>, %77, %cst_32 [1] : vector<2x18xf32> to vector<2xf32>
    %79 = vector.shape_cast %78 : vector<2xf32> to vector<2x1xf32>
    %80 = math.log %79 : vector<2x1xf32>
    %81 = arith.addf %80, %74 : vector<2x1xf32>
    %82 = vector.broadcast %81 : vector<2x1xf32> to vector<2x18xf32>
    %83 = arith.subf %12, %82 : vector<2x18xf32>
    %84 = arith.mulf %83, %52 : vector<2x18xf32>
    %cst_33 = arith.constant dense<0.000000e+00> : vector<2xf32>
    %85 = vector.multi_reduction <add>, %84, %cst_33 [1] : vector<2x18xf32> to vector<2xf32>
    %86 = vector.shape_cast %85 : vector<2xf32> to vector<2x1xf32>
    %cst_34 = arith.constant dense<0.000000e+00> : vector<1xf32>
    %87 = vector.multi_reduction <add>, %86, %cst_34 [0] : vector<2x1xf32> to vector<1xf32>
    %88 = vector.shape_cast %87 : vector<1xf32> to vector<1x1xf32>
    %cst_35 = arith.constant 0.000000e+00 : f32
    %89 = vector.broadcast %cst_35 : f32 to vector<1x1xf32>
    %90 = arith.subf %89, %88 : vector<1x1xf32>
    %cst_36 = arith.constant 5.000000e-01 : f32
    %91 = vector.broadcast %cst_36 : f32 to vector<1x1xf32>
    %92 = arith.mulf %90, %91 : vector<1x1xf32>
    %93 = arith.addf %72, %92 : vector<1x1xf32>
    %cst_37 = arith.constant 5.000000e-01 : f32
    %94 = vector.broadcast %cst_37 : f32 to vector<1x1xf32>
    %95 = arith.mulf %94, %93 : vector<1x1xf32>
    %c0_38 = arith.constant 0 : index
    %c0_39 = arith.constant 0 : index
    %96 = vector.load %arg13[%c0_38, %c0_39] : memref<1x1xf32, #tpu.memory_space<vmem>>, vector<1x1xf32>
    tpu.vector_store %arg13[%c0_38, %c0_39], %95 {strides = array<i32>} : memref<1x1xf32, #tpu.memory_space<vmem>>, vector<1x1xf32>,
    %c0_40 = arith.constant 0 : index
    %c0_41 = arith.constant 0 : index
    %97 = vector.load %arg11[%c0_40, %c0_41] : memref<1x6xf32, #tpu.memory_space<vmem>>, vector<1x6xf32>
    %cst_42 = arith.constant 1.000000e+00 : f32
    %98 = vector.broadcast %cst_42 : f32 to vector<1x6xf32>
    %99 = arith.subf %98, %97 : vector<1x6xf32>
    %cst_43 = arith.constant -1.000000e+09 : f32
    %100 = vector.broadcast %cst_43 : f32 to vector<1x6xf32>
    %101 = arith.mulf %99, %100 : vector<1x6xf32>
    %102 = tpu.iota {dimensions = array<i32: 0>} : vector<6x6xi32>
    %103 = tpu.iota {dimensions = array<i32: 1>} : vector<6x6xi32>
    %104 = arith.cmpi eq, %102, %103 : vector<6x6xi32>
    %105 = arith.extui %104 : vector<6x6xi1> to vector<6x6xi32>
    %106 = arith.sitofp %105 : vector<6x6xi32> to vector<6x6xf32>
    %cst_44 = arith.constant dense<0.000000e+00> : vector<1xf32>
    %107 = vector.multi_reduction <add>, %97, %cst_44 [1] : vector<1x6xf32> to vector<1xf32>
    %108 = vector.shape_cast %107 : vector<1xf32> to vector<1x1xf32>
    %c0_45 = arith.constant 0 : index
    %c0_46 = arith.constant 0 : index
    %109 = vector.load %arg7[%c0_45, %c0_46] : memref<6x32xf32, #tpu.memory_space<vmem>>, vector<6x32xf32>
    %c0_47 = arith.constant 0 : index
    %c0_48 = arith.constant 0 : index
    %110 = vector.load %arg8[%c0_47, %c0_48] : memref<6x32xf32, #tpu.memory_space<vmem>>, vector<6x32xf32>
    %c0_49 = arith.constant 0 : index
    %c0_50 = arith.constant 0 : index
    %111 = vector.load %arg9[%c0_49, %c0_50] : memref<6x32xf32, #tpu.memory_space<vmem>>, vector<6x32xf32>
    %c0_51 = arith.constant 0 : index
    %c0_52 = arith.constant 0 : index
    %112 = vector.load %arg10[%c0_51, %c0_52] : memref<6x32xf32, #tpu.memory_space<vmem>>, vector<6x32xf32>
    %cst_53 = arith.constant dense<0.000000e+00> : vector<6x6xf32>
    %113 = tpu.matmul %109, %112, %cst_53 {dimension_numbers = #tpu.dot_dimension_numbers<[1], [1], [0], [0], [0, 0, 1, 0], [], []>} : vector<6x32xf32>, vector<6x32xf32>, vector<6x6xf32> -> vector<6x6xf32>
    %114 = vector.broadcast %0 : f32 to vector<6x6xf32>
    %115 = arith.mulf %113, %114 : vector<6x6xf32>
    %116 = vector.broadcast %101 : vector<1x6xf32> to vector<6x6xf32>
    %117 = arith.addf %115, %116 : vector<6x6xf32>
    %cst_54 = arith.constant dense<0.000000e+00> : vector<6x6xf32>
    %118 = tpu.matmul %110, %111, %cst_54 {dimension_numbers = #tpu.dot_dimension_numbers<[1], [1], [0], [0], [0, 0, 1, 0], [], []>} : vector<6x32xf32>, vector<6x32xf32>, vector<6x6xf32> -> vector<6x6xf32>
    %119 = vector.broadcast %0 : f32 to vector<6x6xf32>
    %120 = arith.mulf %118, %119 : vector<6x6xf32>
    %121 = vector.broadcast %101 : vector<1x6xf32> to vector<6x6xf32>
    %122 = arith.addf %120, %121 : vector<6x6xf32>
    %cst_55 = arith.constant dense<0.000000e+00> : vector<6x6xf32>
    %123 = tpu.matmul %111, %112, %cst_55 {dimension_numbers = #tpu.dot_dimension_numbers<[1], [1], [0], [0], [0, 0, 1, 0], [], []>} : vector<6x32xf32>, vector<6x32xf32>, vector<6x6xf32> -> vector<6x6xf32>
    %124 = vector.broadcast %0 : f32 to vector<6x6xf32>
    %125 = arith.mulf %123, %124 : vector<6x6xf32>
    %126 = vector.broadcast %101 : vector<1x6xf32> to vector<6x6xf32>
    %127 = arith.addf %125, %126 : vector<6x6xf32>
    %cst_56 = arith.constant dense<0.000000e+00> : vector<6x6xf32>
    %128 = tpu.matmul %112, %111, %cst_56 {dimension_numbers = #tpu.dot_dimension_numbers<[1], [1], [0], [0], [0, 0, 1, 0], [], []>} : vector<6x32xf32>, vector<6x32xf32>, vector<6x6xf32> -> vector<6x6xf32>
    %129 = vector.broadcast %0 : f32 to vector<6x6xf32>
    %130 = arith.mulf %128, %129 : vector<6x6xf32>
    %131 = vector.broadcast %101 : vector<1x6xf32> to vector<6x6xf32>
    %132 = arith.addf %130, %131 : vector<6x6xf32>
    %cst_57 = arith.constant dense<0xFF800000> : vector<6xf32>
    %133 = vector.multi_reduction <maximumf>, %127, %cst_57 [1] : vector<6x6xf32> to vector<6xf32>
    %134 = vector.shape_cast %133 : vector<6xf32> to vector<6x1xf32>
    %135 = vector.broadcast %134 : vector<6x1xf32> to vector<6x6xf32>
    %136 = arith.subf %127, %135 : vector<6x6xf32>
    %137 = math.exp %136 : vector<6x6xf32>
    %cst_58 = arith.constant dense<0.000000e+00> : vector<6xf32>
    %138 = vector.multi_reduction <add>, %137, %cst_58 [1] : vector<6x6xf32> to vector<6xf32>
    %139 = vector.shape_cast %138 : vector<6xf32> to vector<6x1xf32>
    %140 = tpu.reciprocal %139 {approx = true} : vector<6x1xf32> -> vector<6x1xf32>
    %141 = vector.broadcast %140 : vector<6x1xf32> to vector<6x6xf32>
    %142 = arith.mulf %137, %141 : vector<6x6xf32>
    %143 = vector.broadcast %1 : f32 to vector<6x6xf32>
    %144 = arith.mulf %143, %142 : vector<6x6xf32>
    %cst_59 = arith.constant 1.000000e+00 : f32
    %145 = arith.subf %cst_59, %1 : f32
    %146 = vector.broadcast %145 : f32 to vector<6x6xf32>
    %147 = arith.mulf %146, %106 : vector<6x6xf32>
    %148 = arith.addf %144, %147 : vector<6x6xf32>
    %cst_60 = arith.constant dense<0xFF800000> : vector<6xf32>
    %149 = vector.multi_reduction <maximumf>, %132, %cst_60 [1] : vector<6x6xf32> to vector<6xf32>
    %150 = vector.shape_cast %149 : vector<6xf32> to vector<6x1xf32>
    %151 = vector.broadcast %150 : vector<6x1xf32> to vector<6x6xf32>
    %152 = arith.subf %132, %151 : vector<6x6xf32>
    %153 = math.exp %152 : vector<6x6xf32>
    %cst_61 = arith.constant dense<0.000000e+00> : vector<6xf32>
    %154 = vector.multi_reduction <add>, %153, %cst_61 [1] : vector<6x6xf32> to vector<6xf32>
    %155 = vector.shape_cast %154 : vector<6xf32> to vector<6x1xf32>
    %156 = tpu.reciprocal %155 {approx = true} : vector<6x1xf32> -> vector<6x1xf32>
    %157 = vector.broadcast %156 : vector<6x1xf32> to vector<6x6xf32>
    %158 = arith.mulf %153, %157 : vector<6x6xf32>
    %159 = vector.broadcast %1 : f32 to vector<6x6xf32>
    %160 = arith.mulf %159, %158 : vector<6x6xf32>
    %cst_62 = arith.constant 1.000000e+00 : f32
    %161 = arith.subf %cst_62, %1 : f32
    %162 = vector.broadcast %161 : f32 to vector<6x6xf32>
    %163 = arith.mulf %162, %106 : vector<6x6xf32>
    %164 = arith.addf %160, %163 : vector<6x6xf32>
    %cst_63 = arith.constant dense<0xFF800000> : vector<6xf32>
    %165 = vector.multi_reduction <maximumf>, %117, %cst_63 [1] : vector<6x6xf32> to vector<6xf32>
    %166 = vector.shape_cast %165 : vector<6xf32> to vector<6x1xf32>
    %167 = vector.broadcast %166 : vector<6x1xf32> to vector<6x6xf32>
    %168 = arith.subf %117, %167 : vector<6x6xf32>
    %169 = math.exp %168 : vector<6x6xf32>
    %cst_64 = arith.constant dense<0.000000e+00> : vector<6xf32>
    %170 = vector.multi_reduction <add>, %169, %cst_64 [1] : vector<6x6xf32> to vector<6xf32>
    %171 = vector.shape_cast %170 : vector<6xf32> to vector<6x1xf32>
    %172 = math.log %171 : vector<6x1xf32>
    %173 = arith.addf %172, %166 : vector<6x1xf32>
    %174 = vector.broadcast %173 : vector<6x1xf32> to vector<6x6xf32>
    %175 = arith.subf %117, %174 : vector<6x6xf32>
    %176 = arith.mulf %175, %148 : vector<6x6xf32>
    %cst_65 = arith.constant dense<0.000000e+00> : vector<6xf32>
    %177 = vector.multi_reduction <add>, %176, %cst_65 [1] : vector<6x6xf32> to vector<6xf32>
    %178 = vector.shape_cast %177 : vector<6xf32> to vector<6x1xf32>
    %cst_66 = arith.constant 0.000000e+00 : f32
    %179 = vector.broadcast %cst_66 : f32 to vector<6x1xf32>
    %180 = arith.subf %179, %178 : vector<6x1xf32>
    %cst_67 = arith.constant dense<0.000000e+00> : vector<1x1xf32>
    %181 = tpu.matmul %97, %180, %cst_67 {dimension_numbers = #tpu.dot_dimension_numbers<[1], [0], [0], [1], [0, 0, 1, 1], [], []>} : vector<1x6xf32>, vector<6x1xf32>, vector<1x1xf32> -> vector<1x1xf32>
    %182 = arith.divf %181, %108 : vector<1x1xf32>
    %cst_68 = arith.constant dense<0xFF800000> : vector<6xf32>
    %183 = vector.multi_reduction <maximumf>, %122, %cst_68 [1] : vector<6x6xf32> to vector<6xf32>
    %184 = vector.shape_cast %183 : vector<6xf32> to vector<6x1xf32>
    %185 = vector.broadcast %184 : vector<6x1xf32> to vector<6x6xf32>
    %186 = arith.subf %122, %185 : vector<6x6xf32>
    %187 = math.exp %186 : vector<6x6xf32>
    %cst_69 = arith.constant dense<0.000000e+00> : vector<6xf32>
    %188 = vector.multi_reduction <add>, %187, %cst_69 [1] : vector<6x6xf32> to vector<6xf32>
    %189 = vector.shape_cast %188 : vector<6xf32> to vector<6x1xf32>
    %190 = math.log %189 : vector<6x1xf32>
    %191 = arith.addf %190, %184 : vector<6x1xf32>
    %192 = vector.broadcast %191 : vector<6x1xf32> to vector<6x6xf32>
    %193 = arith.subf %122, %192 : vector<6x6xf32>
    %194 = arith.mulf %193, %164 : vector<6x6xf32>
    %cst_70 = arith.constant dense<0.000000e+00> : vector<6xf32>
    %195 = vector.multi_reduction <add>, %194, %cst_70 [1] : vector<6x6xf32> to vector<6xf32>
    %196 = vector.shape_cast %195 : vector<6xf32> to vector<6x1xf32>
    %cst_71 = arith.constant 0.000000e+00 : f32
    %197 = vector.broadcast %cst_71 : f32 to vector<6x1xf32>
    %198 = arith.subf %197, %196 : vector<6x1xf32>
    %cst_72 = arith.constant dense<0.000000e+00> : vector<1x1xf32>
    %199 = tpu.matmul %97, %198, %cst_72 {dimension_numbers = #tpu.dot_dimension_numbers<[1], [0], [0], [1], [0, 0, 1, 1], [], []>} : vector<1x6xf32>, vector<6x1xf32>, vector<1x1xf32> -> vector<1x1xf32>
    %200 = arith.divf %199, %108 : vector<1x1xf32>
    %201 = arith.addf %182, %200 : vector<1x1xf32>
    %cst_73 = arith.constant 5.000000e-01 : f32
    %202 = vector.broadcast %cst_73 : f32 to vector<1x1xf32>
    %203 = arith.mulf %202, %201 : vector<1x1xf32>
    %c0_74 = arith.constant 0 : index
    %c0_75 = arith.constant 0 : index
    %204 = vector.load %arg14[%c0_74, %c0_75] : memref<1x1xf32, #tpu.memory_space<vmem>>, vector<1x1xf32>
    tpu.vector_store %arg14[%c0_74, %c0_75], %203 {strides = array<i32>} : memref<1x1xf32, #tpu.memory_space<vmem>>, vector<1x1xf32>,
    return
  }
}

</mosaic_0001>

<bundles_post_ra>
// kernel: split.3
= control target key start
LH: loop header
LB: loop body
LE: loop exit
PB: predicated region body
PF: predicated region fallthrough
CT: control target
= control target key end

     0   :  { %vm6_vm0 = vcmask 1040384   ;;  %v9_v0 = vlaneseq  ;;  %s35_s0 = inlined_call_operand.vmem [shape: f32[157696], index: 0, kind: input, shape index: {}]   ;;  %s36_s1 = inlined_call_operand.vmem [shape: f32[832], index: 1, kind: output, shape index: {}]  }
   0x1   :  { %v16_v1 = vld [vmem:[%s35_s0 + $0x4b8] sm:$0xff]  ;;  %s18_s0 = smov 96  }
   0x2   :  { %v7_v2 = vsel %vm6_vm0, 0, %v16_v1  ;;  %v10_v3 = vand.u32 127, %v9_v0 }
   0x3   :  { %v8_v4 = vrot.slane %v7_v2, 1 }
   0x4   :  { %vm11_vm1 = vcmp.lt.s32.totalorder %v10_v3, 32 }
   0x5   :  { %v12_v5 = vsel %vm11_vm1, %v8_v4, %v16_v1 }
   0x6   :  { %13 = vrot.lane.b32.xlu0 %v12_v5, %s18_s0 }
  0x78   :  { %v14_v6 = vpop.permute.xlu0 %13 }
  0x79   :  { %15 = vst [vmem:[%s36_s1] sm:$0xff] %v14_v6 }

// kernel: albef_forward.12
= control target key start
LH: loop header
LB: loop body
LE: loop exit
PB: predicated region body
PF: predicated region fallthrough
CT: control target
= control target key end

     0   :  { %vm29_vm0 = vcmask 523264   ;;  %vm68_vm1 = vcmask 261120   ;;  %vm75_vm2 = vcmask 254976   ;;  %s219_s1 = inlined_call_operand.vmem [shape: f32[64,32], index: 1, kind: input, shape index: {}]   ;;  %s220_s2 = inlined_call_operand.vmem [shape: f32[1,32], index: 2, kind: input, shape index: {}]   ;;  %s221_s0 = inlined_call_operand.vmem [shape: f32[18,64], index: 0, kind: input, shape index: {}]   ;;  %s222_s3 = inlined_call_operand.vmem [shape: f32[18,32], index: 3, kind: output, shape index: {}]  }
   0x1   :  { %v24_v0 = vld [vmem:[%s219_s1 + $0x38] sm:$0xff]  ;;  %v23_v1 = vld [vmem:[%s219_s1 + $0x30] sm:$0xff]  ;;  %v22_v2 = vld [vmem:[%s219_s1 + $0x28] sm:$0xff] }
   0x2   :  { %47 = vmatpush.msra.mxu0 %v24_v0  ;;  %126 = vmatpush.msra.mxu2 %v24_v0  ;;  %v21_v3 = vld [vmem:[%s219_s1 + $0x20] sm:$0xff]  ;;  %v20_v4 = vld [vmem:[%s219_s1 + $0x18] sm:$0xff]  ;;  %v19_v5 = vld [vmem:[%s219_s1 + $0x10] sm:$0xff] }
   0x3   :  { %125 = vmatpush.msra.mxu1 %v24_v0  ;;  %v18_v6 = vld [vmem:[%s219_s1 + $0x8] sm:$0xff]  ;;  %v17_v7 = vld [vmem:[%s219_s1] sm:$0xff]  ;;  %v16_v9 = vld [vmem:[%s221_s0 + $0x10] sm:$0x3] }
   0x4   :  { %48 = vmatpush.msra.mxu0 %v23_v1  ;;  %128 = vmatpush.msra.mxu2 %v23_v1  ;;  %v14_v8 = vld [vmem:[%s221_s0] sm:$0xff]  ;;  %v15_v10 = vld [vmem:[%s221_s0 + $0x8] sm:$0xff] }
   0x5   :  { %127 = vmatpush.msra.mxu1 %v23_v1  ;;  %v141_v11 = vld [vmem:[%s220_s2] ss:$0 sm:$0xff] }
   0x6   :  { %49 = vmatpush.msra.mxu0 %v22_v2  ;;  %130 = vmatpush.msra.mxu2 %v22_v2 }
   0x7   :  { %129 = vmatpush.msra.mxu1 %v22_v2 }
   0x8   :  { %50 = vmatpush.msra.mxu0 %v21_v3  ;;  %132 = vmatpush.msra.mxu2 %v21_v3 }
   0x9   :  { %131 = vmatpush.msra.mxu1 %v21_v3 }
   0xa   :  { %51 = vmatpush.msra.mxu0 %v20_v4  ;;  %134 = vmatpush.msra.mxu2 %v20_v4 }
   0xb   :  { %133 = vmatpush.msra.mxu1 %v20_v4 }
   0xc   :  { %52 = vmatpush.msra.mxu0 %v19_v5  ;;  %136 = vmatpush.msra.mxu2 %v19_v5 }
   0xd   :  { %135 = vmatpush.msra.mxu1 %v19_v5 }
   0xe   :  { %53 = vmatpush.msra.mxu0 %v18_v6  ;;  %138 = vmatpush.msra.mxu2 %v18_v6 }
   0xf   :  { %137 = vmatpush.msra.mxu1 %v18_v6 }
  0x10   :  { %54 = vmatpush.msra.mxu0 %v17_v7  ;;  %140 = vmatpush.msra.mxu2 %v17_v7 }
  0x11   :  { %122 = vmatmul.msk.f32.vlgmr.msra.gmra.mxu0 %vm29_vm0, %v14_v8  ;;  %124 = vmatmul.msk.f32.vlgmr.msra.gmra.mxu2 %vm29_vm0, %v16_v9 }
  0x12   :  { %139 = vmatpush.msra.mxu1 %v17_v7 }
  0x13   :  { %123 = vmatmul.msk.f32.vlgmr.msra.gmra.mxu1 %vm29_vm0, %v15_v10 }
  0x8e   :  { %v56_v12 = vpop.f32.mrf.mxu0 }
  0x8f   :  { %v57_v13 = vadd.f32 %v141_v11, %v56_v12 }
  0x90   :  { %v59_v14 = vpop.f32.mrf.mxu1 }
  0x91   :  { %v65_v15 = vmul.f32 %v57_v13, %v57_v13  ;;  %v60_v16 = vadd.f32 %v141_v11, %v59_v14 }
  0x93   :  { %v69_v17 = vsel %vm68_vm1, %v65_v15, 0.0  ;;  %v66_v20 = vmul.f32 %v60_v16, %v60_v16 }
  0x94   :  { %v62_v18 = vpop.f32.mrf.mxu2  ;;  %70 = vadd.xlane.f32.xlu0 %v69_v17 }
  0x95   :  { %v63_v19 = vadd.f32 %v141_v11, %v62_v18  ;;  %v72_v23 = vsel %vm68_vm1, %v66_v20, 0.0 }
  0x97   :  { %v67_v21 = vmul.f32 %v63_v19, %v63_v19 }
  0x99   :  { %v76_v22 = vsel %vm75_vm2, %v67_v21, 0.0 }
  0x9a   :  { %77 = vadd.xlane.f32.xlu1 %v76_v22 }
  0x9c   :  { %73 = vadd.xlane.f32.xlu0 %v72_v23 }
 0x107   :  { %v71_v24 = vpop.xlane.xlu0 %70 }
 0x108   :  { %v79_v25 = vmax.f32 %v71_v24, 1e-24 }
 0x10a   :  { %142 = vrsqrt.f32 %v79_v25  ;;  %vm88_vm4 = vweird.f32 %v79_v25 }
 0x10d   :  { %v78_v26 = vpop.xlane.xlu1 %77 }
 0x10e   :  { %v81_v27 = vmax.f32 %v78_v26, 1e-24 }
 0x10f   :  { %v74_v28 = vpop.xlane.xlu0 %73 }
 0x110   :  { %v143_v29 = vpop.eup %142  ;;  %144 = vrsqrt.f32 %v81_v27  ;;  %v80_v30 = vmax.f32 %v74_v28, 1e-24  ;;  %vm108_vm7 = vweird.f32 %v81_v27 }
 0x111   :  { %v83_v31 = vmul.f32 %v143_v29, %v79_v25  ;;  %vm89_vm3 = vweird.f32 %v143_v29 }
 0x112   :  { %146 = vrsqrt.f32 %v80_v30  ;;  %vm90_vm5 = vmor %vm88_vm4, %vm89_vm3  ;;  %vm98_vm10 = vweird.f32 %v80_v30 }
 0x113   :  { %v84_v32 = vmul.f32 %v143_v29, %v83_v31 }
 0x115   :  { %v85_v33 = vmul.f32 0.5, %v84_v32 }
 0x116   :  { %v145_v34 = vpop.eup %144 }
 0x117   :  { %v86_v35 = vsub.f32 1.5, %v85_v33  ;;  %v103_v36 = vmul.f32 %v145_v34, %v81_v27  ;;  %vm109_vm6 = vweird.f32 %v145_v34 }
 0x118   :  { %v147_v37 = vpop.eup %146  ;;  %vm110_vm9 = vmor %vm108_vm7, %vm109_vm6 }
 0x119   :  { %v87_v38 = vmul.f32 %v143_v29, %v86_v35  ;;  %v104_v39 = vmul.f32 %v145_v34, %v103_v36  ;;  %v93_v40 = vmul.f32 %v147_v37, %v80_v30  ;;  %vm99_vm8 = vweird.f32 %v147_v37 }
 0x11a   :  { %vm100_vm11 = vmor %vm98_vm10, %vm99_vm8 }
 0x11b   :  { %v91_v41 = vsel %vm90_vm5, %v143_v29, %v87_v38  ;;  %v105_v42 = vmul.f32 0.5, %v104_v39  ;;  %v94_v43 = vmul.f32 %v147_v37, %v93_v40 }
 0x11c   :  { %v112_v44 = vmul.f32 %v91_v41, %v57_v13 }
 0x11d   :  { %v106_v45 = vsub.f32 1.5, %v105_v42  ;;  %v95_v46 = vmul.f32 0.5, %v94_v43 }
 0x11e   :  { %115 = vst.msk [vmem:[%s222_s3] sm:$0xff] %vm68_vm1, %v112_v44 }
 0x11f   :  { %v107_v47 = vmul.f32 %v145_v34, %v106_v45  ;;  %v96_v48 = vsub.f32 1.5, %v95_v46 }
 0x121   :  { %v111_v49 = vsel %vm110_vm9, %v145_v34, %v107_v47  ;;  %v97_v50 = vmul.f32 %v147_v37, %v96_v48 }
 0x122   :  { %v114_v51 = vmul.f32 %v111_v49, %v63_v19 }
 0x123   :  { %v101_v52 = vsel %vm100_vm11, %v147_v37, %v97_v50 }
 0x124   :  { %117 = vst.msk [vmem:[%s222_s3 + $0x10] sm:$0x3] %vm75_vm2, %v114_v51  ;;  %v113_v53 = vmul.f32 %v101_v52, %v60_v16 }
 0x126   :  { %116 = vst.msk [vmem:[%s222_s3 + $0x8] sm:$0xff] %vm68_vm1, %v113_v53 }

// kernel: albef_forward.16
= control target key start
LH: loop header
LB: loop body
LE: loop exit
PB: predicated region body
PF: predicated region fallthrough
CT: control target
= control target key end

     0   :  { %s2430_s0 = inlined_call_operand.vmem [shape: f32[154,1024], index: 0, kind: input, shape index: {}]   ;;  %s2431_s1 = inlined_call_operand.vmem [shape: f32[154,1024], index: 1, kind: input, shape index: {}]   ;;  %s2432_s2 = inlined_call_operand.vmem [shape: f32[154,1024], index: 2, kind: output, shape index: {}]  }
   0x1   :  { %v11_v0 = vld [vmem:[%s2430_s0] sm:$0xff]  ;;  %v12_v2 = vld [vmem:[%s2430_s0 + $0x8] sm:$0xff]  ;;  %v13_v7 = vld [vmem:[%s2430_s0 + $0x10] sm:$0xff] }
   0x2   :  { %v331_v1 = vld [vmem:[%s2431_s1] sm:$0xff]  ;;  %v171_v3 = vmul.f32 0.995, %v11_v0  ;;  %v172_v5 = vmul.f32 0.995, %v12_v2  ;;  %v332_v6 = vld [vmem:[%s2431_s1 + $0x8] sm:$0xff] }
   0x3   :  { %v491_v4 = vmul.f32 0.005, %v331_v1  ;;  %v333_v8 = vld [vmem:[%s2431_s1 + $0x10] sm:$0xff]  ;;  %v492_v10 = vmul.f32 0.005, %v332_v6  ;;  %v14_v13 = vld [vmem:[%s2430_s0 + $0x18] sm:$0xff] }
   0x4   :  { %v173_v11 = vmul.f32 0.995, %v13_v7  ;;  %v493_v12 = vmul.f32 0.005, %v333_v8  ;;  %v334_v14 = vld [vmem:[%s2431_s1 + $0x18] sm:$0xff]  ;;  %v15_v15 = vld [vmem:[%s2430_s0 + $0x20] sm:$0xff] }
   0x5   :  { %v651_v9 = vadd.f32 %v491_v4, %v171_v3  ;;  %v652_v16 = vadd.f32 %v492_v10, %v172_v5  ;;  %v174_v18 = vmul.f32 0.995, %v14_v13  ;;  %v494_v19 = vmul.f32 0.005, %v334_v14  ;;  %v335_v20 = vld [vmem:[%s2431_s1 + $0x20] sm:$0xff]  ;;  %v16_v21 = vld [vmem:[%s2430_s0 + $0x28] sm:$0xff] }
   0x6   :  { %v653_v17 = vadd.f32 %v493_v12, %v173_v11  ;;  %v175_v22 = vmul.f32 0.995, %v15_v15  ;;  %v495_v23 = vmul.f32 0.005, %v335_v20  ;;  %v176_v24 = vmul.f32 0.995, %v16_v21 }
   0x7   :  { %811 = vst [vmem:[%s2432_s2] sm:$0xff] %v651_v9  ;;  %v654_v25 = vadd.f32 %v494_v19, %v174_v18  ;;  %v336_v26 = vld [vmem:[%s2431_s1 + $0x28] sm:$0xff]  ;;  %v17_v27 = vld [vmem:[%s2430_s0 + $0x30] sm:$0xff]  ;;  %v18_v32 = vld [vmem:[%s2430_s0 + $0x38] sm:$0xff] }
   0x8   :  { %812 = vst [vmem:[%s2432_s2 + $0x8] sm:$0xff] %v652_v16  ;;  %v337_v28 = vld [vmem:[%s2431_s1 + $0x30] sm:$0xff]  ;;  %v655_v29 = vadd.f32 %v495_v23, %v175_v22  ;;  %v496_v30 = vmul.f32 0.005, %v336_v26  ;;  %v177_v31 = vmul.f32 0.995, %v17_v27 }
   0x9   :  { %813 = vst [vmem:[%s2432_s2 + $0x10] sm:$0xff] %v653_v17  ;;  %v497_v33 = vmul.f32 0.005, %v337_v28  ;;  %v178_v34 = vmul.f32 0.995, %v18_v32  ;;  %v338_v35 = vld [vmem:[%s2431_s1 + $0x38] sm:$0xff] }
   0xa   :  { %814 = vst [vmem:[%s2432_s2 + $0x18] sm:$0xff] %v654_v25  ;;  %v656_v36 = vadd.f32 %v496_v30, %v176_v24  ;;  %v498_v37 = vmul.f32 0.005, %v338_v35  ;;  %v19_v38 = vld [vmem:[%s2430_s0 + $0x40] sm:$0xff]  ;;  %v20_v40 = vld [vmem:[%s2430_s0 + $0x48] sm:$0xff]  ;;  %v21_v47 = vld [vmem:[%s2430_s0 + $0x50] sm:$0xff] }
   0xb   :  { %815 = vst [vmem:[%s2432_s2 + $0x20] sm:$0xff] %v655_v29  ;;  %v339_v39 = vld [vmem:[%s2431_s1 + $0x40] sm:$0xff]  ;;  %v657_v41 = vadd.f32 %v497_v33, %v177_v31  ;;  %v179_v42 = vmul.f32 0.995, %v19_v38  ;;  %v180_v44 = vmul.f32 0.995, %v20_v40 }
   0xc   :  { %v499_v43 = vmul.f32 0.005, %v339_v39  ;;  %816 = vst [vmem:[%s2432_s2 + $0x28] sm:$0xff] %v656_v36  ;;  %v658_v45 = vadd.f32 %v498_v37, %v178_v34  ;;  %v340_v46 = vld [vmem:[%s2431_s1 + $0x48] sm:$0xff]  ;;  %v341_v48 = vld [vmem:[%s2431_s1 + $0x50] sm:$0xff]  ;;  %v22_v52 = vld [vmem:[%s2430_s0 + $0x58] sm:$0xff] }
   0xd   :  { %817 = vst [vmem:[%s2432_s2 + $0x30] sm:$0xff] %v657_v41  ;;  %v500_v50 = vmul.f32 0.005, %v340_v46  ;;  %v181_v51 = vmul.f32 0.995, %v21_v47  ;;  %v342_v55 = vld [vmem:[%s2431_s1 + $0x58] sm:$0xff] }
   0xe   :  { %v659_v49 = vadd.f32 %v499_v43, %v179_v42  ;;  %818 = vst [vmem:[%s2432_s2 + $0x38] sm:$0xff] %v658_v45  ;;  %v501_v53 = vmul.f32 0.005, %v341_v48  ;;  %v182_v54 = vmul.f32 0.995, %v22_v52  ;;  %v23_v58 = vld [vmem:[%s2430_s0 + $0x60] sm:$0xff] }
   0xf   :  { %v660_v56 = vadd.f32 %v500_v50, %v180_v44  ;;  %v502_v57 = vmul.f32 0.005, %v342_v55  ;;  %v343_v59 = vld [vmem:[%s2431_s1 + $0x60] sm:$0xff]  ;;  %v24_v60 = vld [vmem:[%s2430_s0 + $0x68] sm:$0xff]  ;;  %v183_v62 = vmul.f32 0.995, %v23_v58 }
  0x10   :  { %819 = vst [vmem:[%s2432_s2 + $0x40] sm:$0xff] %v659_v49  ;;  %v661_v61 = vadd.f32 %v501_v53, %v181_v51  ;;  %v503_v63 = vmul.f32 0.005, %v343_v59  ;;  %v184_v0 = vmul.f32 0.995, %v24_v60  ;;  %v344_v2 = vld [vmem:[%s2431_s1 + $0x68] sm:$0xff] }
  0x11   :  { %820 = vst [vmem:[%s2432_s2 + $0x48] sm:$0xff] %v660_v56  ;;  %v662_v1 = vadd.f32 %v502_v57, %v182_v54  ;;  %v25_v3 = vld [vmem:[%s2430_s0 + $0x70] sm:$0xff]  ;;  %v504_v6 = vmul.f32 0.005, %v344_v2  ;;  %v26_v8 = vld [vmem:[%s2430_s0 + $0x78] sm:$0xff]  ;;  %v27_v14 = vld [vmem:[%s2430_s0 + $0x80] sm:$0xff] }
  0x12   :  { %v345_v4 = vld [vmem:[%s2431_s1 + $0x70] sm:$0xff]  ;;  %821 = vst [vmem:[%s2432_s2 + $0x50] sm:$0xff] %v661_v61  ;;  %v663_v5 = vadd.f32 %v503_v63, %v183_v62  ;;  %v185_v7 = vmul.f32 0.995, %v25_v3  ;;  %v186_v10 = vmul.f32 0.995, %v26_v8 }
  0x13   :  { %822 = vst [vmem:[%s2432_s2 + $0x58] sm:$0xff] %v662_v1  ;;  %v505_v9 = vmul.f32 0.005, %v345_v4  ;;  %v346_v11 = vld [vmem:[%s2431_s1 + $0x78] sm:$0xff]  ;;  %v664_v12 = vadd.f32 %v504_v6, %v184_v0  ;;  %v347_v15 = vld [vmem:[%s2431_s1 + $0x80] sm:$0xff]  ;;  %v28_v16 = vld [vmem:[%s2430_s0 + $0x88] sm:$0xff] }
  0x14   :  { %823 = vst [vmem:[%s2432_s2 + $0x60] sm:$0xff] %v663_v5  ;;  %v506_v13 = vmul.f32 0.005, %v346_v11  ;;  %v187_v18 = vmul.f32 0.995, %v27_v14  ;;  %v348_v22 = vld [vmem:[%s2431_s1 + $0x88] sm:$0xff] }
  0x15   :  { %v665_v17 = vadd.f32 %v505_v9, %v185_v7  ;;  %v507_v19 = vmul.f32 0.005, %v347_v15  ;;  %v188_v20 = vmul.f32 0.995, %v28_v16  ;;  %824 = vst [vmem:[%s2432_s2 + $0x68] sm:$0xff] %v664_v12  ;;  %v29_v23 = vld [vmem:[%s2430_s0 + $0x90] sm:$0xff] }
  0x16   :  { %v666_v21 = vadd.f32 %v506_v13, %v186_v10  ;;  %v349_v24 = vld [vmem:[%s2431_s1 + $0x90] sm:$0xff]  ;;  %v508_v26 = vmul.f32 0.005, %v348_v22  ;;  %v189_v27 = vmul.f32 0.995, %v29_v23  ;;  %v30_v28 = vld [vmem:[%s2430_s0 + $0x98] sm:$0xff] }
  0x17   :  { %825 = vst [vmem:[%s2432_s2 + $0x70] sm:$0xff] %v665_v17  ;;  %v667_v25 = vadd.f32 %v507_v19, %v187_v18  ;;  %v509_v29 = vmul.f32 0.005, %v349_v24  ;;  %v190_v30 = vmul.f32 0.995, %v30_v28  ;;  %v350_v31 = vld [vmem:[%s2431_s1 + $0x98] sm:$0xff] }
  0x18   :  { %826 = vst [vmem:[%s2432_s2 + $0x78] sm:$0xff] %v666_v21  ;;  %v668_v32 = vadd.f32 %v508_v26, %v188_v20  ;;  %v510_v33 = vmul.f32 0.005, %v350_v31  ;;  %v31_v34 = vld [vmem:[%s2430_s0 + $0xa0] sm:$0xff]  ;;  %v32_v36 = vld [vmem:[%s2430_s0 + $0xa8] sm:$0xff]  ;;  %v33_v43 = vld [vmem:[%s2430_s0 + $0xb0] sm:$0xff] }
  0x19   :  { %827 = vst [vmem:[%s2432_s2 + $0x80] sm:$0xff] %v667_v25  ;;  %v351_v35 = vld [vmem:[%s2431_s1 + $0xa0] sm:$0xff]  ;;  %v669_v37 = vadd.f32 %v509_v29, %v189_v27  ;;  %v191_v38 = vmul.f32 0.995, %v31_v34  ;;  %v192_v40 = vmul.f32 0.995, %v32_v36 }
  0x1a   :  { %v511_v39 = vmul.f32 0.005, %v351_v35  ;;  %828 = vst [vmem:[%s2432_s2 + $0x88] sm:$0xff] %v668_v32  ;;  %v670_v41 = vadd.f32 %v510_v33, %v190_v30  ;;  %v352_v42 = vld [vmem:[%s2431_s1 + $0xa8] sm:$0xff]  ;;  %v353_v44 = vld [vmem:[%s2431_s1 + $0xb0] sm:$0xff]  ;;  %v34_v48 = vld [vmem:[%s2430_s0 + $0xb8] sm:$0xff] }
  0x1b   :  { %829 = vst [vmem:[%s2432_s2 + $0x90] sm:$0xff] %v669_v37  ;;  %v512_v46 = vmul.f32 0.005, %v352_v42  ;;  %v193_v47 = vmul.f32 0.995, %v33_v43  ;;  %v354_v51 = vld [vmem:[%s2431_s1 + $0xb8] sm:$0xff] }
  0x1c   :  { %v671_v45 = vadd.f32 %v511_v39, %v191_v38  ;;  %830 = vst [vmem:[%s2432_s2 + $0x98] sm:$0xff] %v670_v41  ;;  %v513_v49 = vmul.f32 0.005, %v353_v44  ;;  %v194_v50 = vmul.f32 0.995, %v34_v48  ;;  %v35_v54 = vld [vmem:[%s2430_s0 + $0xc0] sm:$0xff] }
  0x1d   :  { %v672_v52 = vadd.f32 %v512_v46, %v192_v40  ;;  %v514_v53 = vmul.f32 0.005, %v354_v51  ;;  %v355_v55 = vld [vmem:[%s2431_s1 + $0xc0] sm:$0xff]  ;;  %v36_v56 = vld [vmem:[%s2430_s0 + $0xc8] sm:$0xff]  ;;  %v195_v58 = vmul.f32 0.995, %v35_v54 }
  0x1e   :  { %831 = vst [vmem:[%s2432_s2 + $0xa0] sm:$0xff] %v671_v45  ;;  %v673_v57 = vadd.f32 %v513_v49, %v193_v47  ;;  %v515_v59 = vmul.f32 0.005, %v355_v55  ;;  %v196_v60 = vmul.f32 0.995, %v36_v56  ;;  %v356_v62 = vld [vmem:[%s2431_s1 + $0xc8] sm:$0xff] }
  0x1f   :  { %832 = vst [vmem:[%s2432_s2 + $0xa8] sm:$0xff] %v672_v52  ;;  %v674_v61 = vadd.f32 %v514_v53, %v194_v50  ;;  %v37_v63 = vld [vmem:[%s2430_s0 + $0xd0] sm:$0xff]  ;;  %v516_v2 = vmul.f32 0.005, %v356_v62  ;;  %v38_v4 = vld [vmem:[%s2430_s0 + $0xd8] sm:$0xff]  ;;  %v39_v10 = vld [vmem:[%s2430_s0 + $0xe0] sm:$0xff] }
  0x20   :  { %v357_v0 = vld [vmem:[%s2431_s1 + $0xd0] sm:$0xff]  ;;  %833 = vst [vmem:[%s2432_s2 + $0xb0] sm:$0xff] %v673_v57  ;;  %v675_v1 = vadd.f32 %v515_v59, %v195_v58  ;;  %v197_v3 = vmul.f32 0.995, %v37_v63  ;;  %v198_v6 = vmul.f32 0.995, %v38_v4 }
  0x21   :  { %834 = vst [vmem:[%s2432_s2 + $0xb8] sm:$0xff] %v674_v61  ;;  %v517_v5 = vmul.f32 0.005, %v357_v0  ;;  %v358_v7 = vld [vmem:[%s2431_s1 + $0xd8] sm:$0xff]  ;;  %v676_v8 = vadd.f32 %v516_v2, %v196_v60  ;;  %v359_v11 = vld [vmem:[%s2431_s1 + $0xe0] sm:$0xff]  ;;  %v40_v12 = vld [vmem:[%s2430_s0 + $0xe8] sm:$0xff] }
  0x22   :  { %835 = vst [vmem:[%s2432_s2 + $0xc0] sm:$0xff] %v675_v1  ;;  %v518_v9 = vmul.f32 0.005, %v358_v7  ;;  %v199_v14 = vmul.f32 0.995, %v39_v10  ;;  %v360_v18 = vld [vmem:[%s2431_s1 + $0xe8] sm:$0xff] }
  0x23   :  { %v677_v13 = vadd.f32 %v517_v5, %v197_v3  ;;  %v519_v15 = vmul.f32 0.005, %v359_v11  ;;  %v200_v16 = vmul.f32 0.995, %v40_v12  ;;  %836 = vst [vmem:[%s2432_s2 + $0xc8] sm:$0xff] %v676_v8  ;;  %v41_v19 = vld [vmem:[%s2430_s0 + $0xf0] sm:$0xff] }
  0x24   :  { %v678_v17 = vadd.f32 %v518_v9, %v198_v6  ;;  %v361_v20 = vld [vmem:[%s2431_s1 + $0xf0] sm:$0xff]  ;;  %v520_v22 = vmul.f32 0.005, %v360_v18  ;;  %v201_v23 = vmul.f32 0.995, %v41_v19  ;;  %v42_v24 = vld [vmem:[%s2430_s0 + $0xf8] sm:$0xff] }
  0x25   :  { %837 = vst [vmem:[%s2432_s2 + $0xd0] sm:$0xff] %v677_v13  ;;  %v679_v21 = vadd.f32 %v519_v15, %v199_v14  ;;  %v521_v25 = vmul.f32 0.005, %v361_v20  ;;  %v202_v26 = vmul.f32 0.995, %v42_v24  ;;  %v362_v27 = vld [vmem:[%s2431_s1 + $0xf8] sm:$0xff] }
  0x26   :  { %838 = vst [vmem:[%s2432_s2 + $0xd8] sm:$0xff] %v678_v17  ;;  %v680_v28 = vadd.f32 %v520_v22, %v200_v16  ;;  %v522_v29 = vmul.f32 0.005, %v362_v27  ;;  %v43_v30 = vld [vmem:[%s2430_s0 + $0x100] sm:$0xff]  ;;  %v44_v32 = vld [vmem:[%s2430_s0 + $0x108] sm:$0xff]  ;;  %v45_v39 = vld [vmem:[%s2430_s0 + $0x110] sm:$0xff] }
  0x27   :  { %839 = vst [vmem:[%s2432_s2 + $0xe0] sm:$0xff] %v679_v21  ;;  %v363_v31 = vld [vmem:[%s2431_s1 + $0x100] sm:$0xff]  ;;  %v681_v33 = vadd.f32 %v521_v25, %v201_v23  ;;  %v203_v34 = vmul.f32 0.995, %v43_v30  ;;  %v204_v36 = vmul.f32 0.995, %v44_v32 }
  0x28   :  { %v523_v35 = vmul.f32 0.005, %v363_v31  ;;  %840 = vst [vmem:[%s2432_s2 + $0xe8] sm:$0xff] %v680_v28  ;;  %v682_v37 = vadd.f32 %v522_v29, %v202_v26  ;;  %v364_v38 = vld [vmem:[%s2431_s1 + $0x108] sm:$0xff]  ;;  %v365_v40 = vld [vmem:[%s2431_s1 + $0x110] sm:$0xff]  ;;  %v46_v44 = vld [vmem:[%s2430_s0 + $0x118] sm:$0xff] }
  0x29   :  { %841 = vst [vmem:[%s2432_s2 + $0xf0] sm:$0xff] %v681_v33  ;;  %v524_v42 = vmul.f32 0.005, %v364_v38  ;;  %v205_v43 = vmul.f32 0.995, %v45_v39  ;;  %v366_v47 = vld [vmem:[%s2431_s1 + $0x118] sm:$0xff] }
  0x2a   :  { %v683_v41 = vadd.f32 %v523_v35, %v203_v34  ;;  %842 = vst [vmem:[%s2432_s2 + $0xf8] sm:$0xff] %v682_v37  ;;  %v525_v45 = vmul.f32 0.005, %v365_v40  ;;  %v206_v46 = vmul.f32 0.995, %v46_v44  ;;  %v47_v50 = vld [vmem:[%s2430_s0 + $0x120] sm:$0xff] }
  0x2b   :  { %v684_v48 = vadd.f32 %v524_v42, %v204_v36  ;;  %v526_v49 = vmul.f32 0.005, %v366_v47  ;;  %v367_v51 = vld [vmem:[%s2431_s1 + $0x120] sm:$0xff]  ;;  %v48_v52 = vld [vmem:[%s2430_s0 + $0x128] sm:$0xff]  ;;  %v207_v54 = vmul.f32 0.995, %v47_v50 }
  0x2c   :  { %843 = vst [vmem:[%s2432_s2 + $0x100] sm:$0xff] %v683_v41  ;;  %v685_v53 = vadd.f32 %v525_v45, %v205_v43  ;;  %v527_v55 = vmul.f32 0.005, %v367_v51  ;;  %v208_v56 = vmul.f32 0.995, %v48_v52  ;;  %v368_v58 = vld [vmem:[%s2431_s1 + $0x128] sm:$0xff] }
  0x2d   :  { %844 = vst [vmem:[%s2432_s2 + $0x108] sm:$0xff] %v684_v48  ;;  %v686_v57 = vadd.f32 %v526_v49, %v206_v46  ;;  %v49_v59 = vld [vmem:[%s2430_s0 + $0x130] sm:$0xff]  ;;  %v528_v62 = vmul.f32 0.005, %v368_v58  ;;  %v50_v0 = vld [vmem:[%s2430_s0 + $0x138] sm:$0xff]  ;;  %v51_v6 = vld [vmem:[%s2430_s0 + $0x140] sm:$0xff] }
  0x2e   :  { %v369_v60 = vld [vmem:[%s2431_s1 + $0x130] sm:$0xff]  ;;  %845 = vst [vmem:[%s2432_s2 + $0x110] sm:$0xff] %v685_v53  ;;  %v687_v61 = vadd.f32 %v527_v55, %v207_v54  ;;  %v209_v63 = vmul.f32 0.995, %v49_v59  ;;  %v210_v2 = vmul.f32 0.995, %v50_v0 }
  0x2f   :  { %846 = vst [vmem:[%s2432_s2 + $0x118] sm:$0xff] %v686_v57  ;;  %v529_v1 = vmul.f32 0.005, %v369_v60  ;;  %v370_v3 = vld [vmem:[%s2431_s1 + $0x138] sm:$0xff]  ;;  %v688_v4 = vadd.f32 %v528_v62, %v208_v56  ;;  %v371_v7 = vld [vmem:[%s2431_s1 + $0x140] sm:$0xff]  ;;  %v52_v8 = vld [vmem:[%s2430_s0 + $0x148] sm:$0xff] }
  0x30   :  { %847 = vst [vmem:[%s2432_s2 + $0x120] sm:$0xff] %v687_v61  ;;  %v530_v5 = vmul.f32 0.005, %v370_v3  ;;  %v211_v10 = vmul.f32 0.995, %v51_v6  ;;  %v372_v14 = vld [vmem:[%s2431_s1 + $0x148] sm:$0xff] }
  0x31   :  { %v689_v9 = vadd.f32 %v529_v1, %v209_v63  ;;  %v531_v11 = vmul.f32 0.005, %v371_v7  ;;  %v212_v12 = vmul.f32 0.995, %v52_v8  ;;  %848 = vst [vmem:[%s2432_s2 + $0x128] sm:$0xff] %v688_v4  ;;  %v53_v15 = vld [vmem:[%s2430_s0 + $0x150] sm:$0xff] }
  0x32   :  { %v690_v13 = vadd.f32 %v530_v5, %v210_v2  ;;  %v373_v16 = vld [vmem:[%s2431_s1 + $0x150] sm:$0xff]  ;;  %v532_v18 = vmul.f32 0.005, %v372_v14  ;;  %v213_v19 = vmul.f32 0.995, %v53_v15  ;;  %v54_v20 = vld [vmem:[%s2430_s0 + $0x158] sm:$0xff] }
  0x33   :  { %849 = vst [vmem:[%s2432_s2 + $0x130] sm:$0xff] %v689_v9  ;;  %v691_v17 = vadd.f32 %v531_v11, %v211_v10  ;;  %v533_v21 = vmul.f32 0.005, %v373_v16  ;;  %v214_v22 = vmul.f32 0.995, %v54_v20  ;;  %v374_v23 = vld [vmem:[%s2431_s1 + $0x158] sm:$0xff] }
  0x34   :  { %850 = vst [vmem:[%s2432_s2 + $0x138] sm:$0xff] %v690_v13  ;;  %v692_v24 = vadd.f32 %v532_v18, %v212_v12  ;;  %v534_v25 = vmul.f32 0.005, %v374_v23  ;;  %v55_v26 = vld [vmem:[%s2430_s0 + $0x160] sm:$0xff]  ;;  %v56_v28 = vld [vmem:[%s2430_s0 + $0x168] sm:$0xff]  ;;  %v57_v35 = vld [vmem:[%s2430_s0 + $0x170] sm:$0xff] }
  0x35   :  { %851 = vst [vmem:[%s2432_s2 + $0x140] sm:$0xff] %v691_v17  ;;  %v375_v27 = vld [vmem:[%s2431_s1 + $0x160] sm:$0xff]  ;;  %v693_v29 = vadd.f32 %v533_v21, %v213_v19  ;;  %v215_v30 = vmul.f32 0.995, %v55_v26  ;;  %v216_v32 = vmul.f32 0.995, %v56_v28 }
  0x36   :  { %v535_v31 = vmul.f32 0.005, %v375_v27  ;;  %852 = vst [vmem:[%s2432_s2 + $0x148] sm:$0xff] %v692_v24  ;;  %v694_v33 = vadd.f32 %v534_v25, %v214_v22  ;;  %v376_v34 = vld [vmem:[%s2431_s1 + $0x168] sm:$0xff]  ;;  %v377_v36 = vld [vmem:[%s2431_s1 + $0x170] sm:$0xff]  ;;  %v58_v40 = vld [vmem:[%s2430_s0 + $0x178] sm:$0xff] }
  0x37   :  { %853 = vst [vmem:[%s2432_s2 + $0x150] sm:$0xff] %v693_v29  ;;  %v536_v38 = vmul.f32 0.005, %v376_v34  ;;  %v217_v39 = vmul.f32 0.995, %v57_v35  ;;  %v378_v43 = vld [vmem:[%s2431_s1 + $0x178] sm:$0xff] }
  0x38   :  { %v695_v37 = vadd.f32 %v535_v31, %v215_v30  ;;  %854 = vst [vmem:[%s2432_s2 + $0x158] sm:$0xff] %v694_v33  ;;  %v537_v41 = vmul.f32 0.005, %v377_v36  ;;  %v218_v42 = vmul.f32 0.995, %v58_v40  ;;  %v59_v46 = vld [vmem:[%s2430_s0 + $0x180] sm:$0xff] }
  0x39   :  { %v696_v44 = vadd.f32 %v536_v38, %v216_v32  ;;  %v538_v45 = vmul.f32 0.005, %v378_v43  ;;  %v379_v47 = vld [vmem:[%s2431_s1 + $0x180] sm:$0xff]  ;;  %v60_v48 = vld [vmem:[%s2430_s0 + $0x188] sm:$0xff]  ;;  %v219_v50 = vmul.f32 0.995, %v59_v46 }
  0x3a   :  { %855 = vst [vmem:[%s2432_s2 + $0x160] sm:$0xff] %v695_v37  ;;  %v697_v49 = vadd.f32 %v537_v41, %v217_v39  ;;  %v539_v51 = vmul.f32 0.005, %v379_v47  ;;  %v220_v52 = vmul.f32 0.995, %v60_v48  ;;  %v380_v54 = vld [vmem:[%s2431_s1 + $0x188] sm:$0xff] }
  0x3b   :  { %856 = vst [vmem:[%s2432_s2 + $0x168] sm:$0xff] %v696_v44  ;;  %v698_v53 = vadd.f32 %v538_v45, %v218_v42  ;;  %v61_v55 = vld [vmem:[%s2430_s0 + $0x190] sm:$0xff]  ;;  %v540_v58 = vmul.f32 0.005, %v380_v54  ;;  %v62_v60 = vld [vmem:[%s2430_s0 + $0x198] sm:$0xff]  ;;  %v63_v2 = vld [vmem:[%s2430_s0 + $0x1a0] sm:$0xff] }
  0x3c   :  { %v381_v56 = vld [vmem:[%s2431_s1 + $0x190] sm:$0xff]  ;;  %857 = vst [vmem:[%s2432_s2 + $0x170] sm:$0xff] %v697_v49  ;;  %v699_v57 = vadd.f32 %v539_v51, %v219_v50  ;;  %v221_v59 = vmul.f32 0.995, %v61_v55  ;;  %v222_v62 = vmul.f32 0.995, %v62_v60 }
  0x3d   :  { %858 = vst [vmem:[%s2432_s2 + $0x178] sm:$0xff] %v698_v53  ;;  %v541_v61 = vmul.f32 0.005, %v381_v56  ;;  %v382_v63 = vld [vmem:[%s2431_s1 + $0x198] sm:$0xff]  ;;  %v700_v0 = vadd.f32 %v540_v58, %v220_v52  ;;  %v383_v3 = vld [vmem:[%s2431_s1 + $0x1a0] sm:$0xff]  ;;  %v64_v4 = vld [vmem:[%s2430_s0 + $0x1a8] sm:$0xff] }
  0x3e   :  { %859 = vst [vmem:[%s2432_s2 + $0x180] sm:$0xff] %v699_v57  ;;  %v542_v1 = vmul.f32 0.005, %v382_v63  ;;  %v223_v6 = vmul.f32 0.995, %v63_v2  ;;  %v384_v10 = vld [vmem:[%s2431_s1 + $0x1a8] sm:$0xff] }
  0x3f   :  { %v701_v5 = vadd.f32 %v541_v61, %v221_v59  ;;  %v543_v7 = vmul.f32 0.005, %v383_v3  ;;  %v224_v8 = vmul.f32 0.995, %v64_v4  ;;  %860 = vst [vmem:[%s2432_s2 + $0x188] sm:$0xff] %v700_v0  ;;  %v65_v11 = vld [vmem:[%s2430_s0 + $0x1b0] sm:$0xff] }
  0x40   :  { %v702_v9 = vadd.f32 %v542_v1, %v222_v62  ;;  %v385_v12 = vld [vmem:[%s2431_s1 + $0x1b0] sm:$0xff]  ;;  %v544_v14 = vmul.f32 0.005, %v384_v10  ;;  %v225_v15 = vmul.f32 0.995, %v65_v11  ;;  %v66_v16 = vld [vmem:[%s2430_s0 + $0x1b8] sm:$0xff] }
  0x41   :  { %861 = vst [vmem:[%s2432_s2 + $0x190] sm:$0xff] %v701_v5  ;;  %v703_v13 = vadd.f32 %v543_v7, %v223_v6  ;;  %v545_v17 = vmul.f32 0.005, %v385_v12  ;;  %v226_v18 = vmul.f32 0.995, %v66_v16  ;;  %v386_v19 = vld [vmem:[%s2431_s1 + $0x1b8] sm:$0xff] }
  0x42   :  { %862 = vst [vmem:[%s2432_s2 + $0x198] sm:$0xff] %v702_v9  ;;  %v704_v20 = vadd.f32 %v544_v14, %v224_v8  ;;  %v546_v21 = vmul.f32 0.005, %v386_v19  ;;  %v67_v22 = vld [vmem:[%s2430_s0 + $0x1c0] sm:$0xff]  ;;  %v68_v24 = vld [vmem:[%s2430_s0 + $0x1c8] sm:$0xff]  ;;  %v69_v31 = vld [vmem:[%s2430_s0 + $0x1d0] sm:$0xff] }
  0x43   :  { %863 = vst [vmem:[%s2432_s2 + $0x1a0] sm:$0xff] %v703_v13  ;;  %v387_v23 = vld [vmem:[%s2431_s1 + $0x1c0] sm:$0xff]  ;;  %v705_v25 = vadd.f32 %v545_v17, %v225_v15  ;;  %v227_v26 = vmul.f32 0.995, %v67_v22  ;;  %v228_v28 = vmul.f32 0.995, %v68_v24 }
  0x44   :  { %v547_v27 = vmul.f32 0.005, %v387_v23  ;;  %864 = vst [vmem:[%s2432_s2 + $0x1a8] sm:$0xff] %v704_v20  ;;  %v706_v29 = vadd.f32 %v546_v21, %v226_v18  ;;  %v388_v30 = vld [vmem:[%s2431_s1 + $0x1c8] sm:$0xff]  ;;  %v389_v32 = vld [vmem:[%s2431_s1 + $0x1d0] sm:$0xff]  ;;  %v70_v36 = vld [vmem:[%s2430_s0 + $0x1d8] sm:$0xff] }
  0x45   :  { %865 = vst [vmem:[%s2432_s2 + $0x1b0] sm:$0xff] %v705_v25  ;;  %v548_v34 = vmul.f32 0.005, %v388_v30  ;;  %v229_v35 = vmul.f32 0.995, %v69_v31  ;;  %v390_v39 = vld [vmem:[%s2431_s1 + $0x1d8] sm:$0xff] }
  0x46   :  { %v707_v33 = vadd.f32 %v547_v27, %v227_v26  ;;  %866 = vst [vmem:[%s2432_s2 + $0x1b8] sm:$0xff] %v706_v29  ;;  %v549_v37 = vmul.f32 0.005, %v389_v32  ;;  %v230_v38 = vmul.f32 0.995, %v70_v36  ;;  %v71_v42 = vld [vmem:[%s2430_s0 + $0x1e0] sm:$0xff] }
  0x47   :  { %v708_v40 = vadd.f32 %v548_v34, %v228_v28  ;;  %v550_v41 = vmul.f32 0.005, %v390_v39  ;;  %v391_v43 = vld [vmem:[%s2431_s1 + $0x1e0] sm:$0xff]  ;;  %v72_v44 = vld [vmem:[%s2430_s0 + $0x1e8] sm:$0xff]  ;;  %v231_v46 = vmul.f32 0.995, %v71_v42 }
  0x48   :  { %867 = vst [vmem:[%s2432_s2 + $0x1c0] sm:$0xff] %v707_v33  ;;  %v709_v45 = vadd.f32 %v549_v37, %v229_v35  ;;  %v551_v47 = vmul.f32 0.005, %v391_v43  ;;  %v232_v48 = vmul.f32 0.995, %v72_v44  ;;  %v392_v50 = vld [vmem:[%s2431_s1 + $0x1e8] sm:$0xff] }
  0x49   :  { %868 = vst [vmem:[%s2432_s2 + $0x1c8] sm:$0xff] %v708_v40  ;;  %v710_v49 = vadd.f32 %v550_v41, %v230_v38  ;;  %v73_v51 = vld [vmem:[%s2430_s0 + $0x1f0] sm:$0xff]  ;;  %v552_v54 = vmul.f32 0.005, %v392_v50  ;;  %v74_v56 = vld [vmem:[%s2430_s0 + $0x1f8] sm:$0xff]  ;;  %v75_v62 = vld [vmem:[%s2430_s0 + $0x200] sm:$0xff] }
  0x4a   :  { %v393_v52 = vld [vmem:[%s2431_s1 + $0x1f0] sm:$0xff]  ;;  %869 = vst [vmem:[%s2432_s2 + $0x1d0] sm:$0xff] %v709_v45  ;;  %v711_v53 = vadd.f32 %v551_v47, %v231_v46  ;;  %v233_v55 = vmul.f32 0.995, %v73_v51  ;;  %v234_v58 = vmul.f32 0.995, %v74_v56 }
  0x4b   :  { %870 = vst [vmem:[%s2432_s2 + $0x1d8] sm:$0xff] %v710_v49  ;;  %v553_v57 = vmul.f32 0.005, %v393_v52  ;;  %v394_v59 = vld [vmem:[%s2431_s1 + $0x1f8] sm:$0xff]  ;;  %v712_v60 = vadd.f32 %v552_v54, %v232_v48  ;;  %v395_v63 = vld [vmem:[%s2431_s1 + $0x200] sm:$0xff]  ;;  %v76_v0 = vld [vmem:[%s2430_s0 + $0x208] sm:$0xff] }
  0x4c   :  { %871 = vst [vmem:[%s2432_s2 + $0x1e0] sm:$0xff] %v711_v53  ;;  %v554_v61 = vmul.f32 0.005, %v394_v59  ;;  %v235_v2 = vmul.f32 0.995, %v75_v62  ;;  %v396_v6 = vld [vmem:[%s2431_s1 + $0x208] sm:$0xff] }
  0x4d   :  { %v713_v1 = vadd.f32 %v553_v57, %v233_v55  ;;  %v555_v3 = vmul.f32 0.005, %v395_v63  ;;  %v236_v4 = vmul.f32 0.995, %v76_v0  ;;  %872 = vst [vmem:[%s2432_s2 + $0x1e8] sm:$0xff] %v712_v60  ;;  %v77_v7 = vld [vmem:[%s2430_s0 + $0x210] sm:$0xff] }
  0x4e   :  { %v714_v5 = vadd.f32 %v554_v61, %v234_v58  ;;  %v397_v8 = vld [vmem:[%s2431_s1 + $0x210] sm:$0xff]  ;;  %v556_v10 = vmul.f32 0.005, %v396_v6  ;;  %v237_v11 = vmul.f32 0.995, %v77_v7  ;;  %v78_v12 = vld [vmem:[%s2430_s0 + $0x218] sm:$0xff] }
  0x4f   :  { %873 = vst [vmem:[%s2432_s2 + $0x1f0] sm:$0xff] %v713_v1  ;;  %v715_v9 = vadd.f32 %v555_v3, %v235_v2  ;;  %v557_v13 = vmul.f32 0.005, %v397_v8  ;;  %v238_v14 = vmul.f32 0.995, %v78_v12  ;;  %v398_v15 = vld [vmem:[%s2431_s1 + $0x218] sm:$0xff] }
  0x50   :  { %874 = vst [vmem:[%s2432_s2 + $0x1f8] sm:$0xff] %v714_v5  ;;  %v716_v16 = vadd.f32 %v556_v10, %v236_v4  ;;  %v558_v17 = vmul.f32 0.005, %v398_v15  ;;  %v79_v18 = vld [vmem:[%s2430_s0 + $0x220] sm:$0xff]  ;;  %v80_v20 = vld [vmem:[%s2430_s0 + $0x228] sm:$0xff]  ;;  %v81_v27 = vld [vmem:[%s2430_s0 + $0x230] sm:$0xff] }
  0x51   :  { %875 = vst [vmem:[%s2432_s2 + $0x200] sm:$0xff] %v715_v9  ;;  %v399_v19 = vld [vmem:[%s2431_s1 + $0x220] sm:$0xff]  ;;  %v717_v21 = vadd.f32 %v557_v13, %v237_v11  ;;  %v239_v22 = vmul.f32 0.995, %v79_v18  ;;  %v240_v24 = vmul.f32 0.995, %v80_v20 }
  0x52   :  { %v559_v23 = vmul.f32 0.005, %v399_v19  ;;  %876 = vst [vmem:[%s2432_s2 + $0x208] sm:$0xff] %v716_v16  ;;  %v718_v25 = vadd.f32 %v558_v17, %v238_v14  ;;  %v400_v26 = vld [vmem:[%s2431_s1 + $0x228] sm:$0xff]  ;;  %v401_v28 = vld [vmem:[%s2431_s1 + $0x230] sm:$0xff]  ;;  %v82_v32 = vld [vmem:[%s2430_s0 + $0x238] sm:$0xff] }
  0x53   :  { %877 = vst [vmem:[%s2432_s2 + $0x210] sm:$0xff] %v717_v21  ;;  %v560_v30 = vmul.f32 0.005, %v400_v26  ;;  %v241_v31 = vmul.f32 0.995, %v81_v27  ;;  %v402_v35 = vld [vmem:[%s2431_s1 + $0x238] sm:$0xff] }
  0x54   :  { %v719_v29 = vadd.f32 %v559_v23, %v239_v22  ;;  %878 = vst [vmem:[%s2432_s2 + $0x218] sm:$0xff] %v718_v25  ;;  %v561_v33 = vmul.f32 0.005, %v401_v28  ;;  %v242_v34 = vmul.f32 0.995, %v82_v32  ;;  %v83_v38 = vld [vmem:[%s2430_s0 + $0x240] sm:$0xff] }
  0x55   :  { %v720_v36 = vadd.f32 %v560_v30, %v240_v24  ;;  %v562_v37 = vmul.f32 0.005, %v402_v35  ;;  %v403_v39 = vld [vmem:[%s2431_s1 + $0x240] sm:$0xff]  ;;  %v84_v40 = vld [vmem:[%s2430_s0 + $0x248] sm:$0xff]  ;;  %v243_v42 = vmul.f32 0.995, %v83_v38 }
  0x56   :  { %879 = vst [vmem:[%s2432_s2 + $0x220] sm:$0xff] %v719_v29  ;;  %v721_v41 = vadd.f32 %v561_v33, %v241_v31  ;;  %v563_v43 = vmul.f32 0.005, %v403_v39  ;;  %v244_v44 = vmul.f32 0.995, %v84_v40  ;;  %v404_v46 = vld [vmem:[%s2431_s1 + $0x248] sm:$0xff] }
  0x57   :  { %880 = vst [vmem:[%s2432_s2 + $0x228] sm:$0xff] %v720_v36  ;;  %v722_v45 = vadd.f32 %v562_v37, %v242_v34  ;;  %v85_v47 = vld [vmem:[%s2430_s0 + $0x250] sm:$0xff]  ;;  %v564_v50 = vmul.f32 0.005, %v404_v46  ;;  %v86_v52 = vld [vmem:[%s2430_s0 + $0x258] sm:$0xff]  ;;  %v87_v58 = vld [vmem:[%s2430_s0 + $0x260] sm:$0xff] }
  0x58   :  { %v405_v48 = vld [vmem:[%s2431_s1 + $0x250] sm:$0xff]  ;;  %881 = vst [vmem:[%s2432_s2 + $0x230] sm:$0xff] %v721_v41  ;;  %v723_v49 = vadd.f32 %v563_v43, %v243_v42  ;;  %v245_v51 = vmul.f32 0.995, %v85_v47  ;;  %v246_v54 = vmul.f32 0.995, %v86_v52 }
  0x59   :  { %882 = vst [vmem:[%s2432_s2 + $0x238] sm:$0xff] %v722_v45  ;;  %v565_v53 = vmul.f32 0.005, %v405_v48  ;;  %v406_v55 = vld [vmem:[%s2431_s1 + $0x258] sm:$0xff]  ;;  %v724_v56 = vadd.f32 %v564_v50, %v244_v44  ;;  %v407_v59 = vld [vmem:[%s2431_s1 + $0x260] sm:$0xff]  ;;  %v88_v60 = vld [vmem:[%s2430_s0 + $0x268] sm:$0xff] }
  0x5a   :  { %883 = vst [vmem:[%s2432_s2 + $0x240] sm:$0xff] %v723_v49  ;;  %v566_v57 = vmul.f32 0.005, %v406_v55  ;;  %v247_v62 = vmul.f32 0.995, %v87_v58  ;;  %v408_v2 = vld [vmem:[%s2431_s1 + $0x268] sm:$0xff] }
  0x5b   :  { %v725_v61 = vadd.f32 %v565_v53, %v245_v51  ;;  %v567_v63 = vmul.f32 0.005, %v407_v59  ;;  %v248_v0 = vmul.f32 0.995, %v88_v60  ;;  %884 = vst [vmem:[%s2432_s2 + $0x248] sm:$0xff] %v724_v56  ;;  %v89_v3 = vld [vmem:[%s2430_s0 + $0x270] sm:$0xff] }
  0x5c   :  { %v726_v1 = vadd.f32 %v566_v57, %v246_v54  ;;  %v409_v4 = vld [vmem:[%s2431_s1 + $0x270] sm:$0xff]  ;;  %v568_v6 = vmul.f32 0.005, %v408_v2  ;;  %v249_v7 = vmul.f32 0.995, %v89_v3  ;;  %v90_v8 = vld [vmem:[%s2430_s0 + $0x278] sm:$0xff] }
  0x5d   :  { %885 = vst [vmem:[%s2432_s2 + $0x250] sm:$0xff] %v725_v61  ;;  %v727_v5 = vadd.f32 %v567_v63, %v247_v62  ;;  %v569_v9 = vmul.f32 0.005, %v409_v4  ;;  %v250_v10 = vmul.f32 0.995, %v90_v8  ;;  %v410_v11 = vld [vmem:[%s2431_s1 + $0x278] sm:$0xff] }
  0x5e   :  { %886 = vst [vmem:[%s2432_s2 + $0x258] sm:$0xff] %v726_v1  ;;  %v728_v12 = vadd.f32 %v568_v6, %v248_v0  ;;  %v570_v13 = vmul.f32 0.005, %v410_v11  ;;  %v91_v14 = vld [vmem:[%s2430_s0 + $0x280] sm:$0xff]  ;;  %v92_v16 = vld [vmem:[%s2430_s0 + $0x288] sm:$0xff]  ;;  %v93_v23 = vld [vmem:[%s2430_s0 + $0x290] sm:$0xff] }
  0x5f   :  { %887 = vst [vmem:[%s2432_s2 + $0x260] sm:$0xff] %v727_v5  ;;  %v411_v15 = vld [vmem:[%s2431_s1 + $0x280] sm:$0xff]  ;;  %v729_v17 = vadd.f32 %v569_v9, %v249_v7  ;;  %v251_v18 = vmul.f32 0.995, %v91_v14  ;;  %v252_v20 = vmul.f32 0.995, %v92_v16 }
  0x60   :  { %v571_v19 = vmul.f32 0.005, %v411_v15  ;;  %888 = vst [vmem:[%s2432_s2 + $0x268] sm:$0xff] %v728_v12  ;;  %v730_v21 = vadd.f32 %v570_v13, %v250_v10  ;;  %v412_v22 = vld [vmem:[%s2431_s1 + $0x288] sm:$0xff]  ;;  %v413_v24 = vld [vmem:[%s2431_s1 + $0x290] sm:$0xff]  ;;  %v94_v28 = vld [vmem:[%s2430_s0 + $0x298] sm:$0xff] }
  0x61   :  { %889 = vst [vmem:[%s2432_s2 + $0x270] sm:$0xff] %v729_v17  ;;  %v572_v26 = vmul.f32 0.005, %v412_v22  ;;  %v253_v27 = vmul.f32 0.995, %v93_v23  ;;  %v414_v31 = vld [vmem:[%s2431_s1 + $0x298] sm:$0xff] }
  0x62   :  { %v731_v25 = vadd.f32 %v571_v19, %v251_v18  ;;  %890 = vst [vmem:[%s2432_s2 + $0x278] sm:$0xff] %v730_v21  ;;  %v573_v29 = vmul.f32 0.005, %v413_v24  ;;  %v254_v30 = vmul.f32 0.995, %v94_v28  ;;  %v95_v34 = vld [vmem:[%s2430_s0 + $0x2a0] sm:$0xff] }
  0x63   :  { %v732_v32 = vadd.f32 %v572_v26, %v252_v20  ;;  %v574_v33 = vmul.f32 0.005, %v414_v31  ;;  %v415_v35 = vld [vmem:[%s2431_s1 + $0x2a0] sm:$0xff]  ;;  %v96_v36 = vld [vmem:[%s2430_s0 + $0x2a8] sm:$0xff]  ;;  %v255_v38 = vmul.f32 0.995, %v95_v34 }
  0x64   :  { %891 = vst [vmem:[%s2432_s2 + $0x280] sm:$0xff] %v731_v25  ;;  %v733_v37 = vadd.f32 %v573_v29, %v253_v27  ;;  %v575_v39 = vmul.f32 0.005, %v415_v35  ;;  %v256_v40 = vmul.f32 0.995, %v96_v36  ;;  %v416_v42 = vld [vmem:[%s2431_s1 + $0x2a8] sm:$0xff] }
  0x65   :  { %892 = vst [vmem:[%s2432_s2 + $0x288] sm:$0xff] %v732_v32  ;;  %v734_v41 = vadd.f32 %v574_v33, %v254_v30  ;;  %v97_v43 = vld [vmem:[%s2430_s0 + $0x2b0] sm:$0xff]  ;;  %v576_v46 = vmul.f32 0.005, %v416_v42  ;;  %v98_v48 = vld [vmem:[%s2430_s0 + $0x2b8] sm:$0xff]  ;;  %v99_v54 = vld [vmem:[%s2430_s0 + $0x2c0] sm:$0xff] }
  0x66   :  { %v417_v44 = vld [vmem:[%s2431_s1 + $0x2b0] sm:$0xff]  ;;  %893 = vst [vmem:[%s2432_s2 + $0x290] sm:$0xff] %v733_v37  ;;  %v735_v45 = vadd.f32 %v575_v39, %v255_v38  ;;  %v257_v47 = vmul.f32 0.995, %v97_v43  ;;  %v258_v50 = vmul.f32 0.995, %v98_v48 }
  0x67   :  { %894 = vst [vmem:[%s2432_s2 + $0x298] sm:$0xff] %v734_v41  ;;  %v577_v49 = vmul.f32 0.005, %v417_v44  ;;  %v418_v51 = vld [vmem:[%s2431_s1 + $0x2b8] sm:$0xff]  ;;  %v736_v52 = vadd.f32 %v576_v46, %v256_v40  ;;  %v419_v55 = vld [vmem:[%s2431_s1 + $0x2c0] sm:$0xff]  ;;  %v100_v56 = vld [vmem:[%s2430_s0 + $0x2c8] sm:$0xff] }
  0x68   :  { %895 = vst [vmem:[%s2432_s2 + $0x2a0] sm:$0xff] %v735_v45  ;;  %v578_v53 = vmul.f32 0.005, %v418_v51  ;;  %v259_v58 = vmul.f32 0.995, %v99_v54  ;;  %v420_v62 = vld [vmem:[%s2431_s1 + $0x2c8] sm:$0xff] }
  0x69   :  { %v737_v57 = vadd.f32 %v577_v49, %v257_v47  ;;  %v579_v59 = vmul.f32 0.005, %v419_v55  ;;  %v260_v60 = vmul.f32 0.995, %v100_v56  ;;  %896 = vst [vmem:[%s2432_s2 + $0x2a8] sm:$0xff] %v736_v52  ;;  %v101_v63 = vld [vmem:[%s2430_s0 + $0x2d0] sm:$0xff] }
  0x6a   :  { %v738_v61 = vadd.f32 %v578_v53, %v258_v50  ;;  %v421_v0 = vld [vmem:[%s2431_s1 + $0x2d0] sm:$0xff]  ;;  %v580_v2 = vmul.f32 0.005, %v420_v62  ;;  %v261_v3 = vmul.f32 0.995, %v101_v63  ;;  %v102_v4 = vld [vmem:[%s2430_s0 + $0x2d8] sm:$0xff] }
  0x6b   :  { %897 = vst [vmem:[%s2432_s2 + $0x2b0] sm:$0xff] %v737_v57  ;;  %v739_v1 = vadd.f32 %v579_v59, %v259_v58  ;;  %v581_v5 = vmul.f32 0.005, %v421_v0  ;;  %v262_v6 = vmul.f32 0.995, %v102_v4  ;;  %v422_v7 = vld [vmem:[%s2431_s1 + $0x2d8] sm:$0xff] }
  0x6c   :  { %898 = vst [vmem:[%s2432_s2 + $0x2b8] sm:$0xff] %v738_v61  ;;  %v740_v8 = vadd.f32 %v580_v2, %v260_v60  ;;  %v582_v9 = vmul.f32 0.005, %v422_v7  ;;  %v103_v10 = vld [vmem:[%s2430_s0 + $0x2e0] sm:$0xff]  ;;  %v104_v12 = vld [vmem:[%s2430_s0 + $0x2e8] sm:$0xff]  ;;  %v105_v19 = vld [vmem:[%s2430_s0 + $0x2f0] sm:$0xff] }
  0x6d   :  { %899 = vst [vmem:[%s2432_s2 + $0x2c0] sm:$0xff] %v739_v1  ;;  %v423_v11 = vld [vmem:[%s2431_s1 + $0x2e0] sm:$0xff]  ;;  %v741_v13 = vadd.f32 %v581_v5, %v261_v3  ;;  %v263_v14 = vmul.f32 0.995, %v103_v10  ;;  %v264_v16 = vmul.f32 0.995, %v104_v12 }
  0x6e   :  { %v583_v15 = vmul.f32 0.005, %v423_v11  ;;  %900 = vst [vmem:[%s2432_s2 + $0x2c8] sm:$0xff] %v740_v8  ;;  %v742_v17 = vadd.f32 %v582_v9, %v262_v6  ;;  %v424_v18 = vld [vmem:[%s2431_s1 + $0x2e8] sm:$0xff]  ;;  %v425_v20 = vld [vmem:[%s2431_s1 + $0x2f0] sm:$0xff]  ;;  %v106_v24 = vld [vmem:[%s2430_s0 + $0x2f8] sm:$0xff] }
  0x6f   :  { %901 = vst [vmem:[%s2432_s2 + $0x2d0] sm:$0xff] %v741_v13  ;;  %v584_v22 = vmul.f32 0.005, %v424_v18  ;;  %v265_v23 = vmul.f32 0.995, %v105_v19  ;;  %v426_v27 = vld [vmem:[%s2431_s1 + $0x2f8] sm:$0xff] }
  0x70   :  { %v743_v21 = vadd.f32 %v583_v15, %v263_v14  ;;  %902 = vst [vmem:[%s2432_s2 + $0x2d8] sm:$0xff] %v742_v17  ;;  %v585_v25 = vmul.f32 0.005, %v425_v20  ;;  %v266_v26 = vmul.f32 0.995, %v106_v24  ;;  %v107_v30 = vld [vmem:[%s2430_s0 + $0x300] sm:$0xff] }
  0x71   :  { %v744_v28 = vadd.f32 %v584_v22, %v264_v16  ;;  %v586_v29 = vmul.f32 0.005, %v426_v27  ;;  %v427_v31 = vld [vmem:[%s2431_s1 + $0x300] sm:$0xff]  ;;  %v108_v32 = vld [vmem:[%s2430_s0 + $0x308] sm:$0xff]  ;;  %v267_v34 = vmul.f32 0.995, %v107_v30 }
  0x72   :  { %903 = vst [vmem:[%s2432_s2 + $0x2e0] sm:$0xff] %v743_v21  ;;  %v745_v33 = vadd.f32 %v585_v25, %v265_v23  ;;  %v587_v35 = vmul.f32 0.005, %v427_v31  ;;  %v268_v36 = vmul.f32 0.995, %v108_v32  ;;  %v428_v38 = vld [vmem:[%s2431_s1 + $0x308] sm:$0xff] }
  0x73   :  { %904 = vst [vmem:[%s2432_s2 + $0x2e8] sm:$0xff] %v744_v28  ;;  %v746_v37 = vadd.f32 %v586_v29, %v266_v26  ;;  %v109_v39 = vld [vmem:[%s2430_s0 + $0x310] sm:$0xff]  ;;  %v588_v42 = vmul.f32 0.005, %v428_v38  ;;  %v110_v44 = vld [vmem:[%s2430_s0 + $0x318] sm:$0xff]  ;;  %v111_v50 = vld [vmem:[%s2430_s0 + $0x320] sm:$0xff] }
  0x74   :  { %v429_v40 = vld [vmem:[%s2431_s1 + $0x310] sm:$0xff]  ;;  %905 = vst [vmem:[%s2432_s2 + $0x2f0] sm:$0xff] %v745_v33  ;;  %v747_v41 = vadd.f32 %v587_v35, %v267_v34  ;;  %v269_v43 = vmul.f32 0.995, %v109_v39  ;;  %v270_v46 = vmul.f32 0.995, %v110_v44 }
  0x75   :  { %906 = vst [vmem:[%s2432_s2 + $0x2f8] sm:$0xff] %v746_v37  ;;  %v589_v45 = vmul.f32 0.005, %v429_v40  ;;  %v430_v47 = vld [vmem:[%s2431_s1 + $0x318] sm:$0xff]  ;;  %v748_v48 = vadd.f32 %v588_v42, %v268_v36  ;;  %v431_v51 = vld [vmem:[%s2431_s1 + $0x320] sm:$0xff]  ;;  %v112_v52 = vld [vmem:[%s2430_s0 + $0x328] sm:$0xff] }
  0x76   :  { %907 = vst [vmem:[%s2432_s2 + $0x300] sm:$0xff] %v747_v41  ;;  %v590_v49 = vmul.f32 0.005, %v430_v47  ;;  %v271_v54 = vmul.f32 0.995, %v111_v50  ;;  %v432_v58 = vld [vmem:[%s2431_s1 + $0x328] sm:$0xff] }
  0x77   :  { %v749_v53 = vadd.f32 %v589_v45, %v269_v43  ;;  %v591_v55 = vmul.f32 0.005, %v431_v51  ;;  %v272_v56 = vmul.f32 0.995, %v112_v52  ;;  %908 = vst [vmem:[%s2432_s2 + $0x308] sm:$0xff] %v748_v48  ;;  %v113_v59 = vld [vmem:[%s2430_s0 + $0x330] sm:$0xff] }
  0x78   :  { %v750_v57 = vadd.f32 %v590_v49, %v270_v46  ;;  %v433_v60 = vld [vmem:[%s2431_s1 + $0x330] sm:$0xff]  ;;  %v592_v62 = vmul.f32 0.005, %v432_v58  ;;  %v273_v63 = vmul.f32 0.995, %v113_v59  ;;  %v114_v0 = vld [vmem:[%s2430_s0 + $0x338] sm:$0xff] }
  0x79   :  { %909 = vst [vmem:[%s2432_s2 + $0x310] sm:$0xff] %v749_v53  ;;  %v751_v61 = vadd.f32 %v591_v55, %v271_v54  ;;  %v593_v1 = vmul.f32 0.005, %v433_v60  ;;  %v274_v2 = vmul.f32 0.995, %v114_v0  ;;  %v434_v3 = vld [vmem:[%s2431_s1 + $0x338] sm:$0xff] }
  0x7a   :  { %910 = vst [vmem:[%s2432_s2 + $0x318] sm:$0xff] %v750_v57  ;;  %v752_v4 = vadd.f32 %v592_v62, %v272_v56  ;;  %v594_v5 = vmul.f32 0.005, %v434_v3  ;;  %v115_v6 = vld [vmem:[%s2430_s0 + $0x340] sm:$0xff]  ;;  %v116_v8 = vld [vmem:[%s2430_s0 + $0x348] sm:$0xff]  ;;  %v117_v15 = vld [vmem:[%s2430_s0 + $0x350] sm:$0xff] }
  0x7b   :  { %911 = vst [vmem:[%s2432_s2 + $0x320] sm:$0xff] %v751_v61  ;;  %v435_v7 = vld [vmem:[%s2431_s1 + $0x340] sm:$0xff]  ;;  %v753_v9 = vadd.f32 %v593_v1, %v273_v63  ;;  %v275_v10 = vmul.f32 0.995, %v115_v6  ;;  %v276_v12 = vmul.f32 0.995, %v116_v8 }
  0x7c   :  { %v595_v11 = vmul.f32 0.005, %v435_v7  ;;  %912 = vst [vmem:[%s2432_s2 + $0x328] sm:$0xff] %v752_v4  ;;  %v754_v13 = vadd.f32 %v594_v5, %v274_v2  ;;  %v436_v14 = vld [vmem:[%s2431_s1 + $0x348] sm:$0xff]  ;;  %v437_v16 = vld [vmem:[%s2431_s1 + $0x350] sm:$0xff]  ;;  %v118_v20 = vld [vmem:[%s2430_s0 + $0x358] sm:$0xff] }
  0x7d   :  { %913 = vst [vmem:[%s2432_s2 + $0x330] sm:$0xff] %v753_v9  ;;  %v596_v18 = vmul.f32 0.005, %v436_v14  ;;  %v277_v19 = vmul.f32 0.995, %v117_v15  ;;  %v438_v23 = vld [vmem:[%s2431_s1 + $0x358] sm:$0xff] }
  0x7e   :  { %v755_v17 = vadd.f32 %v595_v11, %v275_v10  ;;  %914 = vst [vmem:[%s2432_s2 + $0x338] sm:$0xff] %v754_v13  ;;  %v597_v21 = vmul.f32 0.005, %v437_v16  ;;  %v278_v22 = vmul.f32 0.995, %v118_v20  ;;  %v119_v26 = vld [vmem:[%s2430_s0 + $0x360] sm:$0xff] }
  0x7f   :  { %v756_v24 = vadd.f32 %v596_v18, %v276_v12  ;;  %v598_v25 = vmul.f32 0.005, %v438_v23  ;;  %v439_v27 = vld [vmem:[%s2431_s1 + $0x360] sm:$0xff]  ;;  %v120_v28 = vld [vmem:[%s2430_s0 + $0x368] sm:$0xff]  ;;  %v279_v30 = vmul.f32 0.995, %v119_v26 }
  0x80   :  { %915 = vst [vmem:[%s2432_s2 + $0x340] sm:$0xff] %v755_v17  ;;  %v757_v29 = vadd.f32 %v597_v21, %v277_v19  ;;  %v599_v31 = vmul.f32 0.005, %v439_v27  ;;  %v280_v32 = vmul.f32 0.995, %v120_v28  ;;  %v440_v34 = vld [vmem:[%s2431_s1 + $0x368] sm:$0xff] }
  0x81   :  { %916 = vst [vmem:[%s2432_s2 + $0x348] sm:$0xff] %v756_v24  ;;  %v758_v33 = vadd.f32 %v598_v25, %v278_v22  ;;  %v121_v35 = vld [vmem:[%s2430_s0 + $0x370] sm:$0xff]  ;;  %v600_v38 = vmul.f32 0.005, %v440_v34  ;;  %v122_v40 = vld [vmem:[%s2430_s0 + $0x378] sm:$0xff]  ;;  %v123_v46 = vld [vmem:[%s2430_s0 + $0x380] sm:$0xff] }
  0x82   :  { %v441_v36 = vld [vmem:[%s2431_s1 + $0x370] sm:$0xff]  ;;  %917 = vst [vmem:[%s2432_s2 + $0x350] sm:$0xff] %v757_v29  ;;  %v759_v37 = vadd.f32 %v599_v31, %v279_v30  ;;  %v281_v39 = vmul.f32 0.995, %v121_v35  ;;  %v282_v42 = vmul.f32 0.995, %v122_v40 }
  0x83   :  { %918 = vst [vmem:[%s2432_s2 + $0x358] sm:$0xff] %v758_v33  ;;  %v601_v41 = vmul.f32 0.005, %v441_v36  ;;  %v442_v43 = vld [vmem:[%s2431_s1 + $0x378] sm:$0xff]  ;;  %v760_v44 = vadd.f32 %v600_v38, %v280_v32  ;;  %v443_v47 = vld [vmem:[%s2431_s1 + $0x380] sm:$0xff]  ;;  %v124_v48 = vld [vmem:[%s2430_s0 + $0x388] sm:$0xff] }
  0x84   :  { %919 = vst [vmem:[%s2432_s2 + $0x360] sm:$0xff] %v759_v37  ;;  %v602_v45 = vmul.f32 0.005, %v442_v43  ;;  %v283_v50 = vmul.f32 0.995, %v123_v46  ;;  %v444_v54 = vld [vmem:[%s2431_s1 + $0x388] sm:$0xff] }
  0x85   :  { %v761_v49 = vadd.f32 %v601_v41, %v281_v39  ;;  %v603_v51 = vmul.f32 0.005, %v443_v47  ;;  %v284_v52 = vmul.f32 0.995, %v124_v48  ;;  %920 = vst [vmem:[%s2432_s2 + $0x368] sm:$0xff] %v760_v44  ;;  %v125_v55 = vld [vmem:[%s2430_s0 + $0x390] sm:$0xff] }
  0x86   :  { %v762_v53 = vadd.f32 %v602_v45, %v282_v42  ;;  %v445_v56 = vld [vmem:[%s2431_s1 + $0x390] sm:$0xff]  ;;  %v604_v58 = vmul.f32 0.005, %v444_v54  ;;  %v285_v59 = vmul.f32 0.995, %v125_v55  ;;  %v126_v60 = vld [vmem:[%s2430_s0 + $0x398] sm:$0xff] }
  0x87   :  { %921 = vst [vmem:[%s2432_s2 + $0x370] sm:$0xff] %v761_v49  ;;  %v763_v57 = vadd.f32 %v603_v51, %v283_v50  ;;  %v605_v61 = vmul.f32 0.005, %v445_v56  ;;  %v286_v62 = vmul.f32 0.995, %v126_v60  ;;  %v446_v63 = vld [vmem:[%s2431_s1 + $0x398] sm:$0xff] }
  0x88   :  { %922 = vst [vmem:[%s2432_s2 + $0x378] sm:$0xff] %v762_v53  ;;  %v764_v0 = vadd.f32 %v604_v58, %v284_v52  ;;  %v606_v1 = vmul.f32 0.005, %v446_v63  ;;  %v127_v2 = vld [vmem:[%s2430_s0 + $0x3a0] sm:$0xff]  ;;  %v128_v4 = vld [vmem:[%s2430_s0 + $0x3a8] sm:$0xff]  ;;  %v129_v11 = vld [vmem:[%s2430_s0 + $0x3b0] sm:$0xff] }
  0x89   :  { %923 = vst [vmem:[%s2432_s2 + $0x380] sm:$0xff] %v763_v57  ;;  %v447_v3 = vld [vmem:[%s2431_s1 + $0x3a0] sm:$0xff]  ;;  %v765_v5 = vadd.f32 %v605_v61, %v285_v59  ;;  %v287_v6 = vmul.f32 0.995, %v127_v2  ;;  %v288_v8 = vmul.f32 0.995, %v128_v4 }
  0x8a   :  { %v607_v7 = vmul.f32 0.005, %v447_v3  ;;  %924 = vst [vmem:[%s2432_s2 + $0x388] sm:$0xff] %v764_v0  ;;  %v766_v9 = vadd.f32 %v606_v1, %v286_v62  ;;  %v448_v10 = vld [vmem:[%s2431_s1 + $0x3a8] sm:$0xff]  ;;  %v449_v12 = vld [vmem:[%s2431_s1 + $0x3b0] sm:$0xff]  ;;  %v130_v16 = vld [vmem:[%s2430_s0 + $0x3b8] sm:$0xff] }
  0x8b   :  { %925 = vst [vmem:[%s2432_s2 + $0x390] sm:$0xff] %v765_v5  ;;  %v608_v14 = vmul.f32 0.005, %v448_v10  ;;  %v289_v15 = vmul.f32 0.995, %v129_v11  ;;  %v450_v19 = vld [vmem:[%s2431_s1 + $0x3b8] sm:$0xff] }
  0x8c   :  { %v767_v13 = vadd.f32 %v607_v7, %v287_v6  ;;  %926 = vst [vmem:[%s2432_s2 + $0x398] sm:$0xff] %v766_v9  ;;  %v609_v17 = vmul.f32 0.005, %v449_v12  ;;  %v290_v18 = vmul.f32 0.995, %v130_v16  ;;  %v131_v22 = vld [vmem:[%s2430_s0 + $0x3c0] sm:$0xff] }
  0x8d   :  { %v768_v20 = vadd.f32 %v608_v14, %v288_v8  ;;  %v610_v21 = vmul.f32 0.005, %v450_v19  ;;  %v451_v23 = vld [vmem:[%s2431_s1 + $0x3c0] sm:$0xff]  ;;  %v132_v24 = vld [vmem:[%s2430_s0 + $0x3c8] sm:$0xff]  ;;  %v291_v26 = vmul.f32 0.995, %v131_v22 }
  0x8e   :  { %927 = vst [vmem:[%s2432_s2 + $0x3a0] sm:$0xff] %v767_v13  ;;  %v769_v25 = vadd.f32 %v609_v17, %v289_v15  ;;  %v611_v27 = vmul.f32 0.005, %v451_v23  ;;  %v292_v28 = vmul.f32 0.995, %v132_v24  ;;  %v452_v30 = vld [vmem:[%s2431_s1 + $0x3c8] sm:$0xff] }
  0x8f   :  { %928 = vst [vmem:[%s2432_s2 + $0x3a8] sm:$0xff] %v768_v20  ;;  %v770_v29 = vadd.f32 %v610_v21, %v290_v18  ;;  %v133_v31 = vld [vmem:[%s2430_s0 + $0x3d0] sm:$0xff]  ;;  %v612_v34 = vmul.f32 0.005, %v452_v30  ;;  %v134_v36 = vld [vmem:[%s2430_s0 + $0x3d8] sm:$0xff]  ;;  %v135_v42 = vld [vmem:[%s2430_s0 + $0x3e0] sm:$0xff] }
  0x90   :  { %v453_v32 = vld [vmem:[%s2431_s1 + $0x3d0] sm:$0xff]  ;;  %929 = vst [vmem:[%s2432_s2 + $0x3b0] sm:$0xff] %v769_v25  ;;  %v771_v33 = vadd.f32 %v611_v27, %v291_v26  ;;  %v293_v35 = vmul.f32 0.995, %v133_v31  ;;  %v294_v38 = vmul.f32 0.995, %v134_v36 }
  0x91   :  { %930 = vst [vmem:[%s2432_s2 + $0x3b8] sm:$0xff] %v770_v29  ;;  %v613_v37 = vmul.f32 0.005, %v453_v32  ;;  %v454_v39 = vld [vmem:[%s2431_s1 + $0x3d8] sm:$0xff]  ;;  %v772_v40 = vadd.f32 %v612_v34, %v292_v28  ;;  %v455_v43 = vld [vmem:[%s2431_s1 + $0x3e0] sm:$0xff]  ;;  %v136_v44 = vld [vmem:[%s2430_s0 + $0x3e8] sm:$0xff] }
  0x92   :  { %931 = vst [vmem:[%s2432_s2 + $0x3c0] sm:$0xff] %v771_v33  ;;  %v614_v41 = vmul.f32 0.005, %v454_v39  ;;  %v295_v46 = vmul.f32 0.995, %v135_v42  ;;  %v456_v50 = vld [vmem:[%s2431_s1 + $0x3e8] sm:$0xff] }
  0x93   :  { %v773_v45 = vadd.f32 %v613_v37, %v293_v35  ;;  %v615_v47 = vmul.f32 0.005, %v455_v43  ;;  %v296_v48 = vmul.f32 0.995, %v136_v44  ;;  %932 = vst [vmem:[%s2432_s2 + $0x3c8] sm:$0xff] %v772_v40  ;;  %v137_v51 = vld [vmem:[%s2430_s0 + $0x3f0] sm:$0xff] }
  0x94   :  { %v774_v49 = vadd.f32 %v614_v41, %v294_v38  ;;  %v457_v52 = vld [vmem:[%s2431_s1 + $0x3f0] sm:$0xff]  ;;  %v616_v54 = vmul.f32 0.005, %v456_v50  ;;  %v297_v55 = vmul.f32 0.995, %v137_v51  ;;  %v138_v56 = vld [vmem:[%s2430_s0 + $0x3f8] sm:$0xff] }
  0x95   :  { %933 = vst [vmem:[%s2432_s2 + $0x3d0] sm:$0xff] %v773_v45  ;;  %v775_v53 = vadd.f32 %v615_v47, %v295_v46  ;;  %v617_v57 = vmul.f32 0.005, %v457_v52  ;;  %v298_v58 = vmul.f32 0.995, %v138_v56  ;;  %v458_v59 = vld [vmem:[%s2431_s1 + $0x3f8] sm:$0xff] }
  0x96   :  { %934 = vst [vmem:[%s2432_s2 + $0x3d8] sm:$0xff] %v774_v49  ;;  %v776_v60 = vadd.f32 %v616_v54, %v296_v48  ;;  %v618_v61 = vmul.f32 0.005, %v458_v59  ;;  %v139_v62 = vld [vmem:[%s2430_s0 + $0x400] sm:$0xff]  ;;  %v140_v0 = vld [vmem:[%s2430_s0 + $0x408] sm:$0xff]  ;;  %v141_v7 = vld [vmem:[%s2430_s0 + $0x410] sm:$0xff] }
  0x97   :  { %935 = vst [vmem:[%s2432_s2 + $0x3e0] sm:$0xff] %v775_v53  ;;  %v459_v63 = vld [vmem:[%s2431_s1 + $0x400] sm:$0xff]  ;;  %v777_v1 = vadd.f32 %v617_v57, %v297_v55  ;;  %v299_v2 = vmul.f32 0.995, %v139_v62  ;;  %v300_v4 = vmul.f32 0.995, %v140_v0 }
  0x98   :  { %v619_v3 = vmul.f32 0.005, %v459_v63  ;;  %936 = vst [vmem:[%s2432_s2 + $0x3e8] sm:$0xff] %v776_v60  ;;  %v778_v5 = vadd.f32 %v618_v61, %v298_v58  ;;  %v460_v6 = vld [vmem:[%s2431_s1 + $0x408] sm:$0xff]  ;;  %v461_v8 = vld [vmem:[%s2431_s1 + $0x410] sm:$0xff]  ;;  %v142_v12 = vld [vmem:[%s2430_s0 + $0x418] sm:$0xff] }
  0x99   :  { %937 = vst [vmem:[%s2432_s2 + $0x3f0] sm:$0xff] %v777_v1  ;;  %v620_v10 = vmul.f32 0.005, %v460_v6  ;;  %v301_v11 = vmul.f32 0.995, %v141_v7  ;;  %v462_v15 = vld [vmem:[%s2431_s1 + $0x418] sm:$0xff] }
  0x9a   :  { %v779_v9 = vadd.f32 %v619_v3, %v299_v2  ;;  %938 = vst [vmem:[%s2432_s2 + $0x3f8] sm:$0xff] %v778_v5  ;;  %v621_v13 = vmul.f32 0.005, %v461_v8  ;;  %v302_v14 = vmul.f32 0.995, %v142_v12  ;;  %v143_v18 = vld [vmem:[%s2430_s0 + $0x420] sm:$0xff] }
  0x9b   :  { %v780_v16 = vadd.f32 %v620_v10, %v300_v4  ;;  %v622_v17 = vmul.f32 0.005, %v462_v15  ;;  %v463_v19 = vld [vmem:[%s2431_s1 + $0x420] sm:$0xff]  ;;  %v144_v20 = vld [vmem:[%s2430_s0 + $0x428] sm:$0xff]  ;;  %v303_v22 = vmul.f32 0.995, %v143_v18 }
  0x9c   :  { %939 = vst [vmem:[%s2432_s2 + $0x400] sm:$0xff] %v779_v9  ;;  %v781_v21 = vadd.f32 %v621_v13, %v301_v11  ;;  %v623_v23 = vmul.f32 0.005, %v463_v19  ;;  %v304_v24 = vmul.f32 0.995, %v144_v20  ;;  %v464_v26 = vld [vmem:[%s2431_s1 + $0x428] sm:$0xff] }
  0x9d   :  { %940 = vst [vmem:[%s2432_s2 + $0x408] sm:$0xff] %v780_v16  ;;  %v782_v25 = vadd.f32 %v622_v17, %v302_v14  ;;  %v145_v27 = vld [vmem:[%s2430_s0 + $0x430] sm:$0xff]  ;;  %v624_v30 = vmul.f32 0.005, %v464_v26  ;;  %v146_v32 = vld [vmem:[%s2430_s0 + $0x438] sm:$0xff]  ;;  %v147_v38 = vld [vmem:[%s2430_s0 + $0x440] sm:$0xff] }
  0x9e   :  { %v465_v28 = vld [vmem:[%s2431_s1 + $0x430] sm:$0xff]  ;;  %941 = vst [vmem:[%s2432_s2 + $0x410] sm:$0xff] %v781_v21  ;;  %v783_v29 = vadd.f32 %v623_v23, %v303_v22  ;;  %v305_v31 = vmul.f32 0.995, %v145_v27  ;;  %v306_v34 = vmul.f32 0.995, %v146_v32 }
  0x9f   :  { %942 = vst [vmem:[%s2432_s2 + $0x418] sm:$0xff] %v782_v25  ;;  %v625_v33 = vmul.f32 0.005, %v465_v28  ;;  %v466_v35 = vld [vmem:[%s2431_s1 + $0x438] sm:$0xff]  ;;  %v784_v36 = vadd.f32 %v624_v30, %v304_v24  ;;  %v467_v39 = vld [vmem:[%s2431_s1 + $0x440] sm:$0xff]  ;;  %v148_v40 = vld [vmem:[%s2430_s0 + $0x448] sm:$0xff] }
  0xa0   :  { %943 = vst [vmem:[%s2432_s2 + $0x420] sm:$0xff] %v783_v29  ;;  %v626_v37 = vmul.f32 0.005, %v466_v35  ;;  %v307_v42 = vmul.f32 0.995, %v147_v38  ;;  %v468_v46 = vld [vmem:[%s2431_s1 + $0x448] sm:$0xff] }
  0xa1   :  { %v785_v41 = vadd.f32 %v625_v33, %v305_v31  ;;  %v627_v43 = vmul.f32 0.005, %v467_v39  ;;  %v308_v44 = vmul.f32 0.995, %v148_v40  ;;  %944 = vst [vmem:[%s2432_s2 + $0x428] sm:$0xff] %v784_v36  ;;  %v149_v47 = vld [vmem:[%s2430_s0 + $0x450] sm:$0xff] }
  0xa2   :  { %v786_v45 = vadd.f32 %v626_v37, %v306_v34  ;;  %v469_v48 = vld [vmem:[%s2431_s1 + $0x450] sm:$0xff]  ;;  %v628_v50 = vmul.f32 0.005, %v468_v46  ;;  %v309_v51 = vmul.f32 0.995, %v149_v47  ;;  %v150_v52 = vld [vmem:[%s2430_s0 + $0x458] sm:$0xff] }
  0xa3   :  { %945 = vst [vmem:[%s2432_s2 + $0x430] sm:$0xff] %v785_v41  ;;  %v787_v49 = vadd.f32 %v627_v43, %v307_v42  ;;  %v629_v53 = vmul.f32 0.005, %v469_v48  ;;  %v310_v54 = vmul.f32 0.995, %v150_v52  ;;  %v470_v55 = vld [vmem:[%s2431_s1 + $0x458] sm:$0xff] }
  0xa4   :  { %946 = vst [vmem:[%s2432_s2 + $0x438] sm:$0xff] %v786_v45  ;;  %v788_v56 = vadd.f32 %v628_v50, %v308_v44  ;;  %v630_v57 = vmul.f32 0.005, %v470_v55  ;;  %v151_v58 = vld [vmem:[%s2430_s0 + $0x460] sm:$0xff]  ;;  %v152_v60 = vld [vmem:[%s2430_s0 + $0x468] sm:$0xff]  ;;  %v153_v3 = vld [vmem:[%s2430_s0 + $0x470] sm:$0xff] }
  0xa5   :  { %947 = vst [vmem:[%s2432_s2 + $0x440] sm:$0xff] %v787_v49  ;;  %v471_v59 = vld [vmem:[%s2431_s1 + $0x460] sm:$0xff]  ;;  %v789_v61 = vadd.f32 %v629_v53, %v309_v51  ;;  %v311_v62 = vmul.f32 0.995, %v151_v58  ;;  %v312_v0 = vmul.f32 0.995, %v152_v60 }
  0xa6   :  { %v631_v63 = vmul.f32 0.005, %v471_v59  ;;  %948 = vst [vmem:[%s2432_s2 + $0x448] sm:$0xff] %v788_v56  ;;  %v790_v1 = vadd.f32 %v630_v57, %v310_v54  ;;  %v472_v2 = vld [vmem:[%s2431_s1 + $0x468] sm:$0xff]  ;;  %v473_v4 = vld [vmem:[%s2431_s1 + $0x470] sm:$0xff]  ;;  %v154_v8 = vld [vmem:[%s2430_s0 + $0x478] sm:$0xff] }
  0xa7   :  { %949 = vst [vmem:[%s2432_s2 + $0x450] sm:$0xff] %v789_v61  ;;  %v632_v6 = vmul.f32 0.005, %v472_v2  ;;  %v313_v7 = vmul.f32 0.995, %v153_v3  ;;  %v474_v11 = vld [vmem:[%s2431_s1 + $0x478] sm:$0xff] }
  0xa8   :  { %v791_v5 = vadd.f32 %v631_v63, %v311_v62  ;;  %950 = vst [vmem:[%s2432_s2 + $0x458] sm:$0xff] %v790_v1  ;;  %v633_v9 = vmul.f32 0.005, %v473_v4  ;;  %v314_v10 = vmul.f32 0.995, %v154_v8  ;;  %v155_v14 = vld [vmem:[%s2430_s0 + $0x480] sm:$0xff] }
  0xa9   :  { %v792_v12 = vadd.f32 %v632_v6, %v312_v0  ;;  %v634_v13 = vmul.f32 0.005, %v474_v11  ;;  %v475_v15 = vld [vmem:[%s2431_s1 + $0x480] sm:$0xff]  ;;  %v156_v16 = vld [vmem:[%s2430_s0 + $0x488] sm:$0xff]  ;;  %v315_v18 = vmul.f32 0.995, %v155_v14 }
  0xaa   :  { %951 = vst [vmem:[%s2432_s2 + $0x460] sm:$0xff] %v791_v5  ;;  %v793_v17 = vadd.f32 %v633_v9, %v313_v7  ;;  %v635_v19 = vmul.f32 0.005, %v475_v15  ;;  %v316_v20 = vmul.f32 0.995, %v156_v16  ;;  %v476_v22 = vld [vmem:[%s2431_s1 + $0x488] sm:$0xff] }
  0xab   :  { %952 = vst [vmem:[%s2432_s2 + $0x468] sm:$0xff] %v792_v12  ;;  %v794_v21 = vadd.f32 %v634_v13, %v314_v10  ;;  %v157_v23 = vld [vmem:[%s2430_s0 + $0x490] sm:$0xff]  ;;  %v636_v26 = vmul.f32 0.005, %v476_v22  ;;  %v158_v28 = vld [vmem:[%s2430_s0 + $0x498] sm:$0xff]  ;;  %v159_v34 = vld [vmem:[%s2430_s0 + $0x4a0] sm:$0xff] }
  0xac   :  { %v477_v24 = vld [vmem:[%s2431_s1 + $0x490] sm:$0xff]  ;;  %953 = vst [vmem:[%s2432_s2 + $0x470] sm:$0xff] %v793_v17  ;;  %v795_v25 = vadd.f32 %v635_v19, %v315_v18  ;;  %v317_v27 = vmul.f32 0.995, %v157_v23  ;;  %v318_v30 = vmul.f32 0.995, %v158_v28 }
  0xad   :  { %954 = vst [vmem:[%s2432_s2 + $0x478] sm:$0xff] %v794_v21  ;;  %v637_v29 = vmul.f32 0.005, %v477_v24  ;;  %v478_v31 = vld [vmem:[%s2431_s1 + $0x498] sm:$0xff]  ;;  %v796_v32 = vadd.f32 %v636_v26, %v316_v20  ;;  %v479_v35 = vld [vmem:[%s2431_s1 + $0x4a0] sm:$0xff]  ;;  %v160_v36 = vld [vmem:[%s2430_s0 + $0x4a8] sm:$0xff] }
  0xae   :  { %955 = vst [vmem:[%s2432_s2 + $0x480] sm:$0xff] %v795_v25  ;;  %v638_v33 = vmul.f32 0.005, %v478_v31  ;;  %v319_v38 = vmul.f32 0.995, %v159_v34  ;;  %v480_v42 = vld [vmem:[%s2431_s1 + $0x4a8] sm:$0xff] }
  0xaf   :  { %v797_v37 = vadd.f32 %v637_v29, %v317_v27  ;;  %v639_v39 = vmul.f32 0.005, %v479_v35  ;;  %v320_v40 = vmul.f32 0.995, %v160_v36  ;;  %956 = vst [vmem:[%s2432_s2 + $0x488] sm:$0xff] %v796_v32  ;;  %v161_v43 = vld [vmem:[%s2430_s0 + $0x4b0] sm:$0xff] }
  0xb0   :  { %v798_v41 = vadd.f32 %v638_v33, %v318_v30  ;;  %v481_v44 = vld [vmem:[%s2431_s1 + $0x4b0] sm:$0xff]  ;;  %v640_v46 = vmul.f32 0.005, %v480_v42  ;;  %v321_v47 = vmul.f32 0.995, %v161_v43  ;;  %v162_v48 = vld [vmem:[%s2430_s0 + $0x4b8] sm:$0xff] }
  0xb1   :  { %957 = vst [vmem:[%s2432_s2 + $0x490] sm:$0xff] %v797_v37  ;;  %v799_v45 = vadd.f32 %v639_v39, %v319_v38  ;;  %v641_v49 = vmul.f32 0.005, %v481_v44  ;;  %v322_v50 = vmul.f32 0.995, %v162_v48  ;;  %v482_v51 = vld [vmem:[%s2431_s1 + $0x4b8] sm:$0xff] }
  0xb2   :  { %958 = vst [vmem:[%s2432_s2 + $0x498] sm:$0xff] %v798_v41  ;;  %v800_v52 = vadd.f32 %v640_v46, %v320_v40  ;;  %v642_v53 = vmul.f32 0.005, %v482_v51  ;;  %v163_v54 = vld [vmem:[%s2430_s0 + $0x4c0] sm:$0x3] }
  0xb3   :  { %959 = vst [vmem:[%s2432_s2 + $0x4a0] sm:$0xff] %v799_v45  ;;  %v801_v55 = vadd.f32 %v641_v49, %v321_v47  ;;  %v323_v56 = vmul.f32 0.995, %v163_v54  ;;  %v483_v57 = vld [vmem:[%s2431_s1 + $0x4c0] sm:$0x3] }
  0xb4   :  { %v164_v58 = vld [vmem:[%s2430_s0 + $0x4c8] sm:$0x3]  ;;  %960 = vst [vmem:[%s2432_s2 + $0x4a8] sm:$0xff] %v800_v52  ;;  %v802_v59 = vadd.f32 %v642_v53, %v322_v50  ;;  %v643_v60 = vmul.f32 0.005, %v483_v57 }
  0xb5   :  { %v324_v61 = vmul.f32 0.995, %v164_v58  ;;  %961 = vst [vmem:[%s2432_s2 + $0x4b0] sm:$0xff] %v801_v55  ;;  %v484_v62 = vld [vmem:[%s2431_s1 + $0x4c8] sm:$0x3] }
  0xb6   :  { %v165_v63 = vld [vmem:[%s2430_s0 + $0x4d0] sm:$0x3]  ;;  %962 = vst [vmem:[%s2432_s2 + $0x4b8] sm:$0xff] %v802_v59  ;;  %v803_v0 = vadd.f32 %v643_v60, %v323_v56  ;;  %v644_v1 = vmul.f32 0.005, %v484_v62 }
  0xb7   :  { %v325_v2 = vmul.f32 0.995, %v165_v63  ;;  %v485_v3 = vld [vmem:[%s2431_s1 + $0x4d0] sm:$0x3]  ;;  %v166_v4 = vld [vmem:[%s2430_s0 + $0x4d8] sm:$0x3] }
  0xb8   :  { %v486_v5 = vld [vmem:[%s2431_s1 + $0x4d8] sm:$0x3]  ;;  %963 = vst [vmem:[%s2432_s2 + $0x4c0] sm:$0x3] %v803_v0  ;;  %v804_v6 = vadd.f32 %v644_v1, %v324_v61  ;;  %v645_v7 = vmul.f32 0.005, %v485_v3 }
  0xb9   :  { %v326_v8 = vmul.f32 0.995, %v166_v4  ;;  %v646_v9 = vmul.f32 0.005, %v486_v5  ;;  %v167_v10 = vld [vmem:[%s2430_s0 + $0x4e0] sm:$0x3] }
  0xba   :  { %v487_v11 = vld [vmem:[%s2431_s1 + $0x4e0] sm:$0x3]  ;;  %964 = vst [vmem:[%s2432_s2 + $0x4c8] sm:$0x3] %v804_v6  ;;  %v805_v12 = vadd.f32 %v645_v7, %v325_v2  ;;  %v327_v13 = vmul.f32 0.995, %v167_v10 }
  0xbb   :  { %v647_v14 = vmul.f32 0.005, %v487_v11  ;;  %v806_v15 = vadd.f32 %v646_v9, %v326_v8  ;;  %v168_v16 = vld [vmem:[%s2430_s0 + $0x4e8] sm:$0x3]  ;;  %v169_v18 = vld [vmem:[%s2430_s0 + $0x4f0] sm:$0x3] }
  0xbc   :  { %v488_v17 = vld [vmem:[%s2431_s1 + $0x4e8] sm:$0x3]  ;;  %965 = vst [vmem:[%s2432_s2 + $0x4d0] sm:$0x3] %v805_v12  ;;  %v328_v20 = vmul.f32 0.995, %v168_v16 }
  0xbd   :  { %v807_v19 = vadd.f32 %v647_v14, %v327_v13  ;;  %v648_v21 = vmul.f32 0.005, %v488_v17  ;;  %966 = vst [vmem:[%s2432_s2 + $0x4d8] sm:$0x3] %v806_v15  ;;  %v329_v22 = vmul.f32 0.995, %v169_v18 }
  0xbe   :  { %v489_v23 = vld [vmem:[%s2431_s1 + $0x4f0] sm:$0x3]  ;;  %v170_v26 = vld [vmem:[%s2430_s0 + $0x4f8] sm:$0x3] }
  0xbf   :  { %967 = vst [vmem:[%s2432_s2 + $0x4e0] sm:$0x3] %v807_v19  ;;  %v808_v24 = vadd.f32 %v648_v21, %v328_v20  ;;  %v649_v25 = vmul.f32 0.005, %v489_v23  ;;  %v330_v27 = vmul.f32 0.995, %v170_v26 }
  0xc0   :  { %v490_v28 = vld [vmem:[%s2431_s1 + $0x4f8] sm:$0x3] }
  0xc1   :  { %968 = vst [vmem:[%s2432_s2 + $0x4e8] sm:$0x3] %v808_v24  ;;  %v809_v29 = vadd.f32 %v649_v25, %v329_v22  ;;  %v650_v30 = vmul.f32 0.005, %v490_v28 }
  0xc3   :  { %969 = vst [vmem:[%s2432_s2 + $0x4f0] sm:$0x3] %v809_v29  ;;  %v810_v31 = vadd.f32 %v650_v30, %v330_v27 }
  0xc5   :  { %970 = vst [vmem:[%s2432_s2 + $0x4f8] sm:$0x3] %v810_v31 }

// kernel: split.0
= control target key start
LH: loop header
LB: loop body
LE: loop exit
PB: predicated region body
PF: predicated region fallthrough
CT: control target
= control target key end

     0   :  { %vm8_vm0 = vcmask 1040384   ;;  %v11_v0 = vlaneseq  ;;  %s774_s18 = smov 96   ;;  %s1271_s0 = inlined_call_operand.vmem [shape: f32[157696], index: 0, kind: input, shape index: {}]   ;;  %s1272_s1 = inlined_call_operand.vmem [shape: f32[49152], index: 1, kind: output, shape index: {}]  }
   0x1   :  { %v679_v1 = vld [vmem:[%s1271_s0 + $0x348] sm:$0xff]  ;;  %v681_v2 = vld [vmem:[%s1271_s0 + $0x350] sm:$0xff]  ;;  %v678_v3 = vld [vmem:[%s1271_s0 + $0x340] sm:$0xff] }
   0x2   :  { %v794_v4 = vand.u32 127, %v11_v0  ;;  %v34_v5 = vsel %vm8_vm0, %v681_v2, %v679_v1  ;;  %v677_v6 = vld [vmem:[%s1271_s0 + $0x338] sm:$0xff]  ;;  %v685_v10 = vld [vmem:[%s1271_s0 + $0x360] sm:$0xff]  ;;  %v21_v14 = vsel %vm8_vm0, %v679_v1, %v678_v3  ;;  %v687_v20 = vld [vmem:[%s1271_s0 + $0x368] sm:$0xff] }
   0x3   :  { %v683_v7 = vld [vmem:[%s1271_s0 + $0x358] sm:$0xff]  ;;  %v35_v8 = vrot.slane %v34_v5, 1  ;;  %v9_v9 = vsel %vm8_vm0, %v678_v3, %v677_v6  ;;  %v22_v19 = vrot.slane %v21_v14, 1  ;;  %v689_v21 = vld [vmem:[%s1271_s0 + $0x370] sm:$0xff]  ;;  %v73_v24 = vsel %vm8_vm0, %v687_v20, %v685_v10  ;;  %v693_v31 = vld [vmem:[%s1271_s0 + $0x380] sm:$0xff] }
   0x4   :  { %vm13_vm1 = vcmp.lt.s32.totalorder %v794_v4, 32  ;;  %v10_v11 = vrot.slane %v9_v9, 1  ;;  %v47_v12 = vsel %vm8_vm0, %v683_v7, %v681_v2  ;;  %v60_v16 = vsel %vm8_vm0, %v685_v10, %v683_v7  ;;  %v691_v22 = vld [vmem:[%s1271_s0 + $0x378] sm:$0xff]  ;;  %v695_v35 = vld [vmem:[%s1271_s0 + $0x388] sm:$0xff]  ;;  %v697_v36 = vld [vmem:[%s1271_s0 + $0x390] sm:$0xff] }
   0x5   :  { %v39_v13 = vsel %vm13_vm1, %v35_v8, %v679_v1  ;;  %v48_v17 = vrot.slane %v47_v12, 1  ;;  %v61_v18 = vrot.slane %v60_v16, 1  ;;  %v74_v26 = vrot.slane %v73_v24, 1  ;;  %v699_v43 = vld [vmem:[%s1271_s0 + $0x398] sm:$0xff]  ;;  %v701_v47 = vld [vmem:[%s1271_s0 + $0x3a0] sm:$0xff]  ;;  %v703_v48 = vld [vmem:[%s1271_s0 + $0x3a8] sm:$0xff] }
   0x6   :  { %40 = vrot.lane.b32.xlu1 %v39_v13, %s774_s18  ;;  %v14_v15 = vsel %vm13_vm1, %v10_v11, %v677_v6  ;;  %v26_v27 = vsel %vm13_vm1, %v22_v19, %v678_v3  ;;  %v99_v28 = vsel %vm8_vm0, %v691_v22, %v689_v21  ;;  %v86_v29 = vsel %vm8_vm0, %v689_v21, %v687_v20  ;;  %v705_v55 = vld [vmem:[%s1271_s0 + $0x3b0] sm:$0xff]  ;;  %v707_v59 = vld [vmem:[%s1271_s0 + $0x3b8] sm:$0xff]  ;;  %v709_v60 = vld [vmem:[%s1271_s0 + $0x3c0] sm:$0xff] }
   0x7   :  { %15 = vrot.lane.b32.xlu0 %v14_v15, %s774_s18  ;;  %v65_v23 = vsel %vm13_vm1, %v61_v18, %v683_v7  ;;  %v52_v25 = vsel %vm13_vm1, %v48_v17, %v681_v2  ;;  %v100_v30 = vrot.slane %v99_v28, 1  ;;  %v78_v32 = vsel %vm13_vm1, %v74_v26, %v685_v10  ;;  %v711_v3 = vld [vmem:[%s1271_s0 + $0x3c8] sm:$0xff]  ;;  %v713_v8 = vld [vmem:[%s1271_s0 + $0x3d0] sm:$0xff]  ;;  %v715_v9 = vld [vmem:[%s1271_s0 + $0x3d8] sm:$0xff] }
   0x8   :  { %66 = vrot.lane.b32.xlu2 %v65_v23, %s774_s18  ;;  %v87_v33 = vrot.slane %v86_v29, 1  ;;  %v112_v34 = vsel %vm8_vm0, %v693_v31, %v691_v22  ;;  %v138_v40 = vsel %vm8_vm0, %v697_v36, %v695_v35  ;;  %v125_v41 = vsel %vm8_vm0, %v695_v35, %v693_v31  ;;  %v717_v16 = vld [vmem:[%s1271_s0 + $0x3e0] sm:$0xff]  ;;  %v723_v28 = vld [vmem:[%s1271_s0 + $0x3f8] sm:$0xff] }
   0x9   :  { %v104_v37 = vsel %vm13_vm1, %v100_v30, %v689_v21  ;;  %v113_v38 = vrot.slane %v112_v34, 1  ;;  %v139_v42 = vrot.slane %v138_v40, 1  ;;  %v126_v45 = vrot.slane %v125_v41, 1  ;;  %v721_v21 = vld [vmem:[%s1271_s0 + $0x3f0] sm:$0xff] }
   0xa   :  { %v91_v39 = vsel %vm13_vm1, %v87_v33, %v687_v20  ;;  %v151_v46 = vsel %vm8_vm0, %v699_v43, %v697_v36  ;;  %v177_v52 = vsel %vm8_vm0, %v703_v48, %v701_v47  ;;  %v164_v53 = vsel %vm8_vm0, %v701_v47, %v699_v43  ;;  %v719_v20 = vld [vmem:[%s1271_s0 + $0x3e8] sm:$0xff]  ;;  %v729_v40 = vld [vmem:[%s1271_s0 + $0x410] sm:$0xff] }
   0xb   :  { %v117_v44 = vsel %vm13_vm1, %v113_v38, %v691_v22  ;;  %v143_v49 = vsel %vm13_vm1, %v139_v42, %v695_v35  ;;  %v152_v50 = vrot.slane %v151_v46, 1  ;;  %v130_v51 = vsel %vm13_vm1, %v126_v45, %v693_v31  ;;  %v727_v33 = vld [vmem:[%s1271_s0 + $0x408] sm:$0xff]  ;;  %v733_v45 = vld [vmem:[%s1271_s0 + $0x420] sm:$0xff] }
   0xc   :  { %v178_v54 = vrot.slane %v177_v52, 1  ;;  %v165_v57 = vrot.slane %v164_v53, 1  ;;  %v190_v58 = vsel %vm8_vm0, %v705_v55, %v703_v48  ;;  %v216_v0 = vsel %vm8_vm0, %v709_v60, %v707_v59  ;;  %v735_v52 = vld [vmem:[%s1271_s0 + $0x428] sm:$0xff] }
   0xd   :  { %v156_v56 = vsel %vm13_vm1, %v152_v50, %v697_v36  ;;  %v191_v62 = vrot.slane %v190_v58, 1  ;;  %v203_v1 = vsel %vm8_vm0, %v707_v59, %v705_v55  ;;  %v217_v2 = vrot.slane %v216_v0, 1  ;;  %v741_v0 = vld [vmem:[%s1271_s0 + $0x440] sm:$0xff] }
   0xe   :  { %53 = vrot.lane.b32.xlu1 %v52_v25, %s774_s18  ;;  %v182_v61 = vsel %vm13_vm1, %v178_v54, %v701_v47  ;;  %v169_v63 = vsel %vm13_vm1, %v165_v57, %v699_v43  ;;  %v204_v6 = vrot.slane %v203_v1, 1  ;;  %v229_v7 = vsel %vm8_vm0, %v711_v3, %v709_v60  ;;  %v739_v57 = vld [vmem:[%s1271_s0 + $0x438] sm:$0xff] }
   0xf   :  { %27 = vrot.lane.b32.xlu0 %v26_v27, %s774_s18  ;;  %v195_v5 = vsel %vm13_vm1, %v191_v62, %v703_v48  ;;  %v221_v10 = vsel %vm13_vm1, %v217_v2, %v707_v59  ;;  %v230_v11 = vrot.slane %v229_v7, 1  ;;  %v255_v13 = vsel %vm8_vm0, %v715_v9, %v713_v8 }
  0x10   :  { %79 = vrot.lane.b32.xlu2 %v78_v32, %s774_s18  ;;  %v208_v12 = vsel %vm13_vm1, %v204_v6, %v705_v55  ;;  %v242_v14 = vsel %vm8_vm0, %v713_v8, %v711_v3  ;;  %v256_v15 = vrot.slane %v255_v13, 1  ;;  %v268_v19 = vsel %vm8_vm0, %v717_v16, %v715_v9  ;;  %v725_v32 = vld [vmem:[%s1271_s0 + $0x400] sm:$0xff]  ;;  %v745_v6 = vld [vmem:[%s1271_s0 + $0x450] sm:$0xff]  ;;  %v747_v13 = vld [vmem:[%s1271_s0 + $0x458] sm:$0xff] }
  0x11   :  { %v234_v17 = vsel %vm13_vm1, %v230_v11, %v709_v60  ;;  %v243_v18 = vrot.slane %v242_v14, 1  ;;  %v269_v23 = vrot.slane %v268_v19, 1  ;;  %v294_v25 = vsel %vm8_vm0, %v721_v21, %v719_v20 }
  0x12   :  { %v260_v22 = vsel %vm13_vm1, %v256_v15, %v713_v8  ;;  %v281_v26 = vsel %vm8_vm0, %v719_v20, %v717_v16  ;;  %v295_v27 = vrot.slane %v294_v25, 1  ;;  %v307_v31 = vsel %vm8_vm0, %v723_v28, %v721_v21  ;;  %v753_v25 = vld [vmem:[%s1271_s0 + $0x470] sm:$0xff] }
  0x13   :  { %v247_v24 = vsel %vm13_vm1, %v243_v18, %v711_v3  ;;  %v273_v29 = vsel %vm13_vm1, %v269_v23, %v715_v9  ;;  %v282_v30 = vrot.slane %v281_v26, 1  ;;  %v308_v35 = vrot.slane %v307_v31, 1  ;;  %v751_v18 = vld [vmem:[%s1271_s0 + $0x468] sm:$0xff] }
  0x14   :  { %v299_v34 = vsel %vm13_vm1, %v295_v27, %v719_v20  ;;  %v320_v38 = vsel %vm8_vm0, %v725_v32, %v723_v28  ;;  %v346_v43 = vsel %vm8_vm0, %v729_v40, %v727_v33  ;;  %v385_v55 = vsel %vm8_vm0, %v735_v52, %v733_v45 }
  0x15   :  { %v286_v36 = vsel %vm13_vm1, %v282_v30, %v717_v16  ;;  %v312_v41 = vsel %vm13_vm1, %v308_v35, %v721_v21  ;;  %v321_v42 = vrot.slane %v320_v38, 1  ;;  %v347_v47 = vrot.slane %v346_v43, 1  ;;  %v757_v30 = vld [vmem:[%s1271_s0 + $0x480] sm:$0xff]  ;;  %v759_v38 = vld [vmem:[%s1271_s0 + $0x488] sm:$0xff]  ;;  %v763_v43 = vld [vmem:[%s1271_s0 + $0x498] sm:$0xff] }
  0x16   :  { %105 = vrot.lane.b32.xlu1 %v104_v37, %s774_s18  ;;  %v333_v37 = vsel %vm8_vm0, %v727_v33, %v725_v32  ;;  %v386_v59 = vrot.slane %v385_v55, 1  ;;  %v424_v3 = vsel %vm8_vm0, %v741_v0, %v739_v57  ;;  %v463_v16 = vsel %vm8_vm0, %v747_v13, %v745_v6  ;;  %v767_v55 = vld [vmem:[%s1271_s0 + $0x4a8] sm:$0xff] }
  0x17   :  { %92 = vrot.lane.b32.xlu0 %v91_v39, %s774_s18  ;;  %v334_v39 = vrot.slane %v333_v37, 1  ;;  %v325_v48 = vsel %vm13_vm1, %v321_v42, %v723_v28  ;;  %v351_v53 = vsel %vm13_vm1, %v347_v47, %v727_v33  ;;  %v425_v8 = vrot.slane %v424_v3, 1  ;;  %v761_v42 = vld [vmem:[%s1271_s0 + $0x490] sm:$0xff] }
  0x18   :  { %118 = vrot.lane.b32.xlu2 %v117_v44, %s774_s18  ;;  %v731_v44 = vld [vmem:[%s1271_s0 + $0x418] sm:$0xff]  ;;  %v390_v1 = vsel %vm13_vm1, %v386_v59, %v733_v45  ;;  %v464_v20 = vrot.slane %v463_v16, 1  ;;  %v502_v28 = vsel %vm8_vm0, %v753_v25, %v751_v18  ;;  %v567_v47 = vsel %vm8_vm0, %v763_v43, %v761_v42 }
  0x19   :  { %v338_v46 = vsel %vm13_vm1, %v334_v39, %v725_v32  ;;  %v359_v50 = vsel %vm8_vm0, %v731_v44, %v729_v40  ;;  %v429_v14 = vsel %vm13_vm1, %v425_v8, %v739_v57  ;;  %v503_v32 = vrot.slane %v502_v28, 1 }
  0x1a   :  { %v360_v54 = vrot.slane %v359_v50, 1  ;;  %v468_v26 = vsel %vm13_vm1, %v464_v20, %v745_v6  ;;  %v568_v50 = vrot.slane %v567_v47, 1 }
  0x1b   :  { %v507_v39 = vsel %vm13_vm1, %v503_v32, %v751_v18 }
  0x1c   :  { %v364_v60 = vsel %vm13_vm1, %v360_v54, %v729_v40 }
  0x1e   :  { %144 = vrot.lane.b32.xlu1 %v143_v49, %s774_s18  ;;  %v372_v49 = vsel %vm8_vm0, %v733_v45, %v731_v44 }
  0x1f   :  { %131 = vrot.lane.b32.xlu0 %v130_v51, %s774_s18  ;;  %v373_v51 = vrot.slane %v372_v49, 1  ;;  %v554_v49 = vsel %vm8_vm0, %v761_v42, %v759_v38 }
  0x20   :  { %157 = vrot.lane.b32.xlu2 %v156_v56, %s774_s18  ;;  %v737_v56 = vld [vmem:[%s1271_s0 + $0x430] sm:$0xff] }
  0x21   :  { %v377_v58 = vsel %vm13_vm1, %v373_v51, %v731_v44  ;;  %v398_v62 = vsel %vm8_vm0, %v737_v56, %v735_v52  ;;  %v765_v51 = vld [vmem:[%s1271_s0 + $0x4a0] sm:$0xff] }
  0x22   :  { %v399_v2 = vrot.slane %v398_v62, 1  ;;  %v580_v54 = vsel %vm8_vm0, %v765_v51, %v763_v43  ;;  %v593_v62 = vsel %vm8_vm0, %v767_v55, %v765_v51 }
  0x23   :  { %v594_v3 = vrot.slane %v593_v62, 1 }
  0x24   :  { %v403_v9 = vsel %vm13_vm1, %v399_v2, %v735_v52 }
  0x26   :  { %183 = vrot.lane.b32.xlu1 %v182_v61, %s774_s18  ;;  %v411_v61 = vsel %vm8_vm0, %v739_v57, %v737_v56  ;;  %v572_v57 = vsel %vm13_vm1, %v568_v50, %v761_v42 }
  0x27   :  { %170 = vrot.lane.b32.xlu0 %v169_v63, %s774_s18  ;;  %v412_v63 = vrot.slane %v411_v61, 1 }
  0x28   :  { %196 = vrot.lane.b32.xlu2 %v195_v5, %s774_s18  ;;  %v743_v5 = vld [vmem:[%s1271_s0 + $0x448] sm:$0xff] }
  0x29   :  { %v416_v7 = vsel %vm13_vm1, %v412_v63, %v737_v56  ;;  %v437_v11 = vsel %vm8_vm0, %v743_v5, %v741_v0  ;;  %v769_v56 = vld [vmem:[%s1271_s0 + $0x4b0] sm:$0xff]  ;;  %v771_v63 = vld [vmem:[%s1271_s0 + $0x4b8] sm:$0xff] }
  0x2a   :  { %v438_v15 = vrot.slane %v437_v11, 1 }
  0x2c   :  { %v442_v21 = vsel %vm13_vm1, %v438_v15, %v741_v0 }
  0x2e   :  { %222 = vrot.lane.b32.xlu1 %v221_v10, %s774_s18  ;;  %v450_v10 = vsel %vm8_vm0, %v745_v6, %v743_v5 }
  0x2f   :  { %209 = vrot.lane.b32.xlu0 %v208_v12, %s774_s18  ;;  %v451_v12 = vrot.slane %v450_v10, 1 }
  0x30   :  { %235 = vrot.lane.b32.xlu2 %v234_v17, %s774_s18  ;;  %v749_v17 = vld [vmem:[%s1271_s0 + $0x460] sm:$0xff] }
  0x31   :  { %v455_v19 = vsel %vm13_vm1, %v451_v12, %v743_v5  ;;  %v476_v23 = vsel %vm8_vm0, %v749_v17, %v747_v13  ;;  %v619_v5 = vsel %vm8_vm0, %v771_v63, %v769_v56 }
  0x32   :  { %v477_v27 = vrot.slane %v476_v23, 1  ;;  %v620_v8 = vrot.slane %v619_v5, 1 }
  0x34   :  { %v481_v33 = vsel %vm13_vm1, %v477_v27, %v747_v13  ;;  %v624_v4 = vsel %vm13_vm1, %v620_v8, %v769_v56 }
  0x36   :  { %261 = vrot.lane.b32.xlu1 %v260_v22, %s774_s18  ;;  %v489_v22 = vsel %vm8_vm0, %v751_v18, %v749_v17 }
  0x37   :  { %248 = vrot.lane.b32.xlu0 %v247_v24, %s774_s18  ;;  %v490_v24 = vrot.slane %v489_v22, 1 }
  0x38   :  { %274 = vrot.lane.b32.xlu2 %v273_v29, %s774_s18  ;;  %v755_v29 = vld [vmem:[%s1271_s0 + $0x478] sm:$0xff] }
  0x39   :  { %v494_v31 = vsel %vm13_vm1, %v490_v24, %v749_v17 }
  0x3e   :  { %300 = vrot.lane.b32.xlu1 %v299_v34, %s774_s18  ;;  %v528_v34 = vsel %vm8_vm0, %v757_v30, %v755_v29 }
  0x3f   :  { %287 = vrot.lane.b32.xlu0 %v286_v36, %s774_s18  ;;  %v515_v36 = vsel %vm8_vm0, %v755_v29, %v753_v25  ;;  %v529_v37 = vrot.slane %v528_v34, 1 }
  0x40   :  { %313 = vrot.lane.b32.xlu2 %v312_v41, %s774_s18  ;;  %v516_v40 = vrot.slane %v515_v36, 1  ;;  %v541_v41 = vsel %vm8_vm0, %v759_v38, %v757_v30 }
  0x41   :  { %v533_v44 = vsel %vm13_vm1, %v529_v37, %v755_v29  ;;  %v542_v45 = vrot.slane %v541_v41, 1 }
  0x43   :  { %v546_v52 = vsel %vm13_vm1, %v542_v45, %v757_v30 }
  0x46   :  { %339 = vrot.lane.b32.xlu1 %v338_v46, %s774_s18  ;;  %v520_v46 = vsel %vm13_vm1, %v516_v40, %v753_v25 }
  0x47   :  { %326 = vrot.lane.b32.xlu0 %v325_v48, %s774_s18 }
  0x48   :  { %352 = vrot.lane.b32.xlu2 %v351_v53, %s774_s18  ;;  %v555_v53 = vrot.slane %v554_v49, 1 }
  0x4a   :  { %v559_v59 = vsel %vm13_vm1, %v555_v53, %v759_v38 }
  0x4e   :  { %378 = vrot.lane.b32.xlu1 %v377_v58, %s774_s18  ;;  %v581_v58 = vrot.slane %v580_v54, 1 }
  0x4f   :  { %365 = vrot.lane.b32.xlu0 %v364_v60, %s774_s18  ;;  %v606_v60 = vsel %vm8_vm0, %v769_v56, %v767_v55 }
  0x50   :  { %391 = vrot.lane.b32.xlu2 %v390_v1, %s774_s18  ;;  %v607_v0 = vrot.slane %v606_v60, 1  ;;  %v585_v1 = vsel %vm13_vm1, %v581_v58, %v763_v43 }
  0x56   :  { %417 = vrot.lane.b32.xlu1 %v416_v7, %s774_s18  ;;  %v611_v7 = vsel %vm13_vm1, %v607_v0, %v767_v55 }
  0x57   :  { %404 = vrot.lane.b32.xlu0 %v403_v9, %s774_s18  ;;  %v598_v9 = vsel %vm13_vm1, %v594_v3, %v765_v51 }
  0x58   :  { %430 = vrot.lane.b32.xlu2 %v429_v14, %s774_s18 }
  0x5e   :  { %456 = vrot.lane.b32.xlu1 %v455_v19, %s774_s18 }
  0x5f   :  { %443 = vrot.lane.b32.xlu0 %v442_v21, %s774_s18 }
  0x60   :  { %469 = vrot.lane.b32.xlu2 %v468_v26, %s774_s18 }
  0x62   :  { %v67_v35 = vpop.permute.xlu2 %66 }
  0x63   :  { %686 = vst [vmem:[%s1272_s1 + $0x20] sm:$0xff] %v67_v35 }
  0x66   :  { %495 = vrot.lane.b32.xlu1 %v494_v31, %s774_s18 }
  0x67   :  { %482 = vrot.lane.b32.xlu0 %v481_v33, %s774_s18 }
  0x68   :  { %508 = vrot.lane.b32.xlu2 %v507_v39, %s774_s18 }
  0x6a   :  { %v80_v48 = vpop.permute.xlu2 %79 }
  0x6b   :  { %688 = vst [vmem:[%s1272_s1 + $0x28] sm:$0xff] %v80_v48 }
  0x6e   :  { %534 = vrot.lane.b32.xlu1 %v533_v44, %s774_s18 }
  0x6f   :  { %521 = vrot.lane.b32.xlu0 %v520_v46, %s774_s18 }
  0x70   :  { %547 = vrot.lane.b32.xlu2 %v546_v52, %s774_s18 }
  0x72   :  { %v119_v61 = vpop.permute.xlu2 %118 }
  0x73   :  { %694 = vst [vmem:[%s1272_s1 + $0x40] sm:$0xff] %v119_v61 }
  0x76   :  { %573 = vrot.lane.b32.xlu1 %v572_v57, %s774_s18 }
  0x77   :  { %560 = vrot.lane.b32.xlu0 %v559_v59, %s774_s18 }
  0x78   :  { %v41_v2 = vpop.permute.xlu1 %40  ;;  %586 = vrot.lane.b32.xlu2 %v585_v1, %s774_s18 }
  0x79   :  { %682 = vst [vmem:[%s1272_s1 + $0x10] sm:$0xff] %v41_v2  ;;  %v16_v6 = vpop.permute.xlu0 %15 }
  0x7a   :  { %17 = vst [vmem:[%s1272_s1] sm:$0xff] %v16_v6  ;;  %v158_v10 = vpop.permute.xlu2 %157 }
  0x7b   :  { %700 = vst [vmem:[%s1272_s1 + $0x58] sm:$0xff] %v158_v10 }
  0x7e   :  { %612 = vrot.lane.b32.xlu1 %v611_v7, %s774_s18 }
  0x7f   :  { %599 = vrot.lane.b32.xlu0 %v598_v9, %s774_s18 }
  0x80   :  { %v54_v11 = vpop.permute.xlu1 %53  ;;  %625 = vrot.lane.b32.xlu2 %v624_v4, %s774_s18 }
  0x81   :  { %684 = vst [vmem:[%s1272_s1 + $0x18] sm:$0xff] %v54_v11  ;;  %v28_v12 = vpop.permute.xlu0 %27 }
  0x82   :  { %680 = vst [vmem:[%s1272_s1 + $0x8] sm:$0xff] %v28_v12  ;;  %v197_v13 = vpop.permute.xlu2 %196 }
  0x83   :  { %706 = vst [vmem:[%s1272_s1 + $0x70] sm:$0xff] %v197_v13 }
  0x88   :  { %v106_v14 = vpop.permute.xlu1 %105 }
  0x89   :  { %692 = vst [vmem:[%s1272_s1 + $0x38] sm:$0xff] %v106_v14  ;;  %v93_v15 = vpop.permute.xlu0 %92 }
  0x8a   :  { %690 = vst [vmem:[%s1272_s1 + $0x30] sm:$0xff] %v93_v15  ;;  %v236_v16 = vpop.permute.xlu2 %235 }
  0x8b   :  { %712 = vst [vmem:[%s1272_s1 + $0x88] sm:$0xff] %v236_v16 }
  0x90   :  { %v145_v17 = vpop.permute.xlu1 %144 }
  0x91   :  { %698 = vst [vmem:[%s1272_s1 + $0x50] sm:$0xff] %v145_v17  ;;  %v132_v18 = vpop.permute.xlu0 %131 }
  0x92   :  { %696 = vst [vmem:[%s1272_s1 + $0x48] sm:$0xff] %v132_v18  ;;  %v275_v19 = vpop.permute.xlu2 %274 }
  0x93   :  { %718 = vst [vmem:[%s1272_s1 + $0xa0] sm:$0xff] %v275_v19 }
  0x98   :  { %v184_v20 = vpop.permute.xlu1 %183 }
  0x99   :  { %704 = vst [vmem:[%s1272_s1 + $0x68] sm:$0xff] %v184_v20  ;;  %v171_v21 = vpop.permute.xlu0 %170 }
  0x9a   :  { %702 = vst [vmem:[%s1272_s1 + $0x60] sm:$0xff] %v171_v21  ;;  %v314_v22 = vpop.permute.xlu2 %313 }
  0x9b   :  { %724 = vst [vmem:[%s1272_s1 + $0xb8] sm:$0xff] %v314_v22 }
  0xa0   :  { %v223_v23 = vpop.permute.xlu1 %222 }
  0xa1   :  { %710 = vst [vmem:[%s1272_s1 + $0x80] sm:$0xff] %v223_v23  ;;  %v210_v24 = vpop.permute.xlu0 %209 }
  0xa2   :  { %708 = vst [vmem:[%s1272_s1 + $0x78] sm:$0xff] %v210_v24  ;;  %v353_v25 = vpop.permute.xlu2 %352 }
  0xa3   :  { %730 = vst [vmem:[%s1272_s1 + $0xd0] sm:$0xff] %v353_v25 }
  0xa8   :  { %v262_v26 = vpop.permute.xlu1 %261 }
  0xa9   :  { %716 = vst [vmem:[%s1272_s1 + $0x98] sm:$0xff] %v262_v26  ;;  %v249_v27 = vpop.permute.xlu0 %248 }
  0xaa   :  { %714 = vst [vmem:[%s1272_s1 + $0x90] sm:$0xff] %v249_v27  ;;  %v392_v28 = vpop.permute.xlu2 %391 }
  0xab   :  { %736 = vst [vmem:[%s1272_s1 + $0xe8] sm:$0xff] %v392_v28 }
  0xb0   :  { %v301_v29 = vpop.permute.xlu1 %300 }
  0xb1   :  { %722 = vst [vmem:[%s1272_s1 + $0xb0] sm:$0xff] %v301_v29  ;;  %v288_v30 = vpop.permute.xlu0 %287 }
  0xb2   :  { %720 = vst [vmem:[%s1272_s1 + $0xa8] sm:$0xff] %v288_v30  ;;  %v431_v31 = vpop.permute.xlu2 %430 }
  0xb3   :  { %742 = vst [vmem:[%s1272_s1 + $0x100] sm:$0xff] %v431_v31 }
  0xb8   :  { %v340_v32 = vpop.permute.xlu1 %339 }
  0xb9   :  { %728 = vst [vmem:[%s1272_s1 + $0xc8] sm:$0xff] %v340_v32  ;;  %v327_v33 = vpop.permute.xlu0 %326 }
  0xba   :  { %726 = vst [vmem:[%s1272_s1 + $0xc0] sm:$0xff] %v327_v33  ;;  %v470_v34 = vpop.permute.xlu2 %469 }
  0xbb   :  { %748 = vst [vmem:[%s1272_s1 + $0x118] sm:$0xff] %v470_v34 }
  0xc0   :  { %v379_v35 = vpop.permute.xlu1 %378 }
  0xc1   :  { %734 = vst [vmem:[%s1272_s1 + $0xe0] sm:$0xff] %v379_v35  ;;  %v366_v36 = vpop.permute.xlu0 %365 }
  0xc2   :  { %732 = vst [vmem:[%s1272_s1 + $0xd8] sm:$0xff] %v366_v36  ;;  %v509_v37 = vpop.permute.xlu2 %508 }
  0xc3   :  { %754 = vst [vmem:[%s1272_s1 + $0x130] sm:$0xff] %v509_v37 }
  0xc8   :  { %v418_v38 = vpop.permute.xlu1 %417 }
  0xc9   :  { %740 = vst [vmem:[%s1272_s1 + $0xf8] sm:$0xff] %v418_v38  ;;  %v405_v39 = vpop.permute.xlu0 %404 }
  0xca   :  { %738 = vst [vmem:[%s1272_s1 + $0xf0] sm:$0xff] %v405_v39  ;;  %v548_v40 = vpop.permute.xlu2 %547 }
  0xcb   :  { %760 = vst [vmem:[%s1272_s1 + $0x148] sm:$0xff] %v548_v40 }
  0xd0   :  { %v457_v41 = vpop.permute.xlu1 %456 }
  0xd1   :  { %746 = vst [vmem:[%s1272_s1 + $0x110] sm:$0xff] %v457_v41  ;;  %v444_v42 = vpop.permute.xlu0 %443 }
  0xd2   :  { %744 = vst [vmem:[%s1272_s1 + $0x108] sm:$0xff] %v444_v42  ;;  %v587_v43 = vpop.permute.xlu2 %586 }
  0xd3   :  { %766 = vst [vmem:[%s1272_s1 + $0x160] sm:$0xff] %v587_v43 }
  0xd8   :  { %v496_v44 = vpop.permute.xlu1 %495 }
  0xd9   :  { %752 = vst [vmem:[%s1272_s1 + $0x128] sm:$0xff] %v496_v44  ;;  %v483_v45 = vpop.permute.xlu0 %482 }
  0xda   :  { %750 = vst [vmem:[%s1272_s1 + $0x120] sm:$0xff] %v483_v45  ;;  %v626_v46 = vpop.permute.xlu2 %625 }
  0xdb   :  { %772 = vst [vmem:[%s1272_s1 + $0x178] sm:$0xff] %v626_v46 }
  0xe0   :  { %v535_v47 = vpop.permute.xlu1 %534 }
  0xe1   :  { %758 = vst [vmem:[%s1272_s1 + $0x140] sm:$0xff] %v535_v47  ;;  %v522_v48 = vpop.permute.xlu0 %521 }
  0xe2   :  { %756 = vst [vmem:[%s1272_s1 + $0x138] sm:$0xff] %v522_v48 }
  0xe8   :  { %v574_v49 = vpop.permute.xlu1 %573 }
  0xe9   :  { %764 = vst [vmem:[%s1272_s1 + $0x158] sm:$0xff] %v574_v49  ;;  %v561_v50 = vpop.permute.xlu0 %560 }
  0xea   :  { %762 = vst [vmem:[%s1272_s1 + $0x150] sm:$0xff] %v561_v50 }
  0xf0   :  { %v613_v51 = vpop.permute.xlu1 %612 }
  0xf1   :  { %770 = vst [vmem:[%s1272_s1 + $0x170] sm:$0xff] %v613_v51  ;;  %v600_v52 = vpop.permute.xlu0 %599 }
  0xf2   :  { %768 = vst [vmem:[%s1272_s1 + $0x168] sm:$0xff] %v600_v52 }

// kernel: albef_forward.14
= control target key start
LH: loop header
LB: loop body
LE: loop exit
PB: predicated region body
PF: predicated region fallthrough
CT: control target
= control target key end

     0   :  { %vm27_vm0 = vcmask 523264   ;;  %vm52_vm1 = vcmask 261120   ;;  %s132_s1 = inlined_call_operand.vmem [shape: f32[64,32], index: 1, kind: input, shape index: {}]   ;;  %s133_s2 = inlined_call_operand.vmem [shape: f32[1,32], index: 2, kind: input, shape index: {}]   ;;  %s134_s0 = inlined_call_operand.vmem [shape: f32[8,64], index: 0, kind: input, shape index: {}]   ;;  %s135_s3 = inlined_call_operand.vmem [shape: f32[8,32], index: 3, kind: output, shape index: {}]  }
   0x1   :  { %v22_v0 = vld [vmem:[%s132_s1 + $0x38] sm:$0xff]  ;;  %v21_v1 = vld [vmem:[%s132_s1 + $0x30] sm:$0xff]  ;;  %v20_v2 = vld [vmem:[%s132_s1 + $0x28] sm:$0xff] }
   0x2   :  { %39 = vmatpush.msra.mxu0 %v22_v0  ;;  %v19_v3 = vld [vmem:[%s132_s1 + $0x20] sm:$0xff]  ;;  %v18_v4 = vld [vmem:[%s132_s1 + $0x18] sm:$0xff]  ;;  %v17_v5 = vld [vmem:[%s132_s1 + $0x10] sm:$0xff] }
   0x3   :  { %v16_v6 = vld [vmem:[%s132_s1 + $0x8] sm:$0xff]  ;;  %v15_v7 = vld [vmem:[%s132_s1] sm:$0xff] }
   0x4   :  { %40 = vmatpush.msra.mxu0 %v21_v1  ;;  %v14_v8 = vld [vmem:[%s134_s0] sm:$0xff] }
   0x5   :  { %v74_v9 = vld [vmem:[%s133_s2] ss:$0 sm:$0xff] }
   0x6   :  { %41 = vmatpush.msra.mxu0 %v20_v2 }
   0x8   :  { %42 = vmatpush.msra.mxu0 %v19_v3 }
   0xa   :  { %43 = vmatpush.msra.mxu0 %v18_v4 }
   0xc   :  { %44 = vmatpush.msra.mxu0 %v17_v5 }
   0xe   :  { %45 = vmatpush.msra.mxu0 %v16_v6 }
  0x10   :  { %46 = vmatpush.msra.mxu0 %v15_v7 }
  0x11   :  { %73 = vmatmul.msk.f32.vlgmr.msra.gmra.mxu0 %vm27_vm0, %v14_v8 }
  0x8e   :  { %v48_v10 = vpop.f32.mrf.mxu0 }
  0x8f   :  { %v49_v11 = vadd.f32 %v74_v9, %v48_v10 }
  0x91   :  { %v51_v12 = vmul.f32 %v49_v11, %v49_v11 }
  0x93   :  { %v53_v13 = vsel %vm52_vm1, %v51_v12, 0.0 }
  0x94   :  { %54 = vadd.xlane.f32.xlu0 %v53_v13 }
 0x107   :  { %v55_v14 = vpop.xlane.xlu0 %54 }
 0x108   :  { %v56_v15 = vmax.f32 %v55_v14, 1e-24 }
 0x10a   :  { %75 = vrsqrt.f32 %v56_v15  ;;  %vm63_vm3 = vweird.f32 %v56_v15 }
 0x110   :  { %v76_v16 = vpop.eup %75 }
 0x111   :  { %v58_v17 = vmul.f32 %v76_v16, %v56_v15  ;;  %vm64_vm2 = vweird.f32 %v76_v16 }
 0x112   :  { %vm65_vm4 = vmor %vm63_vm3, %vm64_vm2 }
 0x113   :  { %v59_v18 = vmul.f32 %v76_v16, %v58_v17 }
 0x115   :  { %v60_v19 = vmul.f32 0.5, %v59_v18 }
 0x117   :  { %v61_v20 = vsub.f32 1.5, %v60_v19 }
 0x119   :  { %v62_v21 = vmul.f32 %v76_v16, %v61_v20 }
 0x11b   :  { %v66_v22 = vsel %vm65_vm4, %v76_v16, %v62_v21 }
 0x11c   :  { %v67_v23 = vmul.f32 %v66_v22, %v49_v11 }
 0x11e   :  { %68 = vst.msk [vmem:[%s135_s3] sm:$0xff] %vm52_vm1, %v67_v23 }

// kernel: albef_forward.11
= control target key start
LH: loop header
LB: loop body
LE: loop exit
PB: predicated region body
PF: predicated region fallthrough
CT: control target
= control target key end

     0   :  { %s3533_s0 = inlined_call_operand.vmem [shape: f32[2,13,768], index: 0, kind: input, shape index: {}]   ;;  %s3534_s1 = inlined_call_operand.vmem [shape: f32[768,64], index: 1, kind: input, shape index: {}]   ;;  %s3535_s2 = inlined_call_operand.vmem [shape: f32[13,64], index: 2, kind: input, shape index: {}]   ;;  %s3536_s3 = inlined_call_operand.vmem [shape: f32[1,64], index: 3, kind: input, shape index: {}]   ;;  %s3537_s4 = inlined_call_operand.vmem [shape: f32[1,64], index: 4, kind: input, shape index: {}]   ;;  %s3538_s5 = inlined_call_operand.vmem [shape: f32[4,64,16], index: 5, kind: input, shape index: {}]   ;;  %s3539_s6 = inlined_call_operand.vmem [shape: f32[4,64,16], index: 6, kind: input, shape index: {}]   ;;  %s3540_s7 = inlined_call_operand.vmem [shape: f32[4,64,16], index: 7, kind: input, shape index: {}]   ;;  %s3541_s8 = inlined_call_operand.vmem [shape: f32[4,1,16], index: 8, kind: input, shape index: {}]   ;;  %s3542_s9 = inlined_call_operand.vmem [shape: f32[4,1,16], index: 9, kind: input, shape index: {}]   ;;  %s3543_s10 = inlined_call_operand.vmem [shape: f32[4,1,16], index: 10, kind: input, shape index: {}]   ;;  %s3544_s11 = inlined_call_operand.vmem [shape: f32[4,16,64], index: 11, kind: input, shape index: {}]   ;;  %s3545_s12 = inlined_call_operand.vmem [shape: f32[1,64], index: 12, kind: input, shape index: {}]   ;;  %s3546_s13 = inlined_call_operand.vmem [shape: f32[1,64], index: 13, kind: input, shape index: {}]   ;;  %s3547_s14 = inlined_call_operand.vmem [shape: f32[1,64], index: 14, kind: input, shape index: {}]   ;;  %s3548_s15 = inlined_call_operand.vmem [shape: f32[64,256], index: 15, kind: input, shape index: {}]   ;;  %s3549_s16 = inlined_call_operand.vmem [shape: f32[1,256], index: 16, kind: input, shape index: {}]   ;;  %s3550_s17 = inlined_call_operand.vmem [shape: f32[256,64], index: 17, kind: input, shape index: {}]   ;;  %s3551_s18 = inlined_call_operand.vmem [shape: f32[1,64], index: 18, kind: input, shape index: {}]   ;;  %s3552_s19 = inlined_call_operand.vmem [shape: f32[1,64], index: 19, kind: input, shape index: {}]   ;;  %s3553_s20 = inlined_call_operand.vmem [shape: f32[1,64], index: 20, kind: input, shape index: {}]   ;;  %s3554_s21 = inlined_call_operand.vmem [shape: f32[2,13,64], index: 21, kind: output, shape index: {}]  }
   0x1   :  { %3559 = sst [smem:[#allocation2_spill]] %s3533_s0 }
   0x2   :  { %3560 = sst [smem:[#allocation3_spill]] %s3534_s1 }
   0x3   :  { %3561 = sst [smem:[#allocation4_spill]] %s3535_s2  ;;  %s2522_s2 = smov 0  }
   0x4   :  { %3562 = sst [smem:[#allocation5_spill]] %s3536_s3 }
   0x5   :  { %3563 = sst [smem:[#allocation6_spill]] %s3537_s4 }
   0x6   :  { %3564 = sst [smem:[#allocation7_spill]] %s3538_s5 }
   0x7 LB: > { %s2175_s25 = sadd.s32 4294967295, %s2409_s2   ;;  %p2179_p0 = scmp.ge.s32.totalorder %s2409_s2, 1  ;;  %s2409_s2 = sphi %s2522_s2, %s31_s2  }
   0x8   : > { %p587_p1 = scmp.lt.s32.totalorder %s2409_s2, 3 }
   0xa   : > { %p588_p2 = pnand %p2179_p0, %p587_p1 }
   0xb   : > { %s3565_s3 = sld [smem:[#allocation3_spill]] (!%p588_p2)  ;;  %p2637_p3 = scmp.lt.s32.totalorder (!%p588_p2), %s2175_s25, 1 }
   0xc   : > { %591 = sbr.rel (%p588_p2) target bundleno = 3644 (0xe3c), region = 104  ;;  %s3567_s26 = sld [smem:[#allocation2_spill]] (!%p588_p2) }
   0xd   : > { %s3568_s0 = sld [smem:[#allocation4_spill]] (!%p588_p2) }
   0xe   : > { %s3569_s23 = sld [smem:[#allocation7_spill]] (!%p588_p2) }
  0x11   : > { %v692_v0 = vld [vmem:[%s3565_s3 + $0x70] sm:$0xff]  ;;  %v693_v1 = vld [vmem:[%s3565_s3 + $0x78] sm:$0xff]  ;;  %v690_v11 = vld [vmem:[%s3565_s3 + $0x60] sm:$0xff]  ;;  %s3573_s25 = smov (!%p2637_p3, %s2175_s25), 1  ;;  %vm910_vm0 = vcmask 523264   ;;  %vm914_vm1 = vcmask 520192  }
  0x12   : > { %v708_v2 = vld [vmem:[%s3565_s3 + $0xf0] sm:$0xff]  ;;  %v781_v3 = vpack.c.bf16 %v693_v1, %v692_v0  ;;  %v709_v4 = vld [vmem:[%s3565_s3 + $0xf8] sm:$0xff]  ;;  %v691_v13 = vld [vmem:[%s3565_s3 + $0x68] sm:$0xff]  ;;  %s2319_s22 = smul.u32 96, %s3573_s25  ;;  %vm1067_vm9 = vcmask 130048   ;;  %vm1135_vm10 = vcmask 1044480  }
  0x13   : > { %v724_v5 = vld [vmem:[%s3565_s3 + $0x170] sm:$0xff]  ;;  %v725_v6 = vld [vmem:[%s3565_s3 + $0x178] sm:$0xff]  ;;  %v789_v7 = vpack.c.bf16 %v709_v4, %v708_v2  ;;  %v706_v14 = vld [vmem:[%s3565_s3 + $0xe0] sm:$0xff]  ;;  %v780_v16 = vpack.c.bf16 %v691_v13, %v690_v11  ;;  %vm1105_vm11 = vcmask 105472   ;;  %vm1109_vm12 = vcmask 102400   ;;  %s2318_s28 = sshll.u32 %s3573_s25, 4 }
  0x14   : > { %v797_v8 = vpack.c.bf16 %v725_v6, %v724_v5  ;;  %v740_v9 = vld [vmem:[%s3565_s3 + $0x1f0] sm:$0xff]  ;;  %v741_v10 = vld [vmem:[%s3565_s3 + $0x1f8] sm:$0xff]  ;;  %822 = vmatpush.bf16.msra.mxu0 %v781_v3  ;;  %v707_v15 = vld [vmem:[%s3565_s3 + $0xe8] sm:$0xff]  ;;  %s2732_s1 = scalar_lea.vmem %s3567_s26, %s2319_s22  ;;  %s3570_s22 = sld [smem:[#allocation5_spill]] }
  0x15   : > { %v805_v12 = vpack.c.bf16 %v741_v10, %v740_v9  ;;  %836 = vmatpush.bf16.msra.mxu1 %v789_v7  ;;  %v788_v17 = vpack.c.bf16 %v707_v15, %v706_v14  ;;  %v722_v18 = vld [vmem:[%s3565_s3 + $0x160] sm:$0xff]  ;;  %v723_v19 = vld [vmem:[%s3565_s3 + $0x168] sm:$0xff]  ;;  %v688_v23 = vld [vmem:[%s3565_s3 + $0x50] sm:$0xff]  ;;  %s3571_s26 = sld [smem:[#allocation6_spill]]  ;;  %s656_s30 = scalar_lea.vmem %s3554_s21, %s2318_s28 }
  0x16   : > { %850 = vmatpush.bf16.msra.mxu2 %v797_v8  ;;  %v738_v20 = vld [vmem:[%s3565_s3 + $0x1e0] sm:$0xff]  ;;  %v796_v21 = vpack.c.bf16 %v723_v19, %v722_v18  ;;  %v739_v22 = vld [vmem:[%s3565_s3 + $0x1e8] sm:$0xff]  ;;  %v689_v24 = vld [vmem:[%s3565_s3 + $0x58] sm:$0xff] }
  0x17   : > { %864 = vmatpush.bf16.msra.mxu3 %v805_v12  ;;  %v804_v25 = vpack.c.bf16 %v739_v22, %v738_v20  ;;  %v704_v26 = vld [vmem:[%s3565_s3 + $0xd0] sm:$0xff]  ;;  %v705_v27 = vld [vmem:[%s3565_s3 + $0xd8] sm:$0xff]  ;;  %v779_v29 = vpack.c.bf16 %v689_v24, %v688_v23  ;;  %v686_v35 = vld [vmem:[%s3565_s3 + $0x40] sm:$0xff] }
  0x18   : > { %v720_v28 = vld [vmem:[%s3565_s3 + $0x150] sm:$0xff]  ;;  %823 = vmatpush.bf16.msra.mxu0 %v780_v16  ;;  %v721_v30 = vld [vmem:[%s3565_s3 + $0x158] sm:$0xff]  ;;  %v787_v33 = vpack.c.bf16 %v705_v27, %v704_v26  ;;  %v687_v36 = vld [vmem:[%s3565_s3 + $0x48] sm:$0xff] }
  0x19   : > { %v736_v31 = vld [vmem:[%s3565_s3 + $0x1d0] sm:$0xff]  ;;  %v737_v32 = vld [vmem:[%s3565_s3 + $0x1d8] sm:$0xff]  ;;  %837 = vmatpush.bf16.msra.mxu1 %v788_v17  ;;  %v795_v34 = vpack.c.bf16 %v721_v30, %v720_v28  ;;  %v702_v37 = vld [vmem:[%s3565_s3 + $0xc0] sm:$0xff]  ;;  %v778_v44 = vpack.c.bf16 %v687_v36, %v686_v35 }
  0x1a   : > { %851 = vmatpush.bf16.msra.mxu2 %v796_v21  ;;  %v803_v38 = vpack.c.bf16 %v737_v32, %v736_v31  ;;  %v703_v39 = vld [vmem:[%s3565_s3 + $0xc8] sm:$0xff]  ;;  %v718_v40 = vld [vmem:[%s3565_s3 + $0x140] sm:$0xff]  ;;  %v684_v47 = vld [vmem:[%s3565_s3 + $0x30] sm:$0xff] }
  0x1b   : > { %865 = vmatpush.bf16.msra.mxu3 %v804_v25  ;;  %v719_v41 = vld [vmem:[%s3565_s3 + $0x148] sm:$0xff]  ;;  %v734_v42 = vld [vmem:[%s3565_s3 + $0x1c0] sm:$0xff]  ;;  %v786_v45 = vpack.c.bf16 %v703_v39, %v702_v37  ;;  %v685_v48 = vld [vmem:[%s3565_s3 + $0x38] sm:$0xff] }
  0x1c   : > { %v735_v43 = vld [vmem:[%s3565_s3 + $0x1c8] sm:$0xff]  ;;  %824 = vmatpush.bf16.msra.mxu0 %v779_v29  ;;  %v794_v46 = vpack.c.bf16 %v719_v41, %v718_v40  ;;  %v700_v49 = vld [vmem:[%s3565_s3 + $0xb0] sm:$0xff]  ;;  %v701_v51 = vld [vmem:[%s3565_s3 + $0xb8] sm:$0xff]  ;;  %v777_v56 = vpack.c.bf16 %v685_v48, %v684_v47 }
  0x1d   : > { %838 = vmatpush.bf16.msra.mxu1 %v787_v33  ;;  %v802_v50 = vpack.c.bf16 %v735_v43, %v734_v42  ;;  %v716_v52 = vld [vmem:[%s3565_s3 + $0x130] sm:$0xff]  ;;  %v717_v53 = vld [vmem:[%s3565_s3 + $0x138] sm:$0xff]  ;;  %v785_v57 = vpack.c.bf16 %v701_v51, %v700_v49  ;;  %v682_v59 = vld [vmem:[%s3565_s3 + $0x20] sm:$0xff] }
  0x1e   : > { %852 = vmatpush.bf16.msra.mxu2 %v795_v34  ;;  %v732_v54 = vld [vmem:[%s3565_s3 + $0x1b0] sm:$0xff]  ;;  %v733_v55 = vld [vmem:[%s3565_s3 + $0x1b8] sm:$0xff]  ;;  %v793_v58 = vpack.c.bf16 %v717_v53, %v716_v52  ;;  %v683_v60 = vld [vmem:[%s3565_s3 + $0x28] sm:$0xff] }
  0x1f   : > { %866 = vmatpush.bf16.msra.mxu3 %v803_v38  ;;  %v698_v61 = vld [vmem:[%s3565_s3 + $0xa0] sm:$0xff]  ;;  %v801_v62 = vpack.c.bf16 %v733_v55, %v732_v54  ;;  %v699_v63 = vld [vmem:[%s3565_s3 + $0xa8] sm:$0xff]  ;;  %v776_v4 = vpack.c.bf16 %v683_v60, %v682_v59  ;;  %v680_v7 = vld [vmem:[%s3565_s3 + $0x10] sm:$0xff] }
  0x20   : > { %825 = vmatpush.bf16.msra.mxu0 %v778_v44  ;;  %v714_v0 = vld [vmem:[%s3565_s3 + $0x120] sm:$0xff]  ;;  %v715_v1 = vld [vmem:[%s3565_s3 + $0x128] sm:$0xff]  ;;  %v784_v5 = vpack.c.bf16 %v699_v63, %v698_v61  ;;  %v681_v8 = vld [vmem:[%s3565_s3 + $0x18] sm:$0xff] }
  0x21   : > { %839 = vmatpush.bf16.msra.mxu1 %v786_v45  ;;  %v730_v2 = vld [vmem:[%s3565_s3 + $0x1a0] sm:$0xff]  ;;  %v731_v3 = vld [vmem:[%s3565_s3 + $0x1a8] sm:$0xff]  ;;  %v792_v6 = vpack.c.bf16 %v715_v1, %v714_v0  ;;  %v696_v9 = vld [vmem:[%s3565_s3 + $0x90] sm:$0xff]  ;;  %v775_v16 = vpack.c.bf16 %v681_v8, %v680_v7 }
  0x22   : > { %853 = vmatpush.bf16.msra.mxu2 %v794_v46  ;;  %v800_v10 = vpack.c.bf16 %v731_v3, %v730_v2  ;;  %v697_v11 = vld [vmem:[%s3565_s3 + $0x98] sm:$0xff]  ;;  %v712_v12 = vld [vmem:[%s3565_s3 + $0x110] sm:$0xff]  ;;  %v678_v17 = vld [vmem:[%s3565_s3] sm:$0xff] }
  0x23   : > { %867 = vmatpush.bf16.msra.mxu3 %v802_v50  ;;  %v713_v13 = vld [vmem:[%s3565_s3 + $0x118] sm:$0xff]  ;;  %v728_v14 = vld [vmem:[%s3565_s3 + $0x190] sm:$0xff]  ;;  %v679_v18 = vld [vmem:[%s3565_s3 + $0x8] sm:$0xff]  ;;  %v783_v20 = vpack.c.bf16 %v697_v11, %v696_v9 }
  0x24   : > { %826 = vmatpush.bf16.msra.mxu0 %v777_v56  ;;  %v729_v15 = vld [vmem:[%s3565_s3 + $0x198] sm:$0xff]  ;;  %v694_v19 = vld [vmem:[%s3565_s3 + $0x80] sm:$0xff]  ;;  %v791_v21 = vpack.c.bf16 %v713_v13, %v712_v12  ;;  %v695_v22 = vld [vmem:[%s3565_s3 + $0x88] sm:$0xff]  ;;  %v774_v32 = vpack.c.bf16 %v679_v18, %v678_v17 }
  0x25   : > { %840 = vmatpush.bf16.msra.mxu1 %v785_v57  ;;  %v710_v23 = vld [vmem:[%s3565_s3 + $0x100] sm:$0xff]  ;;  %v711_v24 = vld [vmem:[%s3565_s3 + $0x108] sm:$0xff]  ;;  %v799_v25 = vpack.c.bf16 %v729_v15, %v728_v14  ;;  %v756_v26 = vld [vmem:[%s3565_s3 + $0x270] sm:$0xff]  ;;  %v782_v36 = vpack.c.bf16 %v695_v22, %v694_v19 }
  0x26   : > { %854 = vmatpush.bf16.msra.mxu2 %v793_v58  ;;  %v757_v27 = vld [vmem:[%s3565_s3 + $0x278] sm:$0xff]  ;;  %v772_v28 = vld [vmem:[%s3565_s3 + $0x2f0] sm:$0xff]  ;;  %v726_v30 = vld [vmem:[%s3565_s3 + $0x180] sm:$0xff]  ;;  %v790_v37 = vpack.c.bf16 %v711_v24, %v710_v23 }
  0x27   : > { %868 = vmatpush.bf16.msra.mxu3 %v801_v62  ;;  %v773_v29 = vld [vmem:[%s3565_s3 + $0x2f8] sm:$0xff]  ;;  %v727_v31 = vld [vmem:[%s3565_s3 + $0x188] sm:$0xff]  ;;  %v662_v33 = vld [vmem:[%s2732_s1 + $0x10] sm:$0xff]  ;;  %v813_v41 = vpack.c.bf16 %v757_v27, %v756_v26 }
  0x28   : > { %827 = vmatpush.bf16.msra.mxu0 %v776_v4  ;;  %v660_v34 = vld [vmem:[%s2732_s1] sm:$0xff]  ;;  %v666_v35 = vld [vmem:[%s2732_s1 + $0x30] sm:$0x1f]  ;;  %v661_v39 = vld [vmem:[%s2732_s1 + $0x8] sm:$0xff]  ;;  %v821_v42 = vpack.c.bf16 %v773_v29, %v772_v28  ;;  %v798_v44 = vpack.c.bf16 %v727_v31, %v726_v30 }
  0x29   : > { %841 = vmatpush.bf16.msra.mxu1 %v784_v5  ;;  %v668_v38 = vld [vmem:[%s2732_s1 + $0x40] sm:$0x1f]  ;;  %v667_v40 = vld [vmem:[%s2732_s1 + $0x38] sm:$0x1f]  ;;  %v755_v45 = vld [vmem:[%s3565_s3 + $0x268] sm:$0xff]  ;;  %v672_v48 = vpack.c.bf16 %v666_v35, %v660_v34 }
  0x2a   : > { %855 = vmatpush.bf16.msra.mxu2 %v792_v6  ;;  %v754_v43 = vld [vmem:[%s3565_s3 + $0x260] sm:$0xff]  ;;  %v771_v47 = vld [vmem:[%s3565_s3 + $0x2e8] sm:$0xff]  ;;  %v674_v49 = vpack.c.bf16 %v668_v38, %v662_v33  ;;  %v663_v50 = vld [vmem:[%s2732_s1 + $0x18] sm:$0xff]  ;;  %v673_v52 = vpack.c.bf16 %v667_v40, %v661_v39 }
  0x2b   : > { %869 = vmatpush.bf16.msra.mxu3 %v800_v10  ;;  %v770_v46 = vld [vmem:[%s3565_s3 + $0x2e0] sm:$0xff]  ;;  %v669_v51 = vld [vmem:[%s2732_s1 + $0x48] sm:$0x1f]  ;;  %v812_v53 = vpack.c.bf16 %v755_v45, %v754_v43  ;;  %v752_v55 = vld [vmem:[%s3565_s3 + $0x250] sm:$0xff] }
  0x2c   : > { %828 = vmatpush.bf16.msra.mxu0 %v775_v16  ;;  %v820_v54 = vpack.c.bf16 %v771_v47, %v770_v46  ;;  %v675_v56 = vpack.c.bf16 %v669_v51, %v663_v50  ;;  %v753_v57 = vld [vmem:[%s3565_s3 + $0x258] sm:$0xff]  ;;  %v768_v58 = vld [vmem:[%s3565_s3 + $0x2d0] sm:$0xff]  ;;  %v750_v60 = vld [vmem:[%s3565_s3 + $0x240] sm:$0xff] }
  0x2d   : > { %842 = vmatpush.bf16.msra.mxu1 %v783_v20  ;;  %v769_v59 = vld [vmem:[%s3565_s3 + $0x2d8] sm:$0xff]  ;;  %v751_v61 = vld [vmem:[%s3565_s3 + $0x248] sm:$0xff]  ;;  %v766_v62 = vld [vmem:[%s3565_s3 + $0x2c0] sm:$0xff]  ;;  %v811_v0 = vpack.c.bf16 %v753_v57, %v752_v55 }
  0x2e   : > { %856 = vmatpush.bf16.msra.mxu2 %v791_v21  ;;  %v767_v63 = vld [vmem:[%s3565_s3 + $0x2c8] sm:$0xff]  ;;  %v819_v1 = vpack.c.bf16 %v769_v59, %v768_v58  ;;  %v748_v2 = vld [vmem:[%s3565_s3 + $0x230] sm:$0xff]  ;;  %v749_v3 = vld [vmem:[%s3565_s3 + $0x238] sm:$0xff]  ;;  %v810_v5 = vpack.c.bf16 %v751_v61, %v750_v60 }
  0x2f   : > { %870 = vmatpush.bf16.msra.mxu3 %v799_v25  ;;  %v764_v4 = vld [vmem:[%s3565_s3 + $0x2b0] sm:$0xff]  ;;  %v818_v6 = vpack.c.bf16 %v767_v63, %v766_v62  ;;  %v765_v7 = vld [vmem:[%s3565_s3 + $0x2b8] sm:$0xff]  ;;  %v809_v8 = vpack.c.bf16 %v749_v3, %v748_v2  ;;  %v746_v10 = vld [vmem:[%s3565_s3 + $0x220] sm:$0xff]  ;;  %v2411_v62 = vmov 64.0  }
  0x30   : > { %829 = vmatpush.bf16.msra.mxu0 %v774_v32  ;;  %v817_v9 = vpack.c.bf16 %v765_v7, %v764_v4  ;;  %v747_v11 = vld [vmem:[%s3565_s3 + $0x228] sm:$0xff]  ;;  %v762_v12 = vld [vmem:[%s3565_s3 + $0x2a0] sm:$0xff]  ;;  %v744_v16 = vld [vmem:[%s3565_s3 + $0x210] sm:$0xff]  ;;  %2349 = vrcp.f32 %v2411_v62 }
  0x31   : > { %843 = vmatpush.bf16.msra.mxu1 %v782_v36  ;;  %v763_v13 = vld [vmem:[%s3565_s3 + $0x2a8] sm:$0xff]  ;;  %v808_v14 = vpack.c.bf16 %v747_v11, %v746_v10  ;;  %v745_v17 = vld [vmem:[%s3565_s3 + $0x218] sm:$0xff]  ;;  %v760_v18 = vld [vmem:[%s3565_s3 + $0x290] sm:$0xff] }
  0x32   : > { %857 = vmatpush.bf16.msra.mxu2 %v790_v37  ;;  %v816_v15 = vpack.c.bf16 %v763_v13, %v762_v12  ;;  %v761_v19 = vld [vmem:[%s3565_s3 + $0x298] sm:$0xff]  ;;  %v807_v20 = vpack.c.bf16 %v745_v17, %v744_v16  ;;  %v742_v22 = vld [vmem:[%s3565_s3 + $0x200] sm:$0xff]  ;;  %v743_v23 = vld [vmem:[%s3565_s3 + $0x208] sm:$0xff] }
  0x33   : > { %871 = vmatpush.bf16.msra.mxu3 %v798_v44  ;;  %830 = vmatmul.bf16.vlgmr.msra.gmra.mxu0 %v672_v48  ;;  %v815_v21 = vpack.c.bf16 %v761_v19, %v760_v18  ;;  %v758_v24 = vld [vmem:[%s3565_s3 + $0x280] sm:$0xff]  ;;  %v759_v25 = vld [vmem:[%s3565_s3 + $0x288] sm:$0xff]  ;;  %v806_v27 = vpack.c.bf16 %v743_v23, %v742_v22  ;;  %v670_v29 = vld [vmem:[%s2732_s1 + $0x50] sm:$0x1f] }
  0x34   : > { %878 = vmatpush.bf16.msrb.mxu0 %v813_v41  ;;  %844 = vmatmul.bf16.vlgmr.msra.gmra.mxu1 %v673_v52  ;;  %v664_v26 = vld [vmem:[%s2732_s1 + $0x20] sm:$0xff]  ;;  %v814_v28 = vpack.c.bf16 %v759_v25, %v758_v24  ;;  %v665_v30 = vld [vmem:[%s2732_s1 + $0x28] sm:$0xff]  ;;  %v671_v31 = vld [vmem:[%s2732_s1 + $0x58] sm:$0x1f] }
  0x35   : > { %892 = vmatpush.bf16.msrb.mxu1 %v821_v42  ;;  %858 = vmatmul.bf16.vlgmr.msra.gmra.mxu2 %v674_v49  ;;  %v676_v32 = vpack.c.bf16 %v670_v29, %v664_v26  ;;  %v677_v33 = vpack.c.bf16 %v671_v31, %v665_v30  ;;  %v658_v48 = vld [vmem:[%s3568_s0] sm:$0xff]  ;;  %v659_v57 = vld [vmem:[%s3568_s0 + $0x8] sm:$0x1f]  ;;  %v981_v16 = vld [vmem:[%s3569_s23 + $0x38] sm:$0xff] }
  0x36   : > { %872 = vmatmul.bf16.vlgmr.msra.gmra.mxu3 %v675_v56  ;;  %v2350_v63 = vpop.eup %2349  ;;  %v1013_v17 = vld [vmem:[%s3539_s6 + $0x30] sm:$0xff]  ;;  %v1014_v19 = vld [vmem:[%s3539_s6 + $0x38] sm:$0xff]  ;;  %v978_v24 = vld [vmem:[%s3569_s23 + $0x20] sm:$0xff] }
  0x37   : > { %vm923_vm2 = vweird.f32 %v2350_v63  ;;  %v1018_v22 = vpack.c.bf16 %v1014_v19, %v1013_v17  ;;  %v979_v25 = vld [vmem:[%s3569_s23 + $0x28] sm:$0xff]  ;;  %v1011_v26 = vld [vmem:[%s3539_s6 + $0x20] sm:$0xff] }
  0x38   : > { %879 = vmatpush.bf16.msrb.mxu0 %v812_v53  ;;  %v2197_v29 = vld [vmem:[%s3569_s23 + $0x60] sm:$0xff]  ;;  %v2198_v30 = vld [vmem:[%s3569_s23 + $0x68] sm:$0xff] }
  0x39   : > { %893 = vmatpush.bf16.msrb.mxu1 %v820_v54  ;;  %1027 = vmatpush.bf16.msrb.mxu3 %v1018_v22  ;;  %v2329_v22 = vld [vmem:[%s3570_s22] ss:$0 sm:$0xff] }
  0x3c   : > { %880 = vmatpush.bf16.msrb.mxu0 %v811_v0  ;;  %v919_v0 = vmul.f32 64.0, %v2350_v63 }
  0x3d   : > { %894 = vmatpush.bf16.msrb.mxu1 %v819_v1 }
  0x3e   : > { %v920_v1 = vsub.f32 1.0, %v919_v0  ;;  %v1039_v0 = vld [vmem:[%s3540_s7 + $0x10] sm:$0xff] }
  0x40   : > { %881 = vmatpush.bf16.msrb.mxu0 %v810_v5  ;;  %v921_v2 = vmul.f32 %v2350_v63, %v920_v1  ;;  %v1040_v1 = vld [vmem:[%s3540_s7 + $0x18] sm:$0xff] }
  0x41   : > { %895 = vmatpush.bf16.msrb.mxu1 %v818_v6 }
  0x42   : > { %v922_v3 = vadd.f32 %v2350_v63, %v921_v2 }
  0x44   : > { %882 = vmatpush.bf16.msrb.mxu0 %v809_v8  ;;  %v2862_v4 = vsel %vm923_vm2, %v2350_v63, %v922_v3 }
  0x45   : > { %896 = vmatpush.bf16.msrb.mxu1 %v817_v9 }
  0x48   : > { %883 = vmatpush.bf16.msrb.mxu0 %v808_v14 }
  0x49   : > { %897 = vmatpush.bf16.msrb.mxu1 %v816_v15  ;;  %v980_v15 = vld [vmem:[%s3569_s23 + $0x30] sm:$0xff] }
  0x4a   : > { %v985_v18 = vpack.c.bf16 %v981_v16, %v980_v15 }
  0x4c   : > { %884 = vmatpush.bf16.msrb.mxu0 %v807_v20  ;;  %v2199_v20 = vld [vmem:[%s3569_s23 + $0x70] sm:$0xff]  ;;  %997 = vmatpush.bf16.msrb.mxu2 %v985_v18 }
  0x4d   : > { %898 = vmatpush.bf16.msrb.mxu1 %v815_v21  ;;  %v2200_v21 = vld [vmem:[%s3569_s23 + $0x78] sm:$0xff] }
  0x4e   : > { %v1178_v23 = vpack.c.bf16 %v2200_v21, %v2199_v20 }
  0x50   : > { %885 = vmatpush.bf16.msrb.mxu0 %v806_v27  ;;  %v984_v27 = vpack.c.bf16 %v979_v25, %v978_v24 }
  0x51   : > { %899 = vmatpush.bf16.msrb.mxu1 %v814_v28  ;;  %v1012_v28 = vld [vmem:[%s3539_s6 + $0x28] sm:$0xff] }
  0x52   : > { %v1017_v31 = vpack.c.bf16 %v1012_v28, %v1011_v26  ;;  %998 = vmatpush.bf16.msrb.mxu2 %v984_v27  ;;  %v2330_v26 = vld [vmem:[%s3571_s26] ss:$0 sm:$0xff] }
  0x53   : > { %886 = vmatmul.bf16.vlgmr.msrb.gmra.mxu0 %v676_v32  ;;  %v1177_v32 = vpack.c.bf16 %v2198_v30, %v2197_v29  ;;  %v2209_v30 = vld [vmem:[%s3539_s6 + $0x70] sm:$0xff] }
  0x54   : > { %900 = vmatmul.bf16.vlgmr.msrb.gmra.mxu1 %v677_v33  ;;  %1028 = vmatpush.bf16.msrb.mxu3 %v1017_v31  ;;  %v976_v33 = vld [vmem:[%s3569_s23 + $0x10] sm:$0xff] }
  0x55   : > { %1188 = vmatpush.bf16.msra.mxu1 %v1178_v23 }
  0x59   : > { %1189 = vmatpush.bf16.msra.mxu1 %v1177_v32 }
  0xb0   : > { %v831_v34 = vpop.f32.mrf.mxu0 }
  0xb1   : > { %v845_v35 = vpop.f32.mrf.mxu1 }
  0xb2   : > { %v846_v37 = vadd.f32 %v845_v35, %v831_v34  ;;  %v977_v34 = vld [vmem:[%s3569_s23 + $0x18] sm:$0xff]  ;;  %v1009_v35 = vld [vmem:[%s3539_s6 + $0x10] sm:$0xff] }
  0xb8   : > { %v859_v36 = vpop.f32.mrf.mxu2  ;;  %v833_v38 = vpop.f32.mrf.mxu0 }
  0xb9   : > { %v847_v39 = vpop.f32.mrf.mxu1  ;;  %v873_v40 = vpop.f32.mrf.mxu3  ;;  %v860_v41 = vadd.f32 %v859_v36, %v846_v37  ;;  %v983_v36 = vpack.c.bf16 %v977_v34, %v976_v33  ;;  %v1010_v37 = vld [vmem:[%s3539_s6 + $0x18] sm:$0xff] }
  0xba   : > { %v848_v43 = vadd.f32 %v847_v39, %v833_v38  ;;  %v2195_v38 = vld [vmem:[%s3569_s23 + $0x50] sm:$0xff]  ;;  %v2196_v39 = vld [vmem:[%s3569_s23 + $0x58] sm:$0xff] }
  0xbb   : > { %v874_v42 = vadd.f32 %v873_v40, %v860_v41  ;;  %v1016_v40 = vpack.c.bf16 %v1010_v37, %v1009_v35  ;;  %v1176_v41 = vpack.c.bf16 %v2196_v39, %v2195_v38  ;;  %999 = vmatpush.bf16.msrb.mxu2 %v983_v36  ;;  %v2207_v35 = vld [vmem:[%s3539_s6 + $0x60] sm:$0xff]  ;;  %v2205_v37 = vld [vmem:[%s3539_s6 + $0x50] sm:$0xff]  ;;  %v2206_v38 = vld [vmem:[%s3539_s6 + $0x58] sm:$0xff] }
  0xbc   : > { %v1208_v39 = vpack.c.bf16 %v2206_v38, %v2205_v37  ;;  %v2240_v37 = vld [vmem:[%s3569_s23 + $0xb0] sm:$0xff]  ;;  %v2241_v38 = vld [vmem:[%s3569_s23 + $0xb8] sm:$0xff] }
  0xbd   : > { %1029 = vmatpush.bf16.msrb.mxu3 %v1016_v40  ;;  %1190 = vmatpush.bf16.msra.mxu1 %v1176_v41  ;;  %v2203_v40 = vld [vmem:[%s3539_s6 + $0x40] sm:$0xff]  ;;  %v2204_v41 = vld [vmem:[%s3539_s6 + $0x48] sm:$0xff] }
  0xc0   : > { %v861_v44 = vpop.f32.mrf.mxu2 }
  0xc1   : > { %v862_v49 = vadd.f32 %v861_v44, %v848_v43  ;;  %v875_v51 = vpop.f32.mrf.mxu3  ;;  %v974_v44 = vld [vmem:[%s3569_s23] sm:$0xff] }
  0xc3   : > { %v876_v53 = vadd.f32 %v875_v51, %v862_v49  ;;  %v2193_v49 = vld [vmem:[%s3569_s23 + $0x40] sm:$0xff] }
  0xd0   : > { %v887_v45 = vpop.f32.mrf.mxu0 }
  0xd1   : > { %v901_v46 = vpop.f32.mrf.mxu1  ;;  %v888_v47 = vadd.f32 %v887_v45, %v874_v42  ;;  %v975_v45 = vld [vmem:[%s3569_s23 + $0x8] sm:$0xff] }
  0xd3   : > { %v902_v50 = vadd.f32 %v901_v46, %v888_v47  ;;  %v1007_v46 = vld [vmem:[%s3539_s6] sm:$0xff]  ;;  %v982_v47 = vpack.c.bf16 %v975_v45, %v974_v44 }
  0xd4   : > { %v2333_v45 = vld [vmem:[%s3542_s9] ss:$0 sm:$0xff] }
  0xd5   : > { %v2851_v52 = vadd.f32 %v902_v50, %v658_v48  ;;  %v1008_v48 = vld [vmem:[%s3539_s6 + $0x8] sm:$0xff]  ;;  %1000 = vmatpush.bf16.msrb.mxu2 %v982_v47 }
  0xd6   : > { %v2194_v50 = vld [vmem:[%s3569_s23 + $0x48] sm:$0xff] }
  0xd7   : > { %v911_v54 = vsel %vm910_vm0, %v2851_v52, 0.0 }
  0xd8   : > { %v889_v55 = vpop.f32.mrf.mxu0  ;;  %912 = vadd.xlane.f32.xlu0 %v911_v54  ;;  %v1175_v54 = vpack.c.bf16 %v2194_v50, %v2193_v49  ;;  %v2219_v49 = vld [vmem:[%s3540_s7 + $0x70] sm:$0xff]  ;;  %v2220_v50 = vld [vmem:[%s3540_s7 + $0x78] sm:$0xff] }
  0xd9   : > { %v890_v56 = vadd.f32 %v889_v55, %v876_v53  ;;  %v903_v58 = vpop.f32.mrf.mxu1  ;;  %v1015_v53 = vpack.c.bf16 %v1008_v48, %v1007_v46  ;;  %v1043_v55 = vld [vmem:[%s3540_s7 + $0x30] sm:$0xff] }
  0xda   : > { %1191 = vmatpush.bf16.msra.mxu1 %v1175_v54 }
  0xdb   : > { %v904_v59 = vadd.f32 %v903_v58, %v890_v56  ;;  %1030 = vmatpush.bf16.msrb.mxu3 %v1015_v53  ;;  %v1044_v56 = vld [vmem:[%s3540_s7 + $0x38] sm:$0xff]  ;;  %v1242_v53 = vpack.c.bf16 %v2220_v50, %v2219_v49 }
  0xdd   : > { %v2858_v60 = vadd.f32 %v904_v59, %v659_v57  ;;  %v1048_v57 = vpack.c.bf16 %v1044_v56, %v1043_v55  ;;  %v1041_v59 = vld [vmem:[%s3540_s7 + $0x20] sm:$0xff]  ;;  %v2218_v56 = vld [vmem:[%s3540_s7 + $0x68] sm:$0xff] }
  0xde   : > { %v2217_v55 = vld [vmem:[%s3540_s7 + $0x60] sm:$0xff] }
  0xdf   : > { %v915_v61 = vsel %vm914_vm1, %v2858_v60, 0.0  ;;  %1057 = vmatpush.bf16.msra.mxu2 %v1048_v57 }
  0xe0   : > { %916 = vadd.xlane.f32.xlu0 %v915_v61  ;;  %v1042_v61 = vld [vmem:[%s3540_s7 + $0x28] sm:$0xff] }
  0xe1   : > { %v1047_v63 = vpack.c.bf16 %v1042_v61, %v1041_v59  ;;  %v1241_v59 = vpack.c.bf16 %v2218_v56, %v2217_v55  ;;  %v2215_v61 = vld [vmem:[%s3540_s7 + $0x50] sm:$0xff]  ;;  %v2331_v56 = vld [vmem:[%s3541_s8 + $0x1] ss:$0 sm:$0xff] }
  0xe3   : > { %1058 = vmatpush.bf16.msra.mxu2 %v1047_v63 }
 0x14b   : > { %v913_v5 = vpop.xlane.xlu0 %912 }
 0x14c   : > { %v925_v6 = vmul.f32 %v2862_v4, %v913_v5 }
 0x14e   : > { %v2866_v7 = vsub.f32 %v2851_v52, %v925_v6  ;;  %v1046_v6 = vpack.c.bf16 %v1040_v1, %v1039_v0  ;;  %v2213_v0 = vld [vmem:[%s3540_s7 + $0x40] sm:$0xff]  ;;  %v2214_v1 = vld [vmem:[%s3540_s7 + $0x48] sm:$0xff] }
 0x150   : > { %v929_v8 = vmul.f32 %v2866_v7, %v2866_v7  ;;  %1059 = vmatpush.bf16.msra.mxu2 %v1046_v6  ;;  %v1239_v6 = vpack.c.bf16 %v2214_v1, %v2213_v0 }
 0x152   : > { %v931_v9 = vsel %vm910_vm0, %v929_v8, 0.0 }
 0x153   : > { %932 = vadd.xlane.f32.xlu1 %v931_v9  ;;  %v917_v10 = vpop.xlane.xlu0 %916  ;;  %v1037_v9 = vld [vmem:[%s3540_s7] sm:$0xff] }
 0x154   : > { %v926_v11 = vmul.f32 %v2862_v4, %v917_v10  ;;  %v1038_v10 = vld [vmem:[%s3540_s7 + $0x8] sm:$0xff] }
 0x156   : > { %v2873_v12 = vsub.f32 %v2858_v60, %v926_v11 }
 0x158   : > { %v930_v13 = vmul.f32 %v2873_v12, %v2873_v12 }
 0x15a   : > { %v934_v14 = vsel %vm914_vm1, %v930_v13, 0.0  ;;  %v1045_v13 = vpack.c.bf16 %v1038_v10, %v1037_v9 }
 0x15b   : > { %935 = vadd.xlane.f32.xlu1 %v934_v14 }
 0x15c   : > { %1060 = vmatpush.bf16.msra.mxu2 %v1045_v13 }
 0x1c6   : > { %v933_v42 = vpop.xlane.xlu1 %932 }
 0x1c7   : > { %v937_v43 = vmul.f32 %v933_v42, %v2862_v4  ;;  %v1207_v42 = vpack.c.bf16 %v2204_v41, %v2203_v40  ;;  %v1404_v40 = vpack.c.bf16 %v2241_v38, %v2240_v37 }
 0x1c9   : > { %v939_v51 = vadd.f32 1e-06, %v937_v43 }
 0x1cb   : > { %2351 = vrsqrt.f32 %v939_v51  ;;  %vm947_vm4 = vweird.f32 %v939_v51 }
 0x1ce   : > { %v936_v58 = vpop.xlane.xlu1 %935 }
 0x1cf   : > { %v938_v62 = vmul.f32 %v936_v58, %v2862_v4 }
 0x1d1   : > { %v2352_v2 = vpop.eup %2351  ;;  %v940_v3 = vadd.f32 1e-06, %v938_v62  ;;  %v2216_v62 = vld [vmem:[%s3540_s7 + $0x58] sm:$0xff] }
 0x1d2   : > { %v942_v5 = vmul.f32 %v2352_v2, %v939_v51  ;;  %vm948_vm3 = vweird.f32 %v2352_v2  ;;  %v2332_v51 = vld [vmem:[%s3541_s8] ss:$0 sm:$0xff]  ;;  %v1240_v63 = vpack.c.bf16 %v2216_v62, %v2215_v61  ;;  %v1164_v62 = vld [vmem:[%s3544_s11 + $0x8] sm:$0xff] }
 0x1d3   : > { %2353 = vrsqrt.f32 %v940_v3  ;;  %vm949_vm5 = vmor %vm947_vm4, %vm948_vm3  ;;  %vm957_vm7 = vweird.f32 %v940_v3  ;;  %v1163_v61 = vld [vmem:[%s3544_s11] sm:$0xff] }
 0x1d4   : > { %v943_v8 = vmul.f32 %v2352_v2, %v942_v5 }
 0x1d6   : > { %v944_v11 = vmul.f32 0.5, %v943_v8 }
 0x1d8   : > { %v945_v14 = vsub.f32 1.5, %v944_v11  ;;  %v2335_v11 = vld [vmem:[%s3542_s9 + $0x1] ss:$0 sm:$0xff] }
 0x1d9   : > { %v2354_v15 = vpop.eup %2353 }
 0x1da   : > { %v946_v16 = vmul.f32 %v2352_v2, %v945_v14  ;;  %v952_v17 = vmul.f32 %v2354_v15, %v940_v3  ;;  %vm958_vm6 = vweird.f32 %v2354_v15 }
 0x1db   : > { %vm959_vm8 = vmor %vm957_vm7, %vm958_vm6 }
 0x1dc   : > { %v953_v18 = vmul.f32 %v2354_v15, %v952_v17  ;;  %v950_v19 = vsel %vm949_vm5, %v2352_v2, %v946_v16  ;;  %v2334_v2 = vld [vmem:[%s3543_s10] ss:$0 sm:$0xff] }
 0x1dd   : > { %v961_v23 = vmul.f32 %v950_v19, %v2866_v7  ;;  %v2210_v7 = vld [vmem:[%s3539_s6 + $0x78] sm:$0xff] }
 0x1de   : > { %v954_v20 = vmul.f32 0.5, %v953_v18  ;;  %v1210_v33 = vpack.c.bf16 %v2210_v7, %v2209_v30 }
 0x1df   : > { %v966_v27 = vmul.f32 %v2329_v22, %v961_v23  ;;  %v2336_v23 = vld [vmem:[%s3543_s10 + $0x1] ss:$0 sm:$0xff] }
 0x1e0   : > { %v955_v21 = vsub.f32 1.5, %v954_v20 }
 0x1e1   : > { %v971_v31 = vadd.f32 %v2330_v26, %v966_v27 }
 0x1e2   : > { %v956_v24 = vmul.f32 %v2354_v15, %v955_v21 }
 0x1e4   : > { %v960_v25 = vsel %vm959_vm8, %v2354_v15, %v956_v24 }
 0x1e5   : > { %v962_v28 = vmul.f32 %v960_v25, %v2873_v12  ;;  %v2208_v12 = vld [vmem:[%s3539_s6 + $0x68] sm:$0xff] }
 0x1e6   : > { %v1209_v36 = vpack.c.bf16 %v2208_v12, %v2207_v35 }
 0x1e7   : > { %v967_v29 = vmul.f32 %v2329_v22, %v962_v28 }
 0x1e9   : > { %v972_v32 = vadd.f32 %v2330_v26, %v967_v29 }
 0x1eb   : > { %v2990_v34 = vpack.c.bf16 %v972_v32, %v971_v31 }
 0x1ed   : > { %2183 = vmatmul.msk.bf16.vlgmr.msrb.gmra.mxu2 %vm910_vm0, %v2990_v34  ;;  %2184 = vmatmul.msk.bf16.vlgmr.msrb.gmra.mxu3 %vm910_vm0, %v2990_v34 }
 0x1ee   : > { %2202 = vmatmul.msk.bf16.vlgmr.msra.gmra.mxu1 %vm910_vm0, %v2990_v34  ;;  %1220 = vmatpush.bf16.msrb.mxu2 %v1210_v33 }
 0x1f2   : > { %1221 = vmatpush.bf16.msrb.mxu2 %v1209_v36 }
 0x1f6   : > { %1222 = vmatpush.bf16.msrb.mxu2 %v1208_v39 }
 0x1fa   : > { %1223 = vmatpush.bf16.msrb.mxu2 %v1207_v42 }
 0x1fd   : > { %2185 = vmatmul.msk.bf16.vlgmr.msra.gmra.mxu2 %vm910_vm0, %v2990_v34 }
 0x20d   : > { %2212 = vmatmul.msk.bf16.vlgmr.msrb.gmra.mxu2 %vm910_vm0, %v2990_v34 }
 0x270   : > { %v1002_v43 = vpop.f32.mrf.mxu2  ;;  %v1032_v44 = vpop.f32.mrf.mxu3 }
 0x271   : > { %v1033_v54 = vadd.f32 %v2333_v45, %v1032_v44  ;;  %v1003_v57 = vadd.f32 %v2332_v51, %v1002_v43  ;;  %v2238_v43 = vld [vmem:[%s3569_s23 + $0xa0] sm:$0xff]  ;;  %v2239_v44 = vld [vmem:[%s3569_s23 + $0xa8] sm:$0xff] }
 0x278   : > { %v1004_v46 = vpop.f32.mrf.mxu2  ;;  %v1034_v47 = vpop.f32.mrf.mxu3 }
 0x279   : > { %v1035_v48 = vadd.f32 %v2333_v45, %v1034_v47  ;;  %v1005_v3 = vadd.f32 %v2332_v51, %v1004_v46  ;;  %v1403_v45 = vpack.c.bf16 %v2239_v44, %v2238_v43  ;;  %v2236_v46 = vld [vmem:[%s3569_s23 + $0x90] sm:$0xff]  ;;  %v2237_v47 = vld [vmem:[%s3569_s23 + $0x98] sm:$0xff]  ;;  %v2234_v51 = vld [vmem:[%s3569_s23 + $0x80] sm:$0xff] }
 0x27a   : > { %v1402_v49 = vpack.c.bf16 %v2237_v47, %v2236_v46  ;;  %v2261_v43 = vld [vmem:[%s3540_s7 + $0xb8] sm:$0xff]  ;;  %v2259_v46 = vld [vmem:[%s3540_s7 + $0xa8] sm:$0xff] }
 0x27b   : > { %2186 = vmatpush.xpose.msk.msra.mxu3 %vm1067_vm9, %v1035_v48 }
 0x27f   : > { %2187 = vmatpush.xpose.msk.msra.mxu3 %vm1067_vm9, %v1033_v54  ;;  %v1193_v54 = vpop.f32.mrf.mxu1 }
 0x280   : > { %v1062_v58 = vpop.f32.mrf.mxu2 }
 0x281   : > { %v1063_v9 = vadd.f32 %v2334_v2, %v1062_v58 }
 0x282   : > { %2188 = vmatmul.msk.f32.vlgmr.msra.gmra.mxu3 %vm1067_vm9, %v1003_v57  ;;  %v1194_v57 = vadd.f32 %v2331_v56, %v1193_v54 }
 0x283   : > { %1252 = vmatpush.bf16.msrb.mxu3 %v1242_v53  ;;  %v2235_v53 = vld [vmem:[%s3569_s23 + $0x88] sm:$0xff] }
 0x284   : > { %v1401_v55 = vpack.c.bf16 %v2235_v53, %v2234_v51  ;;  %v2254_v51 = vld [vmem:[%s3540_s7 + $0x80] sm:$0xff]  ;;  %v2255_v53 = vld [vmem:[%s3540_s7 + $0x88] sm:$0xff] }
 0x285   : > { %v1465_v54 = vpack.c.bf16 %v2255_v53, %v2254_v51  ;;  %v2341_v51 = vld [vmem:[%s3542_s9 + $0x3] ss:$0 sm:$0xff] }
 0x287   : > { %1253 = vmatpush.bf16.msrb.mxu3 %v1241_v59  ;;  %v1195_v58 = vpop.f32.mrf.mxu1 }
 0x288   : > { %v1064_v5 = vpop.f32.mrf.mxu2  ;;  %v1196_v59 = vadd.f32 %v2331_v56, %v1195_v58  ;;  %v2280_v56 = vld [vmem:[%s3569_s23 + $0xf0] sm:$0xff] }
 0x289   : > { %v1065_v8 = vadd.f32 %v2334_v2, %v1064_v5 }
 0x28a   : > { %2189 = vmatmul.msk.f32.gmra.mxu3 %vm1067_vm9, %v1005_v3 }
 0x28b   : > { %1254 = vmatpush.bf16.msrb.mxu3 %v1240_v63  ;;  %2190 = vmatpush.msk.msra.mxu0 %vm1135_vm10, %v1065_v8  ;;  %v1165_v63 = vpack.c.bf16 %v1164_v62, %v1163_v61  ;;  %v2278_v62 = vld [vmem:[%s3569_s23 + $0xe0] sm:$0xff] }
 0x28d   : > { %1154 = vmatpush.msra.mxu0 %v1063_v9 }
 0x28f   : > { %1255 = vmatpush.bf16.msrb.mxu3 %v1239_v6 }
 0x290   : > { %v1225_v10 = vpop.f32.mrf.mxu2 }
 0x291   : > { %v1226_v15 = vadd.f32 %v2335_v11, %v1225_v10 }
 0x292   : > { %2222 = vmatmul.msk.bf16.vlgmr.msrb.gmra.mxu3 %vm910_vm0, %v2990_v34 }
 0x293   : > { %1385 = vmatpush.bf16.msra.mxu3 %v1165_v63  ;;  %v2279_v63 = vld [vmem:[%s3569_s23 + $0xe8] sm:$0xff] }
 0x298   : > { %v1227_v13 = vpop.f32.mrf.mxu2 }
 0x299   : > { %v1228_v14 = vadd.f32 %v2335_v11, %v1227_v13 }
 0x29b   : > { %2223 = vmatpush.xpose.msk.msrb.mxu0 %vm1067_vm9, %v1228_v14 }
 0x29f   : > { %2224 = vmatpush.xpose.msk.msrb.mxu0 %vm1067_vm9, %v1226_v15 }
 0x305   : > { %v1097_v16 = vpop.f32.mrf.mxu3 }
 0x306   : > { %v1103_v17 = vmul.f32 0.25, %v1097_v16 }
 0x308   : > { %v1106_v18 = vsel %vm1105_vm11, %v1103_v17, -inf }
 0x309   : > { %1107 = vmax.xlane.f32.xlu2 %v1106_v18 }
 0x30d   : > { %v1100_v19 = vpop.f32.mrf.mxu3 }
 0x30e   : > { %v1104_v20 = vmul.f32 0.25, %v1100_v19 }
 0x310   : > { %v1110_v21 = vsel %vm1109_vm12, %v1104_v20, -inf }
 0x311   : > { %1111 = vmax.xlane.f32.xlu2 %v1110_v21 }
 0x315   : > { %v1257_v22 = vpop.f32.mrf.mxu3 }
 0x316   : > { %v1258_v26 = vadd.f32 %v2336_v23, %v1257_v22  ;;  %v2250_v22 = vld [vmem:[%s3539_s6 + $0xb0] sm:$0xff] }
 0x31d   : > { %v1259_v24 = vpop.f32.mrf.mxu3 }
 0x31e   : > { %v1260_v25 = vadd.f32 %v2336_v23, %v1259_v24  ;;  %v2251_v23 = vld [vmem:[%s3539_s6 + $0xb8] sm:$0xff] }
 0x31f   : > { %v1436_v24 = vpack.c.bf16 %v2251_v23, %v2250_v22 }
 0x320   : > { %2227 = vmatpush.msk.msrb.mxu1 %vm1135_vm10, %v1260_v25  ;;  %v2248_v25 = vld [vmem:[%s3539_s6 + $0xa0] sm:$0xff] }
 0x322   : > { %1345 = vmatpush.msrb.mxu1 %v1258_v26  ;;  %v2249_v26 = vld [vmem:[%s3539_s6 + $0xa8] sm:$0xff] }
 0x324   : > { %1446 = vmatpush.bf16.msra.mxu1 %v1436_v24  ;;  %v2286_v24 = vld [vmem:[%s3539_s6 + $0xd0] sm:$0xff] }
 0x37c   : > { %v1108_v27 = vpop.xlane.xlu2 %1107 }
 0x37d   : > { %v1113_v28 = vsub.f32 %v1103_v17, %v1108_v27  ;;  %v1435_v27 = vpack.c.bf16 %v2249_v26, %v2248_v25  ;;  %v2287_v25 = vld [vmem:[%s3539_s6 + $0xd8] sm:$0xff] }
 0x37e   : > { %v1645_v26 = vpack.c.bf16 %v2287_v25, %v2286_v24 }
 0x37f   : > { %v1115_v29 = vmul.f32 1.442695, %v1113_v28  ;;  %1447 = vmatpush.bf16.msra.mxu1 %v1435_v27  ;;  %v2246_v28 = vld [vmem:[%s3539_s6 + $0x90] sm:$0xff] }
 0x381   : > { %2355 = vpow2.f32 %v1115_v29  ;;  %v2247_v29 = vld [vmem:[%s3539_s6 + $0x98] sm:$0xff] }
 0x384   : > { %v1112_v30 = vpop.xlane.xlu2 %1111 }
 0x385   : > { %v1114_v7 = vsub.f32 %v1104_v20, %v1112_v30  ;;  %v1434_v30 = vpack.c.bf16 %v2247_v29, %v2246_v28  ;;  %v2284_v28 = vld [vmem:[%s3539_s6 + $0xc0] sm:$0xff]  ;;  %v2285_v29 = vld [vmem:[%s3539_s6 + $0xc8] sm:$0xff] }
 0x387   : > { %v2356_v31 = vpop.eup %2355  ;;  %v1117_v32 = vmul.f32 1.442695, %v1114_v7  ;;  %v2244_v7 = vld [vmem:[%s3539_s6 + $0x80] sm:$0xff]  ;;  %1448 = vmatpush.bf16.msra.mxu1 %v1434_v30 }
 0x388   : > { %v1119_v33 = vsel %vm1105_vm11, %v2356_v31, 0.0 }
 0x389   : > { %2357 = vpow2.f32 %v1117_v32  ;;  %1120 = vadd.xlane.f32.xlu0 %v1119_v33 }
 0x38f   : > { %v2358_v35 = vpop.eup %2357 }
 0x390   : > { %v1122_v12 = vsel %vm1109_vm12, %v2358_v35, 0.0 }
 0x391   : > { %1123 = vadd.xlane.f32.xlu1 %v1122_v12 }
 0x3fc   : > { %v1121_v36 = vpop.xlane.xlu0 %1120 }
 0x3fd   : > { %2359 = vrcp.f32 %v1121_v36 }
 0x403   : > { %v2360_v39 = vpop.eup %2359 }
 0x404   : > { %v1127_v41 = vmul.f32 %v2360_v39, %v2356_v31  ;;  %v1124_v42 = vpop.xlane.xlu1 %1123  ;;  %v2245_v31 = vld [vmem:[%s3539_s6 + $0x88] sm:$0xff]  ;;  %v2230_v39 = vld [vmem:[%s3544_s11 + $0x10] sm:$0xff] }
 0x405   : > { %2361 = vrcp.f32 %v1124_v42  ;;  %v1433_v32 = vpack.c.bf16 %v2245_v31, %v2244_v7  ;;  %v2260_v42 = vld [vmem:[%s3540_s7 + $0xb0] sm:$0xff]  ;;  %v1644_v7 = vpack.c.bf16 %v2285_v29, %v2284_v28  ;;  %v2340_v29 = vld [vmem:[%s3541_s8 + $0x3] ss:$0 sm:$0xff] }
 0x406   : > { %2191 = vmatmul.msk.f32.vlgmr.msra.gmra.mxu0 %vm1105_vm11, %v1127_v41  ;;  %v1468_v44 = vpack.c.bf16 %v2261_v43, %v2260_v42 }
 0x407   : > { %1414 = vmatpush.bf16.msra.mxu0 %v1404_v40  ;;  %1449 = vmatpush.bf16.msra.mxu1 %v1433_v32  ;;  %v2231_v40 = vld [vmem:[%s3544_s11 + $0x18] sm:$0xff] }
 0x408   : > { %v1357_v41 = vpack.c.bf16 %v2231_v40, %v2230_v39  ;;  %v2339_v40 = vld [vmem:[%s3543_s10 + $0x2] ss:$0 sm:$0xff] }
 0x40a   : > { %1368 = vmatpush.bf16.msra.mxu2 %v1357_v41 }
 0x40b   : > { %v2362_v48 = vpop.eup %2361  ;;  %1415 = vmatpush.bf16.msra.mxu0 %v1403_v45  ;;  %v2258_v45 = vld [vmem:[%s3540_s7 + $0xa0] sm:$0xff] }
 0x40c   : > { %v1128_v50 = vmul.f32 %v2362_v48, %v2358_v35  ;;  %v1467_v47 = vpack.c.bf16 %v2259_v46, %v2258_v45  ;;  %v2256_v48 = vld [vmem:[%s3540_s7 + $0x90] sm:$0xff] }
 0x40e   : > { %2192 = vmatmul.msk.f32.gmra.mxu0 %vm1105_vm11, %v1128_v50  ;;  %1478 = vmatpush.bf16.msrb.mxu2 %v1468_v44 }
 0x40f   : > { %1416 = vmatpush.bf16.msra.mxu0 %v1402_v49  ;;  %v2257_v49 = vld [vmem:[%s3540_s7 + $0x98] sm:$0xff] }
 0x410   : > { %v1466_v50 = vpack.c.bf16 %v2257_v49, %v2256_v48 }
 0x412   : > { %1479 = vmatpush.bf16.msrb.mxu2 %v1467_v47 }
 0x413   : > { %1417 = vmatpush.bf16.msra.mxu0 %v1401_v55 }
 0x416   : > { %2225 = vmatmul.msk.f32.vlgmr.msrb.gmra.mxu0 %vm1067_vm9, %v1194_v57  ;;  %1480 = vmatpush.bf16.msrb.mxu2 %v1466_v50  ;;  %v2281_v57 = vld [vmem:[%s3569_s23 + $0xf8] sm:$0xff] }
 0x41a   : > { %1481 = vmatpush.bf16.msrb.mxu2 %v1465_v54 }
 0x41e   : > { %2226 = vmatmul.msk.f32.gmra.mxu0 %vm1067_vm9, %v1196_v59  ;;  %v1615_v59 = vpack.c.bf16 %v2281_v57, %v2280_v56 }
 0x426   : > { %2243 = vmatmul.msk.bf16.vlgmr.msra.gmra.mxu0 %vm910_vm0, %v2990_v34 }
 0x483   : > { %v1156_v0 = vpop.f32.mrf.mxu0 }
 0x48b   : > { %v1159_v1 = vpop.f32.mrf.mxu0 }
 0x48c   : > { %v1162_v2 = vpack.c.bf16 %v1159_v1, %v1156_v0  ;;  %v1614_v0 = vpack.c.bf16 %v2279_v63, %v2278_v62  ;;  %v2276_v1 = vld [vmem:[%s3569_s23 + $0xd0] sm:$0xff] }
 0x48e   : > { %2233 = vmatmul.msk.bf16.vlgmr.msra.gmra.mxu3 %vm1067_vm9, %v1162_v2  ;;  %v2277_v2 = vld [vmem:[%s3569_s23 + $0xd8] sm:$0xff] }
 0x493   : > { %v1291_v3 = vpop.f32.mrf.mxu0 }
 0x494   : > { %v1297_v5 = vmul.f32 0.25, %v1291_v3 }
 0x496   : > { %v1299_v6 = vsel %vm1105_vm11, %v1297_v5, -inf }
 0x497   : > { %1300 = vmax.xlane.f32.xlu2 %v1299_v6  ;;  %v2274_v6 = vld [vmem:[%s3569_s23 + $0xc0] sm:$0xff] }
 0x49b   : > { %v1294_v8 = vpop.f32.mrf.mxu0 }
 0x49c   : > { %v1298_v9 = vmul.f32 0.25, %v1294_v8  ;;  %v2275_v8 = vld [vmem:[%s3569_s23 + $0xc8] sm:$0xff] }
 0x49e   : > { %v1302_v10 = vsel %vm1109_vm12, %v1298_v9, -inf }
 0x49f   : > { %1303 = vmax.xlane.f32.xlu0 %v1302_v10  ;;  %v2338_v10 = vld [vmem:[%s3542_s9 + $0x2] ss:$0 sm:$0xff] }
 0x50a   : > { %v1301_v11 = vpop.xlane.xlu2 %1300 }
 0x50b   : > { %v1305_v13 = vsub.f32 %v1297_v5, %v1301_v11  ;;  %v1613_v5 = vpack.c.bf16 %v2277_v2, %v2276_v1 }
 0x50d   : > { %v1307_v14 = vmul.f32 1.442695, %v1305_v13 }
 0x50f   : > { %2363 = vpow2.f32 %v1307_v14  ;;  %v2290_v14 = vld [vmem:[%s3539_s6 + $0xf0] sm:$0xff] }
 0x511   : > { %v3240_v31 = vpop.f32.mrf.mxu3 }
 0x512   : > { %v1304_v15 = vpop.xlane.xlu0 %1303 }
 0x513   : > { %v1306_v16 = vsub.f32 %v1298_v9, %v1304_v15  ;;  %v1612_v9 = vpack.c.bf16 %v2275_v8, %v2274_v6  ;;  %v2291_v15 = vld [vmem:[%s3539_s6 + $0xf8] sm:$0xff]  ;;  %v2298_v8 = vld [vmem:[%s3540_s7 + $0xe0] sm:$0xff] }
 0x515   : > { %v2364_v17 = vpop.eup %2363  ;;  %v1309_v18 = vmul.f32 1.442695, %v1306_v16  ;;  %v1419_v16 = vpop.f32.mrf.mxu0 }
 0x516   : > { %v1311_v19 = vsel %vm1105_vm11, %v2364_v17, 0.0 }
 0x517   : > { %2365 = vpow2.f32 %v1309_v18  ;;  %1312 = vadd.xlane.f32.xlu1 %v1311_v19  ;;  %v1647_v18 = vpack.c.bf16 %v2291_v15, %v2290_v14  ;;  %v2294_v15 = vld [vmem:[%s3540_s7 + $0xc0] sm:$0xff] }
 0x51d   : > { %v2366_v20 = vpop.eup %2365  ;;  %v1421_v27 = vpop.f32.mrf.mxu0 }
 0x51e   : > { %v1314_v21 = vsel %vm1109_vm12, %v2366_v20, 0.0 }
 0x51f   : > { %1315 = vadd.xlane.f32.xlu2 %v1314_v21  ;;  %v2289_v21 = vld [vmem:[%s3539_s6 + $0xe8] sm:$0xff] }
 0x58a   : > { %v1313_v33 = vpop.xlane.xlu1 %1312 }
 0x58b   : > { %2367 = vrcp.f32 %v1313_v33  ;;  %v1389_v33 = vpop.f32.mrf.mxu3 }
 0x591   : > { %v2368_v35 = vpop.eup %2367 }
 0x592   : > { %v1319_v12 = vmul.f32 %v2368_v35, %v2364_v17  ;;  %v1316_v36 = vpop.xlane.xlu2 %1315  ;;  %v2337_v17 = vld [vmem:[%s3541_s8 + $0x2] ss:$0 sm:$0xff] }
 0x593   : > { %2369 = vrcp.f32 %v1316_v36  ;;  %v1420_v22 = vadd.f32 %v2337_v17, %v1419_v16  ;;  %v1422_v30 = vadd.f32 %v2337_v17, %v1421_v27  ;;  %v2271_v36 = vld [vmem:[%s3544_s11 + $0x20] sm:$0xff]  ;;  %v2295_v16 = vld [vmem:[%s3540_s7 + $0xc8] sm:$0xff] }
 0x594   : > { %2228 = vmatmul.msk.f32.vlgmr.msrb.gmra.mxu1 %vm1105_vm11, %v1319_v12  ;;  %v1676_v17 = vpack.c.bf16 %v2295_v16, %v2294_v15 }
 0x599   : > { %v2370_v37 = vpop.eup %2369 }
 0x59a   : > { %v1320_v38 = vmul.f32 %v2370_v37, %v2366_v20  ;;  %v2288_v20 = vld [vmem:[%s3539_s6 + $0xe0] sm:$0xff]  ;;  %v2272_v37 = vld [vmem:[%s3544_s11 + $0x28] sm:$0xff] }
 0x59b   : > { %v1646_v23 = vpack.c.bf16 %v2289_v21, %v2288_v20  ;;  %v1583_v39 = vpack.c.bf16 %v2272_v37, %v2271_v36 }
 0x59c   : > { %2229 = vmatmul.msk.f32.gmra.mxu1 %vm1105_vm11, %v1320_v38 }
 0x59d   : > { %1594 = vmatpush.bf16.msrb.mxu1 %v1583_v39 }
 0x5a4   : > { %2253 = vmatmul.msk.bf16.vlgmr.msra.gmra.mxu1 %vm910_vm0, %v2990_v34 }
 0x611   : > { %v1347_v55 = vpop.f32.mrf.mxu1 }
 0x619   : > { %v1350_v58 = vpop.f32.mrf.mxu1 }
 0x61a   : > { %v1353_v61 = vpack.c.bf16 %v1350_v58, %v1347_v55 }
 0x61c   : > { %2232 = vmatmul.msk.bf16.vlgmr.msra.gmra.mxu2 %vm1067_vm9, %v1353_v61 }
 0x61d   : > { %1625 = vmatpush.bf16.msra.mxu2 %v1615_v59 }
 0x621   : > { %v1451_v3 = vpop.f32.mrf.mxu1  ;;  %1626 = vmatpush.bf16.msra.mxu2 %v1614_v0 }
 0x622   : > { %v1452_v19 = vadd.f32 %v2338_v10, %v1451_v3  ;;  %v2300_v3 = vld [vmem:[%s3540_s7 + $0xf0] sm:$0xff] }
 0x625   : > { %1627 = vmatpush.bf16.msra.mxu2 %v1613_v5  ;;  %v2301_v5 = vld [vmem:[%s3540_s7 + $0xf8] sm:$0xff] }
 0x626   : > { %v1679_v6 = vpack.c.bf16 %v2301_v5, %v2300_v3 }
 0x629   : > { %v1453_v11 = vpop.f32.mrf.mxu1  ;;  %1628 = vmatpush.bf16.msra.mxu2 %v1612_v9  ;;  %v2299_v9 = vld [vmem:[%s3540_s7 + $0xe8] sm:$0xff] }
 0x62a   : > { %v1454_v13 = vadd.f32 %v2338_v10, %v1453_v11  ;;  %v1678_v10 = vpack.c.bf16 %v2299_v9, %v2298_v8  ;;  %v2296_v11 = vld [vmem:[%s3540_s7 + $0xd0] sm:$0xff] }
 0x62c   : > { %2263 = vmatmul.msk.bf16.vlgmr.msrb.gmra.mxu2 %vm910_vm0, %v2990_v34  ;;  %2264 = vmatpush.xpose.msk.msrb.mxu3 %vm1067_vm9, %v1454_v13  ;;  %v2297_v13 = vld [vmem:[%s3540_s7 + $0xd8] sm:$0xff] }
 0x62d   : > { %v1677_v14 = vpack.c.bf16 %v2297_v13, %v2296_v11 }
 0x630   : > { %2265 = vmatpush.xpose.msk.msrb.mxu3 %vm1067_vm9, %v1452_v19 }
 0x633   : > { %2266 = vmatmul.msk.f32.vlgmr.msrb.gmra.mxu3 %vm1067_vm9, %v1420_v22 }
 0x634   : > { %1657 = vmatpush.bf16.msra.mxu3 %v1647_v18 }
 0x638   : > { %1658 = vmatpush.bf16.msra.mxu3 %v1646_v23 }
 0x63b   : > { %2267 = vmatmul.msk.f32.gmra.mxu3 %vm1067_vm9, %v1422_v30  ;;  %v2342_v30 = vld [vmem:[%s3543_s10 + $0x3] ss:$0 sm:$0xff] }
 0x63c   : > { %1659 = vmatpush.bf16.msra.mxu3 %v1645_v26  ;;  %2283 = vmatmul.msk.bf16.vlgmr.msra.gmra.mxu2 %vm910_vm0, %v2990_v34 }
 0x640   : > { %1660 = vmatpush.bf16.msra.mxu3 %v1644_v7 }
 0x643   : > { %2293 = vmatmul.msk.bf16.vlgmr.msra.gmra.mxu3 %vm910_vm0, %v2990_v34 }
 0x69f   : > { %v3242_v32 = vpop.f32.mrf.mxu2 }
 0x6a7   : > { %v1372_v35 = vpop.f32.mrf.mxu2 }
 0x6a8   : > { %v3244_v12 = vadd.f32 %v1389_v33, %v1372_v35 }
 0x6af   : > { %v1483_v38 = vpop.f32.mrf.mxu2 }
 0x6b0   : > { %v1484_v46 = vadd.f32 %v2339_v40, %v1483_v38  ;;  %v1388_v38 = vadd.f32 %v3240_v31, %v3242_v32 }
 0x6b6   : > { %v1517_v41 = vpop.f32.mrf.mxu3 }
 0x6b7   : > { %v1523_v42 = vmul.f32 0.25, %v1517_v41  ;;  %v1485_v43 = vpop.f32.mrf.mxu2 }
 0x6b8   : > { %v1486_v44 = vadd.f32 %v2339_v40, %v1485_v43 }
 0x6b9   : > { %v1525_v45 = vsel %vm1105_vm11, %v1523_v42, -inf }
 0x6ba   : > { %2268 = vmatpush.msk.msrb.mxu0 %vm1135_vm10, %v1486_v44  ;;  %1526 = vmax.xlane.f32.xlu0 %v1525_v45 }
 0x6bc   : > { %1571 = vmatpush.msrb.mxu0 %v1484_v46 }
 0x6be   : > { %v1520_v47 = vpop.f32.mrf.mxu3  ;;  %1689 = vmatpush.bf16.msra.mxu0 %v1679_v6 }
 0x6bf   : > { %v1524_v48 = vmul.f32 0.25, %v1520_v47  ;;  %v1630_v28 = vpop.f32.mrf.mxu2 }
 0x6c0   : > { %v1631_v33 = vadd.f32 %v2340_v29, %v1630_v28  ;;  %v1891_v28 = vld [vmem:[%s3548_s15 + $0x60] sm:$0xff] }
 0x6c1   : > { %v1528_v49 = vsel %vm1109_vm12, %v1524_v48, -inf }
 0x6c2   : > { %1529 = vmax.xlane.f32.xlu1 %v1528_v49  ;;  %1690 = vmatpush.bf16.msra.mxu0 %v1678_v10  ;;  %v2343_v10 = vld [vmem:[%s3545_s12] ss:$0 sm:$0xff] }
 0x6c6   : > { %v1662_v50 = vpop.f32.mrf.mxu3  ;;  %1691 = vmatpush.bf16.msra.mxu0 %v1677_v14 }
 0x6c7   : > { %v1663_v55 = vadd.f32 %v2341_v51, %v1662_v50 }
 0x6ca   : > { %1692 = vmatpush.bf16.msra.mxu0 %v1676_v17 }
 0x6ce   : > { %v1664_v53 = vpop.f32.mrf.mxu3 }
 0x6cf   : > { %v1665_v54 = vadd.f32 %v2341_v51, %v1664_v53 }
 0x6d1   : > { %2304 = vmatpush.xpose.msk.msra.mxu1 %vm1067_vm9, %v1665_v54 }
 0x6d5   : > { %2305 = vmatpush.xpose.msk.msra.mxu1 %vm1067_vm9, %v1663_v55 }
 0x72d   : > { %v1527_v56 = vpop.xlane.xlu0 %1526 }
 0x72e   : > { %v1531_v57 = vsub.f32 %v1523_v42, %v1527_v56 }
 0x730   : > { %v1533_v58 = vmul.f32 1.442695, %v1531_v57 }
 0x732   : > { %2371 = vpow2.f32 %v1533_v58 }
 0x735   : > { %v1530_v59 = vpop.xlane.xlu1 %1529 }
 0x736   : > { %v1532_v61 = vsub.f32 %v1524_v48, %v1530_v59 }
 0x738   : > { %v2372_v62 = vpop.eup %2371  ;;  %v1535_v63 = vmul.f32 1.442695, %v1532_v61 }
 0x739   : > { %v1537_v0 = vsel %vm1105_vm11, %v2372_v62, 0.0 }
 0x73a   : > { %2373 = vpow2.f32 %v1535_v63  ;;  %1538 = vadd.xlane.f32.xlu2 %v1537_v0  ;;  %v2311_v0 = vld [vmem:[%s3544_s11 + $0x30] sm:$0xff] }
 0x740   : > { %v2374_v1 = vpop.eup %2373 }
 0x741   : > { %v1540_v2 = vsel %vm1109_vm12, %v2374_v1, 0.0 }
 0x742   : > { %1541 = vadd.xlane.f32.xlu0 %v1540_v2 }
 0x7ad   : > { %v1539_v18 = vpop.xlane.xlu2 %1538 }
 0x7ae   : > { %2375 = vrcp.f32 %v1539_v18 }
 0x7b4   : > { %v2376_v19 = vpop.eup %2375 }
 0x7b5   : > { %v1545_v20 = vmul.f32 %v2376_v19, %v2372_v62  ;;  %v1542_v21 = vpop.xlane.xlu0 %1541 }
 0x7b6   : > { %2377 = vrcp.f32 %v1542_v21 }
 0x7b7   : > { %2269 = vmatmul.msk.f32.vlgmr.msrb.gmra.mxu0 %vm1105_vm11, %v1545_v20 }
 0x7bc   : > { %v2378_v22 = vpop.eup %2377 }
 0x7bd   : > { %v1546_v23 = vmul.f32 %v2378_v22, %v2374_v1  ;;  %v2312_v1 = vld [vmem:[%s3544_s11 + $0x38] sm:$0xff] }
 0x7be   : > { %v1794_v2 = vpack.c.bf16 %v2312_v1, %v2311_v0 }
 0x7bf   : > { %2270 = vmatmul.msk.f32.gmra.mxu0 %vm1105_vm11, %v1546_v23 }
 0x7c0   : > { %1805 = vmatpush.bf16.msrb.mxu3 %v1794_v2 }
 0x7c7   : > { %2303 = vmatmul.msk.bf16.vlgmr.msra.gmra.mxu0 %vm910_vm0, %v2990_v34  ;;  %v1632_v34 = vpop.f32.mrf.mxu2 }
 0x7c8   : > { %v1633_v37 = vadd.f32 %v2340_v29, %v1632_v34  ;;  %v1893_v29 = vld [vmem:[%s3548_s15 + $0x70] sm:$0xff] }
 0x7c9   : > { %v1889_v34 = vld [vmem:[%s3548_s15 + $0x50] sm:$0xff] }
 0x834   : > { %v1573_v24 = vpop.f32.mrf.mxu0 }
 0x83c   : > { %v1576_v25 = vpop.f32.mrf.mxu0 }
 0x83d   : > { %v1579_v26 = vpack.c.bf16 %v1576_v25, %v1573_v24 }
 0x83f   : > { %2273 = vmatmul.msk.bf16.vlgmr.msrb.gmra.mxu1 %vm1067_vm9, %v1579_v26 }
 0x844   : > { %v1694_v27 = vpop.f32.mrf.mxu0 }
 0x845   : > { %v1695_v36 = vadd.f32 %v2342_v30, %v1694_v27 }
 0x84c   : > { %v1696_v7 = vpop.f32.mrf.mxu0 }
 0x84d   : > { %v1697_v35 = vadd.f32 %v2342_v30, %v1696_v7  ;;  %v1892_v30 = vld [vmem:[%s3548_s15 + $0x68] sm:$0xff]  ;;  %v1901_v7 = vpack.c.bf16 %v1893_v29, %v1891_v28  ;;  %v2006_v28 = vld [vmem:[%s3550_s17 + $0xe0] sm:$0xff] }
 0x84f   : > { %2306 = vmatmul.msk.f32.vlgmr.msra.gmra.mxu1 %vm1067_vm9, %v1631_v33  ;;  %2308 = vmatpush.msk.msrb.mxu2 %vm1135_vm10, %v1697_v35  ;;  %v1894_v33 = vld [vmem:[%s3548_s15 + $0x78] sm:$0xff] }
 0x850   : > { %v1902_v35 = vpack.c.bf16 %v1894_v33, %v1892_v30  ;;  %1916 = vmatpush.bf16.msrb.mxu0 %v1901_v7  ;;  %v2007_v30 = vld [vmem:[%s3550_s17 + $0xe8] sm:$0xff]  ;;  %v1988_v33 = vld [vmem:[%s3550_s17 + $0x50] sm:$0xff] }
 0x851   : > { %1782 = vmatpush.msrb.mxu2 %v1695_v36  ;;  %v1887_v36 = vld [vmem:[%s3548_s15 + $0x40] sm:$0xff]  ;;  %v2024_v7 = vpack.c.bf16 %v2007_v30, %v2006_v28 }
 0x852   : > { %1930 = vmatpush.bf16.msrb.mxu1 %v1902_v35  ;;  %v1989_v35 = vld [vmem:[%s3550_s17 + $0x58] sm:$0xff] }
 0x857   : > { %2307 = vmatmul.msk.f32.gmra.mxu1 %vm1067_vm9, %v1633_v37  ;;  %v1888_v37 = vld [vmem:[%s3548_s15 + $0x48] sm:$0xff] }
 0x8bc   : > { %v1596_v39 = vpop.f32.mrf.mxu1 }
 0x8bd   : > { %v1601_v40 = vadd.f32 %v1596_v39, %v1388_v38  ;;  %v1899_v38 = vpack.c.bf16 %v1889_v34, %v1887_v36  ;;  %v1890_v39 = vld [vmem:[%s3548_s15 + $0x58] sm:$0xff]  ;;  %v2004_v36 = vld [vmem:[%s3550_s17 + $0xd0] sm:$0xff]  ;;  %v2015_v34 = vpack.c.bf16 %v1989_v35, %v1988_v33 }
 0x8bf   : > { %1917 = vmatpush.bf16.msrb.mxu0 %v1899_v38 }
 0x8c4   : > { %v1598_v41 = vpop.f32.mrf.mxu1 }
 0x8c5   : > { %v1602_v42 = vadd.f32 %v1598_v41, %v3244_v12  ;;  %v1883_v41 = vld [vmem:[%s3548_s15 + $0x20] sm:$0xff] }
 0x8cc   : > { %v1728_v43 = vpop.f32.mrf.mxu1 }
 0x8cd   : > { %v1734_v44 = vmul.f32 0.25, %v1728_v43  ;;  %v1884_v43 = vld [vmem:[%s3548_s15 + $0x28] sm:$0xff] }
 0x8cf   : > { %v1736_v45 = vsel %vm1105_vm11, %v1734_v44, -inf }
 0x8d0   : > { %1737 = vmax.xlane.f32.xlu1 %v1736_v45  ;;  %v1886_v45 = vld [vmem:[%s3548_s15 + $0x38] sm:$0xff] }
 0x8d4   : > { %v1731_v46 = vpop.f32.mrf.mxu1 }
 0x8d5   : > { %v1735_v47 = vmul.f32 0.25, %v1731_v46 }
 0x8d7   : > { %v1739_v48 = vsel %vm1109_vm12, %v1735_v47, -inf }
 0x8d8   : > { %1740 = vmax.xlane.f32.xlu2 %v1739_v48 }
 0x943   : > { %v1738_v49 = vpop.xlane.xlu1 %1737 }
 0x944   : > { %v1742_v50 = vsub.f32 %v1734_v44, %v1738_v49  ;;  %v1879_v49 = vld [vmem:[%s3548_s15] sm:$0xff] }
 0x946   : > { %v1744_v51 = vmul.f32 1.442695, %v1742_v50  ;;  %v1881_v50 = vld [vmem:[%s3548_s15 + $0x10] sm:$0xff] }
 0x948   : > { %2379 = vpow2.f32 %v1744_v51  ;;  %v1880_v51 = vld [vmem:[%s3548_s15 + $0x8] sm:$0xff] }
 0x94b   : > { %v1741_v31 = vpop.xlane.xlu2 %1740 }
 0x94c   : > { %v1743_v32 = vsub.f32 %v1735_v47, %v1741_v31  ;;  %v1898_v47 = vpack.c.bf16 %v1886_v45, %v1884_v43  ;;  %v2003_v43 = vld [vmem:[%s3550_s17 + $0xc8] sm:$0xff]  ;;  %v1984_v45 = vld [vmem:[%s3550_s17 + $0x30] sm:$0xff] }
 0x94e   : > { %v2380_v53 = vpop.eup %2379  ;;  %v1746_v54 = vmul.f32 1.442695, %v1743_v32  ;;  %v1895_v32 = vpack.c.bf16 %v1881_v50, %v1879_v49  ;;  %v2001_v49 = vld [vmem:[%s3550_s17 + $0xb8] sm:$0xff] }
 0x94f   : > { %v1748_v12 = vsel %vm1105_vm11, %v2380_v53, 0.0 }
 0x950   : > { %2381 = vpow2.f32 %v1746_v54  ;;  %1749 = vadd.xlane.f32.xlu0 %v1748_v12 }
 0x956   : > { %v2382_v55 = vpop.eup %2381 }
 0x957   : > { %v1751_v56 = vsel %vm1109_vm12, %v2382_v55, 0.0 }
 0x958   : > { %1752 = vadd.xlane.f32.xlu1 %v1751_v56 }
 0x9c3   : > { %v1750_v57 = vpop.xlane.xlu0 %1749 }
 0x9c4   : > { %2383 = vrcp.f32 %v1750_v57 }
 0x9ca   : > { %v2384_v58 = vpop.eup %2383 }
 0x9cb   : > { %v1756_v59 = vmul.f32 %v2384_v58, %v2380_v53  ;;  %v1753_v61 = vpop.xlane.xlu1 %1752  ;;  %v1882_v53 = vld [vmem:[%s3548_s15 + $0x18] sm:$0xff] }
 0x9cc   : > { %2385 = vrcp.f32 %v1753_v61  ;;  %v1896_v54 = vpack.c.bf16 %v1882_v53, %v1880_v51  ;;  %v1982_v51 = vld [vmem:[%s3550_s17 + $0x20] sm:$0xff] }
 0x9cd   : > { %2309 = vmatmul.msk.f32.vlgmr.msrb.gmra.mxu2 %vm1105_vm11, %v1756_v59 }
 0x9d2   : > { %v2386_v62 = vpop.eup %2385 }
 0x9d3   : > { %v1757_v63 = vmul.f32 %v2386_v62, %v2382_v55 }
 0x9d5   : > { %2310 = vmatmul.msk.f32.gmra.mxu2 %vm1105_vm11, %v1757_v63 }
 0xa50   : > { %v1784_v3 = vpop.f32.mrf.mxu2 }
 0xa58   : > { %v1787_v5 = vpop.f32.mrf.mxu2 }
 0xa59   : > { %v1790_v6 = vpack.c.bf16 %v1787_v5, %v1784_v3 }
 0xa5b   : > { %2313 = vmatmul.msk.bf16.vlgmr.msrb.gmra.mxu3 %vm1067_vm9, %v1790_v6 }
 0xade   : > { %v1807_v8 = vpop.f32.mrf.mxu3 }
 0xadf   : > { %v1812_v9 = vadd.f32 %v1807_v8, %v1601_v40  ;;  %v1900_v40 = vpack.c.bf16 %v1890_v39, %v1888_v37  ;;  %v2344_v8 = vld [vmem:[%s3546_s13] ss:$0 sm:$0xff]  ;;  %v2005_v37 = vld [vmem:[%s3550_s17 + $0xd8] sm:$0xff] }
 0xae0   : > { %v2023_v38 = vpack.c.bf16 %v2005_v37, %v2004_v36  ;;  %v1986_v39 = vld [vmem:[%s3550_s17 + $0x40] sm:$0xff] }
 0xae1   : > { %v1814_v11 = vadd.f32 %v1812_v9, %v2851_v52  ;;  %1931 = vmatpush.bf16.msrb.mxu1 %v1900_v40  ;;  %v1987_v40 = vld [vmem:[%s3550_s17 + $0x48] sm:$0xff] }
 0xae3   : > { %v3323_v13 = vadd.f32 %v2343_v10, %v1814_v11 }
 0xae5   : > { %v1824_v14 = vsel %vm910_vm0, %v3323_v13, 0.0  ;;  %1932 = vmatpush.bf16.msrb.mxu1 %v1898_v47  ;;  %v2000_v47 = vld [vmem:[%s3550_s17 + $0xb0] sm:$0xff] }
 0xae6   : > { %v1809_v15 = vpop.f32.mrf.mxu3  ;;  %1825 = vadd.xlane.f32.xlu2 %v1824_v14  ;;  %v2345_v14 = vld [vmem:[%s3547_s14] ss:$0 sm:$0xff]  ;;  %v2021_v50 = vpack.c.bf16 %v2001_v49, %v2000_v47 }
 0xae7   : > { %v1813_v16 = vadd.f32 %v1809_v15, %v1602_v42  ;;  %v1885_v42 = vld [vmem:[%s3548_s15 + $0x30] sm:$0xff] }
 0xae8   : > { %v1897_v44 = vpack.c.bf16 %v1885_v42, %v1883_v41  ;;  %v2002_v41 = vld [vmem:[%s3550_s17 + $0xc0] sm:$0xff]  ;;  %v2014_v42 = vpack.c.bf16 %v1987_v40, %v1986_v39 }
 0xae9   : > { %v1815_v17 = vadd.f32 %v1813_v16, %v2858_v60  ;;  %1933 = vmatpush.bf16.msrb.mxu1 %v1896_v54  ;;  %v1999_v54 = vld [vmem:[%s3550_s17 + $0xa8] sm:$0xff] }
 0xaea   : > { %1918 = vmatpush.bf16.msrb.mxu0 %v1897_v44  ;;  %v2022_v44 = vpack.c.bf16 %v2003_v43, %v2002_v41 }
 0xaeb   : > { %v3328_v18 = vadd.f32 %v2343_v10, %v1815_v17 }
 0xaed   : > { %v1827_v19 = vsel %vm914_vm1, %v3328_v18, 0.0 }
 0xaee   : > { %1828 = vadd.xlane.f32.xlu0 %v1827_v19  ;;  %1919 = vmatpush.bf16.msrb.mxu0 %v1895_v32  ;;  %v1998_v32 = vld [vmem:[%s3550_s17 + $0xa0] sm:$0xff] }
 0xb59   : > { %v1826_v20 = vpop.xlane.xlu2 %1825 }
 0xb5a   : > { %v1830_v21 = vmul.f32 %v1826_v20, %v2862_v4 }
 0xb5c   : > { %v3334_v52 = vsub.f32 %v3323_v13, %v1830_v21 }
 0xb5e   : > { %v1834_v22 = vmul.f32 %v3334_v52, %v3334_v52 }
 0xb60   : > { %v1836_v23 = vsel %vm910_vm0, %v1834_v22, 0.0  ;;  %v1993_v22 = vld [vmem:[%s3550_s17 + $0x78] sm:$0xff] }
 0xb61   : > { %v1829_v24 = vpop.xlane.xlu0 %1828  ;;  %1837 = vadd.xlane.f32.xlu1 %v1836_v23  ;;  %v2008_v23 = vld [vmem:[%s3550_s17 + $0xf0] sm:$0xff] }
 0xb62   : > { %v1831_v60 = vmul.f32 %v1829_v24, %v2862_v4 }
 0xb64   : > { %v3341_v25 = vsub.f32 %v3328_v18, %v1831_v60  ;;  %v2009_v60 = vld [vmem:[%s3550_s17 + $0xf8] sm:$0xff] }
 0xb66   : > { %v1835_v26 = vmul.f32 %v3341_v25, %v3341_v25 }
 0xb68   : > { %v1839_v27 = vsel %vm914_vm1, %v1835_v26, 0.0  ;;  %v1990_v26 = vld [vmem:[%s3550_s17 + $0x60] sm:$0xff] }
 0xb69   : > { %1840 = vadd.xlane.f32.xlu2 %v1839_v27  ;;  %v1991_v27 = vld [vmem:[%s3550_s17 + $0x68] sm:$0xff] }
 0xb6a   : > { %v2016_v29 = vpack.c.bf16 %v1991_v27, %v1990_v26 }
 0xbd4   : > { %v1838_v46 = vpop.xlane.xlu1 %1837 }
 0xbd5   : > { %v1842_v48 = vmul.f32 %v1838_v46, %v2862_v4  ;;  %v1985_v46 = vld [vmem:[%s3550_s17 + $0x38] sm:$0xff] }
 0xbd7   : > { %v1844_v31 = vadd.f32 1e-06, %v1842_v48  ;;  %v2013_v48 = vpack.c.bf16 %v1985_v46, %v1984_v45 }
 0xbd9   : > { %2387 = vrsqrt.f32 %v1844_v31  ;;  %vm1852_vm14 = vweird.f32 %v1844_v31 }
 0xbdc   : > { %v1841_v12 = vpop.xlane.xlu2 %1840 }
 0xbdd   : > { %v1843_v55 = vmul.f32 %v1841_v12, %v2862_v4  ;;  %v2020_v12 = vpack.c.bf16 %v1999_v54, %v1998_v32 }
 0xbdf   : > { %v2388_v56 = vpop.eup %2387  ;;  %v1845_v57 = vadd.f32 1e-06, %v1843_v55  ;;  %v1903_v55 = vld [vmem:[%s3549_s16] sm:$0x3] }
 0xbe0   : > { %v1847_v58 = vmul.f32 %v2388_v56, %v1844_v31  ;;  %vm1853_vm13 = vweird.f32 %v2388_v56  ;;  %v1983_v31 = vld [vmem:[%s3550_s17 + $0x28] sm:$0xff] }
 0xbe1   : > { %2389 = vrsqrt.f32 %v1845_v57  ;;  %vm1854_vm15 = vmor %vm1852_vm14, %vm1853_vm13  ;;  %vm1862_vm3 = vweird.f32 %v1845_v57  ;;  %v2012_v53 = vpack.c.bf16 %v1983_v31, %v1982_v51 }
 0xbe2   : > { %v1848_v59 = vmul.f32 %v2388_v56, %v1847_v58  ;;  %v1996_v58 = vld [vmem:[%s3550_s17 + $0x90] sm:$0xff] }
 0xbe4   : > { %v1849_v61 = vmul.f32 0.5, %v1848_v59 }
 0xbe6   : > { %v1850_v62 = vsub.f32 1.5, %v1849_v61  ;;  %v1997_v61 = vld [vmem:[%s3550_s17 + $0x98] sm:$0xff] }
 0xbe7   : > { %v2390_v63 = vpop.eup %2389 }
 0xbe8   : > { %v1851_v0 = vmul.f32 %v2388_v56, %v1850_v62  ;;  %v1857_v1 = vmul.f32 %v2390_v63, %v1845_v57  ;;  %vm1863_vm2 = vweird.f32 %v2390_v63  ;;  %v1981_v57 = vld [vmem:[%s3550_s17 + $0x18] sm:$0xff]  ;;  %v1905_v62 = vperm.slane %v1903_v55, 0 }
 0xbe9   : > { %vm1864_vm4 = vmor %vm1862_vm3, %vm1863_vm2 }
 0xbea   : > { %v1858_v2 = vmul.f32 %v2390_v63, %v1857_v1  ;;  %v1855_v3 = vsel %vm1854_vm15, %v2388_v56, %v1851_v0  ;;  %v1980_v56 = vld [vmem:[%s3550_s17 + $0x10] sm:$0xff]  ;;  %v2019_v0 = vpack.c.bf16 %v1997_v61, %v1996_v58  ;;  %v1978_v1 = vld [vmem:[%s3550_s17] sm:$0xff] }
 0xbeb   : > { %v1866_v9 = vmul.f32 %v1855_v3, %v3334_v52  ;;  %v1992_v52 = vld [vmem:[%s3550_s17 + $0x70] sm:$0xff]  ;;  %v2011_v59 = vpack.c.bf16 %v1981_v57, %v1980_v56  ;;  %v1994_v3 = vld [vmem:[%s3550_s17 + $0x80] sm:$0xff] }
 0xbec   : > { %v1859_v5 = vmul.f32 0.5, %v1858_v2  ;;  %v2017_v24 = vpack.c.bf16 %v1993_v22, %v1992_v52  ;;  %v1979_v2 = vld [vmem:[%s3550_s17 + $0x8] sm:$0xff]  ;;  %v2346_v58 = vld [vmem:[%s3551_s18] ss:$0 sm:$0xff] }
 0xbed   : > { %v1871_v15 = vmul.f32 %v2344_v8, %v1866_v9  ;;  %v1995_v9 = vld [vmem:[%s3550_s17 + $0x88] sm:$0xff] }
 0xbee   : > { %v1860_v6 = vsub.f32 1.5, %v1859_v5  ;;  %2026 = vmatpush.bf16.msra.mxu2 %v2017_v24 }
 0xbef   : > { %v1876_v19 = vadd.f32 %v2345_v14, %v1871_v15 }
 0xbf0   : > { %v1861_v10 = vmul.f32 %v2390_v63, %v1860_v6 }
 0xbf2   : > { %v1865_v11 = vsel %vm1864_vm4, %v2390_v63, %v1861_v10  ;;  %2027 = vmatpush.bf16.msra.mxu2 %v2016_v29  ;;  %v1906_v63 = vperm.slane %v1903_v55, 1 }
 0xbf3   : > { %v1867_v16 = vmul.f32 %v1865_v11, %v3341_v25  ;;  %v2025_v25 = vpack.c.bf16 %v2009_v60, %v2008_v23 }
 0xbf5   : > { %v1872_v17 = vmul.f32 %v2344_v8, %v1867_v16  ;;  %2040 = vmatpush.bf16.msra.mxu3 %v2025_v25  ;;  %v2010_v8 = vpack.c.bf16 %v1979_v2, %v1978_v1 }
 0xbf6   : > { %2028 = vmatpush.bf16.msra.mxu2 %v2015_v34 }
 0xbf7   : > { %v1877_v20 = vadd.f32 %v2345_v14, %v1872_v17  ;;  %v2018_v14 = vpack.c.bf16 %v1995_v9, %v1994_v3 }
 0xbf9   : > { %v1878_v21 = vpack.c.bf16 %v1877_v20, %v1876_v19  ;;  %2041 = vmatpush.bf16.msra.mxu3 %v2024_v7 }
 0xbfa   : > { %2029 = vmatpush.bf16.msra.mxu2 %v2014_v42 }
 0xbfb   : > { %2314 = vmatmul.msk.bf16.vlgmr.msrb.gmra.mxu0 %vm910_vm0, %v1878_v21  ;;  %2315 = vmatmul.msk.bf16.vlgmr.msrb.gmra.mxu1 %vm910_vm0, %v1878_v21 }
 0xbfd   : > { %2042 = vmatpush.bf16.msra.mxu3 %v2023_v38 }
 0xbfe   : > { %2030 = vmatpush.bf16.msra.mxu2 %v2013_v48 }
 0xc01   : > { %2043 = vmatpush.bf16.msra.mxu3 %v2022_v44 }
 0xc02   : > { %2031 = vmatpush.bf16.msra.mxu2 %v2012_v53 }
 0xc05   : > { %2044 = vmatpush.bf16.msra.mxu3 %v2021_v50 }
 0xc06   : > { %2032 = vmatpush.bf16.msra.mxu2 %v2011_v59 }
 0xc09   : > { %2045 = vmatpush.bf16.msra.mxu3 %v2020_v12 }
 0xc0a   : > { %2033 = vmatpush.bf16.msra.mxu2 %v2010_v8 }
 0xc0d   : > { %2046 = vmatpush.bf16.msra.mxu3 %v2019_v0 }
 0xc11   : > { %2047 = vmatpush.bf16.msra.mxu3 %v2018_v14 }
 0xc78   : > { %v1921_v5 = vpop.f32.mrf.mxu0  ;;  %v1935_v6 = vpop.f32.mrf.mxu1 }
 0xc79   : > { %v1922_v10 = vadd.f32 %v1921_v5, %v1905_v62  ;;  %v1936_v11 = vadd.f32 %v1935_v6, %v1906_v63 }
 0xc7b   : > { %v1940_v15 = vmul.f32 %v1922_v10, %v1922_v10  ;;  %v1941_v16 = vmul.f32 %v1936_v11, %v1936_v11 }
 0xc7d   : > { %v1944_v17 = vmul.f32 %v1940_v15, %v1922_v10  ;;  %v1945_v19 = vmul.f32 %v1941_v16, %v1936_v11 }
 0xc7f   : > { %v1948_v20 = vmul.f32 0.044715, %v1944_v17  ;;  %v1949_v21 = vmul.f32 0.044715, %v1945_v19 }
 0xc80   : > { %v1923_v52 = vpop.f32.mrf.mxu0  ;;  %v1937_v22 = vpop.f32.mrf.mxu1 }
 0xc81   : > { %v1952_v23 = vadd.f32 %v1948_v20, %v1922_v10  ;;  %v1953_v24 = vadd.f32 %v1949_v21, %v1936_v11  ;;  %v1924_v60 = vadd.f32 %v1923_v52, %v1905_v62  ;;  %v1938_v25 = vadd.f32 %v1937_v22, %v1906_v63 }
 0xc83   : > { %v1956_v26 = vmul.f32 0.7978846, %v1952_v23  ;;  %v1942_v27 = vmul.f32 %v1924_v60, %v1924_v60  ;;  %v1943_v28 = vmul.f32 %v1938_v25, %v1938_v25  ;;  %v1957_v29 = vmul.f32 0.7978846, %v1953_v24 }
 0xc85   : > { %v1946_v30 = vmul.f32 %v1942_v27, %v1924_v60  ;;  %v1947_v7 = vmul.f32 %v1943_v28, %v1938_v25  ;;  %2391 = vtanh.f32 %v1956_v26 }
 0xc86   : > { %2393 = vtanh.f32 %v1957_v29 }
 0xc87   : > { %v1950_v33 = vmul.f32 0.044715, %v1946_v30  ;;  %v1951_v35 = vmul.f32 0.044715, %v1947_v7  ;;  %v2347_v30 = vld [vmem:[%s3552_s19] ss:$0 sm:$0xff] }
 0xc89   : > { %v1954_v36 = vadd.f32 %v1950_v33, %v1924_v60  ;;  %v1955_v34 = vadd.f32 %v1951_v35, %v1938_v25  ;;  %v2348_v33 = vld [vmem:[%s3553_s20] ss:$0 sm:$0xff] }
 0xc8b   : > { %v1958_v37 = vmul.f32 0.7978846, %v1954_v36  ;;  %v1959_v38 = vmul.f32 0.7978846, %v1955_v34  ;;  %v2392_v39 = vpop.eup %2391 }
 0xc8c   : > { %v2394_v40 = vpop.eup %2393  ;;  %v1964_v41 = vadd.f32 1.0, %v2392_v39 }
 0xc8d   : > { %2395 = vtanh.f32 %v1958_v37  ;;  %v1965_v42 = vadd.f32 1.0, %v2394_v40 }
 0xc8e   : > { %2397 = vtanh.f32 %v1959_v38  ;;  %v1968_v45 = vmul.f32 0.5, %v1964_v41 }
 0xc8f   : > { %v1969_v47 = vmul.f32 0.5, %v1965_v42 }
 0xc90   : > { %v1972_v51 = vmul.f32 %v1968_v45, %v1922_v10 }
 0xc91   : > { %v1973_v32 = vmul.f32 %v1969_v47, %v1936_v11 }
 0xc93   : > { %v2396_v43 = vpop.eup %2395 }
 0xc94   : > { %v2398_v44 = vpop.eup %2397  ;;  %v1966_v46 = vadd.f32 1.0, %v2396_v43 }
 0xc95   : > { %v1967_v48 = vadd.f32 1.0, %v2398_v44 }
 0xc96   : > { %v1970_v49 = vmul.f32 0.5, %v1966_v46 }
 0xc97   : > { %v1971_v50 = vmul.f32 0.5, %v1967_v48 }
 0xc98   : > { %v1974_v31 = vmul.f32 %v1970_v49, %v1924_v60 }
 0xc99   : > { %v1975_v53 = vmul.f32 %v1971_v50, %v1938_v25 }
 0xc9a   : > { %v1976_v54 = vpack.c.bf16 %v1974_v31, %v1972_v51 }
 0xc9b   : > { %v1977_v12 = vpack.c.bf16 %v1975_v53, %v1973_v32 }
 0xc9c   : > { %2034 = vmatmul.bf16.vlgmr.msra.gmra.mxu2 %v1976_v54 }
 0xc9d   : > { %2048 = vmatmul.bf16.vlgmr.msra.gmra.mxu3 %v1977_v12 }
 0xd1f   : > { %v2035_v55 = vpop.f32.mrf.mxu2 }
 0xd20   : > { %v2049_v56 = vpop.f32.mrf.mxu3 }
 0xd21   : > { %v2050_v57 = vadd.f32 %v2049_v56, %v2035_v55 }
 0xd23   : > { %v2054_v59 = vadd.f32 %v2050_v57, %v3323_v13 }
 0xd25   : > { %v2060_v61 = vadd.f32 %v2346_v58, %v2054_v59 }
 0xd27   : > { %v2064_v62 = vsel %vm910_vm0, %v2060_v61, 0.0  ;;  %v2037_v63 = vpop.f32.mrf.mxu2 }
 0xd28   : > { %v2051_v0 = vpop.f32.mrf.mxu3  ;;  %2065 = vadd.xlane.f32.xlu0 %v2064_v62 }
 0xd29   : > { %v2052_v1 = vadd.f32 %v2051_v0, %v2037_v63 }
 0xd2b   : > { %v2055_v2 = vadd.f32 %v2052_v1, %v3328_v18 }
 0xd2d   : > { %v2061_v3 = vadd.f32 %v2346_v58, %v2055_v2 }
 0xd2f   : > { %v2067_v5 = vsel %vm914_vm1, %v2061_v3, 0.0 }
 0xd30   : > { %2068 = vadd.xlane.f32.xlu1 %v2067_v5 }
 0xd9b   : > { %v2066_v6 = vpop.xlane.xlu0 %2065 }
 0xd9c   : > { %v2070_v8 = vmul.f32 %v2066_v6, %v2862_v4 }
 0xd9e   : > { %v2072_v9 = vsub.f32 %v2060_v61, %v2070_v8 }
 0xda0   : > { %v2074_v10 = vmul.f32 %v2072_v9, %v2072_v9 }
 0xda2   : > { %v2076_v13 = vsel %vm910_vm0, %v2074_v10, 0.0 }
 0xda3   : > { %2077 = vadd.xlane.f32.xlu2 %v2076_v13  ;;  %v2069_v11 = vpop.xlane.xlu1 %2068 }
 0xda4   : > { %v2071_v14 = vmul.f32 %v2069_v11, %v2862_v4 }
 0xda6   : > { %v2073_v15 = vsub.f32 %v2061_v3, %v2071_v14 }
 0xda8   : > { %v2075_v16 = vmul.f32 %v2073_v15, %v2073_v15 }
 0xdaa   : > { %v2079_v17 = vsel %vm914_vm1, %v2075_v16, 0.0 }
 0xdab   : > { %2080 = vadd.xlane.f32.xlu0 %v2079_v17 }
 0xe16   : > { %v2078_v18 = vpop.xlane.xlu2 %2077 }
 0xe17   : > { %v2082_v19 = vmul.f32 %v2078_v18, %v2862_v4 }
 0xe19   : > { %v2084_v20 = vadd.f32 1e-06, %v2082_v19 }
 0xe1b   : > { %2399 = vrsqrt.f32 %v2084_v20  ;;  %vm2092_vm6 = vweird.f32 %v2084_v20 }
 0xe1e   : > { %v2081_v21 = vpop.xlane.xlu0 %2080 }
 0xe1f   : > { %v2083_v52 = vmul.f32 %v2081_v21, %v2862_v4 }
 0xe21   : > { %v2400_v22 = vpop.eup %2399  ;;  %v2085_v23 = vadd.f32 1e-06, %v2083_v52 }
 0xe22   : > { %v2087_v24 = vmul.f32 %v2400_v22, %v2084_v20  ;;  %vm2093_vm5 = vweird.f32 %v2400_v22 }
 0xe23   : > { %2401 = vrsqrt.f32 %v2085_v23  ;;  %vm2094_vm7 = vmor %vm2092_vm6, %vm2093_vm5  ;;  %vm2102_vm9 = vweird.f32 %v2085_v23 }
 0xe24   : > { %v2088_v60 = vmul.f32 %v2400_v22, %v2087_v24 }
 0xe26   : > { %v2089_v25 = vmul.f32 0.5, %v2088_v60 }
 0xe28   : > { %v2090_v26 = vsub.f32 1.5, %v2089_v25 }
 0xe29   : > { %v2402_v27 = vpop.eup %2401 }
 0xe2a   : > { %v2091_v28 = vmul.f32 %v2400_v22, %v2090_v26  ;;  %v2097_v29 = vmul.f32 %v2402_v27, %v2085_v23  ;;  %vm2103_vm8 = vweird.f32 %v2402_v27 }
 0xe2b   : > { %vm2104_vm10 = vmor %vm2102_vm9, %vm2103_vm8 }
 0xe2c   : > { %v2095_v7 = vsel %vm2094_vm7, %v2400_v22, %v2091_v28  ;;  %v2098_v4 = vmul.f32 %v2402_v27, %v2097_v29 }
 0xe2d   : > { %v2106_v35 = vmul.f32 %v2095_v7, %v2072_v9 }
 0xe2e   : > { %v2099_v36 = vmul.f32 0.5, %v2098_v4 }
 0xe2f   : > { %v2111_v34 = vmul.f32 %v2347_v30, %v2106_v35 }
 0xe30   : > { %v2100_v37 = vsub.f32 1.5, %v2099_v36 }
 0xe31   : > { %v2116_v38 = vadd.f32 %v2348_v33, %v2111_v34 }
 0xe32   : > { %v2101_v39 = vmul.f32 %v2402_v27, %v2100_v37 }
 0xe33   : > { %2118 = vst.msk [vmem:[%s656_s30] sm:$0xff] %vm910_vm0, %v2116_v38 }
 0xe34   : > { %v2105_v40 = vsel %vm2104_vm10, %v2402_v27, %v2101_v39 }
 0xe35   : > { %v2107_v41 = vmul.f32 %v2105_v40, %v2073_v15 }
 0xe37   : > { %v2112_v42 = vmul.f32 %v2347_v30, %v2107_v41 }
 0xe39   : > { %v2117_v43 = vadd.f32 %v2348_v33, %v2112_v42 }
 0xe3b   : > { %2119 = vst.msk [vmem:[%s656_s30 + $0x8] sm:$0x1f] %vm914_vm1, %v2117_v43 }
 0xe3c PF: > { %s31_s2 = sadd.s32 1, %s2409_s2  }
 0xe3d   : > { %p28_p4 = scmp.ge.s32.totalorder %s31_s2, 4  }
 0xe3f   :  { %30 = sbr.rel (!%p28_p4) target bundleno = 7 (0x7), region = 155 }

// kernel: split.13
= control target key start
LH: loop header
LB: loop body
LE: loop exit
PB: predicated region body
PF: predicated region fallthrough
CT: control target
= control target key end

     0   :  { %vm6_vm0 = vcmask 1042432   ;;  %vm9_vm1 = vcmask 1043456   ;;  %v12_v0 = vlaneseq  ;;  %s38_s0 = inlined_call_operand.vmem [shape: f32[157696], index: 0, kind: input, shape index: {}]   ;;  %s39_s1 = inlined_call_operand.vmem [shape: f32[256], index: 1, kind: output, shape index: {}]  }
   0x1   :  { %v19_v1 = vld [vmem:[%s38_s0 + $0x1a8] sm:$0xff]  ;;  %s21_s0 = smov 32  }
   0x2   :  { %v7_v2 = vsel %vm6_vm0, 0, %v19_v1  ;;  %v10_v3 = vsel %vm9_vm1, 0, %v19_v1  ;;  %v13_v4 = vand.u32 127, %v12_v0 }
   0x3   :  { %v8_v5 = vrot.slane %v7_v2, 3  ;;  %v11_v6 = vrot.slane %v10_v3, 4 }
   0x4   :  { %vm14_vm2 = vcmp.lt.s32.totalorder %v13_v4, 96 }
   0x5   :  { %v15_v7 = vsel %vm14_vm2, %v11_v6, %v8_v5 }
   0x6   :  { %16 = vrot.lane.b32.xlu0 %v15_v7, %s21_s0 }
  0x78   :  { %v17_v8 = vpop.permute.xlu0 %16 }
  0x79   :  { %18 = vst [vmem:[%s39_s1] sm:$0x3] %v17_v8 }

// kernel: albef_forward.13
= control target key start
LH: loop header
LB: loop body
LE: loop exit
PB: predicated region body
PF: predicated region fallthrough
CT: control target
= control target key end

     0   :  { %s2610_s0 = inlined_call_operand.vmem [shape: f32[8,8,64], index: 0, kind: input, shape index: {}]   ;;  %s2611_s1 = inlined_call_operand.vmem [shape: f32[8,1,8], index: 1, kind: input, shape index: {}]   ;;  %s2612_s2 = inlined_call_operand.vmem [shape: f32[1,64], index: 2, kind: input, shape index: {}]   ;;  %s2613_s3 = inlined_call_operand.vmem [shape: f32[1,64], index: 3, kind: input, shape index: {}]   ;;  %s2614_s4 = inlined_call_operand.vmem [shape: f32[1,64], index: 4, kind: input, shape index: {}]   ;;  %s2615_s5 = inlined_call_operand.vmem [shape: f32[1,64], index: 5, kind: input, shape index: {}]   ;;  %s2616_s6 = inlined_call_operand.vmem [shape: f32[4,64,16], index: 6, kind: input, shape index: {}]   ;;  %s2617_s7 = inlined_call_operand.vmem [shape: f32[4,64,16], index: 7, kind: input, shape index: {}]   ;;  %s2618_s8 = inlined_call_operand.vmem [shape: f32[4,64,16], index: 8, kind: input, shape index: {}]   ;;  %s2619_s9 = inlined_call_operand.vmem [shape: f32[4,1,16], index: 9, kind: input, shape index: {}]   ;;  %s2620_s10 = inlined_call_operand.vmem [shape: f32[4,1,16], index: 10, kind: input, shape index: {}]   ;;  %s2621_s11 = inlined_call_operand.vmem [shape: f32[4,1,16], index: 11, kind: input, shape index: {}]   ;;  %s2622_s12 = inlined_call_operand.vmem [shape: f32[4,16,64], index: 12, kind: input, shape index: {}]   ;;  %s2623_s13 = inlined_call_operand.vmem [shape: f32[1,64], index: 13, kind: input, shape index: {}]   ;;  %s2624_s14 = inlined_call_operand.vmem [shape: f32[1,64], index: 14, kind: input, shape index: {}]   ;;  %s2625_s15 = inlined_call_operand.vmem [shape: f32[1,64], index: 15, kind: input, shape index: {}]   ;;  %s2626_s16 = inlined_call_operand.vmem [shape: f32[64,256], index: 16, kind: input, shape index: {}]   ;;  %s2627_s17 = inlined_call_operand.vmem [shape: f32[1,256], index: 17, kind: input, shape index: {}]   ;;  %s2628_s18 = inlined_call_operand.vmem [shape: f32[256,64], index: 18, kind: input, shape index: {}]   ;;  %s2629_s19 = inlined_call_operand.vmem [shape: f32[1,64], index: 19, kind: input, shape index: {}]   ;;  %s2630_s20 = inlined_call_operand.vmem [shape: f32[8,1,64], index: 20, kind: output, shape index: {}]  }
   0x1   :  { %2631 = sst [smem:[#allocation2_spill]] %s2610_s0 }
   0x2   :  { %2632 = sst [smem:[#allocation3_spill]] %s2611_s1  ;;  %s1973_s1 = smov 0  }
   0x3   :  { %2633 = sst [smem:[#allocation4_spill]] %s2612_s2 }
   0x4   :  { %2634 = sst [smem:[#allocation5_spill]] %s2613_s3 }
   0x5   :  { %2635 = sst [smem:[#allocation6_spill]] %s2614_s4 }
   0x6 LB: > { %s1676_s22 = sadd.s32 4294967295, %s1865_s1   ;;  %p1680_p0 = scmp.ge.s32.totalorder %s1865_s1, 1  ;;  %s1865_s1 = sphi %s1973_s1, %s30_s1  }
   0x7   : > { %p569_p1 = scmp.lt.s32.totalorder %s1865_s1, 9 }
   0x9   : > { %p570_p2 = pnand %p1680_p0, %p569_p1 }
   0xa   : > { %p627_p3 = scmp.lt.s32.totalorder (!%p570_p2), %s1676_s22, 7  ;;  %s2636_s25 = sld [smem:[#allocation2_spill]] (!%p570_p2) }
   0xb   : > { %573 = sbr.rel (%p570_p2) target bundleno = 2988 (0xbac), region = 100  ;;  %s2637_s28 = sld [smem:[#allocation4_spill]] (!%p570_p2) }
   0xc   : > { %s2638_s30 = sld [smem:[#allocation5_spill]] (!%p570_p2) }
   0xd   : > { %s2639_s2 = sld [smem:[#allocation6_spill]] (!%p570_p2) }
   0xe   : > { %s2640_s27 = sld [smem:[#allocation3_spill]] (!%p570_p2) }
  0x10   : > { %s2642_s22 = smov (!%p627_p3, %s1676_s22), 7  ;;  %vm641_vm0 = vcmask 523264   ;;  %v1867_v2 = vmov 64.0   ;;  %v719_v35 = vld [vmem:[%s2616_s6 + $0x30] sm:$0xff]  ;;  %v720_v36 = vld [vmem:[%s2616_s6 + $0x38] sm:$0xff]  ;;  %v717_v44 = vld [vmem:[%s2616_s6 + $0x20] sm:$0xff] }
  0x11   : > { %s1681_s23 = sshll.u32 %s2642_s22, 3  ;;  %1831 = vrcp.f32 %v1867_v2  ;;  %v1810_v23 = vld [vmem:[%s2637_s28] ss:$0 sm:$0xff]  ;;  %v751_v37 = vld [vmem:[%s2617_s7 + $0x30] sm:$0xff]  ;;  %v724_v38 = vpack.c.bf16 %v720_v36, %v719_v35  ;;  %v752_v39 = vld [vmem:[%s2617_s7 + $0x38] sm:$0xff]  ;;  %vm803_vm8 = vcmask 130048   ;;  %s636_s29 = scalar_lea.vmem %s2630_s20, %s2642_s22 }
  0x12   : > { %s630_s3 = scalar_lea.vmem %s2636_s25, %s1681_s23  ;;  %v1811_v26 = vld [vmem:[%s2638_s30] ss:$0 sm:$0xff]  ;;  %v780_v40 = vld [vmem:[%s2618_s8 + $0x30] sm:$0xff]  ;;  %v781_v41 = vld [vmem:[%s2618_s8 + $0x38] sm:$0xff]  ;;  %v756_v42 = vpack.c.bf16 %v752_v39, %v751_v37  ;;  %vm835_vm9 = vcmask 64512   ;;  %vm1618_vm13 = vcmask 516096  }
  0x13   : > { %v638_v0 = vld [vmem:[%s630_s3] sm:$0xff]  ;;  %v785_v43 = vpack.c.bf16 %v781_v41, %v780_v40  ;;  %736 = vmatpush.bf16.msra.mxu0 %v724_v38  ;;  %v718_v45 = vld [vmem:[%s2616_s6 + $0x28] sm:$0xff]  ;;  %v715_v53 = vld [vmem:[%s2616_s6 + $0x10] sm:$0xff] }
  0x14   : > { %v642_v1 = vsel %vm641_vm0, %v638_v0, 0.0  ;;  %765 = vmatpush.bf16.msra.mxu1 %v756_v42  ;;  %v749_v46 = vld [vmem:[%s2617_s7 + $0x20] sm:$0xff]  ;;  %v723_v47 = vpack.c.bf16 %v718_v45, %v717_v44  ;;  %v750_v48 = vld [vmem:[%s2617_s7 + $0x28] sm:$0xff]  ;;  %v716_v54 = vld [vmem:[%s2616_s6 + $0x18] sm:$0xff]  ;;  %s633_s28 = scalar_lea.vmem %s2640_s27, %s2642_s22 }
  0x15   : > { %643 = vadd.xlane.f32.xlu0 %v642_v1  ;;  %794 = vmatpush.bf16.msra.mxu2 %v785_v43  ;;  %v778_v49 = vld [vmem:[%s2618_s8 + $0x20] sm:$0xff]  ;;  %v779_v50 = vld [vmem:[%s2618_s8 + $0x28] sm:$0xff]  ;;  %v755_v51 = vpack.c.bf16 %v750_v48, %v749_v46  ;;  %v747_v55 = vld [vmem:[%s2617_s7 + $0x10] sm:$0xff]  ;;  %v722_v56 = vpack.c.bf16 %v716_v54, %v715_v53 }
  0x16   : > { %v784_v52 = vpack.c.bf16 %v779_v50, %v778_v49  ;;  %v748_v57 = vld [vmem:[%s2617_s7 + $0x18] sm:$0xff]  ;;  %v776_v58 = vld [vmem:[%s2618_s8 + $0x10] sm:$0xff]  ;;  %v713_v62 = vld [vmem:[%s2616_s6] sm:$0xff] }
  0x17   : > { %v1832_v3 = vpop.eup %1831  ;;  %737 = vmatpush.bf16.msra.mxu0 %v723_v47  ;;  %v777_v59 = vld [vmem:[%s2618_s8 + $0x18] sm:$0xff]  ;;  %v754_v60 = vpack.c.bf16 %v748_v57, %v747_v55  ;;  %v714_v63 = vld [vmem:[%s2616_s6 + $0x8] sm:$0xff]  ;;  %v1812_v43 = vld [vmem:[%s2639_s2] ss:$0 sm:$0xff] }
  0x18   : > { %v646_v4 = vmul.f32 64.0, %v1832_v3  ;;  %vm650_vm1 = vweird.f32 %v1832_v3  ;;  %766 = vmatpush.bf16.msra.mxu1 %v755_v51  ;;  %v783_v61 = vpack.c.bf16 %v777_v59, %v776_v58  ;;  %v721_v1 = vpack.c.bf16 %v714_v63, %v713_v62  ;;  %v746_v2 = vld [vmem:[%s2617_s7 + $0x8] sm:$0xff]  ;;  %v1813_v45 = vld [vmem:[%s2615_s5] ss:$0 sm:$0xff]  ;;  %v1714_v48 = vld [vmem:[%s2618_s8 + $0x70] sm:$0xff] }
  0x19   : > { %795 = vmatpush.bf16.msra.mxu2 %v784_v52  ;;  %v1715_v49 = vld [vmem:[%s2618_s8 + $0x78] sm:$0xff]  ;;  %v1712_v53 = vld [vmem:[%s2618_s8 + $0x60] sm:$0xff]  ;;  %v1710_v55 = vld [vmem:[%s2618_s8 + $0x50] sm:$0xff] }
  0x1a   : > { %v647_v5 = vsub.f32 1.0, %v646_v4  ;;  %v775_v4 = vld [vmem:[%s2618_s8 + $0x8] sm:$0xff]  ;;  %v948_v51 = vpack.c.bf16 %v1715_v49, %v1714_v48  ;;  %v1708_v58 = vld [vmem:[%s2618_s8 + $0x40] sm:$0xff]  ;;  %v1732_v62 = vld [vmem:[%s2616_s6 + $0xb8] sm:$0xff] }
  0x1b   : > { %738 = vmatpush.bf16.msra.mxu0 %v722_v56  ;;  %v1711_v56 = vld [vmem:[%s2618_s8 + $0x58] sm:$0xff]  ;;  %v1709_v59 = vld [vmem:[%s2618_s8 + $0x48] sm:$0xff] }
  0x1c   : > { %v648_v6 = vmul.f32 %v1832_v3, %v647_v5  ;;  %767 = vmatpush.bf16.msra.mxu1 %v754_v60  ;;  %v946_v57 = vpack.c.bf16 %v1711_v56, %v1710_v55  ;;  %v945_v60 = vpack.c.bf16 %v1709_v59, %v1708_v58  ;;  %v1742_v58 = vld [vmem:[%s2617_s7 + $0xb8] sm:$0xff] }
  0x1d   : > { %796 = vmatpush.bf16.msra.mxu2 %v783_v61  ;;  %v1731_v61 = vld [vmem:[%s2616_s6 + $0xb0] sm:$0xff] }
  0x1e   : > { %v649_v7 = vadd.f32 %v1832_v3, %v648_v6  ;;  %v1078_v63 = vpack.c.bf16 %v1732_v62, %v1731_v61  ;;  %v1740_v61 = vld [vmem:[%s2617_s7 + $0xa8] sm:$0xff] }
  0x1f   : > { %739 = vmatpush.bf16.msra.mxu0 %v721_v1  ;;  %v1730_v1 = vld [vmem:[%s2616_s6 + $0xa8] sm:$0xff] }
  0x20   : > { %v1988_v8 = vsel %vm650_vm1, %v1832_v3, %v649_v7  ;;  %v774_v3 = vld [vmem:[%s2618_s8] sm:$0xff]  ;;  %v1694_v7 = vld [vmem:[%s2616_s6 + $0x70] sm:$0xff] }
  0x21   : > { %v782_v6 = vpack.c.bf16 %v775_v4, %v774_v3  ;;  %v1727_v3 = vld [vmem:[%s2616_s6 + $0x90] sm:$0xff]  ;;  %v1728_v4 = vld [vmem:[%s2616_s6 + $0x98] sm:$0xff] }
  0x23   : > { %797 = vmatpush.bf16.msra.mxu2 %v782_v6  ;;  %v1725_v6 = vld [vmem:[%s2616_s6 + $0x80] sm:$0xff] }
  0x88   : > { %v644_v9 = vpop.xlane.xlu0 %643 }
  0x89   : > { %v652_v10 = vmul.f32 %v1988_v8, %v644_v9  ;;  %v1695_v9 = vld [vmem:[%s2616_s6 + $0x78] sm:$0xff] }
  0x8b   : > { %v653_v11 = vsub.f32 %v638_v0, %v652_v10  ;;  %v745_v0 = vld [vmem:[%s2617_s7] sm:$0xff]  ;;  %v1704_v10 = vld [vmem:[%s2617_s7 + $0x70] sm:$0xff] }
  0x8c   : > { %v753_v5 = vpack.c.bf16 %v746_v2, %v745_v0  ;;  %v1729_v0 = vld [vmem:[%s2616_s6 + $0xa0] sm:$0xff] }
  0x8d   : > { %v654_v12 = vmul.f32 %v653_v11, %v653_v11  ;;  %v1077_v2 = vpack.c.bf16 %v1730_v1, %v1729_v0  ;;  %v1738_v0 = vld [vmem:[%s2617_s7 + $0x98] sm:$0xff] }
  0x8e   : > { %768 = vmatpush.bf16.msra.mxu1 %v753_v5  ;;  %v1076_v5 = vpack.c.bf16 %v1728_v4, %v1727_v3  ;;  %v1736_v3 = vld [vmem:[%s2617_s7 + $0x88] sm:$0xff] }
  0x8f   : > { %v655_v13 = vsel %vm641_vm0, %v654_v12, 0.0  ;;  %v1705_v12 = vld [vmem:[%s2617_s7 + $0x78] sm:$0xff] }
  0x90   : > { %656 = vadd.xlane.f32.xlu0 %v655_v13 }
 0x103   : > { %v657_v14 = vpop.xlane.xlu0 %656 }
 0x104   : > { %v658_v15 = vmul.f32 %v657_v14, %v1988_v8  ;;  %v917_v14 = vpack.c.bf16 %v1705_v12, %v1704_v10  ;;  %v1815_v10 = vld [vmem:[%s2620_s10] ss:$0 sm:$0xff] }
 0x106   : > { %v659_v16 = vadd.f32 1e-12, %v658_v15  ;;  %v1692_v15 = vld [vmem:[%s2616_s6 + $0x60] sm:$0xff]  ;;  %927 = vmatpush.bf16.msrb.mxu0 %v917_v14 }
 0x108   : > { %1833 = vrsqrt.f32 %v659_v16  ;;  %vm666_vm3 = vweird.f32 %v659_v16 }
 0x10e   : > { %v1834_v17 = vpop.eup %1833 }
 0x10f   : > { %v661_v18 = vmul.f32 %v1834_v17, %v659_v16  ;;  %vm667_vm2 = vweird.f32 %v1834_v17  ;;  %v1693_v16 = vld [vmem:[%s2616_s6 + $0x68] sm:$0xff] }
 0x110   : > { %vm668_vm4 = vmor %vm666_vm3, %vm667_vm2 }
 0x111   : > { %v662_v19 = vmul.f32 %v1834_v17, %v661_v18 }
 0x113   : > { %v663_v20 = vmul.f32 0.5, %v662_v19  ;;  %v885_v19 = vpack.c.bf16 %v1693_v16, %v1692_v15  ;;  %v1816_v16 = vld [vmem:[%s2621_s11] ss:$0 sm:$0xff] }
 0x115   : > { %v664_v21 = vsub.f32 1.5, %v663_v20  ;;  %v1703_v20 = vld [vmem:[%s2617_s7 + $0x68] sm:$0xff] }
 0x117   : > { %v665_v22 = vmul.f32 %v1834_v17, %v664_v21 }
 0x119   : > { %v669_v24 = vsel %vm668_vm4, %v1834_v17, %v665_v22  ;;  %v1702_v17 = vld [vmem:[%s2617_s7 + $0x60] sm:$0xff]  ;;  %v1690_v22 = vld [vmem:[%s2616_s6 + $0x50] sm:$0xff] }
 0x11a   : > { %v670_v25 = vmul.f32 %v669_v24, %v653_v11  ;;  %v886_v11 = vpack.c.bf16 %v1695_v9, %v1694_v7  ;;  %v916_v21 = vpack.c.bf16 %v1703_v20, %v1702_v17  ;;  %v1726_v7 = vld [vmem:[%s2616_s6 + $0x88] sm:$0xff] }
 0x11b   : > { %v1075_v9 = vpack.c.bf16 %v1726_v7, %v1725_v6 }
 0x11c   : > { %v674_v27 = vmul.f32 %v1810_v23, %v670_v25  ;;  %896 = vmatpush.bf16.msrb.mxu1 %v886_v11  ;;  %v1691_v23 = vld [vmem:[%s2616_s6 + $0x58] sm:$0xff]  ;;  %v1700_v25 = vld [vmem:[%s2617_s7 + $0x50] sm:$0xff]  ;;  %928 = vmatpush.bf16.msrb.mxu0 %v916_v21  ;;  %v1814_v11 = vld [vmem:[%s2619_s9] ss:$0 sm:$0xff] }
 0x11d   : > { %v1818_v21 = vld [vmem:[%s2620_s10 + $0x1] ss:$0 sm:$0xff] }
 0x11e   : > { %v1999_v28 = vadd.f32 %v1811_v26, %v674_v27  ;;  %v1701_v26 = vld [vmem:[%s2617_s7 + $0x58] sm:$0xff]  ;;  %v884_v27 = vpack.c.bf16 %v1691_v23, %v1690_v22  ;;  %v1817_v23 = vld [vmem:[%s2619_s9 + $0x1] ss:$0 sm:$0xff] }
 0x120   : > { %v682_v29 = vsel %vm641_vm0, %v1999_v28, 0.0  ;;  %897 = vmatpush.bf16.msrb.mxu1 %v885_v19 }
 0x121   : > { %683 = vadd.xlane.f32.xlu1 %v682_v29  ;;  %v915_v29 = vpack.c.bf16 %v1701_v26, %v1700_v25 }
 0x123   : > { %929 = vmatpush.bf16.msrb.mxu0 %v915_v29 }
 0x124   : > { %898 = vmatpush.bf16.msrb.mxu1 %v884_v27 }
 0x194   : > { %v684_v30 = vpop.xlane.xlu1 %683 }
 0x195   : > { %v685_v31 = vmul.f32 %v684_v30, %v1988_v8  ;;  %v1688_v30 = vld [vmem:[%s2616_s6 + $0x40] sm:$0xff] }
 0x197   : > { %v2005_v32 = vsub.f32 %v1999_v28, %v685_v31  ;;  %v1689_v31 = vld [vmem:[%s2616_s6 + $0x48] sm:$0xff] }
 0x198   : > { %v883_v35 = vpack.c.bf16 %v1689_v31, %v1688_v30  ;;  %v1819_v31 = vld [vmem:[%s2621_s11 + $0x1] ss:$0 sm:$0xff] }
 0x199   : > { %v687_v33 = vmul.f32 %v2005_v32, %v2005_v32 }
 0x19a   : > { %899 = vmatpush.bf16.msrb.mxu1 %v883_v35 }
 0x19b   : > { %v688_v34 = vsel %vm641_vm0, %v687_v33, 0.0  ;;  %v1698_v33 = vld [vmem:[%s2617_s7 + $0x40] sm:$0xff] }
 0x19c   : > { %689 = vadd.xlane.f32.xlu1 %v688_v34  ;;  %v1699_v34 = vld [vmem:[%s2617_s7 + $0x48] sm:$0xff] }
 0x19d   : > { %v914_v36 = vpack.c.bf16 %v1699_v34, %v1698_v33 }
 0x19f   : > { %930 = vmatpush.bf16.msrb.mxu0 %v914_v36 }
 0x20f   : > { %v690_v13 = vpop.xlane.xlu1 %689 }
 0x210   : > { %v691_v18 = vmul.f32 %v690_v13, %v1988_v8 }
 0x212   : > { %v692_v24 = vadd.f32 1e-12, %v691_v18 }
 0x214   : > { %1835 = vrsqrt.f32 %v692_v24  ;;  %vm699_vm6 = vweird.f32 %v692_v24 }
 0x21a   : > { %v1836_v37 = vpop.eup %1835 }
 0x21b   : > { %v694_v38 = vmul.f32 %v1836_v37, %v692_v24  ;;  %vm700_vm5 = vweird.f32 %v1836_v37 }
 0x21c   : > { %vm701_vm7 = vmor %vm699_vm6, %vm700_vm5 }
 0x21d   : > { %v695_v39 = vmul.f32 %v1836_v37, %v694_v38  ;;  %v2230_v38 = vld [vmem:[%s633_s28] ss:$0 sm:$0xff] }
 0x21f   : > { %v696_v40 = vmul.f32 0.5, %v695_v39 }
 0x221   : > { %v697_v41 = vsub.f32 1.5, %v696_v40 }
 0x223   : > { %v698_v42 = vmul.f32 %v1836_v37, %v697_v41 }
 0x225   : > { %v702_v44 = vsel %vm701_vm7, %v1836_v37, %v698_v42 }
 0x226   : > { %v703_v46 = vmul.f32 %v702_v44, %v2005_v32  ;;  %v1713_v32 = vld [vmem:[%s2618_s8 + $0x68] sm:$0xff] }
 0x227   : > { %v947_v54 = vpack.c.bf16 %v1713_v32, %v1712_v53 }
 0x228   : > { %v707_v47 = vmul.f32 %v1812_v43, %v703_v46 }
 0x22a   : > { %v711_v50 = vadd.f32 %v1813_v45, %v707_v47 }
 0x22c   : > { %v2144_v52 = vpack.c.bf16 %v711_v50, %v711_v50 }
 0x22e   : > { %1682 = vmatmul.msk.bf16.vlgmr.msra.gmra.mxu0 %vm641_vm0, %v2144_v52  ;;  %1683 = vmatmul.msk.bf16.vlgmr.msra.gmra.mxu1 %vm641_vm0, %v2144_v52 }
 0x22f   : > { %1684 = vmatmul.msk.bf16.vlgmr.msra.gmra.mxu2 %vm641_vm0, %v2144_v52  ;;  %958 = vmatpush.bf16.msra.mxu1 %v948_v51 }
 0x233   : > { %959 = vmatpush.bf16.msra.mxu1 %v947_v54 }
 0x237   : > { %960 = vmatpush.bf16.msra.mxu1 %v946_v57  ;;  %v1741_v57 = vld [vmem:[%s2617_s7 + $0xb0] sm:$0xff] }
 0x238   : > { %v1109_v59 = vpack.c.bf16 %v1742_v58, %v1741_v57  ;;  %v1773_v57 = vld [vmem:[%s2617_s7 + $0xd0] sm:$0xff]  ;;  %v1774_v58 = vld [vmem:[%s2617_s7 + $0xd8] sm:$0xff] }
 0x23b   : > { %961 = vmatpush.bf16.msra.mxu1 %v945_v60  ;;  %v1739_v60 = vld [vmem:[%s2617_s7 + $0xa0] sm:$0xff] }
 0x23c   : > { %v1108_v62 = vpack.c.bf16 %v1740_v61, %v1739_v60  ;;  %v1284_v61 = vpack.c.bf16 %v1774_v58, %v1773_v57 }
 0x23e   : > { %1697 = vmatmul.msk.bf16.vlgmr.msrb.gmra.mxu1 %vm641_vm0, %v2144_v52  ;;  %1707 = vmatmul.msk.bf16.vlgmr.msrb.gmra.mxu0 %vm641_vm0, %v2144_v52 }
 0x23f   : > { %1088 = vmatpush.bf16.msrb.mxu1 %v1078_v63  ;;  %v1737_v63 = vld [vmem:[%s2617_s7 + $0x90] sm:$0xff] }
 0x240   : > { %v1107_v1 = vpack.c.bf16 %v1738_v0, %v1737_v63  ;;  %v1771_v63 = vld [vmem:[%s2617_s7 + $0xc0] sm:$0xff]  ;;  %v1772_v0 = vld [vmem:[%s2617_s7 + $0xc8] sm:$0xff] }
 0x243   : > { %1089 = vmatpush.bf16.msrb.mxu1 %v1077_v2  ;;  %v1735_v2 = vld [vmem:[%s2617_s7 + $0x80] sm:$0xff] }
 0x244   : > { %v1106_v4 = vpack.c.bf16 %v1736_v3, %v1735_v2  ;;  %v1283_v2 = vpack.c.bf16 %v1772_v0, %v1771_v63 }
 0x247   : > { %1090 = vmatpush.bf16.msrb.mxu1 %v1076_v5 }
 0x24b   : > { %1091 = vmatpush.bf16.msrb.mxu1 %v1075_v9 }
 0x24e   : > { %1717 = vmatmul.msk.bf16.vlgmr.msra.gmra.mxu1 %vm641_vm0, %v2144_v52 }
 0x25e   : > { %1734 = vmatmul.msk.bf16.vlgmr.msrb.gmra.mxu1 %vm641_vm0, %v2144_v52 }
 0x2ab   : > { %v741_v12 = vpop.f32.mrf.mxu0  ;;  %v770_v13 = vpop.f32.mrf.mxu1 }
 0x2ac   : > { %v771_v14 = vadd.f32 %v1815_v10, %v770_v13  ;;  %v742_v15 = vadd.f32 %v1814_v11, %v741_v12  ;;  %v1767_v10 = vld [vmem:[%s2616_s6 + $0xf0] sm:$0xff]  ;;  %v1768_v11 = vld [vmem:[%s2616_s6 + $0xf8] sm:$0xff] }
 0x2ad   : > { %v1255_v13 = vpack.c.bf16 %v1768_v11, %v1767_v10  ;;  %v1759_v10 = vld [vmem:[%s2622_s12 + $0x28] sm:$0xff] }
 0x2ae   : > { %1685 = vmatpush.xpose.msk.msra.mxu3 %vm803_vm8, %v771_v14 }
 0x2b1   : > { %1686 = vmatmul.msk.f32.vlgmr.msra.gmra.mxu3 %vm803_vm8, %v742_v15  ;;  %v1765_v15 = vld [vmem:[%s2616_s6 + $0xe0] sm:$0xff] }
 0x2b2   : > { %v799_v17 = vpop.f32.mrf.mxu2 }
 0x2b3   : > { %v800_v18 = vadd.f32 %v1816_v16, %v799_v17  ;;  %v743_v19 = vpop.f32.mrf.mxu0  ;;  %v772_v20 = vpop.f32.mrf.mxu1  ;;  %v1766_v16 = vld [vmem:[%s2616_s6 + $0xe8] sm:$0xff] }
 0x2b4   : > { %v1254_v17 = vpack.c.bf16 %v1766_v16, %v1765_v15  ;;  %v1764_v19 = vld [vmem:[%s2616_s6 + $0xd8] sm:$0xff] }
 0x2b5   : > { %865 = vmatpush.msrb.mxu3 %v800_v18  ;;  %v1763_v18 = vld [vmem:[%s2616_s6 + $0xd0] sm:$0xff] }
 0x2b6   : > { %v1253_v20 = vpack.c.bf16 %v1764_v19, %v1763_v18  ;;  %v1824_v18 = vld [vmem:[%s2621_s11 + $0x2] ss:$0 sm:$0xff] }
 0x2ba   : > { %v801_v22 = vpop.f32.mrf.mxu2 }
 0x2bb   : > { %v901_v24 = vpop.f32.mrf.mxu1  ;;  %v932_v25 = vpop.f32.mrf.mxu0  ;;  %v1762_v22 = vld [vmem:[%s2616_s6 + $0xc8] sm:$0xff] }
 0x2bc   : > { %v933_v26 = vadd.f32 %v1818_v21, %v932_v25  ;;  %v902_v27 = vadd.f32 %v1817_v23, %v901_v24  ;;  %v1761_v21 = vld [vmem:[%s2616_s6 + $0xc0] sm:$0xff]  ;;  %v872_v25 = vld [vmem:[%s2622_s12 + $0x8] sm:$0xff] }
 0x2bd   : > { %v1252_v23 = vpack.c.bf16 %v1762_v22, %v1761_v21  ;;  %v871_v24 = vld [vmem:[%s2622_s12] sm:$0xff] }
 0x2be   : > { %1718 = vmatpush.xpose.msk.msrb.mxu2 %vm803_vm8, %v933_v26  ;;  %v873_v26 = vpack.c.bf16 %v872_v25, %v871_v24  ;;  %v1825_v22 = vld [vmem:[%s2620_s10 + $0x3] ss:$0 sm:$0xff] }
 0x2c0   : > { %1060 = vmatpush.bf16.msra.mxu0 %v873_v26 }
 0x2c1   : > { %1719 = vmatmul.msk.f32.vlgmr.msrb.gmra.mxu2 %vm803_vm8, %v902_v27  ;;  %v1721_v27 = vld [vmem:[%s2622_s12 + $0x10] sm:$0xff] }
 0x2c3   : > { %v903_v29 = vpop.f32.mrf.mxu1  ;;  %v934_v30 = vpop.f32.mrf.mxu0 }
 0x2c4   : > { %v1722_v29 = vld [vmem:[%s2622_s12 + $0x18] sm:$0xff] }
 0x2c5   : > { %v1033_v30 = vpack.c.bf16 %v1722_v29, %v1721_v27 }
 0x2c7   : > { %1044 = vmatpush.bf16.msra.mxu3 %v1033_v30 }
 0x2cb   : > { %v963_v33 = vpop.f32.mrf.mxu1 }
 0x2cc   : > { %v964_v34 = vadd.f32 %v1819_v31, %v963_v33  ;;  %v1751_v31 = vld [vmem:[%s2618_s8 + $0xb0] sm:$0xff]  ;;  %v1752_v33 = vld [vmem:[%s2618_s8 + $0xb8] sm:$0xff] }
 0x2ce   : > { %1024 = vmatpush.msra.mxu2 %v964_v34  ;;  %v1140_v34 = vpack.c.bf16 %v1752_v33, %v1751_v31  ;;  %v1787_v33 = vld [vmem:[%s2618_s8 + $0xf0] sm:$0xff] }
 0x2d0   : > { %1119 = vmatpush.bf16.msrb.mxu2 %v1109_v59  ;;  %v1820_v59 = vld [vmem:[%s2619_s9 + $0x2] ss:$0 sm:$0xff] }
 0x2d3   : > { %v965_v35 = vpop.f32.mrf.mxu1 }
 0x2d4   : > { %1120 = vmatpush.bf16.msrb.mxu2 %v1108_v62  ;;  %v1749_v35 = vld [vmem:[%s2618_s8 + $0xa0] sm:$0xff] }
 0x2d8   : > { %1121 = vmatpush.bf16.msrb.mxu2 %v1107_v1 }
 0x2db   : > { %v2228_v36 = vpop.f32.mrf.mxu1 }
 0x2dc   : > { %1122 = vmatpush.bf16.msrb.mxu2 %v1106_v4  ;;  %v1094_v1 = vadd.f32 %v1820_v59, %v2228_v36  ;;  %v1758_v36 = vld [vmem:[%s2622_s12 + $0x20] sm:$0xff] }
 0x2e3   : > { %v1095_v37 = vpop.f32.mrf.mxu1 }
 0x2e4   : > { %v1750_v37 = vld [vmem:[%s2618_s8 + $0xa8] sm:$0xff] }
 0x334   : > { %v827_v39 = vpop.f32.mrf.mxu3 }
 0x335   : > { %v830_v40 = vmul.f32 0.25, %v827_v39  ;;  %v1139_v39 = vpack.c.bf16 %v1750_v37, %v1749_v35  ;;  %v1785_v37 = vld [vmem:[%s2618_s8 + $0xe0] sm:$0xff] }
 0x337   : > { %v834_v41 = vadd.f32 %v2230_v38, %v830_v40  ;;  %v1747_v40 = vld [vmem:[%s2618_s8 + $0x90] sm:$0xff] }
 0x339   : > { %v836_v42 = vsel %vm835_vm9, %v834_v41, -inf }
 0x33a   : > { %837 = vmax.xlane.f32.xlu2 %v836_v42 }
 0x344   : > { %v990_v43 = vpop.f32.mrf.mxu2 }
 0x345   : > { %v993_v44 = vmul.f32 0.25, %v990_v43  ;;  %v1745_v43 = vld [vmem:[%s2618_s8 + $0x80] sm:$0xff] }
 0x347   : > { %v994_v45 = vadd.f32 %v2230_v38, %v993_v44  ;;  %v1746_v44 = vld [vmem:[%s2618_s8 + $0x88] sm:$0xff] }
 0x349   : > { %v995_v46 = vsel %vm835_vm9, %v994_v45, -inf }
 0x34a   : > { %996 = vmax.xlane.f32.xlu2 %v995_v46 }
 0x3ad   : > { %v838_v47 = vpop.xlane.xlu2 %837 }
 0x3ae   : > { %v839_v48 = vsub.f32 %v834_v41, %v838_v47  ;;  %v1748_v41 = vld [vmem:[%s2618_s8 + $0x98] sm:$0xff] }
 0x3af   : > { %v1138_v42 = vpack.c.bf16 %v1748_v41, %v1747_v40  ;;  %v1783_v41 = vld [vmem:[%s2618_s8 + $0xd0] sm:$0xff] }
 0x3b0   : > { %v840_v49 = vmul.f32 1.442695, %v839_v48  ;;  %v1777_v48 = vld [vmem:[%s2617_s7 + $0xf0] sm:$0xff] }
 0x3b2   : > { %1837 = vpow2.f32 %v840_v49  ;;  %v1778_v49 = vld [vmem:[%s2617_s7 + $0xf8] sm:$0xff] }
 0x3b8   : > { %v1838_v50 = vpop.eup %1837 }
 0x3b9   : > { %v842_v51 = vsel %vm835_vm9, %v1838_v50, 0.0 }
 0x3ba   : > { %843 = vadd.xlane.f32.xlu0 %v842_v51  ;;  %v1286_v51 = vpack.c.bf16 %v1778_v49, %v1777_v48 }
 0x3bd   : > { %v997_v53 = vpop.xlane.xlu2 %996 }
 0x3be   : > { %v998_v32 = vsub.f32 %v994_v45, %v997_v53  ;;  %v1137_v45 = vpack.c.bf16 %v1746_v44, %v1745_v43  ;;  %v1781_v44 = vld [vmem:[%s2618_s8 + $0xc0] sm:$0xff] }
 0x3c0   : > { %v999_v54 = vmul.f32 1.442695, %v998_v32  ;;  %v1775_v32 = vld [vmem:[%s2617_s7 + $0xe0] sm:$0xff] }
 0x3c2   : > { %1839 = vpow2.f32 %v999_v54  ;;  %v1776_v54 = vld [vmem:[%s2617_s7 + $0xe8] sm:$0xff] }
 0x3c8   : > { %v1840_v55 = vpop.eup %1839 }
 0x3c9   : > { %v1001_v56 = vsel %vm835_vm9, %v1840_v55, 0.0 }
 0x3ca   : > { %1002 = vadd.xlane.f32.xlu1 %v1001_v56  ;;  %v1822_v56 = vld [vmem:[%s2620_s10 + $0x2] ss:$0 sm:$0xff] }
 0x42d   : > { %v844_v5 = vpop.xlane.xlu0 %843 }
 0x42e   : > { %1841 = vrcp.f32 %v844_v5 }
 0x434   : > { %v1842_v6 = vpop.eup %1841 }
 0x435   : > { %v846_v7 = vmul.f32 %v1842_v6, %v1838_v50 }
 0x437   : > { %1687 = vmatmul.msk.f32.vlgmr.msrb.gmra.mxu3 %vm835_vm9, %v846_v7 }
 0x438   : > { %1150 = vmatpush.bf16.msrb.mxu3 %v1140_v34  ;;  %v1788_v34 = vld [vmem:[%s2618_s8 + $0xf8] sm:$0xff] }
 0x439   : > { %v1317_v35 = vpack.c.bf16 %v1788_v34, %v1787_v33  ;;  %v1468_v33 = vld [vmem:[%s2626_s16 + $0x48] sm:$0xff] }
 0x43c   : > { %1151 = vmatpush.bf16.msrb.mxu3 %v1139_v39  ;;  %v1786_v39 = vld [vmem:[%s2618_s8 + $0xe8] sm:$0xff] }
 0x43d   : > { %v1003_v9 = vpop.xlane.xlu1 %1002  ;;  %v1316_v40 = vpack.c.bf16 %v1786_v39, %v1785_v37  ;;  %v1463_v39 = vld [vmem:[%s2626_s16 + $0x20] sm:$0xff] }
 0x43e   : > { %1843 = vrcp.f32 %v1003_v9 }
 0x440   : > { %1152 = vmatpush.bf16.msrb.mxu3 %v1138_v42  ;;  %v1784_v42 = vld [vmem:[%s2618_s8 + $0xd8] sm:$0xff] }
 0x441   : > { %v1315_v43 = vpack.c.bf16 %v1784_v42, %v1783_v41  ;;  %v1464_v41 = vld [vmem:[%s2626_s16 + $0x28] sm:$0xff] }
 0x444   : > { %v1844_v12 = vpop.eup %1843  ;;  %1153 = vmatpush.bf16.msrb.mxu3 %v1137_v45  ;;  %v1782_v45 = vld [vmem:[%s2618_s8 + $0xc8] sm:$0xff] }
 0x445   : > { %v1005_v14 = vmul.f32 %v1844_v12, %v1840_v55  ;;  %v1285_v55 = vpack.c.bf16 %v1776_v54, %v1775_v32  ;;  %v1225_v12 = vpack.c.bf16 %v1759_v10, %v1758_v36 }
 0x447   : > { %1720 = vmatmul.msk.f32.vlgmr.msra.gmra.mxu2 %vm835_vm9, %v1005_v14 }
 0x448   : > { %1265 = vmatpush.bf16.msra.mxu2 %v1255_v13 }
 0x44c   : > { %1266 = vmatpush.bf16.msra.mxu2 %v1254_v17 }
 0x44f   : > { %1744 = vmatmul.msk.bf16.vlgmr.msrb.gmra.mxu2 %vm641_vm0, %v2144_v52 }
 0x450   : > { %1267 = vmatpush.bf16.msra.mxu2 %v1253_v20 }
 0x454   : > { %1268 = vmatpush.bf16.msra.mxu2 %v1252_v23 }
 0x45f   : > { %1770 = vmatmul.msk.bf16.vlgmr.msra.gmra.mxu2 %vm641_vm0, %v2144_v52 }
 0x4ba   : > { %v867_v46 = vpop.f32.mrf.mxu3 }
 0x4bb   : > { %v870_v47 = vpack.c.bf16 %v867_v46, %v867_v46  ;;  %v1314_v46 = vpack.c.bf16 %v1782_v45, %v1781_v44  ;;  %v1459_v45 = vld [vmem:[%s2626_s16] sm:$0xff] }
 0x4bd   : > { %1724 = vmatmul.msk.bf16.vlgmr.msra.gmra.mxu0 %vm803_vm8, %v870_v47 }
 0x4ca   : > { %v1026_v50 = vpop.f32.mrf.mxu2 }
 0x4cb   : > { %v1029_v53 = vpack.c.bf16 %v1026_v50, %v1026_v50 }
 0x4cd   : > { %1723 = vmatmul.msk.bf16.vlgmr.msra.gmra.mxu3 %vm803_vm8, %v1029_v53  ;;  %v1826_v53 = vld [vmem:[%s2621_s11 + $0x3] ss:$0 sm:$0xff] }
 0x4ce   : > { %1296 = vmatpush.bf16.msra.mxu3 %v1286_v51 }
 0x4d2   : > { %v1124_v60 = vpop.f32.mrf.mxu2  ;;  %1297 = vmatpush.bf16.msra.mxu3 %v1285_v55  ;;  %v1823_v55 = vld [vmem:[%s2619_s9 + $0x3] ss:$0 sm:$0xff] }
 0x4d3   : > { %v1125_v62 = vadd.f32 %v1822_v56, %v1124_v60 }
 0x4d5   : > { %1755 = vmatpush.xpose.msk.msrb.mxu0 %vm803_vm8, %v1125_v62 }
 0x4d6   : > { %1298 = vmatpush.bf16.msra.mxu3 %v1284_v61 }
 0x4d8   : > { %1756 = vmatmul.msk.f32.vlgmr.msrb.gmra.mxu0 %vm803_vm8, %v1094_v1 }
 0x4d9   : > { %1236 = vmatpush.bf16.msra.mxu0 %v1225_v12 }
 0x4da   : > { %v1126_v3 = vpop.f32.mrf.mxu2  ;;  %1299 = vmatpush.bf16.msra.mxu3 %v1283_v2 }
 0x4dd   : > { %1754 = vmatmul.msk.bf16.vlgmr.msrb.gmra.mxu3 %vm641_vm0, %v2144_v52 }
 0x4e2   : > { %v2365_v4 = vpop.f32.mrf.mxu2 }
 0x4e3   : > { %v1271_v57 = vadd.f32 %v1823_v55, %v2365_v4 }
 0x4ea   : > { %v1272_v5 = vpop.f32.mrf.mxu2 }
 0x4ed   : > { %1780 = vmatmul.msk.bf16.vlgmr.msra.gmra.mxu3 %vm641_vm0, %v2144_v52 }
 0x53a   : > { %v1062_v6 = vpop.f32.mrf.mxu0 }
 0x542   : > { %v1064_v7 = vpop.f32.mrf.mxu0 }
 0x550   : > { %v1046_v9 = vpop.f32.mrf.mxu3 }
 0x551   : > { %v1063_v11 = vadd.f32 %v1062_v6, %v1046_v9  ;;  %v1795_v9 = vld [vmem:[%s2622_s12 + $0x38] sm:$0xff] }
 0x555   : > { %v1182_v13 = vpop.f32.mrf.mxu0 }
 0x556   : > { %v1185_v14 = vmul.f32 0.25, %v1182_v13 }
 0x558   : > { %v1048_v15 = vpop.f32.mrf.mxu3  ;;  %v1186_v16 = vadd.f32 %v2230_v38, %v1185_v14  ;;  %v1827_v14 = vld [vmem:[%s2623_s13] ss:$0 sm:$0xff] }
 0x55a   : > { %v1187_v17 = vsel %vm835_vm9, %v1186_v16, -inf }
 0x55b   : > { %1188 = vmax.xlane.f32.xlu2 %v1187_v17 }
 0x560   : > { %v1155_v19 = vpop.f32.mrf.mxu3 }
 0x561   : > { %v1156_v20 = vadd.f32 %v1824_v18, %v1155_v19 }
 0x563   : > { %1216 = vmatpush.msra.mxu1 %v1156_v20 }
 0x565   : > { %1327 = vmatpush.bf16.msrb.mxu1 %v1317_v35  ;;  %v1470_v35 = vld [vmem:[%s2626_s16 + $0x58] sm:$0xff] }
 0x566   : > { %v1480_v37 = vpack.c.bf16 %v1470_v35, %v1468_v33  ;;  %v1543_v33 = vld [vmem:[%s2628_s18 + $0x28] sm:$0xff] }
 0x568   : > { %v1157_v21 = vpop.f32.mrf.mxu3 }
 0x569   : > { %1328 = vmatpush.bf16.msrb.mxu1 %v1316_v40  ;;  %v1465_v40 = vld [vmem:[%s2626_s16 + $0x30] sm:$0xff] }
 0x56a   : > { %v1477_v42 = vpack.c.bf16 %v1465_v40, %v1463_v39  ;;  %v1540_v39 = vld [vmem:[%s2628_s18 + $0x10] sm:$0xff]  ;;  %v1541_v40 = vld [vmem:[%s2628_s18 + $0x18] sm:$0xff] }
 0x56d   : > { %1329 = vmatpush.bf16.msrb.mxu1 %v1315_v43  ;;  %v1466_v43 = vld [vmem:[%s2626_s16 + $0x38] sm:$0xff] }
 0x56e   : > { %v1478_v44 = vpack.c.bf16 %v1466_v43, %v1464_v41  ;;  %v1557_v43 = vld [vmem:[%s2628_s18 + $0x98] sm:$0xff] }
 0x570   : > { %v1301_v23 = vpop.f32.mrf.mxu3 }
 0x571   : > { %v1302_v24 = vadd.f32 %v1825_v22, %v1301_v23  ;;  %1330 = vmatpush.bf16.msrb.mxu1 %v1314_v46  ;;  %v1461_v46 = vld [vmem:[%s2626_s16 + $0x10] sm:$0xff] }
 0x573   : > { %1791 = vmatpush.xpose.msk.msrb.mxu0 %vm803_vm8, %v1302_v24  ;;  %v1473_v24 = vld [vmem:[%s2626_s16 + $0x70] sm:$0xff] }
 0x578   : > { %v1303_v25 = vpop.f32.mrf.mxu3 }
 0x579   : > { %v1472_v25 = vld [vmem:[%s2626_s16 + $0x68] sm:$0xff] }
 0x5ce   : > { %v1189_v26 = vpop.xlane.xlu2 %1188 }
 0x5cf   : > { %v1190_v27 = vsub.f32 %v1186_v16, %v1189_v26 }
 0x5d1   : > { %v1191_v29 = vmul.f32 1.442695, %v1190_v27  ;;  %v1474_v27 = vld [vmem:[%s2626_s16 + $0x78] sm:$0xff] }
 0x5d3   : > { %1845 = vpow2.f32 %v1191_v29  ;;  %v1482_v29 = vpack.c.bf16 %v1474_v27, %v1472_v25  ;;  %v1545_v25 = vld [vmem:[%s2628_s18 + $0x38] sm:$0xff] }
 0x5d9   : > { %v1846_v30 = vpop.eup %1845 }
 0x5da   : > { %v1193_v31 = vsel %vm835_vm9, %v1846_v30, 0.0 }
 0x5db   : > { %1194 = vadd.xlane.f32.xlu0 %v1193_v31  ;;  %v1469_v31 = vld [vmem:[%s2626_s16 + $0x50] sm:$0xff] }
 0x64e   : > { %v1195_v47 = vpop.xlane.xlu0 %1194 }
 0x64f   : > { %1847 = vrcp.f32 %v1195_v47  ;;  %v1460_v47 = vld [vmem:[%s2626_s16 + $0x8] sm:$0xff] }
 0x655   : > { %v1848_v48 = vpop.eup %1847 }
 0x656   : > { %v1197_v49 = vmul.f32 %v1848_v48, %v1846_v30  ;;  %v1467_v30 = vld [vmem:[%s2626_s16 + $0x40] sm:$0xff]  ;;  %v1475_v48 = vpack.c.bf16 %v1461_v46, %v1459_v45 }
 0x657   : > { %v1479_v34 = vpack.c.bf16 %v1469_v31, %v1467_v30  ;;  %v1542_v31 = vld [vmem:[%s2628_s18 + $0x20] sm:$0xff] }
 0x658   : > { %1757 = vmatmul.msk.f32.vlgmr.msra.gmra.mxu1 %vm835_vm9, %v1197_v49  ;;  %v1462_v49 = vld [vmem:[%s2626_s16 + $0x18] sm:$0xff]  ;;  %v1572_v35 = vpack.c.bf16 %v1543_v33, %v1542_v31  ;;  %v1538_v46 = vld [vmem:[%s2628_s18] sm:$0xff] }
 0x660   : > { %1790 = vmatmul.msk.bf16.vlgmr.msrb.gmra.mxu1 %vm641_vm0, %v2144_v52 }
 0x6d5   : > { %v1218_v50 = vpop.f32.mrf.mxu1 }
 0x6d6   : > { %v1221_v51 = vpack.c.bf16 %v1218_v50, %v1218_v50  ;;  %v1476_v50 = vpack.c.bf16 %v1462_v49, %v1460_v47  ;;  %v1539_v47 = vld [vmem:[%s2628_s18 + $0x8] sm:$0xff] }
 0x6d7   : > { %v1555_v49 = vld [vmem:[%s2628_s18 + $0x88] sm:$0xff] }
 0x6d8   : > { %1760 = vmatmul.msk.bf16.vlgmr.msra.gmra.mxu0 %vm803_vm8, %v1221_v51  ;;  %v1552_v51 = vld [vmem:[%s2628_s18 + $0x70] sm:$0xff] }
 0x6d9   : > { %1509 = vmatpush.bf16.msra.mxu0 %v1482_v29  ;;  %v1561_v29 = vld [vmem:[%s2628_s18 + $0xb8] sm:$0xff] }
 0x6dd   : > { %v1332_v32 = vpop.f32.mrf.mxu1  ;;  %1510 = vmatpush.bf16.msra.mxu0 %v1480_v37  ;;  %v1559_v37 = vld [vmem:[%s2628_s18 + $0xa8] sm:$0xff] }
 0x6de   : > { %v1333_v54 = vadd.f32 %v1826_v53, %v1332_v32  ;;  %v1553_v53 = vld [vmem:[%s2628_s18 + $0x78] sm:$0xff]  ;;  %v1568_v32 = vld [vmem:[%s2628_s18 + $0xf0] sm:$0xff] }
 0x6df   : > { %v1577_v55 = vpack.c.bf16 %v1553_v53, %v1552_v51  ;;  %v1483_v53 = vld [vmem:[%s2627_s17] sm:$0x3] }
 0x6e0   : > { %1393 = vmatpush.msrb.mxu3 %v1333_v54 }
 0x6e1   : > { %1511 = vmatpush.bf16.msra.mxu0 %v1478_v44  ;;  %1586 = vmatpush.bf16.msrb.mxu2 %v1577_v55  ;;  %v1571_v44 = vpack.c.bf16 %v1541_v40, %v1540_v39 }
 0x6e5   : > { %v1334_v56 = vpop.f32.mrf.mxu1  ;;  %1512 = vmatpush.bf16.msra.mxu0 %v1476_v50  ;;  %v1570_v50 = vpack.c.bf16 %v1539_v47, %v1538_v46 }
 0x6e6   : > { %v1569_v56 = vld [vmem:[%s2628_s18 + $0xf8] sm:$0xff] }
 0x6e8   : > { %1792 = vmatmul.msk.f32.vlgmr.msrb.gmra.mxu0 %vm803_vm8, %v1271_v57 }
 0x755   : > { %v1238_v52 = vpop.f32.mrf.mxu0 }
 0x756   : > { %v1242_v58 = vadd.f32 %v1238_v52, %v1063_v11  ;;  %v1585_v52 = vpack.c.bf16 %v1569_v56, %v1568_v32  ;;  %v1485_v32 = vperm.slane %v1483_v53, 0 }
 0x75d   : > { %v1240_v59 = vpop.f32.mrf.mxu0 }
 0x765   : > { %v1359_v60 = vpop.f32.mrf.mxu0 }
 0x766   : > { %v1362_v61 = vmul.f32 0.25, %v1359_v60 }
 0x768   : > { %v1363_v62 = vadd.f32 %v2230_v38, %v1362_v61  ;;  %v1794_v38 = vld [vmem:[%s2622_s12 + $0x30] sm:$0xff] }
 0x769   : > { %v1402_v36 = vpack.c.bf16 %v1795_v9, %v1794_v38  ;;  %v1551_v38 = vld [vmem:[%s2628_s18 + $0x68] sm:$0xff]  ;;  %v1566_v9 = vld [vmem:[%s2628_s18 + $0xe0] sm:$0xff] }
 0x76a   : > { %v1364_v63 = vsel %vm835_vm9, %v1363_v62, -inf }
 0x76b   : > { %1365 = vmax.xlane.f32.xlu1 %v1364_v63  ;;  %1413 = vmatpush.bf16.msra.mxu3 %v1402_v36 }
 0x7de   : > { %v1366_v0 = vpop.xlane.xlu1 %1365 }
 0x7df   : > { %v1367_v1 = vsub.f32 %v1363_v62, %v1366_v0 }
 0x7e1   : > { %v1368_v2 = vmul.f32 1.442695, %v1367_v1  ;;  %v1828_v1 = vld [vmem:[%s2624_s14] ss:$0 sm:$0xff] }
 0x7e3   : > { %1849 = vpow2.f32 %v1368_v2 }
 0x7e9   : > { %v1850_v3 = vpop.eup %1849 }
 0x7ea   : > { %v1370_v5 = vsel %vm835_vm9, %v1850_v3, 0.0 }
 0x7eb   : > { %1371 = vadd.xlane.f32.xlu2 %v1370_v5 }
 0x85e   : > { %v1372_v4 = vpop.xlane.xlu2 %1371 }
 0x85f   : > { %1851 = vrcp.f32 %v1372_v4 }
 0x865   : > { %v1852_v6 = vpop.eup %1851 }
 0x866   : > { %v1374_v7 = vmul.f32 %v1852_v6, %v1850_v3  ;;  %v1829_v3 = vld [vmem:[%s2625_s15] ss:$0 sm:$0xff] }
 0x868   : > { %1793 = vmatmul.msk.f32.vlgmr.msrb.gmra.mxu3 %vm835_vm9, %v1374_v7  ;;  %v1550_v7 = vld [vmem:[%s2628_s18 + $0x60] sm:$0xff] }
 0x869   : > { %1599 = vmatpush.bf16.msrb.mxu3 %v1585_v52  ;;  %v1576_v36 = vpack.c.bf16 %v1551_v38, %v1550_v7 }
 0x86b   : > { %1587 = vmatpush.bf16.msrb.mxu2 %v1576_v36 }
 0x8eb   : > { %v1395_v10 = vpop.f32.mrf.mxu3 }
 0x8ec   : > { %v1398_v11 = vpack.c.bf16 %v1395_v10, %v1395_v10  ;;  %v1567_v10 = vld [vmem:[%s2628_s18 + $0xe8] sm:$0xff] }
 0x8ee   : > { %1796 = vmatmul.msk.bf16.vlgmr.msra.gmra.mxu3 %vm803_vm8, %v1398_v11  ;;  %v1584_v11 = vpack.c.bf16 %v1567_v10, %v1566_v9 }
 0x8f0   : > { %1600 = vmatpush.bf16.msrb.mxu3 %v1584_v11 }
 0x971   : > { %v1415_v12 = vpop.f32.mrf.mxu3 }
 0x972   : > { %v1419_v13 = vadd.f32 %v1415_v12, %v1242_v58  ;;  %v1548_v12 = vld [vmem:[%s2628_s18 + $0x50] sm:$0xff] }
 0x974   : > { %v1420_v15 = vadd.f32 %v1419_v13, %v1999_v28  ;;  %v1471_v28 = vld [vmem:[%s2626_s16 + $0x60] sm:$0xff]  ;;  %v1549_v13 = vld [vmem:[%s2628_s18 + $0x58] sm:$0xff] }
 0x975   : > { %v1481_v26 = vpack.c.bf16 %v1473_v24, %v1471_v28  ;;  %v1544_v24 = vld [vmem:[%s2628_s18 + $0x30] sm:$0xff] }
 0x976   : > { %v2436_v16 = vadd.f32 %v1827_v14, %v1420_v15  ;;  %v1564_v14 = vld [vmem:[%s2628_s18 + $0xd0] sm:$0xff]  ;;  %v1575_v15 = vpack.c.bf16 %v1549_v13, %v1548_v12  ;;  %v1573_v27 = vpack.c.bf16 %v1545_v25, %v1544_v24 }
 0x977   : > { %1496 = vmatpush.bf16.msra.mxu1 %v1481_v26  ;;  %v1560_v26 = vld [vmem:[%s2628_s18 + $0xb0] sm:$0xff] }
 0x978   : > { %v1428_v17 = vsel %vm641_vm0, %v2436_v16, 0.0  ;;  %1588 = vmatpush.bf16.msrb.mxu2 %v1575_v15  ;;  %v1581_v30 = vpack.c.bf16 %v1561_v29, %v1560_v26 }
 0x979   : > { %1429 = vadd.xlane.f32.xlu0 %v1428_v17  ;;  %v1417_v18 = vpop.f32.mrf.mxu3  ;;  %v1565_v17 = vld [vmem:[%s2628_s18 + $0xd8] sm:$0xff] }
 0x97a   : > { %v1583_v18 = vpack.c.bf16 %v1565_v17, %v1564_v14 }
 0x97b   : > { %1497 = vmatpush.bf16.msra.mxu1 %v1479_v34  ;;  %v1558_v34 = vld [vmem:[%s2628_s18 + $0xa0] sm:$0xff] }
 0x97c   : > { %1601 = vmatpush.bf16.msrb.mxu3 %v1583_v18  ;;  %v1580_v41 = vpack.c.bf16 %v1559_v37, %v1558_v34  ;;  %v1830_v18 = vld [vmem:[%s2629_s19] ss:$0 sm:$0xff] }
 0x97f   : > { %1498 = vmatpush.bf16.msra.mxu1 %v1477_v42  ;;  %v1556_v42 = vld [vmem:[%s2628_s18 + $0x90] sm:$0xff] }
 0x980   : > { %v1579_v45 = vpack.c.bf16 %v1557_v43, %v1556_v42 }
 0x983   : > { %1499 = vmatpush.bf16.msra.mxu1 %v1475_v48  ;;  %v1554_v48 = vld [vmem:[%s2628_s18 + $0x80] sm:$0xff] }
 0x984   : > { %v1578_v51 = vpack.c.bf16 %v1555_v49, %v1554_v48 }
 0x9ec   : > { %v1430_v19 = vpop.xlane.xlu0 %1429 }
 0x9ed   : > { %v1431_v20 = vmul.f32 %v1430_v19, %v1988_v8  ;;  %v1546_v19 = vld [vmem:[%s2628_s18 + $0x40] sm:$0xff] }
 0x9ef   : > { %v1432_v21 = vsub.f32 %v2436_v16, %v1431_v20  ;;  %v1547_v20 = vld [vmem:[%s2628_s18 + $0x48] sm:$0xff] }
 0x9f1   : > { %v1433_v22 = vmul.f32 %v1432_v21, %v1432_v21 }
 0x9f3   : > { %v1434_v23 = vsel %vm641_vm0, %v1433_v22, 0.0  ;;  %v1574_v22 = vpack.c.bf16 %v1547_v20, %v1546_v19 }
 0x9f4   : > { %1435 = vadd.xlane.f32.xlu1 %v1434_v23  ;;  %v1563_v23 = vld [vmem:[%s2628_s18 + $0xc8] sm:$0xff] }
 0x9f5   : > { %1589 = vmatpush.bf16.msrb.mxu2 %v1574_v22 }
 0x9f9   : > { %1590 = vmatpush.bf16.msrb.mxu2 %v1573_v27 }
 0x9fd   : > { %1591 = vmatpush.bf16.msrb.mxu2 %v1572_v35 }
 0xa01   : > { %1592 = vmatpush.bf16.msrb.mxu2 %v1571_v44 }
 0xa05   : > { %1593 = vmatpush.bf16.msrb.mxu2 %v1570_v50 }
 0xa67   : > { %v1436_v54 = vpop.xlane.xlu1 %1435 }
 0xa68   : > { %v1437_v57 = vmul.f32 %v1436_v54, %v1988_v8  ;;  %v1486_v54 = vperm.slane %v1483_v53, 1 }
 0xa6a   : > { %v1438_v58 = vadd.f32 1e-12, %v1437_v57 }
 0xa6c   : > { %1853 = vrsqrt.f32 %v1438_v58  ;;  %vm1445_vm11 = vweird.f32 %v1438_v58 }
 0xa72   : > { %v1854_v59 = vpop.eup %1853 }
 0xa73   : > { %v1440_v60 = vmul.f32 %v1854_v59, %v1438_v58  ;;  %vm1446_vm10 = vweird.f32 %v1854_v59 }
 0xa74   : > { %vm1447_vm12 = vmor %vm1445_vm11, %vm1446_vm10 }
 0xa75   : > { %v1441_v61 = vmul.f32 %v1854_v59, %v1440_v60 }
 0xa77   : > { %v1442_v62 = vmul.f32 0.5, %v1441_v61 }
 0xa79   : > { %v1443_v63 = vsub.f32 1.5, %v1442_v62 }
 0xa7b   : > { %v1444_v0 = vmul.f32 %v1854_v59, %v1443_v63 }
 0xa7d   : > { %v1448_v2 = vsel %vm1447_vm12, %v1854_v59, %v1444_v0 }
 0xa7e   : > { %v1449_v8 = vmul.f32 %v1448_v2, %v1432_v21  ;;  %v1562_v21 = vld [vmem:[%s2628_s18 + $0xc0] sm:$0xff] }
 0xa7f   : > { %v1582_v28 = vpack.c.bf16 %v1563_v23, %v1562_v21 }
 0xa80   : > { %v1453_v5 = vmul.f32 %v1828_v1, %v1449_v8 }
 0xa81   : > { %1602 = vmatpush.bf16.msrb.mxu3 %v1582_v28 }
 0xa82   : > { %v1457_v4 = vadd.f32 %v1829_v3, %v1453_v5 }
 0xa84   : > { %v1458_v6 = vpack.c.bf16 %v1457_v4, %v1457_v4 }
 0xa85   : > { %1603 = vmatpush.bf16.msrb.mxu3 %v1581_v30 }
 0xa86   : > { %1797 = vmatmul.msk.bf16.vlgmr.msra.gmra.mxu1 %vm641_vm0, %v1458_v6  ;;  %1798 = vmatmul.msk.bf16.vlgmr.msra.gmra.mxu0 %vm641_vm0, %v1458_v6 }
 0xa89   : > { %1604 = vmatpush.bf16.msrb.mxu3 %v1580_v41 }
 0xa8d   : > { %1605 = vmatpush.bf16.msrb.mxu3 %v1579_v45 }
 0xa91   : > { %1606 = vmatpush.bf16.msrb.mxu3 %v1578_v51 }
 0xb03   : > { %v1501_v55 = vpop.f32.mrf.mxu1  ;;  %v1514_v56 = vpop.f32.mrf.mxu0 }
 0xb04   : > { %v1502_v57 = vadd.f32 %v1501_v55, %v1485_v32  ;;  %v1515_v52 = vadd.f32 %v1514_v56, %v1486_v54 }
 0xb06   : > { %v1518_v58 = vmul.f32 %v1502_v57, %v1502_v57  ;;  %v1519_v59 = vmul.f32 %v1515_v52, %v1515_v52 }
 0xb08   : > { %v1520_v60 = vmul.f32 %v1518_v58, %v1502_v57  ;;  %v1521_v61 = vmul.f32 %v1519_v59, %v1515_v52 }
 0xb0a   : > { %v1522_v62 = vmul.f32 0.044715, %v1520_v60  ;;  %v1523_v63 = vmul.f32 0.044715, %v1521_v61 }
 0xb0b   : > { %v1503_v0 = vpop.f32.mrf.mxu1  ;;  %v1516_v1 = vpop.f32.mrf.mxu0 }
 0xb0c   : > { %v1524_v2 = vadd.f32 %v1522_v62, %v1502_v57  ;;  %v1525_v8 = vadd.f32 %v1523_v63, %v1515_v52 }
 0xb0e   : > { %v1526_v3 = vmul.f32 0.7978846, %v1524_v2  ;;  %v1527_v5 = vmul.f32 0.7978846, %v1525_v8 }
 0xb10   : > { %1855 = vtanh.f32 %v1526_v3 }
 0xb11   : > { %1857 = vtanh.f32 %v1527_v5 }
 0xb16   : > { %v1856_v4 = vpop.eup %1855 }
 0xb17   : > { %v1858_v6 = vpop.eup %1857  ;;  %v1530_v7 = vadd.f32 1.0, %v1856_v4 }
 0xb18   : > { %v1531_v38 = vadd.f32 1.0, %v1858_v6 }
 0xb19   : > { %v1532_v9 = vmul.f32 0.5, %v1530_v7 }
 0xb1a   : > { %v1533_v36 = vmul.f32 0.5, %v1531_v38 }
 0xb1b   : > { %v1534_v10 = vmul.f32 %v1532_v9, %v1502_v57 }
 0xb1c   : > { %v1535_v11 = vmul.f32 %v1533_v36, %v1515_v52 }
 0xb1d   : > { %v1536_v12 = vpack.c.bf16 %v1534_v10, %v1534_v10 }
 0xb1e   : > { %v1537_v13 = vpack.c.bf16 %v1535_v11, %v1535_v11 }
 0xb1f   : > { %1594 = vmatmul.bf16.vlgmr.msrb.gmra.mxu2 %v1536_v12 }
 0xb20   : > { %1607 = vmatmul.bf16.vlgmr.msrb.gmra.mxu3 %v1537_v13 }
 0xba2   : > { %v1595_v14 = vpop.f32.mrf.mxu2 }
 0xba3   : > { %v1608_v15 = vpop.f32.mrf.mxu3 }
 0xba4   : > { %v1609_v17 = vadd.f32 %v1608_v15, %v1595_v14 }
 0xba6   : > { %v1612_v19 = vadd.f32 %v1609_v17, %v2436_v16 }
 0xba8   : > { %v1617_v20 = vadd.f32 %v1830_v18, %v1612_v19 }
 0xbaa   : > { %1619 = vst.msk [vmem:[%s636_s29] sm:$0x1] %vm1618_vm13, %v1617_v20  ;;  %v1597_v21 = vpop.f32.mrf.mxu2 }
 0xbab   : > { %v1610_v22 = vpop.f32.mrf.mxu3 }
 0xbac PF: > { %s30_s1 = sadd.s32 1, %s1865_s1  }
 0xbad   : > { %p27_p4 = scmp.ge.s32.totalorder %s30_s1, 10  }
 0xbaf   :  { %29 = sbr.rel (!%p27_p4) target bundleno = 6 (0x6), region = 154 }

// kernel: albef_forward.15
= control target key start
LH: loop header
LB: loop body
LE: loop exit
PB: predicated region body
PF: predicated region fallthrough
CT: control target
= control target key end

     0   :  { %vm15_vm0 = vcmask 261120   ;;  %vm68_vm1 = vcmask 23552   ;;  %s112_s1 = inlined_call_operand.vmem [shape: f32[2,3,32], index: 1, kind: input, shape index: {}]   ;;  %s113_s0 = inlined_call_operand.vmem [shape: f32[2,8,32], index: 0, kind: input, shape index: {}]   ;;  %s114_s2 = inlined_call_operand.vmem [shape: f32[2,8,3], index: 2, kind: output, shape index: {}]  }
   0x1   :  { %v13_v0 = vld [vmem:[%s112_s1] sm:$0x7]  ;;  %v14_v1 = vld [vmem:[%s112_s1 + $0x4] sm:$0x7]  ;;  %v12_v3 = vld [vmem:[%s113_s0 + $0x8] sm:$0xff] }
   0x2   :  { %75 = vmatpush.xpose.msk.msra.mxu0 %vm15_vm0, %v13_v0  ;;  %77 = vmatpush.xpose.msk.msra.mxu1 %vm15_vm0, %v14_v1  ;;  %v11_v2 = vld [vmem:[%s113_s0] sm:$0xff] }
   0x5   :  { %76 = vmatmul.msk.f32.vlgmr.msra.gmra.mxu0 %vm15_vm0, %v11_v2  ;;  %78 = vmatmul.msk.f32.vlgmr.msra.gmra.mxu1 %vm15_vm0, %v12_v3 }
  0x82   :  { %v39_v4 = vpop.f32.mrf.mxu0  ;;  %v65_v5 = vpop.f32.mrf.mxu1 }
  0x83   :  { %69 = vst.msk [vmem:[%s114_s2] sm:$0xff] %vm68_vm1, %v39_v4 }
  0x84   :  { %70 = vst.msk [vmem:[%s114_s2 + $0x8] sm:$0xff] %vm68_vm1, %v65_v5 }

// kernel: albef_forward.21
= control target key start
LH: loop header
LB: loop body
LE: loop exit
PB: predicated region body
PF: predicated region fallthrough
CT: control target
= control target key end

     0   :  { %20 = vsyncpa [#allocation4], 0  ;;  %s892_s0 = inlined_call_operand.vmem [shape: f32[2,32], index: 0, kind: input, shape index: {}]   ;;  %s893_s1 = inlined_call_operand.vmem [shape: f32[2,32], index: 1, kind: input, shape index: {}]   ;;  %s894_s2 = inlined_call_operand.vmem [shape: f32[2,32], index: 2, kind: input, shape index: {}]   ;;  %s895_s3 = inlined_call_operand.vmem [shape: f32[2,32], index: 3, kind: input, shape index: {}]   ;;  %s896_s4 = inlined_call_operand.vmem [shape: f32[32,18], index: 4, kind: input, shape index: {}]   ;;  %s897_s5 = inlined_call_operand.vmem [shape: f32[32,18], index: 5, kind: input, shape index: {}]   ;;  %s898_s6 = inlined_call_operand.vmem [shape: f32[2,18], index: 6, kind: input, shape index: {}]   ;;  %s899_s7 = inlined_call_operand.vmem [shape: f32[6,32], index: 7, kind: input, shape index: {}]   ;;  %s900_s8 = inlined_call_operand.vmem [shape: f32[6,32], index: 8, kind: input, shape index: {}]   ;;  %s901_s9 = inlined_call_operand.vmem [shape: f32[6,32], index: 9, kind: input, shape index: {}]   ;;  %s902_s10 = inlined_call_operand.vmem [shape: f32[6,32], index: 10, kind: input, shape index: {}]   ;;  %s903_s11 = inlined_call_operand.vmem [shape: f32[1,6], index: 11, kind: input, shape index: {}]   ;;  %s904_s12 = inlined_call_operand.vmem [shape: f32[1,2], index: 12, kind: input, shape index: {}]   ;;  %s905_s13 = inlined_call_operand.hbm [shape: f32[1,1], index: 13, kind: output, shape index: {0}]   ;;  %s906_s14 = inlined_call_operand.hbm [shape: f32[1,1], index: 14, kind: output, shape index: {1}]  }
   0x1   :  { %21 = vsyncpa [#allocation3], 0 }
   0x2   :  { %22 = vsyncpa [#allocation7], 0  ;;  %s52_s15 = sshll.u32 %s904_s12, 4  ;;  %s672_s16 = smov [#allocation2]   ;;  %s53_s15 = int_to_ptr.vmem [resolvable:$true] %s52_s15 }
   0x3   :  { %55 = dma.vmem_to_smem %s53_s15, 16, %s672_s16, [#allocation4]  }
   0x4   :  { %666 = dma.done.wait [#allocation4], 16  }
   0x5   :  { %667 = vsyncadd [#allocation4], 4294967280 }
   0x6   :  { %60 = sfence }
   0x7   :  { %v70_v0 = vld [vmem:[%s897_s5 + $0x18] sm:$0xff]  ;;  %v69_v1 = vld [vmem:[%s897_s5 + $0x10] sm:$0xff]  ;;  %v68_v2 = vld [vmem:[%s897_s5 + $0x8] sm:$0xff]  ;;  %vm73_vm0 = vcmask 261120   ;;  %vm383_vm1 = vcmask 46080   ;;  %vm174_vm2 = vcmask 140288  }
   0x8   :  { %89 = vmatpush.msra.mxu0 %v70_v0  ;;  %140 = vmatpush.msra.mxu2 %v70_v0  ;;  %v66_v3 = vld [vmem:[%s896_s4 + $0x18] sm:$0xff]  ;;  %v65_v4 = vld [vmem:[%s896_s4 + $0x10] sm:$0xff]  ;;  %v67_v5 = vld [vmem:[%s897_s5] sm:$0xff]  ;;  %vm433_vm4 = vcmask 1045504   ;;  %vm272_vm5 = vcmask 40960   ;;  %vm429_vm6 = vcmask 48128  }
   0x9   :  { %115 = vmatpush.msra.mxu1 %v66_v3  ;;  %165 = vmatpush.msra.mxu3 %v66_v3  ;;  %v72_v6 = vld [vmem:[%s892_s0] sm:$0x3]  ;;  %v64_v9 = vld [vmem:[%s896_s4 + $0x8] sm:$0xff]  ;;  %s535_s30 = sshll.u32 %s906_s14, 4  ;;  %vm260_vm11 = vcmask 0   ;;  %vm222_vm12 = vcmask 1041408   ;;  %s536_s30 = int_to_ptr.hbm [resolvable:$true] %s535_s30 }
   0xa   :  { %90 = vmatpush.msra.mxu0 %v69_v1  ;;  %141 = vmatpush.msra.mxu2 %v69_v1  ;;  %v124_v7 = vld [vmem:[%s894_s2] sm:$0x3]  ;;  %s675_s14 = smov [#allocation5]   ;;  %s524_s5 = sshll.u32 %s905_s13, 4  ;;  %s525_s5 = int_to_ptr.hbm [resolvable:$true] %s524_s5 }
   0xb   :  { %v279_v8 = vld [vmem:[%s902_s10] sm:$0x3f]  ;;  %116 = vmatpush.msra.mxu1 %v65_v4  ;;  %166 = vmatpush.msra.mxu3 %v65_v4  ;;  %v265_v4 = vlaneseq  ;;  %s522_s15 = sshll.u32 %s675_s14, 4  ;;  %s523_s15 = int_to_ptr.vmem [resolvable:$true] %s522_s15 }
   0xc   :  { %91 = vmatpush.msra.mxu0 %v68_v2  ;;  %142 = vmatpush.msra.mxu2 %v68_v2  ;;  %v63_v10 = vld [vmem:[%s896_s4] sm:$0xff] }
   0xd   :  { %117 = vmatpush.msra.mxu1 %v64_v9  ;;  %v99_v11 = vld [vmem:[%s893_s1] sm:$0x3]  ;;  %167 = vmatpush.msra.mxu3 %v64_v9 }
   0xe   :  { %92 = vmatpush.msra.mxu0 %v67_v5  ;;  %143 = vmatpush.msra.mxu2 %v67_v5  ;;  %v149_v12 = vld [vmem:[%s895_s3] sm:$0x3]  ;;  %v266_v5 = vshrl.u32 %v265_v4, 7 }
   0xf   :  { %551 = vmatmul.msk.f32.vlgmr.msra.gmra.mxu0 %vm73_vm0, %v72_v6  ;;  %553 = vmatmul.msk.f32.vlgmr.msra.gmra.mxu2 %vm73_vm0, %v124_v7  ;;  %v278_v13 = vld [vmem:[%s901_s9] sm:$0x3f]  ;;  %s61_s9 = sld [smem:[#allocation2]]  ;;  %v268_v6 = vand.u32 127, %v265_v4 }
  0x10   :  { %560 = vmatpush.xpose.msk.msrb.mxu2 %vm73_vm0, %v279_v8  ;;  %556 = vmatpush.xpose.msk.msrb.mxu0 %vm73_vm0, %v279_v8  ;;  %v276_v14 = vld [vmem:[%s899_s7] sm:$0x3f]  ;;  %s550_s7 = sld [smem:[#allocation2 + $0x1]] }
  0x11   :  { %118 = vmatpush.msra.mxu1 %v63_v10  ;;  %168 = vmatpush.msra.mxu3 %v63_v10  ;;  %v277_v15 = vld [vmem:[%s900_s8] sm:$0x3f]  ;;  %vm269_vm3 = vcmp.eq.s32.totalorder %v266_v5, %v268_v6 }
  0x12   :  { %552 = vmatmul.msk.f32.vlgmr.msra.gmra.mxu1 %vm73_vm0, %v99_v11  ;;  %554 = vmatmul.msk.f32.vlgmr.msra.gmra.mxu3 %vm73_vm0, %v149_v12  ;;  %v817_v16 = vld [vmem:[%s903_s11] sm:$0x1]  ;;  %v673_v12 = vmov 0.0  }
  0x13   :  { %558 = vmatpush.xpose.msk.msrb.mxu1 %vm73_vm0, %v278_v13  ;;  %562 = vmatpush.xpose.msk.msrb.mxu3 %vm73_vm0, %v278_v13  ;;  %v263_v18 = vsub.f32 1.0, %v817_v16 }
  0x15   :  { %v97_v17 = vstv %s61_s9  ;;  %v264_v21 = vmul.f32 -1e+09, %v263_v18 }
  0x16   :  { %s188_s8 = ssub.f32 1.0, %s550_s7 }
  0x17   :  { %557 = vmatmul.msk.f32.vlgmr.msrb.gmra.mxu0 %vm73_vm0, %v276_v14  ;;  %561 = vmatmul.msk.f32.vlgmr.msrb.gmra.mxu2 %vm73_vm0, %v278_v13  ;;  %v308_v26 = vperm.slane %v264_v21, 0  ;;  %v555_v13 = vsel %vm269_vm3, 1.0, %v673_v12 }
  0x18   :  { %v848_v11 = vstv %s188_s8 }
  0x19   :  { %v396_v21 = vmul.f32 %v555_v13, %v848_v11 }
  0x1a   :  { %559 = vmatmul.msk.f32.vlgmr.msrb.gmra.mxu1 %vm73_vm0, %v277_v15  ;;  %563 = vmatmul.msk.f32.vlgmr.msrb.gmra.mxu3 %vm73_vm0, %v279_v8  ;;  %v850_v15 = vstv %s550_s7 }
  0x8c   :  { %v94_v19 = vpop.f32.mrf.mxu0 }
  0x8d   :  { %v820_v20 = vmul.f32 %v97_v17, %v94_v19 }
  0x8f   :  { %v120_v22 = vpop.f32.mrf.mxu1 }
  0x90   :  { %v822_v23 = vmul.f32 %v120_v22, %v97_v17 }
  0x92   :  { %v145_v24 = vpop.f32.mrf.mxu2  ;;  %v232_v2 = vsel %vm174_vm2, %v822_v23, -inf }
  0x93   :  { %v824_v25 = vmul.f32 %v145_v24, %v97_v17 }
  0x94   :  { %v303_v27 = vpop.f32.mrf.mxu0 }
  0x95   :  { %v306_v28 = vmul.f32 %v303_v27, %v97_v17  ;;  %v170_v30 = vpop.f32.mrf.mxu3  ;;  %v175_v1 = vsel %vm174_vm2, %v824_v25, -inf }
  0x96   :  { %v828_v31 = vmul.f32 %v170_v30, %v97_v17 }
  0x97   :  { %v826_v29 = vadd.f32 %v308_v26, %v306_v28  ;;  %v334_v32 = vpop.f32.mrf.mxu1 }
  0x98   :  { %v337_v34 = vmul.f32 %v334_v32, %v97_v17 }
  0x99   :  { %v411_v33 = vsel %vm383_vm1, %v826_v29, -inf }
  0x9a   :  { %v356_v35 = vpop.f32.mrf.mxu2  ;;  %412 = vmax.xlane.f32.xlu1 %v411_v33  ;;  %v832_v37 = vadd.f32 %v337_v34, %v308_v26 }
  0x9b   :  { %v359_v36 = vmul.f32 %v356_v35, %v97_v17 }
  0x9c   :  { %v472_v41 = vsel %vm383_vm1, %v832_v37, -inf }
  0x9d   :  { %v360_v38 = vadd.f32 %v359_v36, %v308_v26  ;;  %v378_v40 = vpop.f32.mrf.mxu3 }
  0x9e   :  { %v381_v42 = vmul.f32 %v378_v40, %v97_v17 }
  0x9f   :  { %v384_v39 = vsel %vm383_vm1, %v360_v38, -inf }
  0xa0   :  { %385 = vmax.xlane.f32.xlu0 %v384_v39  ;;  %v382_v43 = vadd.f32 %v381_v42, %v308_v26 }
  0xa2   :  { %473 = vmax.xlane.f32.xlu1 %v472_v41  ;;  %v398_v44 = vsel %vm383_vm1, %v382_v43, -inf }
  0xa8   :  { %399 = vmax.xlane.f32.xlu0 %v398_v44 }
 0x10d   :  { %v413_v45 = vpop.xlane.xlu1 %412 }
 0x10e   :  { %v414_v46 = vsub.f32 %v826_v29, %v413_v45 }
 0x110   :  { %v415_v47 = vmul.f32 1.442695, %v414_v46 }
 0x112   :  { %572 = vpow2.f32 %v415_v47 }
 0x113   :  { %v386_v48 = vpop.xlane.xlu0 %385 }
 0x114   :  { %v387_v49 = vsub.f32 %v360_v38, %v386_v48 }
 0x115   :  { %v474_v50 = vpop.xlane.xlu1 %473 }
 0x116   :  { %v388_v51 = vmul.f32 1.442695, %v387_v49  ;;  %v475_v52 = vsub.f32 %v832_v37, %v474_v50  ;;  %v205_v49 = vsel %vm174_vm2, %v820_v20, -inf }
 0x118   :  { %v573_v53 = vpop.eup %572  ;;  %574 = vpow2.f32 %v388_v51  ;;  %v476_v54 = vmul.f32 1.442695, %v475_v52 }
 0x119   :  { %v417_v55 = vsel %vm383_vm1, %v573_v53, 0.0 }
 0x11a   :  { %576 = vpow2.f32 %v476_v54  ;;  %418 = vadd.xlane.f32.xlu0 %v417_v55 }
 0x11b   :  { %v400_v56 = vpop.xlane.xlu0 %399 }
 0x11c   :  { %v401_v57 = vsub.f32 %v382_v43, %v400_v56 }
 0x11e   :  { %v575_v58 = vpop.eup %574  ;;  %v402_v59 = vmul.f32 1.442695, %v401_v57 }
 0x11f   :  { %v390_v60 = vsel %vm383_vm1, %v575_v58, 0.0 }
 0x120   :  { %v577_v61 = vpop.eup %576  ;;  %578 = vpow2.f32 %v402_v59  ;;  %391 = vadd.xlane.f32.xlu2 %v390_v60 }
 0x121   :  { %v478_v62 = vsel %vm383_vm1, %v577_v61, 0.0 }
 0x122   :  { %479 = vadd.xlane.f32.xlu1 %v478_v62 }
 0x126   :  { %v579_v63 = vpop.eup %578 }
 0x127   :  { %v404_v0 = vsel %vm383_vm1, %v579_v63, 0.0 }
 0x128   :  { %405 = vadd.xlane.f32.xlu2 %v404_v0 }
 0x12a   :  { %176 = vmax.xlane.f32.xlu1 %v175_v1  ;;  %v273_v1 = vsel %vm272_vm5, %v817_v16, 0.0 }
 0x132   :  { %233 = vmax.xlane.f32.xlu1 %v232_v2 }
 0x18d   :  { %v419_v3 = vpop.xlane.xlu0 %418 }
 0x18e   :  { %580 = vlog2.f32 %v419_v3 }
 0x193   :  { %v392_v7 = vpop.xlane.xlu2 %391 }
 0x194   :  { %v581_v8 = vpop.eup %580  ;;  %582 = vrcp.f32 %v392_v7  ;;  %v71_v7 = vld [vmem:[%s898_s6] sm:$0x3]  ;;  %s674_s6 = smov [#allocation6]  }
 0x195   :  { %v480_v9 = vpop.xlane.xlu1 %479  ;;  %v421_v10 = vmul.f32 0.6931472, %v581_v8  ;;  %v190_v13 = vmul.f32 %v848_v11, %v71_v7  ;;  %s533_s27 = sshll.u32 %s674_s6, 4  ;;  %s534_s27 = int_to_ptr.vmem [resolvable:$true] %s533_s27 }
 0x196   :  { %584 = vlog2.f32 %v480_v9 }
 0x197   :  { %v422_v17 = vadd.f32 %v421_v10, %v413_v45 }
 0x199   :  { %v423_v30 = vsub.f32 %v826_v29, %v422_v17 }
 0x19a   :  { %v583_v14 = vpop.eup %582 }
 0x19b   :  { %v394_v18 = vmul.f32 %v583_v14, %v575_v58  ;;  %v406_v19 = vpop.xlane.xlu2 %405 }
 0x19c   :  { %v585_v22 = vpop.eup %584  ;;  %586 = vrcp.f32 %v406_v19 }
 0x19d   :  { %v177_v24 = vpop.xlane.xlu1 %176  ;;  %v395_v26 = vmul.f32 %v394_v18, %v850_v15  ;;  %v482_v27 = vmul.f32 0.6931472, %v585_v22 }
 0x19e   :  { %v178_v34 = vsub.f32 %v824_v25, %v177_v24  ;;  %v192_v25 = vsel %vm174_vm2, %v828_v31, -inf }
 0x19f   :  { %v397_v28 = vadd.f32 %v396_v21, %v395_v26  ;;  %v483_v35 = vadd.f32 %v482_v27, %v474_v50 }
 0x1a0   :  { %v179_v40 = vmul.f32 1.442695, %v178_v34 }
 0x1a1   :  { %v424_v32 = vmul.f32 %v423_v30, %v397_v28  ;;  %v484_v43 = vsub.f32 %v832_v37, %v483_v35 }
 0x1a2   :  { %v587_v33 = vpop.eup %586  ;;  %588 = vpow2.f32 %v179_v40 }
 0x1a3   :  { %v408_v36 = vmul.f32 %v587_v33, %v579_v63  ;;  %v425_v38 = vsel %vm383_vm1, %v424_v32, 0.0 }
 0x1a4   :  { %426 = vadd.xlane.f32.xlu2 %v425_v38 }
 0x1a5   :  { %v409_v39 = vmul.f32 %v408_v36, %v850_v15  ;;  %v234_v41 = vpop.xlane.xlu1 %233 }
 0x1a6   :  { %v235_v29 = vsub.f32 %v822_v23, %v234_v41 }
 0x1a7   :  { %v410_v42 = vadd.f32 %v409_v39, %v396_v21 }
 0x1a8   :  { %v236_v46 = vmul.f32 1.442695, %v235_v29  ;;  %v589_v47 = vpop.eup %588 }
 0x1a9   :  { %v485_v44 = vmul.f32 %v484_v43, %v410_v42  ;;  %v181_v48 = vsel %vm174_vm2, %v589_v47, 0.0 }
 0x1aa   :  { %590 = vpow2.f32 %v236_v46 }
 0x1ab   :  { %v486_v45 = vsel %vm383_vm1, %v485_v44, 0.0 }
 0x1ac   :  { %487 = vadd.xlane.f32.xlu0 %v486_v45  ;;  %193 = vmax.xlane.f32.xlu2 %v192_v25 }
 0x1b0   :  { %v591_v37 = vpop.eup %590 }
 0x1b1   :  { %v238_v50 = vsel %vm174_vm2, %v591_v37, 0.0 }
 0x1b4   :  { %182 = vadd.xlane.f32.xlu2 %v181_v48  ;;  %206 = vmax.xlane.f32.xlu0 %v205_v49 }
 0x1bc   :  { %239 = vadd.xlane.f32.xlu2 %v238_v50 }
 0x217   :  { %v427_v51 = vpop.xlane.xlu2 %426 }
 0x218   :  { %v428_v52 = vsub.f32 0.0, %v427_v51 }
 0x21a   :  { %564 = vmatpush.msk.msra.mxu0 %vm433_vm4, %v428_v52 }
 0x21b   :  { %565 = vmatmul.msk.f32.vlgmr.msra.gmra.mxu0 %vm429_vm6, %v817_v16 }
 0x21f   :  { %v488_v53 = vpop.xlane.xlu0 %487  ;;  %v194_v54 = vpop.xlane.xlu2 %193 }
 0x220   :  { %v489_v55 = vsub.f32 0.0, %v488_v53  ;;  %v195_v56 = vsub.f32 %v828_v31, %v194_v54 }
 0x222   :  { %v196_v57 = vmul.f32 1.442695, %v195_v56  ;;  %566 = vmatpush.msk.msra.mxu1 %vm433_vm4, %v489_v55 }
 0x223   :  { %567 = vmatmul.msk.f32.vlgmr.msra.gmra.mxu1 %vm429_vm6, %v817_v16 }
 0x224   :  { %592 = vpow2.f32 %v196_v57 }
 0x227   :  { %v207_v58 = vpop.xlane.xlu0 %206  ;;  %v183_v31 = vpop.xlane.xlu2 %182 }
 0x228   :  { %v208_v59 = vsub.f32 %v820_v20, %v207_v58 }
 0x22a   :  { %v593_v60 = vpop.eup %592  ;;  %v209_v61 = vmul.f32 1.442695, %v208_v59 }
 0x22b   :  { %v198_v62 = vsel %vm174_vm2, %v593_v60, 0.0 }
 0x22c   :  { %594 = vpow2.f32 %v209_v61  ;;  %199 = vadd.xlane.f32.xlu0 %v198_v62 }
 0x22f   :  { %v240_v2 = vpop.xlane.xlu2 %239 }
 0x230   :  { %596 = vlog2.f32 %v240_v2 }
 0x232   :  { %v595_v63 = vpop.eup %594 }
 0x233   :  { %v211_v0 = vsel %vm174_vm2, %v595_v63, 0.0 }
 0x234   :  { %212 = vadd.xlane.f32.xlu1 %v211_v0  ;;  %274 = vadd.xlane.f32.xlu0 %v273_v1 }
 0x236   :  { %v597_v4 = vpop.eup %596 }
 0x237   :  { %v242_v5 = vmul.f32 0.6931472, %v597_v4 }
 0x239   :  { %v243_v8 = vadd.f32 %v242_v5, %v234_v41 }
 0x23b   :  { %v244_v18 = vsub.f32 %v822_v23, %v243_v8 }
 0x29f   :  { %v200_v3 = vpop.xlane.xlu0 %199 }
 0x2a0   :  { %598 = vrcp.f32 %v200_v3  ;;  %v510_v43 = vpop.f32.mrf.mxu1 }
 0x2a1   :  { %600 = vrcp.f32 %v183_v31 }
 0x2a6   :  { %v599_v6 = vpop.eup %598 }
 0x2a7   :  { %v202_v9 = vmul.f32 %v599_v6, %v593_v60  ;;  %v213_v10 = vpop.xlane.xlu1 %212  ;;  %v601_v12 = vpop.eup %600 }
 0x2a8   :  { %602 = vlog2.f32 %v213_v10  ;;  %v185_v14 = vmul.f32 %v601_v12, %v589_v47  ;;  %v275_v33 = vpop.xlane.xlu0 %274 }
 0x2a9   :  { %v203_v16 = vmul.f32 %v202_v9, %v850_v15  ;;  %604 = vrcp.f32 %v275_v33  ;;  %v468_v36 = vand.u32 2147483648, %v275_v33  ;;  %vm462_vm7 = vweird.f32 %v275_v33 }
 0x2aa   :  { %v187_v26 = vmul.f32 %v850_v15, %v185_v14  ;;  %v466_v15 = vand.u32 2147483647, %v275_v33 }
 0x2ab   :  { %v204_v17 = vadd.f32 %v203_v16, %v190_v13  ;;  %v469_v40 = vor.u32 1.1754944e-38, %v468_v36 }
 0x2ac   :  { %v191_v28 = vadd.f32 %v190_v13, %v187_v26  ;;  %vm467_vm10 = vcmp.eq.f32.partialorder %v466_v15, 8.507059e+37 }
 0x2ad   :  { %v245_v19 = vmul.f32 %v244_v18, %v204_v17 }
 0x2ae   :  { %v603_v21 = vpop.eup %602 }
 0x2af   :  { %v215_v22 = vmul.f32 0.6931472, %v603_v21  ;;  %v246_v24 = vsel %vm174_vm2, %v245_v19, 0.0  ;;  %v605_v34 = vpop.eup %604 }
 0x2b0   :  { %247 = vadd.xlane.f32.xlu2 %v246_v24  ;;  %v458_v23 = vmul.f32 %v605_v34, %v275_v33  ;;  %vm463_vm8 = vweird.f32 %v605_v34 }
 0x2b1   :  { %v216_v27 = vadd.f32 %v215_v22, %v207_v58  ;;  %vm464_vm9 = vmor %vm462_vm7, %vm463_vm8 }
 0x2b2   :  { %v459_v35 = vsub.f32 1.0, %v458_v23 }
 0x2b3   :  { %v217_v30 = vsub.f32 %v820_v20, %v216_v27  ;;  %v454_v20 = vpop.f32.mrf.mxu0 }
 0x2b4   :  { %v460_v38 = vmul.f32 %v605_v34, %v459_v35 }
 0x2b5   :  { %v218_v32 = vmul.f32 %v217_v30, %v191_v28 }
 0x2b6   :  { %v461_v39 = vadd.f32 %v605_v34, %v460_v38 }
 0x2b7   :  { %v219_v11 = vsel %vm174_vm2, %v218_v32, 0.0 }
 0x2b8   :  { %220 = vadd.xlane.f32.xlu1 %v219_v11  ;;  %v465_v41 = vsel %vm464_vm9, %v605_v34, %v461_v39 }
 0x2b9   :  { %v470_v42 = vsel %vm467_vm10, %v469_v40, %v465_v41 }
 0x2ba   :  { %v471_v44 = vmul.f32 %v470_v42, %v454_v20  ;;  %v513_v29 = vmul.f32 %v510_v43, %v470_v42 }
 0x2bc   :  { %v514_v45 = vadd.f32 %v513_v29, %v471_v44 }
 0x2be   :  { %v515_v25 = vmul.f32 0.5, %v514_v45 }
 0x2c0   :  { %516 = vst.msk [vmem:[#allocation6] sm:$0x1] %vm260_vm11, %v515_v25 }
 0x2c1   :  { %538 = dma.vmem_to_hbm [thread:$0]  %s534_s27, 16, %s536_s30, [#allocation7]  }
 0x323   :  { %v248_v46 = vpop.xlane.xlu2 %247 }
 0x324   :  { %v249_v47 = vsel %vm222_vm12, %v248_v46, 0.0 }
 0x325   :  { %v250_v48 = vrot.slane %v249_v47, 4 }
 0x327   :  { %v251_v49 = vadd.f32 %v250_v48, %v249_v47 }
 0x329   :  { %v252_v37 = vrot.slane %v251_v49, 2 }
 0x32b   :  { %v253_v50 = vadd.f32 %v252_v37, %v251_v49  ;;  %v221_v51 = vpop.xlane.xlu1 %220 }
 0x32c   :  { %v223_v52 = vsel %vm222_vm12, %v221_v51, 0.0 }
 0x32d   :  { %v224_v53 = vrot.slane %v223_v52, 4  ;;  %v254_v54 = vrot.slane %v253_v50, 1 }
 0x32f   :  { %v225_v55 = vadd.f32 %v224_v53, %v223_v52  ;;  %v255_v57 = vadd.f32 %v254_v54, %v253_v50 }
 0x331   :  { %v226_v56 = vrot.slane %v225_v55, 2  ;;  %v256_v60 = vsub.f32 0.0, %v255_v57 }
 0x333   :  { %v227_v58 = vadd.f32 %v226_v56, %v225_v55  ;;  %v257_v0 = vmul.f32 0.5, %v256_v60 }
 0x335   :  { %v228_v59 = vrot.slane %v227_v58, 1 }
 0x337   :  { %v229_v61 = vadd.f32 %v228_v59, %v227_v58 }
 0x339   :  { %v230_v62 = vsub.f32 0.0, %v229_v61 }
 0x33b   :  { %v231_v63 = vmul.f32 0.5, %v230_v62 }
 0x33d   :  { %v258_v1 = vadd.f32 %v257_v0, %v231_v63 }
 0x33f   :  { %v259_v31 = vmul.f32 0.5, %v258_v1 }
 0x341   :  { %261 = vst.msk [vmem:[#allocation5] sm:$0x1] %vm260_vm11, %v259_v31 }
 0x342   :  { %527 = dma.vmem_to_hbm [thread:$0]  %s523_s15, 16, %s525_s5, [#allocation3]  }
 0x343   :  { %668 = dma.done.wait [#allocation3], 16  }
 0x344   :  { %669 = vsyncadd [#allocation3], 4294967280 }
 0x345   :  { %670 = dma.done.wait [#allocation7], 16  }
 0x346   :  { %671 = vsyncadd [#allocation7], 4294967280 }
 0x347   :  { %547 = vsyncpa [#allocation3], 1 }
 0x348   :  { %548 = vsyncpa [#allocation7], 1 }
 0x349   :  { %549 = vsyncpa [#allocation4], 1 }

</bundles_post_ra>
